<compile_context>
chip_gen: v7x
topology: tpu7x:2x2x1
jax: 0.10.0
libtpu: 0.0.40
codegen_flags: <defaults>
</compile_context>

<pallas_src>
import functools

import jax
import jax.numpy as jnp
from jax.experimental import pallas as pl
from jax.experimental.pallas import tpu as pltpu

D = 2               # dimension of the VDP dynamical system
ZETA = 200          # hidden width of the PyTorch model
ZETA_PAD = 256      # zero-padded hidden width (exact, lane/MXU friendly)
HL = 2              # hidden layers -> one extra (zeta, zeta) layer (hard-coded)
IN_ROWS = 8         # packed input rows: [t, y0, y1, h, eps, 0, 0, 0]
OUT_ROWS = 4 * D    # packed output rows: [y1, y1-y2, y_Phi_A, y_Phi_g]

# column layout of the packed small-parameter buffer (ZETA_PAD, 16):
C_WG1 = 0                   # wg1 columns [0, D+2)  -> (y0, y1, h, eps)
C_BG1 = D + 2               # 4
C_WA1 = D + 3               # wa1 columns [5, 5+D+3) -> (cos, sin, y0, y1, eps)
C_BA1 = 2 * D + 6           # 10
C_BG2 = 2 * D + 7           # 11
C_BA2 = 2 * D + 8           # 12
C_BG3 = 2 * D + 9           # 13  (rows 0:OUT_ROWS valid)
C_BA3 = 2 * D + 10          # 14  (rows 0:OUT_ROWS valid)
PACK_COLS = 16


def _round_up(x, m):
    return ((x + m - 1) // m) * m


def _chip_config():
    """Per-generation knobs: bf16 elementwise, batch-tile cap, VMEM limit,
    and whether to force >=2 grid steps (2 TensorCores per chip)."""
    kind = ""
    try:
        kind = jax.devices()[0].device_kind.lower()
    except Exception:
        pass
    old = any(s in kind for s in ("v2", "v3", "v4", "v5"))   # no bf16 VPU/EUP
    big_vmem = ("v5" in kind) or ("v6" in kind)               # 128 MiB VMEM
    multi_core = not (old or "v6" in kind)                    # v7x+: 2 TC/chip
    return (
        not old,                                  # bf16_act (bf16 tanh/h2)
        1024 if big_vmem else 512,                # tile_max
        (96 if big_vmem else 48) * 1024 * 1024,   # vmem_limit_bytes
        multi_core,
    )


def nn_kernel(x_ref, small_ref, wg2_ref, wa2_ref, w3_ref, out_ref, h1_ref,
              *, bf16_act):
    x = x_ref[...]                        # (8, m) f32, feature-major
    m = x.shape[1]
    t = x[0:1, :]
    y = x[1:1 + D, :]
    h = x[1 + D:2 + D, :]
    eps = x[2 + D:3 + D, :]

    sp = small_ref[...]                   # (ZETA_PAD, 16) f32 packed params
    wg1_y = sp[:, C_WG1:C_WG1 + D]
    wg1_h = sp[:, C_WG1 + D:C_WG1 + D + 1]
    wg1_e = sp[:, C_WG1 + D + 1:C_WG1 + D + 2]
    bg1 = sp[:, C_BG1:C_BG1 + 1]
    wa1_c = sp[:, C_WA1:C_WA1 + 1]
    wa1_s = sp[:, C_WA1 + 1:C_WA1 + 2]
    wa1_y = sp[:, C_WA1 + 2:C_WA1 + 2 + D]
    wa1_e = sp[:, C_WA1 + 2 + D:C_WA1 + 3 + D]
    ba1 = sp[:, C_BA1:C_BA1 + 1]
    bg2 = sp[:, C_BG2:C_BG2 + 1]
    ba2 = sp[:, C_BA2:C_BA2 + 1]
    bg3 = sp[0:OUT_ROWS, C_BG3:C_BG3 + 1]
    ba3 = sp[0:OUT_ROWS, C_BA3:C_BA3 + 1]

    wg2 = wg2_ref[...]                    # (ZETA_PAD, ZETA_PAD) bf16
    wa2 = wa2_ref[...]
    wg3 = w3_ref[0:OUT_ROWS, :]           # (8, ZETA_PAD) bf16
    wa3 = w3_ref[OUT_ROWS:2 * OUT_ROWS, :]

    def store_h1(col, pre):
        # pre: (ZETA_PAD, m) f32 layer-1 pre-activation of one MLP call.
        if bf16_act:                      # v6e/v7x: bf16 EUP tanh
            h1_ref[:, col * m:(col + 1) * m] = jnp.tanh(pre.astype(jnp.bfloat16))
        else:                             # v5e and older: f32 tanh, cast at MXU
            h1_ref[:, col * m:(col + 1) * m] = jnp.tanh(pre).astype(jnp.bfloat16)

    def mlp_tail(k, w2, b2, w3, b3):
        # consumes the first k stacked calls written into the h1 scratch.
        h1 = h1_ref[:, 0:k * m]                                        # bf16
        z2 = jnp.dot(w2, h1, preferred_element_type=jnp.float32) + b2  # f32
        if bf16_act:
            h2 = jnp.tanh(z2.astype(jnp.bfloat16))
        else:
            h2 = jnp.tanh(z2).astype(jnp.bfloat16)
        return jnp.dot(w3, h2, preferred_element_type=jnp.float32) + b3  # (8,k*m)

    # ---- pass 1: R_Phi_g on [y, h, eps] and [y, 0, eps] (2 calls batched) ---
    g_base = bg1 + wg1_e * eps
    for j in range(D):
        g_base = g_base + wg1_y[:, j:j + 1] * y[j:j + 1, :]
    store_h1(0, g_base + wg1_h * h)
    store_h1(1, g_base)
    out_g = mlp_tail(2, wg2, bg2, wg3, bg3)
    g_h = out_g[0:D, 0:m]
    g_0 = out_g[0:D, m:2 * m]

    y1p = y + h * (g_h - g_0)
    y_phi_g = y + h * g_h                 # branch 4 reuses g_h (dedup)

    # ---- pass 2: R_Phi_A, the 5 distinct calls batched along lanes ----------
    arg_th = (t + h) / eps
    arg_t = t / eps
    c_th = jnp.cos(arg_th)
    s_th = jnp.sin(arg_th)
    c_t = jnp.cos(arg_t)
    s_t = jnp.sin(arg_t)

    a_base = ba1 + wa1_e * eps
    a_base_y = a_base
    a_base_y1 = a_base
    for j in range(D):
        a_base_y = a_base_y + wa1_y[:, j:j + 1] * y[j:j + 1, :]
        a_base_y1 = a_base_y1 + wa1_y[:, j:j + 1] * y1p[j:j + 1, :]
    cs_th = wa1_c * c_th + wa1_s * s_th
    cs_t = wa1_c * c_t + wa1_s * s_t
    store_h1(0, a_base_y1 + cs_th)        # a1    on y1
    store_h1(1, a_base_y1 + wa1_c)        # a1_0  on y1 (cos=1, sin=0)
    store_h1(2, a_base_y + cs_th)         # a2    on y
    store_h1(3, a_base_y + wa1_c)         # a2_0 == aA_0 (dedup)
    store_h1(4, a_base_y + cs_t)          # aA    on y
    out_a = mlp_tail(5, wa2, ba2, wa3, ba3)
    a1 = out_a[0:D, 0:m]
    a1_0 = out_a[0:D, m:2 * m]
    a2 = out_a[0:D, 2 * m:3 * m]
    a2_0 = out_a[0:D, 3 * m:4 * m]
    aA = out_a[0:D, 4 * m:5 * m]

    y1 = y1p + (a1 - a1_0)
    y2p = y + (a2 - a2_0)
    y_phi_a = y + (aA - a2_0)

    # ---- pass 3: R_Phi_g on [y2, h, eps] (depends on pass 2) ----------------
    pre_g2 = bg1 + wg1_h * h + wg1_e * eps
    for j in range(D):
        pre_g2 = pre_g2 + wg1_y[:, j:j + 1] * y2p[j:j + 1, :]
    store_h1(0, pre_g2)
    g2 = mlp_tail(1, wg2, bg2, wg3, bg3)[0:D, :]
    y2 = y2p + h * g2

    # ---- packed, lane-dense output slab (4*D, m) ----------------------------
    out_ref[0:D, :] = y1
    out_ref[D:2 * D, :] = y1 - y2
    out_ref[2 * D:3 * D, :] = y_phi_a
    out_ref[3 * D:4 * D, :] = y_phi_g


def init_params(key):
    """torch.nn.Linear-style init (uniform +-1/sqrt(fan_in)), packed into
    TPU-friendly buffers: one (256,16) f32 slab for all tiny params, bf16
    (256,256) hidden weights, and one (16,256) bf16 slab for both out layers."""
    def linear(k, fan_in, fan_out):
        kw, kb = jax.random.split(k)
        bound = float(fan_in) ** -0.5
        w = jax.random.uniform(kw, (fan_out, fan_in), jnp.float32, -bound, bound)
        b = jax.random.uniform(kb, (fan_out, 1), jnp.float32, -bound, bound)
        return w, b

    def pad(a, shape):
        return jnp.pad(a, [(0, s - d) for d, s in zip(a.shape, shape)])

    keys = jax.random.split(key, 6)
    # R_Phi_g: (d+2 -> zeta) tanh (zeta -> zeta) tanh (zeta -> d)
    wg1, bg1 = linear(keys[0], D + 2, ZETA)
    wg2, bg2 = linear(keys[1], ZETA, ZETA)
    wg3, bg3 = linear(keys[2], ZETA, D)
    # R_Phi_A: (d+3 -> zeta) tanh (zeta -> zeta) tanh (zeta -> d)
    wa1, ba1 = linear(keys[3], D + 3, ZETA)
    wa2, ba2 = linear(keys[4], ZETA, ZETA)
    wa3, ba3 = linear(keys[5], ZETA, D)

    ZP = ZETA_PAD
    small = jnp.zeros((ZP, PACK_COLS), jnp.float32)
    small = small.at[:ZETA, C_WG1:C_WG1 + D + 2].set(wg1)
    small = small.at[:ZETA, C_BG1:C_BG1 + 1].set(bg1)
    small = small.at[:ZETA, C_WA1:C_WA1 + D + 3].set(wa1)
    small = small.at[:ZETA, C_BA1:C_BA1 + 1].set(ba1)
    small = small.at[:ZETA, C_BG2:C_BG2 + 1].set(bg2)
    small = small.at[:ZETA, C_BA2:C_BA2 + 1].set(ba2)
    small = small.at[:D, C_BG3:C_BG3 + 1].set(bg3)
    small = small.at[:D, C_BA3:C_BA3 + 1].set(ba3)

    wg2p = pad(wg2, (ZP, ZP)).astype(jnp.bfloat16)
    wa2p = pad(wa2, (ZP, ZP)).astype(jnp.bfloat16)
    w3 = jnp.zeros((2 * OUT_ROWS, ZP), jnp.float32)
    w3 = w3.at[0:D, :ZETA].set(wg3)
    w3 = w3.at[OUT_ROWS:OUT_ROWS + D, :ZETA].set(wa3)
    return (small, wg2p, wa2p, w3.astype(jnp.bfloat16))


@jax.jit
def nn_forward(t, y, h, eps, params):
    """Matches NN.forward: t,h,eps (1,n); y (d,n). Returns 4 arrays (d,n)."""
    t = jnp.asarray(t, jnp.float32)
    y = jnp.asarray(y, jnp.float32)
    h = jnp.asarray(h, jnp.float32)
    eps = jnp.asarray(eps, jnp.float32)
    n = t.shape[1]

    bf16_act, tile_max, vmem_bytes, multi_core = _chip_config()

    n128 = _round_up(n, 128)
    if n128 <= 128 or not multi_core:
        tile_n = min(tile_max, n128)
    else:
        # >= 2 grid steps so dimension_semantics=("parallel",) can shard the
        # batch across both v7x TensorCores.
        tile_n = min(tile_max, max(128, _round_up(n128 // 2, 128)))
    n_pad = _round_up(n128, tile_n)
    grid = (n_pad // tile_n,)

    pc = n_pad - n
    x = jnp.concatenate([
        jnp.pad(t, ((0, 0), (0, pc))),
        jnp.pad(y, ((0, 0), (0, pc))),
        jnp.pad(h, ((0, 0), (0, pc))),
        jnp.pad(eps, ((0, 0), (0, pc)), constant_values=1.0),  # avoid /0 in pad
        jnp.zeros((IN_ROWS - (3 + D), n_pad), jnp.float32),
    ], axis=0)                                                  # (8, n_pad)

    kernel = functools.partial(nn_kernel, bf16_act=bf16_act)
    out = pl.pallas_call(
        kernel,
        out_shape=jax.ShapeDtypeStruct((OUT_ROWS, n_pad), jnp.float32),
        grid=grid,
        in_specs=[pl.BlockSpec((IN_ROWS, tile_n), lambda i: (0, i))]
                 + [pl.BlockSpec(p.shape, lambda i: (0, 0)) for p in params],
        out_specs=pl.BlockSpec((OUT_ROWS, tile_n), lambda i: (0, i)),
        scratch_shapes=[pltpu.VMEM((ZETA_PAD, 5 * tile_n), jnp.bfloat16)],
        compiler_params=pltpu.CompilerParams(
            dimension_semantics=("parallel",),
            vmem_limit_bytes=vmem_bytes),
    )(x, *params)

    y1 = out[0:D, :n]
    dy = out[D:2 * D, :n]
    y_phi_a = out[2 * D:3 * D, :n]
    y_phi_g = out[3 * D:4 * D, :n]
    return y1, dy, y_phi_a, y_phi_g


# ---------------- pure-JAX f32 reference (mirrors the torch forward 1:1) ----
def _mlp_ref(x_in, w1, b1, w2, b2, w3, b3):
    h1 = jnp.tanh(jnp.dot(w1, x_in) + b1)
    h2 = jnp.tanh(jnp.dot(w2, h1) + b2)
    return (jnp.dot(w3, h2) + b3)[0:D]


def nn_forward_ref(t, y, h, eps, params):
    sp, wg2, wa2, w3p = params
    sp = sp.astype(jnp.float32)
    wg1 = sp[:, C_WG1:C_BG1]
    bg1 = sp[:, C_BG1:C_BG1 + 1]
    wa1 = sp[:, C_WA1:C_BA1]
    ba1 = sp[:, C_BA1:C_BA1 + 1]
    bg2 = sp[:, C_BG2:C_BG2 + 1]
    ba2 = sp[:, C_BA2:C_BA2 + 1]
    bg3 = sp[0:OUT_ROWS, C_BG3:C_BG3 + 1]
    ba3 = sp[0:OUT_ROWS, C_BA3:C_BA3 + 1]
    wg2 = wg2.astype(jnp.float32)
    wa2 = wa2.astype(jnp.float32)
    wg3 = w3p[0:OUT_ROWS, :].astype(jnp.float32)
    wa3 = w3p[OUT_ROWS:2 * OUT_ROWS, :].astype(jnp.float32)

    t = t.astype(jnp.float32); y = y.astype(jnp.float32)
    h = h.astype(jnp.float32); eps = eps.astype(jnp.float32)

    def phi_g(yv, hv):
        return _mlp_ref(jnp.concatenate([yv, hv, eps], axis=0),
                        wg1, bg1, wg2, bg2, wg3, bg3)

    def phi_a(c, s, yv):
        return _mlp_ref(jnp.concatenate([c, s, yv, eps], axis=0),
                        wa1, ba1, wa2, ba2, wa3, ba3)

    ones = jnp.ones_like(t)
    zeros = jnp.zeros_like(t)

    y1 = y + h * (phi_g(y, h) - phi_g(y, 0 * h))
    c_th, s_th = jnp.cos((t + h) / eps), jnp.sin((t + h) / eps)
    y1 = y1 + (phi_a(c_th, s_th, y1) - phi_a(ones, zeros, y1))

    y2 = y + (phi_a(c_th, s_th, y) - phi_a(ones, zeros, y))
    y2 = y2 + h * phi_g(y2, h)

    c_t, s_t = jnp.cos(t / eps), jnp.sin(t / eps)
    y_phi_a = y + (phi_a(c_t, s_t, y) - phi_a(ones, zeros, y))
    y_phi_g = y + h * phi_g(y, h)
    return y1, y1 - y2, y_phi_a, y_phi_g


if __name__ == "__main__":
    key = jax.random.PRNGKey(0)
    kp, kt, ky, kh, ke = jax.random.split(key, 5)
    params = init_params(kp)

    n = 8  # small batch of phase-space points
    t = jax.random.uniform(kt, (1, n), jnp.float32, 0.0, 1.0)
    y = jax.random.normal(ky, (D, n), jnp.float32)
    h = jax.random.uniform(kh, (1, n), jnp.float32, 0.01, 0.1)
    eps = jax.random.uniform(ke, (1, n), jnp.float32, 0.01, 0.1)

    outs = nn_forward(t, y, h, eps, params)
    jax.block_until_ready(outs)
    y1, dy, y_phi_a, y_phi_g = outs
    assert y1.shape == (D, n) and dy.shape == (D, n)
    assert y_phi_a.shape == (D, n) and y_phi_g.shape == (D, n)

    refs = nn_forward_ref(t, y, h, eps, params)
    max_err = max(float(jnp.max(jnp.abs(o - r))) for o, r in zip(outs, refs))
    assert max_err < 8e-2, f"kernel vs reference max abs err = {max_err}"
    print("KERNEL_OK")
</pallas_src>

<mosaic_0001>
module attributes {stable_mosaic.version = 11 : i64} {
  func.func @nn_kernel(%arg0: i32, %arg1: memref<8x128xf32, #tpu.memory_space<vmem>>, %arg2: memref<256x16xf32, #tpu.memory_space<vmem>>, %arg3: memref<256x256xbf16, #tpu.memory_space<vmem>>, %arg4: memref<256x256xbf16, #tpu.memory_space<vmem>>, %arg5: memref<16x256xbf16, #tpu.memory_space<vmem>>, %arg6: memref<8x128xf32, #tpu.memory_space<vmem>>, %arg7: memref<256x640xbf16, #tpu.memory_space<vmem>>) attributes {dimension_semantics = [#tpu.dimension_semantics<parallel>], iteration_bounds = array<i64: 1>, scalar_prefetch = 0 : i64, scratch_operands = 1 : i64, tpu.core_type = #tpu.core_type<tc>, window_params = [{transform_indices = @transform_0, window_bounds = array<i64: 8, 128>}, {pipeline_mode = #tpu.pipeline_mode<synchronous>, transform_indices = @transform_1, window_bounds = array<i64: 256, 16>}, {pipeline_mode = #tpu.pipeline_mode<synchronous>, transform_indices = @transform_2, window_bounds = array<i64: 256, 256>}, {pipeline_mode = #tpu.pipeline_mode<synchronous>, transform_indices = @transform_3, window_bounds = array<i64: 256, 256>}, {pipeline_mode = #tpu.pipeline_mode<synchronous>, transform_indices = @transform_4, window_bounds = array<i64: 16, 256>}, {transform_indices = @transform_5, window_bounds = array<i64: 8, 128>}]} {
    %c0 = arith.constant 0 : index
    %c0_0 = arith.constant 0 : index
    %0 = vector.load %arg1[%c0, %c0_0] : memref<8x128xf32, #tpu.memory_space<vmem>>, vector<8x128xf32>
    %1 = vector.extract_strided_slice %0 {offsets = [0, 0], sizes = [1, 128], strides = [1, 1]} : vector<8x128xf32> to vector<1x128xf32>
    %2 = vector.extract_strided_slice %0 {offsets = [1, 0], sizes = [2, 128], strides = [1, 1]} : vector<8x128xf32> to vector<2x128xf32>
    %3 = vector.extract_strided_slice %0 {offsets = [3, 0], sizes = [1, 128], strides = [1, 1]} : vector<8x128xf32> to vector<1x128xf32>
    %4 = vector.extract_strided_slice %0 {offsets = [4, 0], sizes = [1, 128], strides = [1, 1]} : vector<8x128xf32> to vector<1x128xf32>
    %c0_1 = arith.constant 0 : index
    %c0_2 = arith.constant 0 : index
    %5 = vector.load %arg2[%c0_1, %c0_2] : memref<256x16xf32, #tpu.memory_space<vmem>>, vector<256x16xf32>
    %6 = vector.extract_strided_slice %5 {offsets = [0, 0], sizes = [256, 2], strides = [1, 1]} : vector<256x16xf32> to vector<256x2xf32>
    %7 = vector.extract_strided_slice %5 {offsets = [0, 2], sizes = [256, 1], strides = [1, 1]} : vector<256x16xf32> to vector<256x1xf32>
    %8 = vector.extract_strided_slice %5 {offsets = [0, 3], sizes = [256, 1], strides = [1, 1]} : vector<256x16xf32> to vector<256x1xf32>
    %9 = vector.extract_strided_slice %5 {offsets = [0, 4], sizes = [256, 1], strides = [1, 1]} : vector<256x16xf32> to vector<256x1xf32>
    %10 = vector.extract_strided_slice %5 {offsets = [0, 5], sizes = [256, 1], strides = [1, 1]} : vector<256x16xf32> to vector<256x1xf32>
    %11 = vector.extract_strided_slice %5 {offsets = [0, 6], sizes = [256, 1], strides = [1, 1]} : vector<256x16xf32> to vector<256x1xf32>
    %12 = vector.extract_strided_slice %5 {offsets = [0, 7], sizes = [256, 2], strides = [1, 1]} : vector<256x16xf32> to vector<256x2xf32>
    %13 = vector.extract_strided_slice %5 {offsets = [0, 9], sizes = [256, 1], strides = [1, 1]} : vector<256x16xf32> to vector<256x1xf32>
    %14 = vector.extract_strided_slice %5 {offsets = [0, 10], sizes = [256, 1], strides = [1, 1]} : vector<256x16xf32> to vector<256x1xf32>
    %15 = vector.extract_strided_slice %5 {offsets = [0, 11], sizes = [256, 1], strides = [1, 1]} : vector<256x16xf32> to vector<256x1xf32>
    %16 = vector.extract_strided_slice %5 {offsets = [0, 12], sizes = [256, 1], strides = [1, 1]} : vector<256x16xf32> to vector<256x1xf32>
    %17 = vector.extract_strided_slice %5 {offsets = [0, 13], sizes = [8, 1], strides = [1, 1]} : vector<256x16xf32> to vector<8x1xf32>
    %18 = vector.extract_strided_slice %5 {offsets = [0, 14], sizes = [8, 1], strides = [1, 1]} : vector<256x16xf32> to vector<8x1xf32>
    %c0_3 = arith.constant 0 : index
    %c0_4 = arith.constant 0 : index
    %19 = vector.load %arg3[%c0_3, %c0_4] : memref<256x256xbf16, #tpu.memory_space<vmem>>, vector<256x256xbf16>
    %c0_5 = arith.constant 0 : index
    %c0_6 = arith.constant 0 : index
    %20 = vector.load %arg4[%c0_5, %c0_6] : memref<256x256xbf16, #tpu.memory_space<vmem>>, vector<256x256xbf16>
    %c0_7 = arith.constant 0 : index
    %c0_8 = arith.constant 0 : index
    %21 = vector.load %arg5[%c0_7, %c0_8] : memref<16x256xbf16, #tpu.memory_space<vmem>>, vector<8x256xbf16>
    %c8 = arith.constant 8 : index
    %c0_9 = arith.constant 0 : index
    %22 = vector.load %arg5[%c8, %c0_9] : memref<16x256xbf16, #tpu.memory_space<vmem>>, vector<8x256xbf16>
    %23 = vector.broadcast %8 : vector<256x1xf32> to vector<256x128xf32>
    %24 = vector.broadcast %4 : vector<1x128xf32> to vector<256x128xf32>
    %25 = arith.mulf %23, %24 : vector<256x128xf32>
    %26 = vector.broadcast %9 : vector<256x1xf32> to vector<256x128xf32>
    %27 = arith.addf %26, %25 : vector<256x128xf32>
    %28 = vector.extract_strided_slice %6 {offsets = [0, 0], sizes = [256, 1], strides = [1, 1]} : vector<256x2xf32> to vector<256x1xf32>
    %29 = vector.extract_strided_slice %2 {offsets = [0, 0], sizes = [1, 128], strides = [1, 1]} : vector<2x128xf32> to vector<1x128xf32>
    %30 = vector.broadcast %28 : vector<256x1xf32> to vector<256x128xf32>
    %31 = vector.broadcast %29 : vector<1x128xf32> to vector<256x128xf32>
    %32 = arith.mulf %30, %31 : vector<256x128xf32>
    %33 = arith.addf %27, %32 : vector<256x128xf32>
    %34 = vector.extract_strided_slice %6 {offsets = [0, 1], sizes = [256, 1], strides = [1, 1]} : vector<256x2xf32> to vector<256x1xf32>
    %35 = vector.extract_strided_slice %2 {offsets = [1, 0], sizes = [1, 128], strides = [1, 1]} : vector<2x128xf32> to vector<1x128xf32>
    %36 = vector.broadcast %34 : vector<256x1xf32> to vector<256x128xf32>
    %37 = vector.broadcast %35 : vector<1x128xf32> to vector<256x128xf32>
    %38 = arith.mulf %36, %37 : vector<256x128xf32>
    %39 = arith.addf %33, %38 : vector<256x128xf32>
    %40 = vector.broadcast %7 : vector<256x1xf32> to vector<256x128xf32>
    %41 = vector.broadcast %3 : vector<1x128xf32> to vector<256x128xf32>
    %42 = arith.mulf %40, %41 : vector<256x128xf32>
    %43 = arith.addf %39, %42 : vector<256x128xf32>
    %44 = arith.truncf %43 : vector<256x128xf32> to vector<256x128xbf16>
    %45 = math.tanh %44 : vector<256x128xbf16>
    %c0_10 = arith.constant 0 : index
    %c0_11 = arith.constant 0 : index
    %46 = vector.load %arg7[%c0_10, %c0_11] : memref<256x640xbf16, #tpu.memory_space<vmem>>, vector<256x128xbf16>
    tpu.vector_store %arg7[%c0_10, %c0_11], %45 {strides = array<i32>} : memref<256x640xbf16, #tpu.memory_space<vmem>>, vector<256x128xbf16>,
    %47 = arith.truncf %39 : vector<256x128xf32> to vector<256x128xbf16>
    %48 = math.tanh %47 : vector<256x128xbf16>
    %c0_12 = arith.constant 0 : index
    %c128 = arith.constant 128 : index
    %49 = vector.load %arg7[%c0_12, %c128] : memref<256x640xbf16, #tpu.memory_space<vmem>>, vector<256x128xbf16>
    tpu.vector_store %arg7[%c0_12, %c128], %48 {strides = array<i32>} : memref<256x640xbf16, #tpu.memory_space<vmem>>, vector<256x128xbf16>,
    %c0_13 = arith.constant 0 : index
    %c0_14 = arith.constant 0 : index
    %50 = vector.load %arg7[%c0_13, %c0_14] : memref<256x640xbf16, #tpu.memory_space<vmem>>, vector<256x256xbf16>
    %cst = arith.constant dense<0.000000e+00> : vector<256x256xf32>
    %51 = tpu.matmul %19, %50, %cst {dimension_numbers = #tpu.dot_dimension_numbers<[1], [0], [0], [1], [0, 0, 1, 1], [], []>} : vector<256x256xbf16>, vector<256x256xbf16>, vector<256x256xf32> -> vector<256x256xf32>
    %52 = vector.broadcast %15 : vector<256x1xf32> to vector<256x256xf32>
    %53 = arith.addf %51, %52 : vector<256x256xf32>
    %54 = arith.truncf %53 : vector<256x256xf32> to vector<256x256xbf16>
    %55 = math.tanh %54 : vector<256x256xbf16>
    %cst_15 = arith.constant dense<0.000000e+00> : vector<8x256xf32>
    %56 = tpu.matmul %21, %55, %cst_15 {dimension_numbers = #tpu.dot_dimension_numbers<[1], [0], [0], [1], [0, 0, 1, 1], [], []>} : vector<8x256xbf16>, vector<256x256xbf16>, vector<8x256xf32> -> vector<8x256xf32>
    %57 = vector.broadcast %17 : vector<8x1xf32> to vector<8x256xf32>
    %58 = arith.addf %56, %57 : vector<8x256xf32>
    %59 = vector.extract_strided_slice %58 {offsets = [0, 0], sizes = [2, 128], strides = [1, 1]} : vector<8x256xf32> to vector<2x128xf32>
    %60 = vector.extract_strided_slice %58 {offsets = [0, 128], sizes = [2, 128], strides = [1, 1]} : vector<8x256xf32> to vector<2x128xf32>
    %61 = arith.subf %59, %60 : vector<2x128xf32>
    %62 = vector.broadcast %3 : vector<1x128xf32> to vector<2x128xf32>
    %63 = arith.mulf %62, %61 : vector<2x128xf32>
    %64 = arith.addf %2, %63 : vector<2x128xf32>
    %65 = vector.broadcast %3 : vector<1x128xf32> to vector<2x128xf32>
    %66 = arith.mulf %65, %59 : vector<2x128xf32>
    %67 = arith.addf %2, %66 : vector<2x128xf32>
    %68 = arith.addf %1, %3 : vector<1x128xf32>
    %69 = arith.divf %68, %4 : vector<1x128xf32>
    %70 = arith.divf %1, %4 : vector<1x128xf32>
    %71 = math.cos %69 : vector<1x128xf32>
    %72 = math.sin %69 : vector<1x128xf32>
    %73 = math.cos %70 : vector<1x128xf32>
    %74 = math.sin %70 : vector<1x128xf32>
    %75 = vector.broadcast %13 : vector<256x1xf32> to vector<256x128xf32>
    %76 = vector.broadcast %4 : vector<1x128xf32> to vector<256x128xf32>
    %77 = arith.mulf %75, %76 : vector<256x128xf32>
    %78 = vector.broadcast %14 : vector<256x1xf32> to vector<256x128xf32>
    %79 = arith.addf %78, %77 : vector<256x128xf32>
    %80 = vector.extract_strided_slice %12 {offsets = [0, 0], sizes = [256, 1], strides = [1, 1]} : vector<256x2xf32> to vector<256x1xf32>
    %81 = vector.extract_strided_slice %2 {offsets = [0, 0], sizes = [1, 128], strides = [1, 1]} : vector<2x128xf32> to vector<1x128xf32>
    %82 = vector.broadcast %80 : vector<256x1xf32> to vector<256x128xf32>
    %83 = vector.broadcast %81 : vector<1x128xf32> to vector<256x128xf32>
    %84 = arith.mulf %82, %83 : vector<256x128xf32>
    %85 = arith.addf %79, %84 : vector<256x128xf32>
    %86 = vector.extract_strided_slice %12 {offsets = [0, 0], sizes = [256, 1], strides = [1, 1]} : vector<256x2xf32> to vector<256x1xf32>
    %87 = vector.extract_strided_slice %64 {offsets = [0, 0], sizes = [1, 128], strides = [1, 1]} : vector<2x128xf32> to vector<1x128xf32>
    %88 = vector.broadcast %86 : vector<256x1xf32> to vector<256x128xf32>
    %89 = vector.broadcast %87 : vector<1x128xf32> to vector<256x128xf32>
    %90 = arith.mulf %88, %89 : vector<256x128xf32>
    %91 = arith.addf %79, %90 : vector<256x128xf32>
    %92 = vector.extract_strided_slice %12 {offsets = [0, 1], sizes = [256, 1], strides = [1, 1]} : vector<256x2xf32> to vector<256x1xf32>
    %93 = vector.extract_strided_slice %2 {offsets = [1, 0], sizes = [1, 128], strides = [1, 1]} : vector<2x128xf32> to vector<1x128xf32>
    %94 = vector.broadcast %92 : vector<256x1xf32> to vector<256x128xf32>
    %95 = vector.broadcast %93 : vector<1x128xf32> to vector<256x128xf32>
    %96 = arith.mulf %94, %95 : vector<256x128xf32>
    %97 = arith.addf %85, %96 : vector<256x128xf32>
    %98 = vector.extract_strided_slice %12 {offsets = [0, 1], sizes = [256, 1], strides = [1, 1]} : vector<256x2xf32> to vector<256x1xf32>
    %99 = vector.extract_strided_slice %64 {offsets = [1, 0], sizes = [1, 128], strides = [1, 1]} : vector<2x128xf32> to vector<1x128xf32>
    %100 = vector.broadcast %98 : vector<256x1xf32> to vector<256x128xf32>
    %101 = vector.broadcast %99 : vector<1x128xf32> to vector<256x128xf32>
    %102 = arith.mulf %100, %101 : vector<256x128xf32>
    %103 = arith.addf %91, %102 : vector<256x128xf32>
    %104 = vector.broadcast %10 : vector<256x1xf32> to vector<256x128xf32>
    %105 = vector.broadcast %71 : vector<1x128xf32> to vector<256x128xf32>
    %106 = arith.mulf %104, %105 : vector<256x128xf32>
    %107 = vector.broadcast %11 : vector<256x1xf32> to vector<256x128xf32>
    %108 = vector.broadcast %72 : vector<1x128xf32> to vector<256x128xf32>
    %109 = arith.mulf %107, %108 : vector<256x128xf32>
    %110 = arith.addf %106, %109 : vector<256x128xf32>
    %111 = vector.broadcast %10 : vector<256x1xf32> to vector<256x128xf32>
    %112 = vector.broadcast %73 : vector<1x128xf32> to vector<256x128xf32>
    %113 = arith.mulf %111, %112 : vector<256x128xf32>
    %114 = vector.broadcast %11 : vector<256x1xf32> to vector<256x128xf32>
    %115 = vector.broadcast %74 : vector<1x128xf32> to vector<256x128xf32>
    %116 = arith.mulf %114, %115 : vector<256x128xf32>
    %117 = arith.addf %113, %116 : vector<256x128xf32>
    %118 = arith.addf %103, %110 : vector<256x128xf32>
    %119 = arith.truncf %118 : vector<256x128xf32> to vector<256x128xbf16>
    %120 = math.tanh %119 : vector<256x128xbf16>
    %c0_16 = arith.constant 0 : index
    %c0_17 = arith.constant 0 : index
    %121 = vector.load %arg7[%c0_16, %c0_17] : memref<256x640xbf16, #tpu.memory_space<vmem>>, vector<256x128xbf16>
    tpu.vector_store %arg7[%c0_16, %c0_17], %120 {strides = array<i32>} : memref<256x640xbf16, #tpu.memory_space<vmem>>, vector<256x128xbf16>,
    %122 = vector.broadcast %10 : vector<256x1xf32> to vector<256x128xf32>
    %123 = arith.addf %103, %122 : vector<256x128xf32>
    %124 = arith.truncf %123 : vector<256x128xf32> to vector<256x128xbf16>
    %125 = math.tanh %124 : vector<256x128xbf16>
    %c0_18 = arith.constant 0 : index
    %c128_19 = arith.constant 128 : index
    %126 = vector.load %arg7[%c0_18, %c128_19] : memref<256x640xbf16, #tpu.memory_space<vmem>>, vector<256x128xbf16>
    tpu.vector_store %arg7[%c0_18, %c128_19], %125 {strides = array<i32>} : memref<256x640xbf16, #tpu.memory_space<vmem>>, vector<256x128xbf16>,
    %127 = arith.addf %97, %110 : vector<256x128xf32>
    %128 = arith.truncf %127 : vector<256x128xf32> to vector<256x128xbf16>
    %129 = math.tanh %128 : vector<256x128xbf16>
    %c0_20 = arith.constant 0 : index
    %c256 = arith.constant 256 : index
    %130 = vector.load %arg7[%c0_20, %c256] : memref<256x640xbf16, #tpu.memory_space<vmem>>, vector<256x128xbf16>
    tpu.vector_store %arg7[%c0_20, %c256], %129 {strides = array<i32>} : memref<256x640xbf16, #tpu.memory_space<vmem>>, vector<256x128xbf16>,
    %131 = vector.broadcast %10 : vector<256x1xf32> to vector<256x128xf32>
    %132 = arith.addf %97, %131 : vector<256x128xf32>
    %133 = arith.truncf %132 : vector<256x128xf32> to vector<256x128xbf16>
    %134 = math.tanh %133 : vector<256x128xbf16>
    %c0_21 = arith.constant 0 : index
    %c384 = arith.constant 384 : index
    %135 = vector.load %arg7[%c0_21, %c384] : memref<256x640xbf16, #tpu.memory_space<vmem>>, vector<256x128xbf16>
    tpu.vector_store %arg7[%c0_21, %c384], %134 {strides = array<i32>} : memref<256x640xbf16, #tpu.memory_space<vmem>>, vector<256x128xbf16>,
    %136 = arith.addf %97, %117 : vector<256x128xf32>
    %137 = arith.truncf %136 : vector<256x128xf32> to vector<256x128xbf16>
    %138 = math.tanh %137 : vector<256x128xbf16>
    %c0_22 = arith.constant 0 : index
    %c512 = arith.constant 512 : index
    %139 = vector.load %arg7[%c0_22, %c512] : memref<256x640xbf16, #tpu.memory_space<vmem>>, vector<256x128xbf16>
    tpu.vector_store %arg7[%c0_22, %c512], %138 {strides = array<i32>} : memref<256x640xbf16, #tpu.memory_space<vmem>>, vector<256x128xbf16>,
    %c0_23 = arith.constant 0 : index
    %c0_24 = arith.constant 0 : index
    %140 = vector.load %arg7[%c0_23, %c0_24] : memref<256x640xbf16, #tpu.memory_space<vmem>>, vector<256x640xbf16>
    %cst_25 = arith.constant dense<0.000000e+00> : vector<256x640xf32>
    %141 = tpu.matmul %20, %140, %cst_25 {dimension_numbers = #tpu.dot_dimension_numbers<[1], [0], [0], [1], [0, 0, 1, 1], [], []>} : vector<256x256xbf16>, vector<256x640xbf16>, vector<256x640xf32> -> vector<256x640xf32>
    %142 = vector.broadcast %16 : vector<256x1xf32> to vector<256x640xf32>
    %143 = arith.addf %141, %142 : vector<256x640xf32>
    %144 = arith.truncf %143 : vector<256x640xf32> to vector<256x640xbf16>
    %145 = math.tanh %144 : vector<256x640xbf16>
    %cst_26 = arith.constant dense<0.000000e+00> : vector<8x640xf32>
    %146 = tpu.matmul %22, %145, %cst_26 {dimension_numbers = #tpu.dot_dimension_numbers<[1], [0], [0], [1], [0, 0, 1, 1], [], []>} : vector<8x256xbf16>, vector<256x640xbf16>, vector<8x640xf32> -> vector<8x640xf32>
    %147 = vector.broadcast %18 : vector<8x1xf32> to vector<8x640xf32>
    %148 = arith.addf %146, %147 : vector<8x640xf32>
    %149 = vector.extract_strided_slice %148 {offsets = [0, 0], sizes = [2, 128], strides = [1, 1]} : vector<8x640xf32> to vector<2x128xf32>
    %150 = vector.extract_strided_slice %148 {offsets = [0, 128], sizes = [2, 128], strides = [1, 1]} : vector<8x640xf32> to vector<2x128xf32>
    %151 = vector.extract_strided_slice %148 {offsets = [0, 256], sizes = [2, 128], strides = [1, 1]} : vector<8x640xf32> to vector<2x128xf32>
    %152 = vector.extract_strided_slice %148 {offsets = [0, 384], sizes = [2, 128], strides = [1, 1]} : vector<8x640xf32> to vector<2x128xf32>
    %153 = vector.extract_strided_slice %148 {offsets = [0, 512], sizes = [2, 128], strides = [1, 1]} : vector<8x640xf32> to vector<2x128xf32>
    %154 = arith.subf %149, %150 : vector<2x128xf32>
    %155 = arith.addf %64, %154 : vector<2x128xf32>
    %156 = arith.subf %151, %152 : vector<2x128xf32>
    %157 = arith.addf %2, %156 : vector<2x128xf32>
    %158 = arith.subf %153, %152 : vector<2x128xf32>
    %159 = arith.addf %2, %158 : vector<2x128xf32>
    %160 = vector.broadcast %7 : vector<256x1xf32> to vector<256x128xf32>
    %161 = vector.broadcast %3 : vector<1x128xf32> to vector<256x128xf32>
    %162 = arith.mulf %160, %161 : vector<256x128xf32>
    %163 = vector.broadcast %9 : vector<256x1xf32> to vector<256x128xf32>
    %164 = arith.addf %163, %162 : vector<256x128xf32>
    %165 = vector.broadcast %8 : vector<256x1xf32> to vector<256x128xf32>
    %166 = vector.broadcast %4 : vector<1x128xf32> to vector<256x128xf32>
    %167 = arith.mulf %165, %166 : vector<256x128xf32>
    %168 = arith.addf %164, %167 : vector<256x128xf32>
    %169 = vector.extract_strided_slice %6 {offsets = [0, 0], sizes = [256, 1], strides = [1, 1]} : vector<256x2xf32> to vector<256x1xf32>
    %170 = vector.extract_strided_slice %157 {offsets = [0, 0], sizes = [1, 128], strides = [1, 1]} : vector<2x128xf32> to vector<1x128xf32>
    %171 = vector.broadcast %169 : vector<256x1xf32> to vector<256x128xf32>
    %172 = vector.broadcast %170 : vector<1x128xf32> to vector<256x128xf32>
    %173 = arith.mulf %171, %172 : vector<256x128xf32>
    %174 = arith.addf %168, %173 : vector<256x128xf32>
    %175 = vector.extract_strided_slice %6 {offsets = [0, 1], sizes = [256, 1], strides = [1, 1]} : vector<256x2xf32> to vector<256x1xf32>
    %176 = vector.extract_strided_slice %157 {offsets = [1, 0], sizes = [1, 128], strides = [1, 1]} : vector<2x128xf32> to vector<1x128xf32>
    %177 = vector.broadcast %175 : vector<256x1xf32> to vector<256x128xf32>
    %178 = vector.broadcast %176 : vector<1x128xf32> to vector<256x128xf32>
    %179 = arith.mulf %177, %178 : vector<256x128xf32>
    %180 = arith.addf %174, %179 : vector<256x128xf32>
    %181 = arith.truncf %180 : vector<256x128xf32> to vector<256x128xbf16>
    %182 = math.tanh %181 : vector<256x128xbf16>
    %c0_27 = arith.constant 0 : index
    %c0_28 = arith.constant 0 : index
    %183 = vector.load %arg7[%c0_27, %c0_28] : memref<256x640xbf16, #tpu.memory_space<vmem>>, vector<256x128xbf16>
    tpu.vector_store %arg7[%c0_27, %c0_28], %182 {strides = array<i32>} : memref<256x640xbf16, #tpu.memory_space<vmem>>, vector<256x128xbf16>,
    %c0_29 = arith.constant 0 : index
    %c0_30 = arith.constant 0 : index
    %184 = vector.load %arg7[%c0_29, %c0_30] : memref<256x640xbf16, #tpu.memory_space<vmem>>, vector<256x128xbf16>
    %cst_31 = arith.constant dense<0.000000e+00> : vector<256x128xf32>
    %185 = tpu.matmul %19, %184, %cst_31 {dimension_numbers = #tpu.dot_dimension_numbers<[1], [0], [0], [1], [0, 0, 1, 1], [], []>} : vector<256x256xbf16>, vector<256x128xbf16>, vector<256x128xf32> -> vector<256x128xf32>
    %186 = vector.broadcast %15 : vector<256x1xf32> to vector<256x128xf32>
    %187 = arith.addf %185, %186 : vector<256x128xf32>
    %188 = arith.truncf %187 : vector<256x128xf32> to vector<256x128xbf16>
    %189 = math.tanh %188 : vector<256x128xbf16>
    %cst_32 = arith.constant dense<0.000000e+00> : vector<8x128xf32>
    %190 = tpu.matmul %21, %189, %cst_32 {dimension_numbers = #tpu.dot_dimension_numbers<[1], [0], [0], [1], [0, 0, 1, 1], [], []>} : vector<8x256xbf16>, vector<256x128xbf16>, vector<8x128xf32> -> vector<8x128xf32>
    %191 = vector.broadcast %17 : vector<8x1xf32> to vector<8x128xf32>
    %192 = arith.addf %190, %191 : vector<8x128xf32>
    %193 = vector.extract_strided_slice %192 {offsets = [0, 0], sizes = [2, 128], strides = [1, 1]} : vector<8x128xf32> to vector<2x128xf32>
    %194 = vector.broadcast %3 : vector<1x128xf32> to vector<2x128xf32>
    %195 = arith.mulf %194, %193 : vector<2x128xf32>
    %196 = arith.addf %157, %195 : vector<2x128xf32>
    %c0_33 = arith.constant 0 : index
    %c0_34 = arith.constant 0 : index
    %197 = vector.load %arg6[%c0_33, %c0_34] : memref<8x128xf32, #tpu.memory_space<vmem>>, vector<2x128xf32>
    tpu.vector_store %arg6[%c0_33, %c0_34], %155 {strides = array<i32>} : memref<8x128xf32, #tpu.memory_space<vmem>>, vector<2x128xf32>,
    %198 = arith.subf %155, %196 : vector<2x128xf32>
    %c2 = arith.constant 2 : index
    %c0_35 = arith.constant 0 : index
    %199 = vector.load %arg6[%c2, %c0_35] : memref<8x128xf32, #tpu.memory_space<vmem>>, vector<2x128xf32>
    tpu.vector_store %arg6[%c2, %c0_35], %198 {strides = array<i32>} : memref<8x128xf32, #tpu.memory_space<vmem>>, vector<2x128xf32>,
    %c4 = arith.constant 4 : index
    %c0_36 = arith.constant 0 : index
    %200 = vector.load %arg6[%c4, %c0_36] : memref<8x128xf32, #tpu.memory_space<vmem>>, vector<2x128xf32>
    tpu.vector_store %arg6[%c4, %c0_36], %159 {strides = array<i32>} : memref<8x128xf32, #tpu.memory_space<vmem>>, vector<2x128xf32>,
    %c6 = arith.constant 6 : index
    %c0_37 = arith.constant 0 : index
    %201 = vector.load %arg6[%c6, %c0_37] : memref<8x128xf32, #tpu.memory_space<vmem>>, vector<2x128xf32>
    tpu.vector_store %arg6[%c6, %c0_37], %67 {strides = array<i32>} : memref<8x128xf32, #tpu.memory_space<vmem>>, vector<2x128xf32>,
    return
  }
  func.func @transform_0(%arg0: i32) -> (i32, i32) {
    %c0_i32 = arith.constant 0 : i32
    %c0_i32_0 = arith.constant 0 : i32
    return %c0_i32, %arg0 : i32, i32
  }
  func.func @transform_1(%arg0: i32) -> (i32, i32) {
    %c0_i32 = arith.constant 0 : i32
    %c0_i32_0 = arith.constant 0 : i32
    %c0_i32_1 = arith.constant 0 : i32
    return %c0_i32, %c0_i32_0 : i32, i32
  }
  func.func @transform_2(%arg0: i32) -> (i32, i32) {
    %c0_i32 = arith.constant 0 : i32
    %c0_i32_0 = arith.constant 0 : i32
    %c0_i32_1 = arith.constant 0 : i32
    return %c0_i32, %c0_i32_0 : i32, i32
  }
  func.func @transform_3(%arg0: i32) -> (i32, i32) {
    %c0_i32 = arith.constant 0 : i32
    %c0_i32_0 = arith.constant 0 : i32
    %c0_i32_1 = arith.constant 0 : i32
    return %c0_i32, %c0_i32_0 : i32, i32
  }
  func.func @transform_4(%arg0: i32) -> (i32, i32) {
    %c0_i32 = arith.constant 0 : i32
    %c0_i32_0 = arith.constant 0 : i32
    %c0_i32_1 = arith.constant 0 : i32
    return %c0_i32, %c0_i32_0 : i32, i32
  }
  func.func @transform_5(%arg0: i32) -> (i32, i32) {
    %c0_i32 = arith.constant 0 : i32
    %c0_i32_0 = arith.constant 0 : i32
    return %c0_i32, %arg0 : i32, i32
  }
}

</mosaic_0001>

<bundles_post_ra>
// kernel: nn_forward.1
= control target key start
LH: loop header
LB: loop body
LE: loop exit
PB: predicated region body
PF: predicated region fallthrough
CT: control target
= control target key end

     0   :  { %10 = vsyncpa [#allocation4], 0  ;;  %s7034_s18 = smov [#allocation3]   ;;  %s12445_s0 = inlined_call_operand.vmem [shape: f32[8,128], index: 0, kind: input, shape index: {}]   ;;  %s12446_s1 = inlined_call_operand.vmem [shape: f32[256,16], index: 1, kind: input, shape index: {}]   ;;  %s12447_s2 = inlined_call_operand.vmem [shape: bf16[256,256], index: 2, kind: input, shape index: {}]   ;;  %s12448_s3 = inlined_call_operand.hbm [shape: bf16[256,256], index: 3, kind: input, shape index: {}]   ;;  %s12449_s4 = inlined_call_operand.vmem [shape: bf16[16,256], index: 4, kind: input, shape index: {}]   ;;  %s12450_s5 = inlined_call_operand.vmem [shape: f32[8,128], index: 5, kind: output, shape index: {}]  }
   0x1   :  { %s22_s19 = sshll.u32 %s7034_s18, 4  ;;  %s7010_s22 = scalar_lea.hbm %s12448_s3, 4096  ;;  %s23_s19 = int_to_ptr.vmem [resolvable:$true] %s22_s19 }
   0x2   :  { %p7011_p0 = scmp.ne.s32.totalorder %s12448_s3, %s7010_s22  ;;  %p7014_p1 = scmp.lt.u32.totalorder %s7010_s22, %s12448_s3 }
   0x4   :  { %p7016_p2 = pnand %p7014_p1, %p7011_p0 }
   0x6   :  { %7019 = shalt.err (!%p7016_p2)
}
   0x7   :  { %s7020_s27 = scalar_lea.vmem %s23_s19, 4096  ;;  %p7025_p4 = scmp.lt.s32.totalorder %s23_s19, %s23_s19 }
   0x8   :  { %p7021_p3 = scmp.ne.s32.totalorder %s23_s19, %s7020_s27  ;;  %p7026_p5 = scmp.lt.s32.totalorder %s7020_s27, %s7020_s27 }
   0xa   :  { %p7027_p6 = por %p7026_p5, %p7025_p4 }
   0xc   :  { %p7028_p7 = pnand %p7027_p6, %p7021_p3 }
   0xe   :  { %7031 = shalt.err (!%p7028_p7)
}
   0xf   :  { %s7035_s28 = smov 128   ;;  %s7036_s29 = smov 8  }
  0x10   :  { %28 = dma.hbm_to_vmem [thread:$0]  %s12448_s3, 4096, %s23_s19, [#allocation4], %s7035_s28, %s7035_s28, %s7036_s29  }
  0x11   :  { %7032 = dma.done.wait [#allocation4], 4096  }
  0x12   :  { %7033 = vsyncadd [#allocation4], 4294963200  ;;  %v12451_v0 = vmov 3   ;;  %v7105_v1 = vld [vmem:[%s12446_s1 + $0x10] sm:$0xff]  ;;  %v7110_v2 = vld [vmem:[%s12446_s1] sm:$0xff]  ;;  %v12453_v30 = vmov 4  }
  0x13   :  { %6061 = vset.pattern.permute.xlu1 %v12451_v0  ;;  %6060 = vset.pattern.permute.xlu0 %v12451_v0  ;;  %v7117_v3 = vld [vmem:[%s12446_s1 + $0x18] sm:$0xff]  ;;  %v7122_v4 = vld [vmem:[%s12446_s1 + $0x8] sm:$0xff]  ;;  %v7134_v6 = vld [vmem:[%s12446_s1 + $0x20] sm:$0xff]  ;;  %v12455_v32 = vmov 0   ;;  %v12457_v33 = vmov 1   ;;  %v12459_v34 = vmov 2  }
  0x14   :  { %146 = vperm.xlu1 %6061, %v7105_v1   ;;  %136 = vperm.xlu0 %6060, %v7110_v2   ;;  %v7129_v5 = vld [vmem:[%s12446_s1 + $0x28] sm:$0xff]  ;;  %v7141_v7 = vld [vmem:[%s12446_s1 + $0x38] sm:$0xff]  ;;  %v7146_v8 = vld [vmem:[%s12446_s1 + $0x30] sm:$0xff] }
  0x15   :  { %v7151_v9 = vld [vmem:[%s12446_s1 + $0x48] sm:$0xff]  ;;  %v7156_v10 = vld [vmem:[%s12446_s1 + $0x40] sm:$0xff]  ;;  %v7163_v11 = vld [vmem:[%s12446_s1 + $0x58] sm:$0xff] }
  0x16   :  { %v7168_v12 = vld [vmem:[%s12446_s1 + $0x50] sm:$0xff]  ;;  %v7175_v13 = vld [vmem:[%s12446_s1 + $0x68] sm:$0xff]  ;;  %v7180_v14 = vld [vmem:[%s12446_s1 + $0x60] sm:$0xff] }
  0x17   :  { %12913 = vst [vmem:[#allocation6_spill] sm:$0xff] %v7180_v14  ;;  %v7187_v15 = vld [vmem:[%s12446_s1 + $0x78] sm:$0xff]  ;;  %v7192_v16 = vld [vmem:[%s12446_s1 + $0x70] sm:$0xff]  ;;  %v7199_v17 = vld [vmem:[%s12446_s1 + $0x88] sm:$0xff] }
  0x18   :  { %151 = vperm.xlu1 %6061, %v7117_v3   ;;  %141 = vperm.xlu0 %6060, %v7122_v4   ;;  %12914 = vst [vmem:[#allocation7_spill] sm:$0xff] %v7192_v16  ;;  %v7204_v18 = vld [vmem:[%s12446_s1 + $0x80] sm:$0xff]  ;;  %v7213_v19 = vld [vmem:[%s12446_s1 + $0x98] sm:$0xff]  ;;  %v7218_v20 = vld [vmem:[%s12446_s1 + $0x90] sm:$0xff] }
  0x19   :  { %v7225_v21 = vld [vmem:[%s12446_s1 + $0xa8] sm:$0xff]  ;;  %v7230_v22 = vld [vmem:[%s12446_s1 + $0xa0] sm:$0xff]  ;;  %v7237_v23 = vld [vmem:[%s12446_s1 + $0xb8] sm:$0xff] }
  0x1a   :  { %12915 = vst [vmem:[#allocation8_spill] sm:$0xff] %v7237_v23  ;;  %v7242_v24 = vld [vmem:[%s12446_s1 + $0xb0] sm:$0xff]  ;;  %v7249_v25 = vld [vmem:[%s12446_s1 + $0xc8] sm:$0xff]  ;;  %v7254_v26 = vld [vmem:[%s12446_s1 + $0xc0] sm:$0xff] }
  0x1b   :  { %12916 = vst [vmem:[#allocation9_spill] sm:$0xff] %v7249_v25  ;;  %v63_v27 = vld [vmem:[%s12446_s1 + $0xd8] sm:$0xff]  ;;  %v7264_v28 = vld [vmem:[%s12446_s1 + $0xd0] sm:$0xff]  ;;  %v7270_v29 = vld [vmem:[%s12446_s1 + $0xe0] sm:$0xff] }
  0x1c   :  { %161 = vperm.xlu1 %6061, %v7129_v5   ;;  %156 = vperm.xlu0 %6060, %v7134_v6   ;;  %12917 = vst [vmem:[#allocation10_spill] sm:$0xff] %v7264_v28  ;;  %v7278_v31 = vld [vmem:[%s12446_s1 + $0xf8] sm:$0xff]  ;;  %v65_v35 = vld [vmem:[%s12446_s1 + $0xe8] sm:$0xff]  ;;  %v7314_v36 = vld [vmem:[%s12446_s1 + $0xf0] sm:$0xff] }
  0x1d   :  { %12918 = vst [vmem:[#allocation11_spill] sm:$0xff] %v7314_v36 }
  0x20   :  { %171 = vperm.xlu1 %6061, %v7141_v7   ;;  %166 = vperm.xlu0 %6060, %v7146_v8  }
  0x24   :  { %181 = vperm.xlu1 %6061, %v7151_v9   ;;  %176 = vperm.xlu0 %6060, %v7156_v10  }
  0x28   :  { %191 = vperm.xlu1 %6061, %v7163_v11   ;;  %186 = vperm.xlu0 %6060, %v7168_v12  }
  0x2c   :  { %201 = vperm.xlu1 %6061, %v7175_v13   ;;  %196 = vperm.xlu0 %6060, %v7180_v14  }
  0x30   :  { %211 = vperm.xlu1 %6061, %v7187_v15   ;;  %206 = vperm.xlu0 %6060, %v7192_v16  }
  0x34   :  { %221 = vperm.xlu1 %6061, %v7199_v17   ;;  %216 = vperm.xlu0 %6060, %v7204_v18  }
  0x38   :  { %231 = vperm.xlu1 %6061, %v7213_v19   ;;  %226 = vperm.xlu0 %6060, %v7218_v20  }
  0x3c   :  { %241 = vperm.xlu1 %6061, %v7225_v21   ;;  %236 = vperm.xlu0 %6060, %v7230_v22  }
  0x40   :  { %251 = vperm.xlu1 %6061, %v7237_v23   ;;  %246 = vperm.xlu0 %6060, %v7242_v24  }
  0x44   :  { %261 = vperm.xlu1 %6061, %v7249_v25   ;;  %256 = vperm.xlu0 %6060, %v7254_v26  }
  0x48   :  { %271 = vperm.xlu1 %6061, %v63_v27   ;;  %266 = vperm.xlu0 %6060, %v7264_v28  }
  0x4c   :  { %6062 = vset.pattern.permute.xlu1 %v12453_v30  ;;  %276 = vperm.xlu0 %6060, %v7270_v29  }
  0x4d   :  { %331 = vperm.xlu1 %6062, %v7110_v2  }
  0x50   :  { %291 = vperm.xlu0 %6060, %v7278_v31  }
  0x51   :  { %6063 = vset.pattern.permute.xlu1 %v12455_v32 }
  0x52   :  { %491 = vperm.xlu1 %6063, %v7110_v2  }
  0x54   :  { %6122 = vset.pattern.permute.xlu0 %v12453_v30 }
  0x55   :  { %335 = vperm.xlu0 %6122, %v7122_v4  }
  0x56   :  { %495 = vperm.xlu1 %6063, %v7122_v4  }
  0x59   :  { %343 = vperm.xlu0 %6122, %v7117_v3  }
  0x5a   :  { %6064 = vset.pattern.permute.xlu1 %v12457_v33 }
  0x5b   :  { %691 = vperm.xlu1 %6064, %v7122_v4  }
  0x5d   :  { %355 = vperm.xlu0 %6122, %v7146_v8  }
  0x5f   :  { %6065 = vset.pattern.permute.xlu1 %v12453_v30 }
  0x60   :  { %339 = vperm.xlu1 %6065, %v7105_v1  }
  0x61   :  { %367 = vperm.xlu0 %6122, %v7151_v9  }
  0x64   :  { %6066 = vset.pattern.permute.xlu1 %v12455_v32 }
  0x65   :  { %499 = vperm.xlu1 %6066, %v7105_v1   ;;  %379 = vperm.xlu0 %6122, %v7180_v14  }
  0x69   :  { %503 = vperm.xlu1 %6066, %v7117_v3   ;;  %391 = vperm.xlu0 %6122, %v7187_v15  }
  0x6d   :  { %6067 = vset.pattern.permute.xlu1 %v12459_v34  ;;  %403 = vperm.xlu0 %6122, %v7218_v20  }
  0x6e   :  { %887 = vperm.xlu1 %6067, %v7122_v4  }
  0x71   :  { %415 = vperm.xlu0 %6122, %v7225_v21  }
  0x72   :  { %6068 = vset.pattern.permute.xlu1 %v12457_v33 }
  0x73   :  { %695 = vperm.xlu1 %6068, %v7105_v1  }
  0x75   :  { %427 = vperm.xlu0 %6122, %v7254_v26  }
  0x77   :  { %6069 = vset.pattern.permute.xlu1 %v12453_v30 }
  0x78   :  { %347 = vperm.xlu1 %6069, %v7134_v6  }
  0x79   :  { %439 = vperm.xlu0 %6122, %v63_v27  }
  0x7c   :  { %351 = vperm.xlu1 %6069, %v7129_v5  }
  0x7d   :  { %447 = vperm.xlu0 %6122, %v65_v35  }
  0x80   :  { %6070 = vset.pattern.permute.xlu1 %v12455_v32 }
  0x81   :  { %511 = vperm.xlu1 %6070, %v7129_v5   ;;  %451 = vperm.xlu0 %6122, %v7314_v36  }
  0x85   :  { %6071 = vset.pattern.permute.xlu1 %v12459_v34  ;;  %6124 = vset.pattern.permute.xlu0 %v12455_v32 }
  0x86   :  { %891 = vperm.xlu1 %6071, %v7105_v1   ;;  %507 = vperm.xlu0 %6124, %v7134_v6  }
  0x8a   :  { %6072 = vset.pattern.permute.xlu1 %v12457_v33  ;;  %519 = vperm.xlu0 %6124, %v7141_v7  }
  0x8b   :  { %703 = vperm.xlu1 %6072, %v7134_v6  }
  0x8e   :  { %531 = vperm.xlu0 %6124, %v7168_v12  }
  0x8f   :  { %707 = vperm.xlu1 %6072, %v7129_v5  }
  0x92   :  { %543 = vperm.xlu0 %6124, %v7175_v13  }
  0x93   :  { %v7329_v37 = vpop.permute.xlu1 %146  ;;  %6073 = vset.pattern.permute.xlu1 %v12453_v30  ;;  %v7332_v38 = vpop.permute.xlu0 %136 }
  0x94   :  { %359 = vperm.xlu1 %6073, %v7141_v7  }
  0x96   :  { %555 = vperm.xlu0 %6124, %v7204_v18  }
  0x97   :  { %v7336_v39 = vpop.permute.xlu1 %151  ;;  %v7338_v40 = vpop.permute.xlu0 %141 }
  0x98   :  { %6074 = vset.pattern.permute.xlu1 %v12455_v32 }
  0x99   :  { %515 = vperm.xlu1 %6074, %v7146_v8  }
  0x9a   :  { %567 = vperm.xlu0 %6124, %v7213_v19  }
  0x9b   :  { %v7343_v41 = vpop.permute.xlu1 %161  ;;  %v7345_v42 = vpop.permute.xlu0 %156 }
  0x9d   :  { %6075 = vset.pattern.permute.xlu1 %v12459_v34 }
  0x9e   :  { %899 = vperm.xlu1 %6075, %v7134_v6   ;;  %579 = vperm.xlu0 %6124, %v7242_v24  }
  0x9f   :  { %v7350_v43 = vpop.permute.xlu1 %171  ;;  %v7352_v44 = vpop.permute.xlu0 %166 }
  0xa2   :  { %903 = vperm.xlu1 %6075, %v7129_v5   ;;  %591 = vperm.xlu0 %6124, %v7249_v25  }
  0xa3   :  { %v7356_v45 = vpop.permute.xlu1 %181  ;;  %v7358_v46 = vpop.permute.xlu0 %176 }
  0xa6   :  { %6076 = vset.pattern.permute.xlu1 %v12457_v33  ;;  %615 = vperm.xlu0 %6124, %v7278_v31  }
  0xa7   :  { %v7362_v47 = vpop.permute.xlu1 %191  ;;  %715 = vperm.xlu1 %6076, %v7141_v7   ;;  %v7365_v48 = vpop.permute.xlu0 %186 }
  0xaa   :  { %6127 = vset.pattern.permute.xlu0 %v12457_v33 }
  0xab   :  { %v7368_v49 = vpop.permute.xlu1 %201  ;;  %6077 = vset.pattern.permute.xlu1 %v12453_v30  ;;  %687 = vperm.xlu0 %6127, %v7110_v2   ;;  %v7372_v50 = vpop.permute.xlu0 %196 }
  0xac   :  { %12919 = vst [vmem:[#allocation12_spill] sm:$0xff] %v7368_v49  ;;  %12920 = vst [vmem:[#allocation13_spill] sm:$0xff] %v7372_v50  ;;  %363 = vperm.xlu1 %6077, %v7156_v10  }
  0xaf   :  { %v7375_v51 = vpop.permute.xlu1 %211  ;;  %699 = vperm.xlu0 %6127, %v7117_v3   ;;  %v7378_v52 = vpop.permute.xlu0 %206 }
  0xb0   :  { %12921 = vst [vmem:[#allocation14_spill] sm:$0xff] %v7375_v51  ;;  %12922 = vst [vmem:[#allocation15_spill] sm:$0xff] %v7378_v52  ;;  %6078 = vset.pattern.permute.xlu1 %v12455_v32 }
  0xb1   :  { %523 = vperm.xlu1 %6078, %v7156_v10  }
  0xb3   :  { %v7382_v53 = vpop.permute.xlu1 %221  ;;  %711 = vperm.xlu0 %6127, %v7146_v8   ;;  %v7385_v54 = vpop.permute.xlu0 %216 }
  0xb4   :  { %12923 = vst [vmem:[#allocation16_spill] sm:$0xff] %v7382_v53  ;;  %12924 = vst [vmem:[#allocation17_spill] sm:$0xff] %v7385_v54 }
  0xb5   :  { %527 = vperm.xlu1 %6078, %v7151_v9  }
  0xb7   :  { %v7388_v55 = vpop.permute.xlu1 %231  ;;  %723 = vperm.xlu0 %6127, %v7151_v9   ;;  %v7391_v56 = vpop.permute.xlu0 %226 }
  0xb8   :  { %12925 = vst [vmem:[#allocation18_spill] sm:$0xff] %v7388_v55  ;;  %12926 = vst [vmem:[#allocation19_spill] sm:$0xff] %v7391_v56  ;;  %v12952_v55 = vmov 2  }
  0xb9   :  { %6079 = vset.pattern.permute.xlu1 %v12459_v34 }
  0xba   :  { %911 = vperm.xlu1 %6079, %v7141_v7  }
  0xbb   :  { %v7395_v57 = vpop.permute.xlu1 %241  ;;  %735 = vperm.xlu0 %6127, %v7180_v14   ;;  %v7398_v58 = vpop.permute.xlu0 %236 }
  0xbc   :  { %12927 = vst [vmem:[#allocation20_spill] sm:$0xff] %v7395_v57  ;;  %12928 = vst [vmem:[#allocation21_spill] sm:$0xff] %v7398_v58 }
  0xbe   :  { %6080 = vset.pattern.permute.xlu1 %v12457_v33 }
  0xbf   :  { %v7401_v59 = vpop.permute.xlu1 %251  ;;  %719 = vperm.xlu1 %6080, %v7156_v10   ;;  %747 = vperm.xlu0 %6127, %v7187_v15   ;;  %v7405_v60 = vpop.permute.xlu0 %246 }
  0xc0   :  { %12929 = vst [vmem:[#allocation22_spill] sm:$0xff] %v7401_v59  ;;  %12930 = vst [vmem:[#allocation23_spill] sm:$0xff] %v7405_v60 }
  0xc3   :  { %v7407_v61 = vpop.permute.xlu1 %261  ;;  %6081 = vset.pattern.permute.xlu1 %v12453_v30  ;;  %759 = vperm.xlu0 %6127, %v7218_v20   ;;  %v7411_v62 = vpop.permute.xlu0 %256 }
  0xc4   :  { %12931 = vst [vmem:[#allocation24_spill] sm:$0xff] %v7407_v61  ;;  %12932 = vst [vmem:[#allocation25_spill] sm:$0xff] %v7411_v62  ;;  %371 = vperm.xlu1 %6081, %v7168_v12   ;;  %v12946_v62 = vmov 0  }
  0xc7   :  { %v7414_v63 = vpop.permute.xlu1 %271  ;;  %771 = vperm.xlu0 %6127, %v7225_v21   ;;  %v7417_v4 = vpop.permute.xlu0 %266 }
  0xc8   :  { %12933 = vst [vmem:[#allocation26_spill] sm:$0xff] %v7414_v63  ;;  %12934 = vst [vmem:[#allocation27_spill] sm:$0xff] %v7417_v4  ;;  %375 = vperm.xlu1 %6081, %v7163_v11   ;;  %v12943_v63 = vmov 4  }
  0xcb   :  { %783 = vperm.xlu0 %6127, %v7254_v26   ;;  %v7421_v5 = vpop.permute.xlu0 %276 }
  0xcc   :  { %12935 = vst [vmem:[#allocation28_spill] sm:$0xff] %v7421_v5  ;;  %6082 = vset.pattern.permute.xlu1 %v12455_v32  ;;  %v7424_v7 = vpop.permute.xlu1 %331 }
  0xcd   :  { %12936 = vst [vmem:[#allocation29_spill] sm:$0xff] %v7424_v7  ;;  %535 = vperm.xlu1 %6082, %v7163_v11  }
  0xcf   :  { %791 = vperm.xlu0 %6127, %v7264_v28   ;;  %v7428_v27 = vpop.permute.xlu0 %291 }
  0xd0   :  { %12937 = vst [vmem:[#allocation30_spill] sm:$0xff] %v7428_v27 }
  0xd1   :  { %6083 = vset.pattern.permute.xlu1 %v12459_v34  ;;  %v7431_v35 = vpop.permute.xlu1 %491 }
  0xd2   :  { %12938 = vst [vmem:[#allocation31_spill] sm:$0xff] %v7431_v35  ;;  %915 = vperm.xlu1 %6083, %v7156_v10  }
  0xd3   :  { %807 = vperm.xlu0 %6127, %v7314_v36  }
  0xd4   :  { %v7435_v0 = vpop.permute.xlu0 %335 }
  0xd5   :  { %v7437_v30 = vpop.permute.xlu1 %495 }
  0xd6   :  { %12939 = vst [vmem:[#allocation32_spill] sm:$0xff] %v7437_v30  ;;  %6084 = vset.pattern.permute.xlu1 %v12457_v33  ;;  %v294_v33 = vlaneseq }
  0xd7   :  { %727 = vperm.xlu1 %6084, %v7168_v12   ;;  %6129 = vset.pattern.permute.xlu0 %v12459_v34 }
  0xd8   :  { %883 = vperm.xlu0 %6129, %v7110_v2   ;;  %v7443_v32 = vpop.permute.xlu0 %343  ;;  %v7458_v61 = vshrl.u32 %v294_v33, 7  ;;  %v7476_v33 = vld [vmem:[%s12445_s0] sm:$0xff] }
  0xd9   :  { %12940 = vst [vmem:[#allocation33_spill] sm:$0xff] %v7443_v32  ;;  %12951 = vst [vmem:[#allocation42_spill] sm:$0xff] %v7476_v33 }
  0xda   :  { %v7445_v27 = vpop.permute.xlu1 %691  ;;  %12945 = vst [vmem:[#allocation37_spill] sm:$0xff] %v7458_v61  ;;  %v1012_v60 = vsub.s32 3, %v7458_v61 }
  0xdb   :  { %12941 = vst [vmem:[#allocation34_spill] sm:$0xff] %v7445_v27  ;;  %731 = vperm.xlu1 %6084, %v7163_v11  }
  0xdc   :  { %895 = vperm.xlu0 %6129, %v7117_v3   ;;  %v7449_v5 = vpop.permute.xlu0 %355  ;;  %v7482_v56 = vrot.slane %v7476_v33, %v1012_v60 }
  0xdd   :  { %12942 = vst [vmem:[#allocation35_spill] sm:$0xff] %v7449_v5 }
  0xde   :  { %12953 = vst [vmem:[#allocation43_spill] sm:$0xff] %v7482_v56 }
  0xdf   :  { %6085 = vset.pattern.permute.xlu1 %v12943_v63  ;;  %v7452_v4 = vpop.permute.xlu1 %339 }
  0xe0   :  { %383 = vperm.xlu1 %6085, %v7175_v13   ;;  %907 = vperm.xlu0 %6129, %v7146_v8   ;;  %v7456_v34 = vpop.permute.xlu0 %367 }
  0xe1   :  { %12944 = vst [vmem:[#allocation36_spill] sm:$0xff] %v7456_v34 }
  0xe4   :  { %6086 = vset.pattern.permute.xlu1 %v12946_v62  ;;  %v7461_v59 = vpop.permute.xlu1 %499  ;;  %919 = vperm.xlu0 %6129, %v7151_v9   ;;  %v7464_v3 = vpop.permute.xlu0 %379  ;;  %v296_v9 = vsub.s32 4, %v7458_v61 }
  0xe5   :  { %12947 = vst [vmem:[#allocation38_spill] sm:$0xff] %v7461_v59  ;;  %12948 = vst [vmem:[#allocation39_spill] sm:$0xff] %v7464_v3  ;;  %539 = vperm.xlu1 %6086, %v7180_v14  }
  0xe8   :  { %v7468_v58 = vpop.permute.xlu1 %503  ;;  %931 = vperm.xlu0 %6129, %v7180_v14   ;;  %v7471_v57 = vpop.permute.xlu0 %391 }
  0xe9   :  { %12949 = vst [vmem:[#allocation40_spill] sm:$0xff] %v7468_v58  ;;  %12950 = vst [vmem:[#allocation41_spill] sm:$0xff] %v7471_v57  ;;  %6087 = vset.pattern.permute.xlu1 %v12952_v55  ;;  %v7488_v57 = vrot.slane %v7476_v33, %v296_v9  ;;  %v12958_v9 = vmov 1  }
  0xea   :  { %923 = vperm.xlu1 %6087, %v7168_v12  }
  0xeb   :  { %v7496_v51 = vmul.f32 %v7488_v57, %v7338_v40 }
  0xec   :  { %943 = vperm.xlu0 %6129, %v7187_v15   ;;  %v7485_v53 = vpop.permute.xlu0 %403 }
  0xed   :  { %12954 = vst [vmem:[#allocation44_spill] sm:$0xff] %v7485_v53  ;;  %v888_v54 = vpop.permute.xlu1 %887 }
  0xee   :  { %v7491_v52 = vmul.f32 %v7482_v56, %v888_v54  ;;  %927 = vperm.xlu1 %6087, %v7163_v11  }
  0xf0   :  { %12955 = vst [vmem:[#allocation45_spill] sm:$0xff] %v7491_v52  ;;  %v5165_v60 = vadd.f32 %v7491_v52, %v7435_v0  ;;  %955 = vperm.xlu0 %6129, %v7218_v20   ;;  %v7501_v36 = vpop.permute.xlu0 %415  ;;  %v7590_v52 = vsub.s32 1, %v7458_v61 }
  0xf1   :  { %12956 = vst [vmem:[#allocation46_spill] sm:$0xff] %v7501_v36 }
  0xf2   :  { %v7504_v53 = vadd.f32 %v5165_v60, %v7496_v51  ;;  %6088 = vset.pattern.permute.xlu1 %v12958_v9  ;;  %v7507_v54 = vpop.permute.xlu1 %695  ;;  %12977 = vst [vmem:[#allocation66_spill] sm:$0xff] %v7590_v52 }
  0xf3   :  { %12959 = vst [vmem:[#allocation48_spill] sm:$0xff] %v7507_v54  ;;  %739 = vperm.xlu1 %6088, %v7175_v13  }
  0xf4   :  { %12957 = vst [vmem:[#allocation47_spill] sm:$0xff] %v7504_v53  ;;  %967 = vperm.xlu0 %6129, %v7225_v21   ;;  %v7511_v11 = vpop.permute.xlu0 %427 }
  0xf5   :  { %12960 = vst [vmem:[#allocation49_spill] sm:$0xff] %v7511_v11 }
  0xf7   :  { %6089 = vset.pattern.permute.xlu1 %v12943_v63  ;;  %v7514_v40 = vpop.permute.xlu1 %347 }
  0xf8   :  { %387 = vperm.xlu1 %6089, %v7192_v16   ;;  %v7517_v36 = vpop.permute.xlu0 %439  ;;  %979 = vperm.xlu0 %6129, %v7254_v26  }
  0xf9   :  { %12961 = vst [vmem:[#allocation50_spill] sm:$0xff] %v7517_v36  ;;  %v12470_v36 = vmov 8  }
  0xfb   :  { %v7520_v60 = vpop.permute.xlu1 %351 }
  0xfc   :  { %6090 = vset.pattern.permute.xlu1 %v12946_v62  ;;  %v7523_v53 = vpop.permute.xlu0 %447  ;;  %987 = vperm.xlu0 %6129, %v7264_v28  }
  0xfd   :  { %12962 = vst [vmem:[#allocation51_spill] sm:$0xff] %v7523_v53  ;;  %547 = vperm.xlu1 %6090, %v7192_v16  }
 0x100   :  { %v7527_v11 = vpop.permute.xlu1 %511  ;;  %v7529_v25 = vpop.permute.xlu0 %451  ;;  %1007 = vperm.xlu0 %6129, %v7278_v31   ;;  %v7544_v31 = vmul.f32 %v7488_v57, %v7329_v37 }
 0x101   :  { %12963 = vst [vmem:[#allocation52_spill] sm:$0xff] %v7527_v11  ;;  %12964 = vst [vmem:[#allocation53_spill] sm:$0xff] %v7529_v25  ;;  %551 = vperm.xlu1 %6090, %v7187_v15  }
 0x104   :  { %6136 = vset.pattern.permute.xlu0 %v12470_v36 }
 0x105   :  { %6091 = vset.pattern.permute.xlu1 %v12952_v55  ;;  %v892_v3 = vpop.permute.xlu1 %891  ;;  %v7535_v49 = vpop.permute.xlu0 %507  ;;  %2818 = vperm.xlu0 %6136, %v7110_v2  }
 0x106   :  { %12965 = vst [vmem:[#allocation54_spill] sm:$0xff] %v7535_v49  ;;  %v7539_v53 = vmul.f32 %v7482_v56, %v892_v3  ;;  %935 = vperm.xlu1 %6091, %v7175_v13  }
 0x108   :  { %12966 = vst [vmem:[#allocation55_spill] sm:$0xff] %v7539_v53  ;;  %v5166_v15 = vadd.f32 %v7539_v53, %v7452_v4 }
 0x109   :  { %v7548_v36 = vpop.permute.xlu0 %519  ;;  %2826 = vperm.xlu0 %6136, %v7105_v1  }
 0x10a   :  { %12967 = vst [vmem:[#allocation56_spill] sm:$0xff] %v7548_v36  ;;  %v7552_v25 = vadd.f32 %v5166_v15, %v7544_v31  ;;  %6092 = vset.pattern.permute.xlu1 %v12958_v9  ;;  %v7555_v3 = vpop.permute.xlu1 %703  ;;  %v7599_v36 = vsub.s32 2, %v7458_v61  ;;  %v7618_v61 = vmul.f32 %v7488_v57, %v7343_v41 }
 0x10b   :  { %12969 = vst [vmem:[#allocation58_spill] sm:$0xff] %v7555_v3  ;;  %743 = vperm.xlu1 %6092, %v7192_v16  }
 0x10c   :  { %12968 = vst [vmem:[#allocation57_spill] sm:$0xff] %v7552_v25  ;;  %12978 = vst [vmem:[#allocation67_spill] sm:$0xff] %v7599_v36 }
 0x10d   :  { %v7558_v13 = vpop.permute.xlu0 %531  ;;  %2834 = vperm.xlu0 %6136, %v7134_v6  }
 0x10e   :  { %12970 = vst [vmem:[#allocation59_spill] sm:$0xff] %v7558_v13  ;;  %v7561_v37 = vpop.permute.xlu1 %707 }
 0x10f   :  { %12971 = vst [vmem:[#allocation60_spill] sm:$0xff] %v7561_v37  ;;  %6093 = vset.pattern.permute.xlu1 %v12943_v63 }
 0x110   :  { %395 = vperm.xlu1 %6093, %v7204_v18  }
 0x111   :  { %v7565_v50 = vpop.permute.xlu0 %543  ;;  %2842 = vperm.xlu0 %6136, %v7146_v8  }
 0x112   :  { %12972 = vst [vmem:[#allocation61_spill] sm:$0xff] %v7565_v50 }
 0x113   :  { %v7568_v15 = vpop.permute.xlu1 %359 }
 0x114   :  { %399 = vperm.xlu1 %6093, %v7199_v17  }
 0x115   :  { %v7571_v25 = vpop.permute.xlu0 %555  ;;  %2850 = vperm.xlu0 %6136, %v7156_v10  }
 0x116   :  { %12973 = vst [vmem:[#allocation62_spill] sm:$0xff] %v7571_v25 }
 0x118   :  { %6094 = vset.pattern.permute.xlu1 %v12946_v62  ;;  %v7575_v13 = vpop.permute.xlu1 %515 }
 0x119   :  { %12974 = vst [vmem:[#allocation63_spill] sm:$0xff] %v7575_v13  ;;  %559 = vperm.xlu1 %6094, %v7199_v17   ;;  %v7578_v23 = vpop.permute.xlu0 %567  ;;  %2858 = vperm.xlu0 %6136, %v7168_v12  }
 0x11a   :  { %12975 = vst [vmem:[#allocation64_spill] sm:$0xff] %v7578_v23  ;;  %v7594_v23 = vmul.f32 %v7488_v57, %v7345_v42  ;;  %v7613_v42 = vrot.slane %v7476_v33, %v7590_v52 }
 0x11d   :  { %6095 = vset.pattern.permute.xlu1 %v12952_v55  ;;  %v900_v50 = vpop.permute.xlu1 %899  ;;  %v7582_v53 = vpop.permute.xlu0 %579  ;;  %2866 = vperm.xlu0 %6136, %v7180_v14  }
 0x11e   :  { %12976 = vst [vmem:[#allocation65_spill] sm:$0xff] %v7582_v53  ;;  %v7586_v25 = vmul.f32 %v7482_v56, %v900_v50  ;;  %939 = vperm.xlu1 %6095, %v7192_v16  }
 0x120   :  { %v5168_v34 = vadd.f32 %v7586_v25, %v7514_v40 }
 0x121   :  { %v904_v53 = vpop.permute.xlu1 %903  ;;  %v7601_v14 = vpop.permute.xlu0 %591  ;;  %2874 = vperm.xlu0 %6136, %v7192_v16   ;;  %v622_v16 = vmul.f32 %v7613_v42, %v7431_v35 }
 0x122   :  { %12979 = vst [vmem:[#allocation68_spill] sm:$0xff] %v7601_v14  ;;  %v7605_v50 = vadd.f32 %v5168_v34, %v7594_v23  ;;  %v7608_v13 = vmul.f32 %v7482_v56, %v904_v53  ;;  %6096 = vset.pattern.permute.xlu1 %v12958_v9  ;;  %v7624_v34 = vmul.f32 %v7488_v57, %v7332_v38 }
 0x123   :  { %751 = vperm.xlu1 %6096, %v7204_v18   ;;  %v7628_v53 = vrot.slane %v7476_v33, %v7599_v36  ;;  %v459_v38 = vadd.f32 %v7435_v0, %v7496_v51 }
 0x124   :  { %12980 = vst [vmem:[#allocation69_spill] sm:$0xff] %v7605_v50  ;;  %12981 = vst [vmem:[#allocation70_spill] sm:$0xff] %v7608_v13  ;;  %v5169_v14 = vadd.f32 %v7608_v13, %v7520_v60  ;;  %v623_v13 = vmul.f32 %v7613_v42, %v7437_v30  ;;  %v458_v36 = vadd.f32 %v7424_v7, %v7624_v34 }
 0x125   :  { %12982 = vst [vmem:[#allocation71_spill] sm:$0xff] %v7624_v34  ;;  %v7630_v50 = vpop.permute.xlu0 %615  ;;  %2882 = vperm.xlu0 %6136, %v7204_v18  }
 0x126   :  { %12983 = vst [vmem:[#allocation72_spill] sm:$0xff] %v7630_v50  ;;  %v7634_v52 = vadd.f32 %v5169_v14, %v7618_v61  ;;  %v7636_v41 = vpop.permute.xlu1 %715  ;;  %v819_v14 = vmul.f32 %v7628_v53, %v7445_v27  ;;  %v654_v50 = vadd.f32 %v622_v16, %v458_v36  ;;  %v655_v35 = vadd.f32 %v623_v13, %v459_v38 }
 0x127   :  { %12985 = vst [vmem:[#allocation74_spill] sm:$0xff] %v7636_v41  ;;  %755 = vperm.xlu1 %6096, %v7199_v17  }
 0x128   :  { %12984 = vst [vmem:[#allocation73_spill] sm:$0xff] %v7634_v52  ;;  %v7658_v30 = vadd.f32 %v819_v14, %v655_v35 }
 0x129   :  { %2890 = vperm.xlu0 %6136, %v7218_v20  }
 0x12a   :  { %v7650_v52 = vpop.permute.xlu0 %687 }
 0x12b   :  { %12986 = vst [vmem:[#allocation75_spill] sm:$0xff] %v7650_v52  ;;  %v818_v0 = vmul.f32 %v7628_v53, %v7650_v52  ;;  %6097 = vset.pattern.permute.xlu1 %v12943_v63  ;;  %v7655_v51 = vpop.permute.xlu1 %363  ;;  %v7690_v52 = vmul.f32 %v7488_v57, %v7350_v43 }
 0x12c   :  { %407 = vperm.xlu1 %6097, %v7213_v19  }
 0x12d   :  { %v7660_v34 = vadd.f32 %v818_v0, %v654_v50  ;;  %2898 = vperm.xlu0 %6136, %v7230_v22  }
 0x12e   :  { %v7663_v27 = vpop.permute.xlu0 %699 }
 0x12f   :  { %12987 = vst [vmem:[#allocation76_spill] sm:$0xff] %v7663_v27  ;;  %v1126_v16 = vpack.c.bf16 %v7658_v30, %v7660_v34 }
 0x130   :  { %6098 = vset.pattern.permute.xlu1 %v12946_v62  ;;  %v7668_v36 = vpop.permute.xlu1 %523 }
 0x131   :  { %12988 = vst [vmem:[#allocation77_spill] sm:$0xff] %v7668_v36  ;;  %563 = vperm.xlu1 %6098, %v7218_v20   ;;  %6340 = vtanh.bf16 %v1126_v16  ;;  %2906 = vperm.xlu0 %6136, %v7242_v24  }
 0x132   :  { %v7672_v35 = vpop.permute.xlu0 %711 }
 0x133   :  { %12989 = vst [vmem:[#allocation78_spill] sm:$0xff] %v7672_v35 }
 0x134   :  { %v7674_v13 = vpop.permute.xlu1 %527 }
 0x135   :  { %12990 = vst [vmem:[#allocation79_spill] sm:$0xff] %v7674_v13  ;;  %6099 = vset.pattern.permute.xlu1 %v12952_v55  ;;  %2914 = vperm.xlu0 %6136, %v7254_v26  }
 0x136   :  { %947 = vperm.xlu1 %6099, %v7204_v18   ;;  %v7679_v50 = vpop.permute.xlu0 %723 }
 0x137   :  { %12991 = vst [vmem:[#allocation80_spill] sm:$0xff] %v7679_v50 }
 0x139   :  { %v912_v38 = vpop.permute.xlu1 %911  ;;  %2922 = vperm.xlu0 %6136, %v7264_v28   ;;  %v12504_v28 = vmov 10  }
 0x13a   :  { %v7683_v14 = vmul.f32 %v7482_v56, %v912_v38  ;;  %951 = vperm.xlu1 %6099, %v7199_v17   ;;  %v7686_v0 = vpop.permute.xlu0 %735 }
 0x13b   :  { %12992 = vst [vmem:[#allocation81_spill] sm:$0xff] %v7686_v0 }
 0x13c   :  { %v6341_v16 = vpop.eup %6340  ;;  %v5171_v7 = vadd.f32 %v7683_v14, %v7568_v15 }
 0x13d   :  { %1494 = vmatprep.subr.bf16.mxu0 %v6341_v16  ;;  %2930 = vperm.xlu0 %6136, %v7270_v29  }
 0x13e   :  { %v7696_v33 = vadd.f32 %v5171_v7, %v7690_v52  ;;  %6100 = vset.pattern.permute.xlu1 %v12958_v9  ;;  %v7699_v38 = vpop.permute.xlu1 %719  ;;  %v7701_v17 = vpop.permute.xlu0 %747 }
 0x13f   :  { %12994 = vst [vmem:[#allocation83_spill] sm:$0xff] %v7699_v38  ;;  %12995 = vst [vmem:[#allocation84_spill] sm:$0xff] %v7701_v17  ;;  %763 = vperm.xlu1 %6100, %v7213_v19  }
 0x140   :  { %12993 = vst [vmem:[#allocation82_spill] sm:$0xff] %v7696_v33 }
 0x141   :  { %6221 = vset.pattern.permute.xlu0 %v12504_v28 }
 0x142   :  { %v7705_v43 = vpop.permute.xlu0 %759  ;;  %2398 = vperm.xlu0 %6221, %v7110_v2  }
 0x143   :  { %12996 = vst [vmem:[#allocation85_spill] sm:$0xff] %v7705_v43  ;;  %6101 = vset.pattern.permute.xlu1 %v12943_v63  ;;  %v7709_v16 = vpop.permute.xlu1 %371 }
 0x144   :  { %411 = vperm.xlu1 %6101, %v7230_v22  }
 0x146   :  { %v7712_v7 = vpop.permute.xlu0 %771  ;;  %2406 = vperm.xlu0 %6221, %v7105_v1   ;;  %v7730_v1 = vmul.f32 %v7488_v57, %v7336_v39 }
 0x147   :  { %12997 = vst [vmem:[#allocation86_spill] sm:$0xff] %v7712_v7  ;;  %v7715_v33 = vpop.permute.xlu1 %375  ;;  %v7734_v7 = vmul.f32 %v7488_v57, %v7352_v44 }
 0x148   :  { %6102 = vset.pattern.permute.xlu1 %v12946_v62  ;;  %13001 = vst [vmem:[#allocation90_spill] sm:$0xff] %v7730_v1 }
 0x149   :  { %571 = vperm.xlu1 %6102, %v7230_v22   ;;  %13002 = vst [vmem:[#allocation91_spill] sm:$0xff] %v7734_v7 }
 0x14a   :  { %v7719_v28 = vpop.permute.xlu0 %783  ;;  %2414 = vperm.xlu0 %6221, %v7134_v6  }
 0x14b   :  { %12998 = vst [vmem:[#allocation87_spill] sm:$0xff] %v7719_v28  ;;  %v625_v28 = vmul.f32 %v7613_v42, %v7468_v58  ;;  %v306_v58 = vmul.f32 %v7488_v57, %v7358_v46 }
 0x14c   :  { %v7722_v2 = vpop.permute.xlu1 %535 }
 0x14d   :  { %12999 = vst [vmem:[#allocation88_spill] sm:$0xff] %v7722_v2  ;;  %575 = vperm.xlu1 %6102, %v7225_v21   ;;  %v7741_v21 = vmul.f32 %v7488_v57, %v7356_v45  ;;  %v627_v45 = vmul.f32 %v7613_v42, %v7527_v11  ;;  %v463_v11 = vadd.f32 %v7520_v60, %v7618_v61 }
 0x14e   :  { %v7725_v43 = vpop.permute.xlu0 %791  ;;  %2422 = vperm.xlu0 %6221, %v7146_v8   ;;  %v624_v8 = vmul.f32 %v7613_v42, %v7461_v59  ;;  %v821_v59 = vmul.f32 %v7628_v53, %v7663_v27  ;;  %v626_v27 = vmul.f32 %v7613_v42, %v7535_v49  ;;  %v822_v60 = vmul.f32 %v7628_v53, %v7555_v3  ;;  %v13011_v3 = vld [vmem:[#allocation45_spill] sm:$0xff] }
 0x14f   :  { %13000 = vst [vmem:[#allocation89_spill] sm:$0xff] %v7725_v43  ;;  %13003 = vst [vmem:[#allocation92_spill] sm:$0xff] %v7741_v21  ;;  %v461_v43 = vadd.f32 %v7443_v32, %v7730_v1  ;;  %v7778_v32 = vmul.f32 %v7488_v57, %v7365_v48  ;;  %v659_v61 = vadd.f32 %v627_v45, %v463_v11 }
 0x151   :  { %6103 = vset.pattern.permute.xlu1 %v12952_v55  ;;  %v916_v6 = vpop.permute.xlu1 %915  ;;  %v657_v1 = vadd.f32 %v625_v28, %v461_v43  ;;  %v462_v28 = vadd.f32 %v7514_v40, %v7594_v23  ;;  %v13009_v23 = vld [vmem:[#allocation56_spill] sm:$0xff] }
 0x152   :  { %v7746_v39 = vmul.f32 %v7482_v56, %v916_v6  ;;  %959 = vperm.xlu1 %6103, %v7213_v19   ;;  %v7749_v44 = vpop.permute.xlu0 %807  ;;  %2430 = vperm.xlu0 %6221, %v7156_v10   ;;  %v7762_v6 = vmul.f32 %v7488_v57, %v7362_v47  ;;  %v460_v19 = vadd.f32 %v7452_v4, %v7544_v31 }
 0x153   :  { %13004 = vst [vmem:[#allocation93_spill] sm:$0xff] %v7749_v44  ;;  %v820_v10 = vmul.f32 %v7628_v53, %v7507_v54  ;;  %v823_v47 = vmul.f32 %v7628_v53, %v7561_v37  ;;  %v853_v43 = vadd.f32 %v821_v59, %v657_v1  ;;  %v658_v37 = vadd.f32 %v626_v27, %v462_v28  ;;  %v13010_v1 = vld [vmem:[#allocation36_spill] sm:$0xff]  ;;  %v13013_v28 = vld [vmem:[#allocation6_spill] sm:$0xff] }
 0x154   :  { %v5172_v46 = vadd.f32 %v7746_v39, %v7655_v51  ;;  %v656_v4 = vadd.f32 %v624_v8, %v460_v19  ;;  %v464_v8 = vadd.f32 %v7449_v5, %v7734_v7  ;;  %v629_v11 = vmul.f32 %v7613_v42, %v13009_v23  ;;  %v8121_v7 = vld [vmem:[%s12446_s1 + $0x98] sm:$0xff] }
 0x155   :  { %v855_v40 = vadd.f32 %v823_v47, %v659_v61  ;;  %v465_v59 = vadd.f32 %v7568_v15, %v7690_v52  ;;  %v467_v45 = vadd.f32 %v13010_v1, %v7741_v21  ;;  %v13014_v47 = vld [vmem:[#allocation55_spill] sm:$0xff]  ;;  %v854_v23 = vadd.f32 %v822_v60, %v658_v37 }
 0x156   :  { %v7780_v31 = vadd.f32 %v5172_v46, %v306_v58  ;;  %6104 = vset.pattern.permute.xlu1 %v12958_v9  ;;  %v7783_v54 = vpop.permute.xlu1 %727  ;;  %2438 = vperm.xlu0 %6221, %v7168_v12   ;;  %v852_v19 = vadd.f32 %v820_v10, %v656_v4  ;;  %v13007_v46 = vld [vmem:[#allocation63_spill] sm:$0xff]  ;;  %v1047_v10 = vadd.f32 %v13011_v3, %v7658_v30 }
 0x157   :  { %13006 = vst [vmem:[#allocation95_spill] sm:$0xff] %v7783_v54  ;;  %767 = vperm.xlu1 %6104, %v7230_v22   ;;  %v884_v48 = vpop.permute.xlu0 %883  ;;  %v824_v4 = vmul.f32 %v7628_v53, %v7672_v35  ;;  %v825_v52 = vmul.f32 %v7628_v53, %v7636_v41  ;;  %v631_v35 = vmul.f32 %v7613_v42, %v7674_v13 }
 0x158   :  { %13005 = vst [vmem:[#allocation94_spill] sm:$0xff] %v7780_v31  ;;  %v628_v31 = vmul.f32 %v7613_v42, %v13007_v46  ;;  %v7796_v12 = vmul.f32 %v7482_v56, %v884_v48  ;;  %v1048_v61 = vadd.f32 %v13014_v47, %v852_v19  ;;  %v1127_v15 = vpack.c.bf16 %v853_v43, %v852_v19  ;;  %v13016_v19 = vld [vmem:[#allocation70_spill] sm:$0xff] }
 0x159   :  { %v661_v47 = vadd.f32 %v629_v11, %v465_v59  ;;  %v1050_v37 = vadd.f32 %v7586_v25, %v854_v23  ;;  %v630_v60 = vmul.f32 %v7613_v42, %v7668_v36  ;;  %v1051_v41 = vadd.f32 %v13016_v19, %v855_v40 }
 0x15a   :  { %13008 = vst [vmem:[#allocation96_spill] sm:$0xff] %v7796_v12  ;;  %v1046_v48 = vadd.f32 %v7796_v12, %v7660_v34  ;;  %v7810_v27 = vpop.permute.xlu1 %731  ;;  %2446 = vperm.xlu0 %6221, %v13013_v28   ;;  %v660_v3 = vadd.f32 %v628_v31, %v464_v8  ;;  %v1128_v28 = vpack.c.bf16 %v855_v40, %v854_v23  ;;  %v13017_v8 = vld [vmem:[#allocation7_spill] sm:$0xff] }
 0x15b   :  { %13012 = vst [vmem:[#allocation45_spill] sm:$0xff] %v7810_v27  ;;  %6105 = vset.pattern.permute.xlu1 %v12943_v63  ;;  %v896_v30 = vpop.permute.xlu0 %895  ;;  %v826_v11 = vmul.f32 %v7628_v53, %v7699_v38  ;;  %v663_v23 = vadd.f32 %v631_v35, %v467_v45  ;;  %v827_v40 = vmul.f32 %v7628_v53, %v7679_v50  ;;  %v8059_v38 = vld [vmem:[%s12446_s1 + $0x68] sm:$0xff] }
 0x15c   :  { %v1078_v46 = vpack.c.bf16 %v1047_v10, %v1046_v48  ;;  %v7820_v34 = vmul.f32 %v7482_v56, %v896_v30  ;;  %419 = vperm.xlu1 %6105, %v7242_v24   ;;  %v856_v49 = vadd.f32 %v824_v4, %v660_v3  ;;  %v857_v10 = vadd.f32 %v825_v52, %v661_v47  ;;  %v13020_v52 = vld [vmem:[#allocation59_spill] sm:$0xff] }
 0x15d   :  { %v466_v48 = vadd.f32 %v7655_v51, %v306_v58  ;;  %v632_v58 = vmul.f32 %v7613_v42, %v13020_v52  ;;  %v1080_v30 = vpack.c.bf16 %v1051_v41, %v1050_v37  ;;  %v829_v47 = vmul.f32 %v7628_v53, %v7810_v27 }
 0x15e   :  { %13015 = vst [vmem:[#allocation6_spill] sm:$0xff] %v7820_v34  ;;  %6342 = vtanh.bf16 %v1078_v46  ;;  %v1049_v31 = vadd.f32 %v7820_v34, %v853_v43  ;;  %2454 = vperm.xlu0 %6221, %v13017_v8   ;;  %v13019_v43 = vld [vmem:[#allocation8_spill] sm:$0xff]  ;;  %v1129_v3 = vpack.c.bf16 %v857_v10, %v856_v49  ;;  %v859_v19 = vadd.f32 %v827_v40, %v663_v23 }
 0x15f   :  { %6344 = vtanh.bf16 %v1127_v15  ;;  %v7832_v59 = vpop.permute.xlu1 %383  ;;  %v908_v25 = vpop.permute.xlu0 %907  ;;  %v662_v51 = vadd.f32 %v630_v60, %v466_v48  ;;  %v633_v15 = vmul.f32 %v7613_v42, %v7722_v2  ;;  %v1053_v41 = vadd.f32 %v7683_v14, %v857_v10 }
 0x160   :  { %v1079_v4 = vpack.c.bf16 %v1049_v31, %v1048_v61  ;;  %v7837_v46 = vmul.f32 %v7482_v56, %v908_v25  ;;  %423 = vperm.xlu1 %6105, %v13019_v43   ;;  %6346 = vtanh.bf16 %v1128_v28  ;;  %v468_v61 = vadd.f32 %v7709_v16, %v7778_v32 }
 0x161   :  { %v858_v45 = vadd.f32 %v826_v11, %v662_v51  ;;  %v469_v28 = vadd.f32 %v7715_v33, %v7762_v6  ;;  %v828_v31 = vmul.f32 %v7628_v53, %v7783_v54  ;;  %v13055_v52 = vmov 3  }
 0x162   :  { %13018 = vst [vmem:[#allocation55_spill] sm:$0xff] %v7837_v46  ;;  %6348 = vtanh.bf16 %v1079_v4  ;;  %v1052_v35 = vadd.f32 %v7837_v46, %v856_v49  ;;  %2462 = vperm.xlu0 %6221, %v7204_v18   ;;  %v664_v10 = vadd.f32 %v632_v58, %v468_v61  ;;  %v13023_v4 = vld [vmem:[#allocation13_spill] sm:$0xff]  ;;  %v13069_v46 = vld [vmem:[#allocation18_spill] sm:$0xff] }
 0x163   :  { %v920_v60 = vpop.permute.xlu0 %919  ;;  %v665_v49 = vadd.f32 %v633_v15, %v469_v28  ;;  %6350 = vtanh.bf16 %v1080_v30  ;;  %v1130_v14 = vpack.c.bf16 %v859_v19, %v858_v45  ;;  %v1054_v23 = vadd.f32 %v7746_v39, %v858_v45 }
 0x164   :  { %v7854_v37 = vmul.f32 %v7482_v56, %v920_v60  ;;  %6106 = vset.pattern.permute.xlu1 %v12946_v62  ;;  %v7857_v18 = vpop.permute.xlu1 %539  ;;  %v1081_v8 = vpack.c.bf16 %v1053_v41, %v1052_v35  ;;  %6352 = vtanh.bf16 %v1129_v3  ;;  %v7869_v51 = vmul.f32 %v7488_v57, %v13023_v4 }
 0x165   :  { %13022 = vst [vmem:[#allocation7_spill] sm:$0xff] %v7857_v18  ;;  %583 = vperm.xlu1 %6106, %v13019_v43   ;;  %v861_v11 = vadd.f32 %v829_v47, %v665_v49  ;;  %v860_v15 = vadd.f32 %v828_v31, %v664_v10  ;;  %v13025_v47 = vld [vmem:[#allocation12_spill] sm:$0xff]  ;;  %v634_v49 = vmul.f32 %v7613_v42, %v7857_v18 }
 0x166   :  { %13021 = vst [vmem:[#allocation70_spill] sm:$0xff] %v7854_v37  ;;  %v1055_v48 = vadd.f32 %v7854_v37, %v859_v19  ;;  %2470 = vperm.xlu0 %6221, %v7218_v20   ;;  %13024 = vst [vmem:[#allocation8_spill] sm:$0xff] %v7869_v51  ;;  %6354 = vtanh.bf16 %v1081_v8  ;;  %v7880_v60 = vmul.f32 %v7488_v57, %v13025_v47  ;;  %v13026_v19 = vld [vmem:[#allocation39_spill] sm:$0xff] }
 0x167   :  { %v7864_v25 = vpop.permute.xlu0 %931  ;;  %6356 = vtanh.bf16 %v1130_v14  ;;  %v1131_v58 = vpack.c.bf16 %v861_v11, %v860_v15  ;;  %v470_v41 = vadd.f32 %v13026_v19, %v7869_v51  ;;  %v8163_v5 = vmul.f32 %v7488_v57, %v13069_v46  ;;  %v13072_v46 = vld [vmem:[#allocation64_spill] sm:$0xff] }
 0x168   :  { %v1082_v20 = vpack.c.bf16 %v1055_v48, %v1054_v23  ;;  %v471_v14 = vadd.f32 %v7832_v59, %v7880_v60 }
 0x169   :  { %v6343_v40 = vpop.eup %6342  ;;  %6107 = vset.pattern.permute.xlu1 %v12952_v55  ;;  %v924_v30 = vpop.permute.xlu1 %923 }
 0x16a   :  { %v6345_v35 = vpop.eup %6344  ;;  %v1024_v3 = vmul.f32 %v7482_v56, %v924_v30  ;;  %963 = vperm.xlu1 %6107, %v7230_v22   ;;  %1495 = vmatpush1.bf16.msra.mxu0 %v6343_v40  ;;  %6358 = vtanh.bf16 %v1082_v20  ;;  %v830_v30 = vmul.f32 %v7628_v53, %v7686_v0 }
 0x16b   :  { %v7874_v39 = vpop.permute.xlu0 %943  ;;  %1496 = vmatprep.subr.bf16.mxu0 %v6345_v35  ;;  %2478 = vperm.xlu0 %6221, %v7230_v22   ;;  %v6347_v45 = vpop.eup %6346  ;;  %6360 = vtanh.bf16 %v1131_v58  ;;  %v666_v35 = vadd.f32 %v634_v49, %v470_v41 }
 0x16c   :  { %v5174_v61 = vadd.f32 %v1024_v3, %v7709_v16  ;;  %v13028_v16 = vld [vmem:[#allocation61_spill] sm:$0xff]  ;;  %v1056_v23 = vadd.f32 %v1024_v3, %v860_v15  ;;  %v8052_v54 = vmul.f32 %v7482_v56, %v7874_v39 }
 0x16d   :  { %v6349_v28 = vpop.eup %6348  ;;  %v928_v31 = vpop.permute.xlu1 %927  ;;  %v635_v48 = vmul.f32 %v7613_v42, %v13028_v16  ;;  %v862_v15 = vadd.f32 %v830_v30, %v666_v35  ;;  %v13035_v30 = vld [vmem:[#allocation11_spill] sm:$0xff]  ;;  %v6862_v35 = vld [vmem:[%s12446_s1 + $0xb0] sm:$0xff] }
 0x16e   :  { %v7887_v8 = vadd.f32 %v5174_v61, %v7778_v32  ;;  %v1025_v22 = vmul.f32 %v7482_v56, %v928_v31  ;;  %6108 = vset.pattern.permute.xlu1 %v12958_v9  ;;  %1497 = vmatpush1.bf16.msra.mxu0 %v6349_v28  ;;  %v6351_v4 = vpop.eup %6350  ;;  %v13032_v31 = vld [vmem:[#allocation10_spill] sm:$0xff]  ;;  %13051 = vst [vmem:[#allocation107_spill] sm:$0xff] %v8052_v54 }
 0x16f   :  { %775 = vperm.xlu1 %6108, %v7242_v24   ;;  %v7896_v10 = vpop.permute.xlu0 %955  ;;  %1498 = vmatprep.subr.bf16.mxu0 %v6347_v45  ;;  %v6353_v20 = vpop.eup %6352  ;;  %v667_v45 = vadd.f32 %v635_v48, %v471_v14 }
 0x170   :  { %13027 = vst [vmem:[#allocation13_spill] sm:$0xff] %v7887_v8  ;;  %v1057_v32 = vadd.f32 %v1025_v22, %v861_v11  ;;  %v5175_v40 = vadd.f32 %v1025_v22, %v7715_v33  ;;  %2486 = vperm.xlu0 %6221, %v7242_v24   ;;  %v7981_v8 = vld [vmem:[%s12446_s1 + $0x18] sm:$0xff] }
 0x171   :  { %v6355_v33 = vpop.eup %6354 }
 0x172   :  { %v1083_v58 = vpack.c.bf16 %v1057_v32, %v1056_v23  ;;  %v7903_v61 = vadd.f32 %v5175_v40, %v7762_v6  ;;  %v7905_v28 = vpop.permute.xlu1 %739  ;;  %1499 = vmatpush1.bf16.msra.mxu0 %v6351_v4  ;;  %v6357_v6 = vpop.eup %6356 }
 0x173   :  { %13030 = vst [vmem:[#allocation97_spill] sm:$0xff] %v7905_v28  ;;  %v831_v11 = vmul.f32 %v7628_v53, %v7905_v28  ;;  %779 = vperm.xlu1 %6108, %v13019_v43   ;;  %v7910_v24 = vpop.permute.xlu0 %967  ;;  %1500 = vmatprep.subr.bf16.mxu0 %v6353_v20  ;;  %v13031_v43 = vld [vmem:[#allocation9_spill] sm:$0xff] }
 0x174   :  { %13029 = vst [vmem:[#allocation12_spill] sm:$0xff] %v7903_v61  ;;  %6362 = vtanh.bf16 %v1083_v58  ;;  %2494 = vperm.xlu0 %6221, %v7254_v26   ;;  %v8038_v28 = vld [vmem:[%s12446_s1 + $0xd8] sm:$0xff] }
 0x175   :  { %v863_v3 = vadd.f32 %v831_v11, %v667_v45  ;;  %v6359_v22 = vpop.eup %6358  ;;  %v13038_v45 = vld [vmem:[#allocation14_spill] sm:$0xff] }
 0x176   :  { %1501 = vmatpush1.bf16.msra.mxu0 %v6355_v33  ;;  %v6361_v48 = vpop.eup %6360  ;;  %v7945_v11 = vmul.f32 %v7488_v57, %v13038_v45  ;;  %v13040_v33 = vld [vmem:[#allocation15_spill] sm:$0xff] }
 0x177   :  { %v1132_v47 = vpack.c.bf16 %v863_v3, %v862_v15  ;;  %6109 = vset.pattern.permute.xlu1 %v12943_v63  ;;  %v7914_v41 = vpop.permute.xlu1 %387  ;;  %1502 = vmatprep.subr.bf16.mxu0 %v6357_v6  ;;  %v7916_v49 = vpop.permute.xlu0 %979  ;;  %v7949_v6 = vmul.f32 %v7488_v57, %v13040_v33 }
 0x178   :  { %431 = vperm.xlu1 %6109, %v13031_v43   ;;  %2502 = vperm.xlu0 %6221, %v13032_v31   ;;  %13039 = vst [vmem:[#allocation14_spill] sm:$0xff] %v7945_v11 }
 0x179   :  { %6364 = vtanh.bf16 %v1132_v47 }
 0x17a   :  { %1503 = vmatpush1.bf16.msra.mxu0 %v6359_v22  ;;  %v7963_v22 = vld [vmem:[%s12446_s1 + $0xb8] sm:$0xff] }
 0x17b   :  { %1504 = vmatprep.subr.bf16.mxu0 %v6361_v48  ;;  %v7920_v14 = vpop.permute.xlu0 %987  ;;  %v13041_v48 = vld [vmem:[#allocation41_spill] sm:$0xff] }
 0x17c   :  { %6110 = vset.pattern.permute.xlu1 %v12946_v62  ;;  %v7923_v23 = vpop.permute.xlu1 %547  ;;  %2510 = vperm.xlu0 %6221, %v7270_v29   ;;  %v7938_v29 = vmul.f32 %v7482_v56, %v7864_v25  ;;  %v7956_v25 = vld [vmem:[%s12446_s1 + $0x8] sm:$0xff] }
 0x17d   :  { %13033 = vst [vmem:[#allocation9_spill] sm:$0xff] %v7923_v23  ;;  %587 = vperm.xlu1 %6110, %v7254_v26   ;;  %v12522_v26 = vmov 7  }
 0x17e   :  { %13036 = vst [vmem:[#allocation11_spill] sm:$0xff] %v7938_v29 }
 0x17f   :  { %v6363_v32 = vpop.eup %6362  ;;  %v7927_v40 = vpop.permute.xlu0 %1007 }
 0x180   :  { %v7929_v4 = vpop.permute.xlu1 %551  ;;  %1505 = vmatpush1.bf16.msra.mxu0 %v6363_v32  ;;  %2518 = vperm.xlu0 %6221, %v13035_v30   ;;  %v473_v32 = vadd.f32 %v13041_v48, %v7945_v11  ;;  %v636_v30 = vmul.f32 %v7613_v42, %v7923_v23 }
 0x181   :  { %13034 = vst [vmem:[#allocation10_spill] sm:$0xff] %v7929_v4  ;;  %6111 = vset.pattern.permute.xlu1 %v12952_v55  ;;  %v637_v47 = vmul.f32 %v7613_v42, %v7929_v4  ;;  %v13052_v4 = vld [vmem:[#allocation17_spill] sm:$0xff] }
 0x182   :  { %971 = vperm.xlu1 %6111, %v6862_v35   ;;  %v1058_v35 = vadd.f32 %v7938_v29, %v862_v15  ;;  %v8064_v23 = vmul.f32 %v7488_v57, %v13052_v4  ;;  %v8079_v4 = vld [vmem:[%s12446_s1 + $0x78] sm:$0xff] }
 0x183   :  { %v669_v61 = vadd.f32 %v637_v47, %v473_v32  ;;  %v7995_v47 = vld [vmem:[%s12446_s1 + $0xc8] sm:$0xff] }
 0x184   :  { %v6365_v20 = vpop.eup %6364  ;;  %6225 = vset.pattern.permute.xlu0 %v12522_v26  ;;  %v7941_v58 = vpop.permute.xlu0 %2818  ;;  %v472_v26 = vadd.f32 %v7914_v41, %v7949_v6 }
 0x185   :  { %13037 = vst [vmem:[#allocation98_spill] sm:$0xff] %v7941_v58  ;;  %v936_v43 = vpop.permute.xlu1 %935  ;;  %1506 = vmatprep.subr.bf16.mxu0 %v6365_v20  ;;  %2562 = vperm.xlu0 %6225, %v7956_v25  }
 0x186   :  { %v1027_v31 = vmul.f32 %v7482_v56, %v936_v43  ;;  %975 = vperm.xlu1 %6111, %v7963_v22   ;;  %v833_v43 = vmul.f32 %v7628_v53, %v7701_v17 }
 0x188   :  { %v1059_v20 = vadd.f32 %v1027_v31, %v863_v3  ;;  %v5177_v45 = vadd.f32 %v1027_v31, %v7832_v59  ;;  %v7972_v33 = vpop.permute.xlu0 %2826  ;;  %v668_v31 = vadd.f32 %v636_v30, %v472_v26 }
 0x189   :  { %13042 = vst [vmem:[#allocation15_spill] sm:$0xff] %v7972_v33  ;;  %2570 = vperm.xlu0 %6225, %v7981_v8  }
 0x18a   :  { %v1084_v15 = vpack.c.bf16 %v1059_v20, %v1058_v35  ;;  %v7985_v3 = vadd.f32 %v5177_v45, %v7880_v60  ;;  %6112 = vset.pattern.permute.xlu1 %v12958_v9  ;;  %v7988_v59 = vpop.permute.xlu1 %743  ;;  %v865_v60 = vadd.f32 %v833_v43, %v669_v61  ;;  %v8003_v20 = vld [vmem:[%s12446_s1 + $0x28] sm:$0xff]  ;;  %v6868_v45 = vld [vmem:[%s12446_s1 + $0xd0] sm:$0xff] }
 0x18b   :  { %13044 = vst [vmem:[#allocation100_spill] sm:$0xff] %v7988_v59  ;;  %v832_v17 = vmul.f32 %v7628_v53, %v7988_v59  ;;  %787 = vperm.xlu1 %6112, %v7995_v47  }
 0x18c   :  { %13043 = vst [vmem:[#allocation99_spill] sm:$0xff] %v7985_v3  ;;  %6366 = vtanh.bf16 %v1084_v15  ;;  %v7998_v32 = vpop.permute.xlu0 %2834  ;;  %v1061_v16 = vadd.f32 %v8052_v54, %v865_v60  ;;  %v13066_v54 = vld [vmem:[#allocation19_spill] sm:$0xff] }
 0x18d   :  { %13045 = vst [vmem:[#allocation101_spill] sm:$0xff] %v7998_v32  ;;  %v864_v35 = vadd.f32 %v832_v17, %v668_v31  ;;  %2578 = vperm.xlu0 %6225, %v8003_v20   ;;  %v8017_v17 = vld [vmem:[%s12446_s1 + $0x38] sm:$0xff]  ;;  %v8028_v31 = vld [vmem:[%s12446_s1 + $0x48] sm:$0xff]  ;;  %v8151_v48 = vmul.f32 %v7488_v57, %v13066_v54  ;;  %v13070_v54 = vld [vmem:[#allocation44_spill] sm:$0xff] }
 0x18f   :  { %v1133_v26 = vpack.c.bf16 %v865_v60, %v864_v35  ;;  %6113 = vset.pattern.permute.xlu1 %v12943_v63  ;;  %v8007_v30 = vpop.permute.xlu1 %395  ;;  %v13057_v60 = vld [vmem:[#allocation16_spill] sm:$0xff]  ;;  %13067 = vst [vmem:[#allocation19_spill] sm:$0xff] %v8151_v48  ;;  %v476_v34 = vadd.f32 %v13070_v54, %v8151_v48  ;;  %v641_v48 = vmul.f32 %v7613_v42, %v13072_v46 }
 0x190   :  { %435 = vperm.xlu1 %6113, %v6868_v45   ;;  %v8012_v15 = vpop.permute.xlu0 %2842 }
 0x191   :  { %13046 = vst [vmem:[#allocation102_spill] sm:$0xff] %v8012_v15  ;;  %6368 = vtanh.bf16 %v1133_v26  ;;  %2586 = vperm.xlu0 %6225, %v8017_v17  }
 0x193   :  { %v8020_v61 = vpop.permute.xlu1 %399 }
 0x194   :  { %6114 = vset.pattern.permute.xlu1 %v12946_v62  ;;  %v8023_v43 = vpop.permute.xlu0 %2850 }
 0x195   :  { %13047 = vst [vmem:[#allocation103_spill] sm:$0xff] %v8023_v43  ;;  %595 = vperm.xlu1 %6114, %v6868_v45   ;;  %2594 = vperm.xlu0 %6225, %v8028_v31   ;;  %v8044_v45 = vld [vmem:[%s12446_s1 + $0x58] sm:$0xff]  ;;  %v12587_v43 = vmov 1326507024  }
 0x197   :  { %v6367_v26 = vpop.eup %6366 }
 0x198   :  { %v8031_v3 = vpop.permute.xlu1 %559  ;;  %1507 = vmatpush1.bf16.msra.mxu0 %v6367_v26  ;;  %v8033_v59 = vpop.permute.xlu0 %2858 }
 0x199   :  { %13048 = vst [vmem:[#allocation104_spill] sm:$0xff] %v8031_v3  ;;  %13049 = vst [vmem:[#allocation105_spill] sm:$0xff] %v8033_v59  ;;  %599 = vperm.xlu1 %6114, %v8038_v28   ;;  %2602 = vperm.xlu0 %6225, %v8044_v45  }
 0x19c   :  { %v6369_v0 = vpop.eup %6368  ;;  %v8047_v27 = vpop.permute.xlu0 %2866 }
 0x19d   :  { %13050 = vst [vmem:[#allocation106_spill] sm:$0xff] %v8047_v27  ;;  %6115 = vset.pattern.permute.xlu1 %v12952_v55  ;;  %v940_v26 = vpop.permute.xlu1 %939  ;;  %1508 = vmatprep.subr.bf16.mxu0 %v6369_v0 }
 0x19e   :  { %v1028_v50 = vmul.f32 %v7482_v56, %v940_v26  ;;  %983 = vperm.xlu1 %6115, %v7995_v47   ;;  %2610 = vperm.xlu0 %6225, %v8059_v38  }
 0x1a0   :  { %v1060_v0 = vadd.f32 %v1028_v50, %v864_v35  ;;  %v5178_v39 = vadd.f32 %v1028_v50, %v7914_v41  ;;  %v8068_v18 = vpop.permute.xlu0 %2874  ;;  %v8084_v50 = vmul.f32 %v7488_v57, %v13057_v60  ;;  %v13058_v41 = vld [vmem:[#allocation62_spill] sm:$0xff]  ;;  %v639_v35 = vmul.f32 %v7613_v42, %v8031_v3  ;;  %v8109_v3 = vld [vmem:[%s12446_s1 + $0x88] sm:$0xff] }
 0x1a1   :  { %13053 = vst [vmem:[#allocation17_spill] sm:$0xff] %v8068_v18 }
 0x1a2   :  { %v1085_v26 = vpack.c.bf16 %v1061_v16, %v1060_v0  ;;  %v8071_v2 = vadd.f32 %v5178_v39, %v7949_v6  ;;  %6116 = vset.pattern.permute.xlu1 %v13055_v52  ;;  %v8074_v13 = vpop.permute.xlu1 %751  ;;  %2618 = vperm.xlu0 %6225, %v8079_v4   ;;  %v638_v16 = vmul.f32 %v7613_v42, %v13058_v41  ;;  %v8095_v0 = vld [vmem:[%s12446_s1 + $0xe8] sm:$0xff] }
 0x1a3   :  { %13056 = vst [vmem:[#allocation109_spill] sm:$0xff] %v8074_v13  ;;  %v474_v6 = vadd.f32 %v8007_v30, %v8064_v23  ;;  %281 = vperm.xlu1 %6116, %v8095_v0   ;;  %v475_v60 = vadd.f32 %v8020_v61, %v8084_v50 }
 0x1a4   :  { %13054 = vst [vmem:[#allocation108_spill] sm:$0xff] %v8071_v2  ;;  %6370 = vtanh.bf16 %v1085_v26  ;;  %v8098_v39 = vpop.permute.xlu0 %2882  ;;  %v834_v2 = vmul.f32 %v7628_v53, %v8074_v13 }
 0x1a5   :  { %13059 = vst [vmem:[#allocation16_spill] sm:$0xff] %v8098_v39  ;;  %v670_v36 = vadd.f32 %v638_v16, %v474_v6  ;;  %v671_v11 = vadd.f32 %v639_v35, %v475_v60  ;;  %v13062_v35 = vld [vmem:[#allocation42_spill] sm:$0xff] }
 0x1a6   :  { %v8104_v41 = vpop.permute.xlu1 %755  ;;  %2626 = vperm.xlu0 %6225, %v8109_v3   ;;  %v1818_v60 = vrot.slane %v13062_v35, 4 }
 0x1a7   :  { %13060 = vst [vmem:[#allocation110_spill] sm:$0xff] %v8104_v41  ;;  %v835_v26 = vmul.f32 %v7628_v53, %v8104_v41  ;;  %6117 = vset.pattern.permute.xlu1 %v12958_v9  ;;  %v866_v13 = vadd.f32 %v834_v2, %v670_v36  ;;  %v8133_v36 = vld [vmem:[%s12446_s1 + $0xe0] sm:$0xff]  ;;  %v8139_v2 = vld [vmem:[%s12446_s1 + $0xa8] sm:$0xff] }
 0x1a8   :  { %795 = vperm.xlu1 %6117, %v8038_v28   ;;  %v8116_v51 = vpop.permute.xlu0 %2890 }
 0x1a9   :  { %13061 = vst [vmem:[#allocation111_spill] sm:$0xff] %v8116_v51  ;;  %v867_v21 = vadd.f32 %v835_v26, %v671_v11 }
 0x1aa   :  { %2634 = vperm.xlu0 %6225, %v8121_v7  }
 0x1ab   :  { %v1134_v16 = vpack.c.bf16 %v867_v21, %v866_v13  ;;  %v8124_v6 = vpop.permute.xlu1 %407 }
 0x1ac   :  { %6118 = vset.pattern.permute.xlu1 %v12943_v63  ;;  %v8128_v41 = vpop.permute.xlu0 %2898 }
 0x1ad   :  { %13063 = vst [vmem:[#allocation42_spill] sm:$0xff] %v8128_v41  ;;  %6372 = vtanh.bf16 %v1134_v16  ;;  %443 = vperm.xlu1 %6118, %v8133_v36  }
 0x1ae   :  { %2642 = vperm.xlu0 %6225, %v8139_v2   ;;  %6374 = vrcp.f32 %v1818_v60 }
 0x1af   :  { %v6371_v11 = vpop.eup %6370 }
 0x1b0   :  { %v8142_v26 = vpop.permute.xlu1 %563  ;;  %1509 = vmatpush1.bf16.msra.mxu0 %v6371_v11  ;;  %v8144_v16 = vpop.permute.xlu0 %2906 }
 0x1b1   :  { %13064 = vst [vmem:[#allocation112_spill] sm:$0xff] %v8142_v26  ;;  %13065 = vst [vmem:[#allocation113_spill] sm:$0xff] %v8144_v16  ;;  %6119 = vset.pattern.permute.xlu1 %v12946_v62 }
 0x1b2   :  { %603 = vperm.xlu1 %6119, %v8133_v36   ;;  %2650 = vperm.xlu0 %6225, %v7963_v22  }
 0x1b4   :  { %v8156_v60 = vpop.permute.xlu0 %2914 }
 0x1b5   :  { %v948_v29 = vpop.permute.xlu1 %947  ;;  %13068 = vst [vmem:[#allocation114_spill] sm:$0xff] %v8156_v60 }
 0x1b6   :  { %v1030_v19 = vmul.f32 %v7482_v56, %v948_v29  ;;  %607 = vperm.xlu1 %6119, %v8095_v0   ;;  %2658 = vperm.xlu0 %6225, %v7995_v47   ;;  %v640_v29 = vmul.f32 %v7613_v42, %v8142_v26  ;;  %v477_v26 = vadd.f32 %v8124_v6, %v8163_v5 }
 0x1b8   :  { %v6373_v11 = vpop.eup %6372  ;;  %v5180_v1 = vadd.f32 %v1030_v19, %v8007_v30 }
 0x1b9   :  { %v8158_v37 = vpop.eup %6374  ;;  %v952_v12 = vpop.permute.xlu1 %951  ;;  %1510 = vmatprep.subr.bf16.mxu0 %v6373_v11  ;;  %v1062_v11 = vadd.f32 %v1030_v19, %v866_v13  ;;  %v673_v13 = vadd.f32 %v641_v48, %v477_v26  ;;  %v8208_v48 = vld [vmem:[%s12446_s1 + $0xf8] sm:$0xff] }
 0x1ba   :  { %v8171_v60 = vmul.f32 %v8158_v37, %v13062_v35  ;;  %v8174_v16 = vadd.f32 %v5180_v1, %v8064_v23  ;;  %v1031_v30 = vmul.f32 %v7482_v56, %v952_v12  ;;  %6120 = vset.pattern.permute.xlu1 %v12952_v55  ;;  %2666 = vperm.xlu0 %6225, %v8038_v28   ;;  %v8185_v1 = vpop.permute.xlu0 %2922  ;;  %v13074_v23 = vld [vmem:[#allocation85_spill] sm:$0xff] }
 0x1bb   :  { %991 = vperm.xlu1 %6120, %v8038_v28   ;;  %13073 = vst [vmem:[#allocation115_spill] sm:$0xff] %v8185_v1  ;;  %v836_v12 = vmul.f32 %v7628_v53, %v13074_v23  ;;  %v13086_v23 = vld [vmem:[#allocation86_spill] sm:$0xff] }
 0x1bc   :  { %13071 = vst [vmem:[#allocation18_spill] sm:$0xff] %v8174_v16  ;;  %v1063_v35 = vadd.f32 %v1031_v30, %v867_v21  ;;  %v5181_v54 = vadd.f32 %v1031_v30, %v8020_v61  ;;  %v672_v16 = vadd.f32 %v640_v29, %v476_v34  ;;  %v2033_v41 = vand.u32 2139095040, %v8171_v60  ;;  %v8202_v34 = vld [vmem:[%s12446_s1 + $0xf0] sm:$0xff] }
 0x1bd   :  { %vm2032_vm12 = vcmp.lt.s32.totalorder %v8171_v60, 0 }
 0x1be   :  { %v1086_v51 = vpack.c.bf16 %v1063_v35, %v1062_v11  ;;  %v8191_v46 = vadd.f32 %v5181_v54, %v8084_v50  ;;  %v8193_v39 = vpop.permute.xlu1 %763  ;;  %2674 = vperm.xlu0 %6225, %v8095_v0   ;;  %v868_v19 = vadd.f32 %v836_v12, %v672_v16  ;;  %v2034_v50 = vshrl.u32 %v2033_v41, 23  ;;  %v8211_v26 = vpop.permute.xlu0 %2930 }
 0x1bf   :  { %13076 = vst [vmem:[#allocation117_spill] sm:$0xff] %v8193_v39  ;;  %v837_v21 = vmul.f32 %v7628_v53, %v8193_v39  ;;  %6121 = vset.pattern.permute.xlu1 %v13055_v52  ;;  %13077 = vst [vmem:[#allocation118_spill] sm:$0xff] %v8211_v26  ;;  %v12559_v54 = vmov 5  }
 0x1c0   :  { %13075 = vst [vmem:[#allocation116_spill] sm:$0xff] %v8191_v46  ;;  %6376 = vtanh.bf16 %v1086_v51  ;;  %286 = vperm.xlu1 %6121, %v8202_v34   ;;  %v5718_v16 = vadd.s32 4294967169, %v2034_v50  ;;  %v8237_v50 = vmul.f32 %v7482_v56, %v7896_v10  ;;  %v13085_v46 = vld [vmem:[#allocation46_spill] sm:$0xff]  ;;  %v839_v10 = vmul.f32 %v7628_v53, %v13086_v23 }
 0x1c1   :  { %v869_v61 = vadd.f32 %v837_v21, %v673_v13  ;;  %v13081_v13 = vld [vmem:[#allocation20_spill] sm:$0xff] }
 0x1c2   :  { %2682 = vperm.xlu0 %6225, %v8208_v48   ;;  %v8221_v29 = vpop.permute.xlu0 %2398  ;;  %v2040_v30 = vadd.s32 1, %v5718_v16  ;;  %v8233_v21 = vmul.f32 %v7488_v57, %v13081_v13  ;;  %13083 = vst [vmem:[#allocation122_spill] sm:$0xff] %v8237_v50 }
 0x1c3   :  { %v1135_v52 = vpack.c.bf16 %v869_v61, %v868_v19  ;;  %v8213_v51 = vpop.permute.xlu1 %411 }
 0x1c4   :  { %6123 = vset.pattern.permute.xlu1 %v12958_v9  ;;  %vm2041_vm0 = vcmp.gt.s32.totalorder %v2040_v30, 0  ;;  %13082 = vst [vmem:[#allocation20_spill] sm:$0xff] %v8233_v21  ;;  %v479_v39 = vadd.f32 %v13085_v46, %v8233_v21  ;;  %v1064_v21 = vadd.f32 %v8237_v50, %v868_v19  ;;  %v12569_v46 = vand.u32 2147483647, %v8171_v60 }
 0x1c5   :  { %6378 = vtanh.bf16 %v1135_v52  ;;  %799 = vperm.xlu1 %6123, %v8133_v36  }
 0x1c6   :  { %6228 = vset.pattern.permute.xlu0 %v12559_v54  ;;  %v8229_v12 = vpop.permute.xlu0 %2406 }
 0x1c7   :  { %3082 = vperm.xlu0 %6228, %v7956_v25   ;;  %13080 = vst [vmem:[#allocation121_spill] sm:$0xff] %v8229_v12 }
 0x1c8   :  { %v8219_v41 = vpop.permute.xlu1 %571 }
 0x1c9   :  { %13078 = vst [vmem:[#allocation119_spill] sm:$0xff] %v8219_v41  ;;  %803 = vperm.xlu1 %6123, %v8095_v0  }
 0x1cb   :  { %v6377_v11 = vpop.eup %6376  ;;  %3090 = vperm.xlu0 %6228, %v7981_v8  }
 0x1cc   :  { %v8225_v35 = vpop.permute.xlu1 %575  ;;  %1511 = vmatpush1.bf16.msra.mxu0 %v6377_v11  ;;  %v13084_v11 = vld [vmem:[#allocation21_spill] sm:$0xff] }
 0x1cd   :  { %13079 = vst [vmem:[#allocation120_spill] sm:$0xff] %v8225_v35  ;;  %6125 = vset.pattern.permute.xlu1 %v12943_v63  ;;  %v643_v52 = vmul.f32 %v7613_v42, %v8225_v35  ;;  %v2042_v63 = vsel %vm2041_vm0, %v2040_v30, 0  ;;  %v8244_v54 = vmul.f32 %v7488_v57, %v13084_v11  ;;  %v6882_v30 = vld [vmem:[%s12445_s0] sm:$0xff]  ;;  %v642_v11 = vmul.f32 %v7613_v42, %v8219_v41 }
 0x1ce   :  { %455 = vperm.xlu1 %6125, %v8208_v48   ;;  %v1815_v35 = vrot.slane %v6882_v30, 3 }
 0x1cf   :  { %3098 = vperm.xlu0 %6228, %v8003_v20   ;;  %v675_v1 = vadd.f32 %v643_v52, %v479_v39  ;;  %v478_v18 = vadd.f32 %v8213_v51, %v8244_v54 }
 0x1d0   :  { %v6379_v16 = vpop.eup %6378 }
 0x1d1   :  { %v960_v13 = vpop.permute.xlu1 %959  ;;  %1512 = vmatprep.subr.bf16.mxu0 %v6379_v16  ;;  %v2044_v16 = vand.u32 31, %v2042_v63  ;;  %v674_v52 = vadd.f32 %v642_v11, %v478_v18  ;;  %v8271_v41 = vadd.f32 %v839_v10, %v675_v1  ;;  %v12579_v18 = vmov 2475754826  }
 0x1d2   :  { %v1033_v26 = vmul.f32 %v7482_v56, %v960_v13  ;;  %6126 = vset.pattern.permute.xlu1 %v12946_v62  ;;  %v8261_v62 = vpop.permute.xlu0 %2414  ;;  %v12577_v10 = vmov 2131351028  }
 0x1d3   :  { %611 = vperm.xlu1 %6126, %v8202_v34   ;;  %3106 = vperm.xlu0 %6228, %v8017_v17   ;;  %13087 = vst [vmem:[#allocation21_spill] sm:$0xff] %v8261_v62  ;;  %v2050_v1 = vshll.u32 %v12579_v18, %v2044_v16  ;;  %v2053_v11 = vshll.u32 %v12577_v10, %v2044_v16 }
 0x1d4   :  { %v1065_v23 = vadd.f32 %v1033_v26, %v869_v61  ;;  %v5183_v13 = vadd.f32 %v1033_v26, %v8124_v6  ;;  %v2045_v6 = vsub.s32 32, %v2044_v16  ;;  %v1817_v62 = vadd.f32 %v6882_v30, %v1815_v35 }
 0x1d6   :  { %v1087_v27 = vpack.c.bf16 %v1065_v23, %v1064_v21  ;;  %v8267_v39 = vadd.f32 %v5183_v13, %v8163_v5  ;;  %v8269_v19 = vpop.permute.xlu1 %767  ;;  %v2037_v5 = vand.u32 8388607, %v12569_v46  ;;  %v12570_v23 = vmov 683565275  }
 0x1d7   :  { %13089 = vst [vmem:[#allocation124_spill] sm:$0xff] %v8269_v19  ;;  %v838_v17 = vmul.f32 %v7628_v53, %v8269_v19  ;;  %6128 = vset.pattern.permute.xlu1 %v12952_v55  ;;  %3114 = vperm.xlu0 %6228, %v8028_v31   ;;  %v2047_v61 = vshll.u32 %v12570_v23, %v2044_v16  ;;  %v2043_v21 = vshrl.u32 %v2042_v63, 5  ;;  %v12581_v13 = vmov 2102212464   ;;  %v8286_v31 = vpop.permute.xlu0 %2422 }
 0x1d8   :  { %13088 = vst [vmem:[#allocation123_spill] sm:$0xff] %v8267_v39  ;;  %6380 = vtanh.bf16 %v1087_v27  ;;  %995 = vperm.xlu1 %6128, %v8133_v36   ;;  %v2056_v27 = vshll.u32 %v12581_v13, %v2044_v16  ;;  %13090 = vst [vmem:[#allocation125_spill] sm:$0xff] %v8286_v31  ;;  %v2048_v36 = vshrl.u32 %v12579_v18, %v2045_v6  ;;  %v12588_v19 = vmov 920167782  }
 0x1d9   :  { %v8282_v26 = vadd.f32 %v838_v17, %v674_v52  ;;  %v2051_v46 = vshrl.u32 %v12577_v10, %v2045_v6  ;;  %v2054_v23 = vshrl.u32 %v12581_v13, %v2045_v6  ;;  %v2057_v39 = vshrl.u32 %v12588_v19, %v2045_v6 }
 0x1da   :  { %v13091_v17 = vmov 683565275   ;;  %v2059_v59 = vshll.u32 %v12588_v19, %v2044_v16  ;;  %v2060_v15 = vshrl.u32 %v12587_v43, %v2045_v6  ;;  %v2049_v10 = vor.u32 %v2048_v36, %v2047_v61 }
 0x1db   :  { %v1136_v63 = vpack.c.bf16 %v8271_v41, %v8282_v26  ;;  %v8294_v52 = vpop.permute.xlu1 %419  ;;  %v2046_v50 = vshrl.u32 %v13091_v17, %v2045_v6  ;;  %3122 = vperm.xlu0 %6228, %v8044_v45   ;;  %v2052_v18 = vor.u32 %v2051_v46, %v2050_v1  ;;  %v2055_v13 = vor.u32 %v2054_v23, %v2053_v11  ;;  %v8305_v45 = vpop.permute.xlu0 %2430 }
 0x1dc   :  { %999 = vperm.xlu1 %6128, %v8095_v0   ;;  %v2058_v31 = vor.u32 %v2057_v39, %v2056_v27  ;;  %v2061_v32 = vor.u32 %v2060_v15, %v2059_v59  ;;  %v2038_v33 = vor.u32 8388608, %v2037_v5  ;;  %vm2062_vm1 = vcmp.lt.s32.totalorder %v2043_v21, 1 }
 0x1dd   :  { %6382 = vtanh.bf16 %v1136_v63  ;;  %vm2063_vm2 = vcmp.lt.s32.totalorder %v2043_v21, 2  ;;  %vm2064_vm3 = vcmp.lt.s32.totalorder %v2043_v21, 3  ;;  %vm2065_vm4 = vcmp.lt.s32.totalorder %v2043_v21, 4 }
 0x1de   :  { %v2066_v16 = vsel %vm2062_vm1, %v2046_v50, %v2049_v10  ;;  %v2070_v6 = vsel %vm2062_vm1, %v2049_v10, %v2052_v18  ;;  %v2067_v46 = vsel %vm2065_vm4, %v2055_v13, 2102212464  ;;  %v2071_v23 = vsel %vm2065_vm4, %v2058_v31, 920167782 }
 0x1df   :  { %v8301_v12 = vpop.permute.xlu1 %423  ;;  %3130 = vperm.xlu0 %6228, %v8059_v38   ;;  %v2068_v59 = vsel %vm2064_vm3, %v2052_v18, %v2067_v46  ;;  %v2072_v15 = vsel %vm2064_vm3, %v2055_v13, %v2071_v23  ;;  %v2074_v35 = vsel %vm2062_vm1, %v2052_v18, %v2055_v13  ;;  %v2075_v30 = vsel %vm2065_vm4, %v2061_v32, 1326507024 }
 0x1e0   :  { %6130 = vset.pattern.permute.xlu1 %v12958_v9  ;;  %v8311_v39 = vmul.f32 %v8158_v37, %v1817_v62  ;;  %v2069_v50 = vsel %vm2063_vm2, %v2066_v16, %v2068_v59  ;;  %v2073_v38 = vsel %vm2063_vm2, %v2070_v6, %v2072_v15  ;;  %v2076_v9 = vsel %vm2064_vm3, %v2058_v31, %v2075_v30  ;;  %v8325_v62 = vpop.permute.xlu0 %2438  ;;  %v13095_v16 = vld [vmem:[#allocation23_spill] sm:$0xff]  ;;  %v13097_v15 = vld [vmem:[#allocation22_spill] sm:$0xff] }
 0x1e1   :  { %811 = vperm.xlu1 %6130, %v8208_v48   ;;  %v2077_v61 = vsel %vm2063_vm2, %v2074_v35, %v2076_v9  ;;  %v2078_v1 = vshll.u32 %v2038_v33, 8  ;;  %13093 = vst [vmem:[#allocation127_spill] sm:$0xff] %v8325_v62  ;;  %v12585_v27 = vmov 9   ;;  %v8359_v35 = vmul.f32 %v7488_v57, %v13097_v15  ;;  %v13100_v9 = vld [vmem:[#allocation65_spill] sm:$0xff] }
 0x1e2   :  { %v1826_v18 = vand.u32 2139095040, %v8311_v39  ;;  %v13104_v15 = vmov 7   ;;  %vm2122_vm3 = vweird.f32 %v8171_v60 }
 0x1e3   :  { %v6381_v5 = vpop.eup %6380  ;;  %3138 = vperm.xlu0 %6228, %v8079_v4   ;;  %v8321_v32 = vmul.u32.u64.low %v2078_v1, %v2077_v61  ;;  %v8322_v37 = vmul.u32.u64.high %v2078_v1, %v2077_v61, %v8321_v32  ;;  %v8328_v11 = vmul.u32.u64.low %v2078_v1, %v2073_v38  ;;  %v8329_v21 = vmul.u32.u64.high %v2078_v1, %v2073_v38, %v8328_v11 }
 0x1e4   :  { %v8318_v10 = vpop.permute.xlu1 %583  ;;  %1513 = vmatpush1.bf16.msra.mxu0 %v6381_v5  ;;  %v8334_v4 = vmul.f32 %v7482_v56, %v7910_v24  ;;  %v1827_v31 = vshrl.u32 %v1826_v18, 23  ;;  %v2085_v36 = vmul.u32 %v2078_v1, %v2069_v50  ;;  %v8347_v24 = vld [vmem:[%s12446_s1] sm:$0xff]  ;;  %v8355_v59 = vpop.permute.xlu0 %2446  ;;  %v644_v5 = vmul.f32 %v7613_v42, %v13100_v9 }
 0x1e5   :  { %13092 = vst [vmem:[#allocation126_spill] sm:$0xff] %v8318_v10  ;;  %6131 = vset.pattern.permute.xlu1 %v12952_v55  ;;  %vm2087_vm5 = vc.u32 %v8322_v37, %v8328_v11  ;;  %v2088_v63 = vadd.s32 1, %v8329_v21  ;;  %13096 = vst [vmem:[#allocation23_spill] sm:$0xff] %v8355_v59  ;;  %v8362_v30 = vadd.s32 %v8328_v11, %v8322_v37 }
 0x1e6   :  { %1003 = vperm.xlu1 %6131, %v8202_v34   ;;  %13094 = vst [vmem:[#allocation128_spill] sm:$0xff] %v8334_v4  ;;  %v1067_v46 = vadd.f32 %v8334_v4, %v8271_v41  ;;  %v645_v1 = vmul.f32 %v7613_v42, %v8318_v10  ;;  %v13118_v4 = vmov 920167782  }
 0x1e7   :  { %3146 = vperm.xlu0 %6228, %v8109_v3   ;;  %v8342_v3 = vmul.f32 %v7488_v57, %v13095_v16 }
 0x1e8   :  { %v6383_v33 = vpop.eup %6382  ;;  %v8386_v11 = vpop.permute.xlu0 %2454 }
 0x1e9   :  { %v964_v55 = vpop.permute.xlu1 %963  ;;  %1514 = vmatprep.subr.bf16.mxu0 %v6383_v33  ;;  %v480_v61 = vadd.f32 %v8294_v52, %v8342_v3  ;;  %13102 = vst [vmem:[#allocation131_spill] sm:$0xff] %v8386_v11 }
 0x1ea   :  { %v1034_v13 = vmul.f32 %v7482_v56, %v964_v55  ;;  %6132 = vset.pattern.permute.xlu1 %v12585_v27 }
 0x1eb   :  { %2238 = vperm.xlu1 %6132, %v8347_v24   ;;  %3154 = vperm.xlu0 %6228, %v8121_v7   ;;  %v2089_v7 = vsel %vm2087_vm5, %v2088_v63, %v8329_v21  ;;  %v676_v33 = vadd.f32 %v644_v5, %v480_v61  ;;  %v13106_v5 = vld [vmem:[#allocation25_spill] sm:$0xff] }
 0x1ec   :  { %v1066_v6 = vadd.f32 %v1034_v13, %v8282_v26  ;;  %v5184_v23 = vadd.f32 %v1034_v13, %v8213_v51  ;;  %v5710_v51 = vadd.s32 4294967169, %v1827_v31  ;;  %v2090_v38 = vadd.s32 %v2089_v7, %v2085_v36 }
 0x1ed   :  { %v13103_v31 = vmov 10   ;;  %v8414_v61 = vmul.f32 %v7488_v57, %v13106_v5  ;;  %v13113_v5 = vld [vmem:[#allocation87_spill] sm:$0xff] }
 0x1ee   :  { %v1088_v50 = vpack.c.bf16 %v1067_v46, %v1066_v6  ;;  %v8368_v26 = vadd.f32 %v5184_v23, %v8244_v54  ;;  %v8370_v41 = vpop.permute.xlu1 %775  ;;  %v481_v54 = vadd.f32 %v8301_v12, %v8359_v35  ;;  %v2091_v37 = vadd.s32 536870912, %v2090_v38 }
 0x1ef   :  { %13099 = vst [vmem:[#allocation129_spill] sm:$0xff] %v8370_v41  ;;  %2242 = vperm.xlu1 %6132, %v7956_v25   ;;  %3162 = vperm.xlu0 %6228, %v8139_v2   ;;  %v840_v32 = vmul.f32 %v7628_v53, %v8370_v41  ;;  %v1833_v21 = vadd.s32 1, %v5710_v51  ;;  %13107 = vst [vmem:[#allocation25_spill] sm:$0xff] %v8414_v61  ;;  %v13116_v41 = vmov 2131351028  }
 0x1f0   :  { %13098 = vst [vmem:[#allocation22_spill] sm:$0xff] %v8368_v26  ;;  %6384 = vtanh.bf16 %v1088_v50  ;;  %v677_v55 = vadd.f32 %v645_v1, %v481_v54  ;;  %v8391_v2 = vshrl.u32 %v2091_v37, 30  ;;  %v8425_v37 = vld [vmem:[%s12446_s1 + $0x10] sm:$0xff] }
 0x1f1   :  { %v8395_v36 = vadd.f32 %v840_v32, %v676_v33  ;;  %vm1834_vm6 = vcmp.gt.s32.totalorder %v1833_v21, 0  ;;  %v13110_v33 = vld [vmem:[#allocation24_spill] sm:$0xff] }
 0x1f2   :  { %v8384_v18 = vpop.permute.xlu1 %779  ;;  %v2093_v16 = vshll.u32 %v8391_v2, 30  ;;  %v1835_v7 = vsel %vm1834_vm6, %v1833_v21, 0 }
 0x1f3   :  { %13101 = vst [vmem:[#allocation130_spill] sm:$0xff] %v8384_v18  ;;  %v841_v13 = vmul.f32 %v7628_v53, %v8384_v18  ;;  %6133 = vset.pattern.permute.xlu1 %v13103_v31  ;;  %3170 = vperm.xlu0 %6228, %v7963_v22   ;;  %v8408_v22 = vpop.permute.xlu0 %2462  ;;  %v1837_v54 = vand.u32 31, %v1835_v7  ;;  %v8453_v19 = vshrl.u32 %v1835_v7, 5 }
 0x1f4   :  { %2402 = vperm.xlu1 %6133, %v7956_v25   ;;  %v8404_v23 = vsub.s32 %v2090_v38, %v2093_v16  ;;  %13105 = vst [vmem:[#allocation132_spill] sm:$0xff] %v8408_v22  ;;  %v12590_v38 = vand.u32 2147483647, %v8311_v39  ;;  %v13119_v22 = vmov 1326507024  }
 0x1f5   :  { %v8397_v63 = vadd.f32 %v841_v13, %v677_v55  ;;  %v8432_v55 = vmul.f32 %v7488_v57, %v13110_v33  ;;  %v8449_v33 = vmul.f32 %v7482_v56, %v7920_v14  ;;  %v1846_v10 = vshll.u32 %v13116_v41, %v1837_v54 }
 0x1f6   :  { %v2096_v50 = vsub.s32 0, %v8404_v23  ;;  %v8438_v16 = vand.u32 8388607, %v12590_v38  ;;  %v13114_v38 = vmov 2102212464   ;;  %vm1858_vm8 = vcmp.lt.s32.totalorder %v8453_v19, 4 }
 0x1f7   :  { %v1137_v6 = vpack.c.bf16 %v8397_v63, %v8395_v36  ;;  %v8402_v46 = vpop.permute.xlu1 %431  ;;  %3178 = vperm.xlu0 %6228, %v7995_v47   ;;  %v8428_v21 = vpop.permute.xlu0 %2470  ;;  %vm1855_vm9 = vcmp.lt.s32.totalorder %v8453_v19, 1  ;;  %vm1857_vm10 = vcmp.lt.s32.totalorder %v8453_v19, 3  ;;  %vm1856_vm11 = vcmp.lt.s32.totalorder %v8453_v19, 2 }
 0x1f8   :  { %6134 = vset.pattern.permute.xlu1 %v13104_v15  ;;  %v5719_v1 = vmin.u32 %v2096_v50, %v8404_v23  ;;  %13109 = vst [vmem:[#allocation134_spill] sm:$0xff] %v8428_v21  ;;  %v13112_v50 = vld [vmem:[#allocation68_spill] sm:$0xff]  ;;  %v1852_v21 = vshll.u32 %v13118_v4, %v1837_v54 }
 0x1f9   :  { %6386 = vtanh.bf16 %v1137_v6  ;;  %2558 = vperm.xlu1 %6134, %v8347_v24  }
 0x1fa   :  { %v2098_v32 = vclz %v5719_v1  ;;  %v8445_v1 = vmul.f32 %v7628_v53, %v13113_v5  ;;  %v13115_v5 = vmov 2475754826  }
 0x1fb   :  { %v6385_v51 = vpop.eup %6384  ;;  %3186 = vperm.xlu0 %6228, %v8038_v28   ;;  %v13111_v28 = vld [vmem:[#allocation49_spill] sm:$0xff]  ;;  %v1843_v26 = vshll.u32 %v13115_v5, %v1837_v54 }
 0x1fc   :  { %v8419_v47 = vpop.permute.xlu1 %587  ;;  %1515 = vmatpush1.bf16.msra.mxu0 %v6385_v51  ;;  %v482_v13 = vadd.f32 %v13111_v28, %v8414_v61  ;;  %v5720_v6 = vadd.s32 4294967294, %v2098_v32  ;;  %v647_v51 = vmul.f32 %v7613_v42, %v13112_v50  ;;  %v1849_v32 = vshll.u32 %v13114_v38, %v1837_v54 }
 0x1fd   :  { %13108 = vst [vmem:[#allocation133_spill] sm:$0xff] %v8419_v47  ;;  %6135 = vset.pattern.permute.xlu1 %v12585_v27  ;;  %v8451_v27 = vsub.s32 32, %v1837_v54  ;;  %v1840_v50 = vshll.u32 %v13091_v17, %v1837_v54  ;;  %v646_v14 = vmul.f32 %v7613_v42, %v8419_v47 }
 0x1fe   :  { %2246 = vperm.xlu1 %6135, %v8425_v37   ;;  %vm5721_vm7 = vcmp.lt.s32.totalorder %v5720_v6, 0 }
 0x1ff   :  { %3194 = vperm.xlu0 %6228, %v8095_v0   ;;  %v2101_v18 = vsel %vm5721_vm7, 0, %v5720_v6  ;;  %v1853_v11 = vshrl.u32 %v13119_v22, %v8451_v27  ;;  %v1847_v22 = vshrl.u32 %v13114_v38, %v8451_v27  ;;  %vm1825_vm7 = vcmp.lt.s32.totalorder %v8311_v39, 0 }
 0x200   :  { %v2102_v9 = vsub.s32 32, %v2101_v18  ;;  %v2103_v7 = vshll.u32 %v8404_v23, %v2101_v18  ;;  %v2106_v6 = vsub.s32 4294967266, %v2101_v18  ;;  %v1850_v23 = vshrl.u32 %v13118_v4, %v8451_v27 }
 0x201   :  { %v972_v43 = vpop.permute.xlu1 %971  ;;  %v1844_v18 = vshrl.u32 %v13116_v41, %v8451_v27  ;;  %v483_v4 = vadd.f32 %v8402_v46, %v8432_v55  ;;  %v1854_v38 = vor.u32 %v1853_v11, %v1852_v21 }
 0x202   :  { %v1036_v0 = vmul.f32 %v7482_v56, %v972_v43  ;;  %2250 = vperm.xlu1 %6135, %v7981_v8   ;;  %v8465_v43 = vpop.permute.xlu0 %2478  ;;  %v1851_v47 = vor.u32 %v1850_v23, %v1849_v32 }
 0x203   :  { %3198 = vperm.xlu0 %6228, %v8202_v34   ;;  %13117 = vst [vmem:[#allocation24_spill] sm:$0xff] %v8465_v43  ;;  %v2104_v34 = vshrl.u32 %v8362_v30, %v2102_v9  ;;  %v13121_v43 = vmov 8   ;;  %v1841_v30 = vshrl.u32 %v13115_v5, %v8451_v27  ;;  %v2107_v9 = vadd.s32 127, %v2106_v6 }
 0x204   :  { %v6387_v61 = vpop.eup %6386  ;;  %v5186_v28 = vadd.f32 %v1036_v0, %v8294_v52 }
 0x205   :  { %v976_v59 = vpop.permute.xlu1 %975  ;;  %1516 = vmatprep.subr.bf16.mxu0 %v6387_v61  ;;  %v12597_v61 = vmov 6   ;;  %v2108_v62 = vshll.u32 %v2107_v9, 23 }
 0x206   :  { %v8477_v52 = vadd.f32 %v5186_v28, %v8342_v3  ;;  %v1037_v54 = vmul.f32 %v7482_v56, %v976_v59  ;;  %6137 = vset.pattern.permute.xlu1 %v13121_v43  ;;  %v2105_v3 = vor.u32 %v2104_v34, %v2103_v7  ;;  %v1068_v59 = vadd.f32 %v1036_v0, %v8395_v36  ;;  %v8501_v34 = vpop.permute.xlu0 %2486 }
 0x207   :  { %2822 = vperm.xlu1 %6137, %v7956_v25   ;;  %6232 = vset.pattern.permute.xlu0 %v12597_v61  ;;  %v1845_v36 = vor.u32 %v1844_v18, %v1843_v26  ;;  %v679_v0 = vadd.f32 %v647_v51, %v483_v4  ;;  %v2109_v11 = vor.u32 4788187, %v2108_v62  ;;  %v1864_v51 = vsel %vm1858_vm8, %v1851_v47, 920167782 }
 0x208   :  { %13120 = vst [vmem:[#allocation135_spill] sm:$0xff] %v8477_v52  ;;  %v1069_v41 = vadd.f32 %v1037_v54, %v8397_v63  ;;  %v5187_v28 = vadd.f32 %v1037_v54, %v8301_v12  ;;  %3366 = vperm.xlu0 %6232, %v8208_v48   ;;  %v678_v52 = vadd.f32 %v646_v14, %v482_v13  ;;  %v13124_v48 = vmov 5   ;;  %v13125_v14 = vld [vmem:[#allocation27_spill] sm:$0xff] }
 0x209   :  { %v1848_v63 = vor.u32 %v1847_v22, %v1846_v10  ;;  %v2112_v21 = vcvt.s32.f32 %v2105_v3  ;;  %v1842_v13 = vor.u32 %v1841_v30, %v1840_v50  ;;  %v2110_v32 = vand.u32 2147483647, %v2109_v11 }
 0x20a   :  { %v1089_v5 = vpack.c.bf16 %v1069_v41, %v1068_v59  ;;  %v8497_v7 = vadd.f32 %v5187_v28, %v8359_v35  ;;  %v8499_v6 = vpop.permute.xlu1 %787  ;;  %v1868_v35 = vsel %vm1858_vm8, %v1854_v38, 1326507024  ;;  %v874_v26 = vadd.f32 %v8445_v1, %v678_v52  ;;  %v8531_v4 = vpop.permute.xlu0 %2494 }
 0x20b   :  { %13123 = vst [vmem:[#allocation137_spill] sm:$0xff] %v8499_v6  ;;  %v843_v12 = vmul.f32 %v7628_v53, %v8499_v6  ;;  %6138 = vset.pattern.permute.xlu1 %v13124_v48  ;;  %v8517_v62 = vmul.f32 %v7488_v57, %v13125_v14  ;;  %v1867_v50 = vsel %vm1855_vm9, %v1845_v36, %v1848_v63  ;;  %v2116_v18 = vsub.s32 4, %v8391_v2 }
 0x20c   :  { %13122 = vst [vmem:[#allocation136_spill] sm:$0xff] %v8497_v7  ;;  %6388 = vtanh.bf16 %v1089_v5  ;;  %3078 = vperm.xlu1 %6138, %v8347_v24   ;;  %v1869_v1 = vsel %vm1857_vm10, %v1851_v47, %v1868_v35  ;;  %v2113_v52 = vmul.f32 %v2112_v21, %v2110_v32  ;;  %v1863_v30 = vsel %vm1855_vm9, %v1842_v13, %v1845_v36  ;;  %v8744_v7 = vld [vmem:[%s12446_s1 + $0x30] sm:$0xff] }
 0x20d   :  { %v8511_v10 = vadd.f32 %v843_v12, %v679_v0  ;;  %v1865_v3 = vsel %vm1857_vm10, %v1848_v63, %v1864_v51  ;;  %v13126_v47 = vor.u32 8388608, %v8438_v16  ;;  %v13127_v59 = vand.u32 2147483647, %v8171_v60 }
 0x20e   :  { %v2114_v28 = vxor.u32 2147483648, %v2113_v52  ;;  %v1870_v5 = vsel %vm1856_vm11, %v1867_v50, %v1869_v1  ;;  %v1866_v16 = vsel %vm1856_vm11, %v1863_v30, %v1865_v3  ;;  %v2117_v12 = vsel %vm2032_vm12, %v2116_v18, %v8391_v2  ;;  %v13135_v3 = vld [vmem:[#allocation26_spill] sm:$0xff] }
 0x20f   :  { %v1138_v23 = vpack.c.bf16 %v8511_v10, %v874_v26  ;;  %v8523_v54 = vpop.permute.xlu1 %435  ;;  %v8541_v9 = vshll.u32 %v13126_v47, 8  ;;  %vm8545_vm13 = vcmp.le.f32.partialorder %v13127_v59, 0.7853982  ;;  %v1860_v21 = vsel %vm1858_vm8, %v1848_v63, 2102212464 }
 0x210   :  { %v5190_v22 = vadd.f32 %v8449_v33, %v8523_v54  ;;  %6139 = vset.pattern.permute.xlu1 %v12597_v61  ;;  %v2115_v0 = vsel %vm2032_vm12, %v2114_v28, %v2113_v52  ;;  %v2119_v63 = vsel %vm8545_vm13, 0, %v2117_v12  ;;  %v1861_v50 = vsel %vm1857_vm10, %v1845_v36, %v1860_v21 }
 0x211   :  { %6390 = vtanh.bf16 %v1138_v23  ;;  %3242 = vperm.xlu1 %6139, %v8347_v24   ;;  %v1839_v24 = vshrl.u32 %v13091_v17, %v8451_v27  ;;  %v2118_v35 = vsel %vm8545_vm13, %v8171_v60, %v2115_v0  ;;  %v8571_v27 = vpop.permute.xlu0 %2502  ;;  %v2226_v23 = vadd.s32 3, %v2119_v63 }
 0x212   :  { %v8550_v38 = vadd.f32 %v5190_v22, %v8517_v62  ;;  %v8568_v51 = vmul.u32.u64.low %v8541_v9, %v1870_v5  ;;  %v8569_v17 = vmul.u32.u64.high %v8541_v9, %v1870_v5, %v8568_v51  ;;  %6392 = vcosq.f32 %v2118_v35  ;;  %v13137_v5 = vld [vmem:[#allocation37_spill] sm:$0xff] }
 0x213   :  { %v8574_v2 = vmul.u32.u64.low %v8541_v9, %v1866_v16  ;;  %v8575_v32 = vmul.u32.u64.high %v8541_v9, %v1866_v16, %v8574_v2  ;;  %6394 = vsinq.f32 %v2118_v35  ;;  %v8589_v52 = vmul.f32 %v7482_v56, %v7916_v49 }
 0x214   :  { %13130 = vst [vmem:[#allocation27_spill] sm:$0xff] %v8550_v38  ;;  %v8559_v11 = vpop.permute.xlu1 %595  ;;  %v2227_v22 = vand.u32 3, %v2226_v23  ;;  %v8600_v47 = vmul.f32 %v7488_v57, %v13135_v3  ;;  %v13141_v3 = vld [vmem:[#allocation50_spill] sm:$0xff]  ;;  %v8739_v38 = vmul.f32 %v7482_v56, %v7927_v40 }
 0x215   :  { %13131 = vst [vmem:[#allocation138_spill] sm:$0xff] %v8559_v11  ;;  %3246 = vperm.xlu1 %6139, %v7956_v25   ;;  %v1859_v25 = vsel %vm1855_vm9, %v1839_v24, %v1842_v13  ;;  %13133 = vst [vmem:[#allocation140_spill] sm:$0xff] %v8589_v52  ;;  %v2123_v13 = vand.u32 3, %v2119_v63  ;;  %v8596_v36 = vpop.permute.xlu0 %2510  ;;  %v1070_v19 = vadd.f32 %v8589_v52, %v874_v26  ;;  %v1881_v41 = vadd.s32 1, %v8575_v32 }
 0x216   :  { %v8594_v18 = vsel %vm1856_vm11, %v1859_v25, %v1861_v50  ;;  %13134 = vst [vmem:[#allocation141_spill] sm:$0xff] %v8596_v36  ;;  %13136 = vst [vmem:[#allocation26_spill] sm:$0xff] %v8600_v47  ;;  %vm1880_vm14 = vc.u32 %v8569_v17, %v8574_v2  ;;  %v8612_v24 = vsub.s32 0, %v13137_v5  ;;  %vm2229_vm1 = vcmp.eq.s32.totalorder %v2227_v22, 0  ;;  %v13142_v5 = vld [vmem:[#allocation89_spill] sm:$0xff] }
 0x217   :  { %v6389_v14 = vpop.eup %6388  ;;  %v1878_v49 = vmul.u32 %v8541_v9, %v8594_v18  ;;  %vm2125_vm15 = vcmp.eq.s32.totalorder %v2123_v13, 0  ;;  %vm2128_vm0 = vcmp.eq.s32.totalorder %v2123_v13, 2  ;;  %vm2232_vm2 = vcmp.eq.s32.totalorder %v2227_v22, 2 }
 0x218   :  { %v8584_v1 = vpop.permute.xlu1 %599  ;;  %1517 = vmatpush1.bf16.msra.mxu0 %v6389_v14  ;;  %vm2124_vm4 = vcmp.lt.s32.totalorder %v2123_v13, 2  ;;  %vm2228_vm5 = vcmp.lt.s32.totalorder %v2227_v22, 2  ;;  %v648_v21 = vmul.f32 %v7613_v42, %v8559_v11  ;;  %v13140_v25 = vmov 9  }
 0x219   :  { %13132 = vst [vmem:[#allocation139_spill] sm:$0xff] %v8584_v1  ;;  %6140 = vset.pattern.permute.xlu1 %v13103_v31  ;;  %v8624_v14 = vpop.permute.xlu0 %2518  ;;  %v844_v13 = vmul.f32 %v7628_v53, %v13142_v5  ;;  %v8755_v5 = vld [vmem:[%s12446_s1 + $0x38] sm:$0xff]  ;;  %v13164_v52 = vmov 6  }
 0x21a   :  { %2410 = vperm.xlu1 %6140, %v7981_v8   ;;  %13139 = vst [vmem:[#allocation142_spill] sm:$0xff] %v8624_v14  ;;  %v13165_v14 = vld [vmem:[#allocation72_spill] sm:$0xff] }
 0x21c   :  { %v6391_v30 = vpop.eup %6390 }
 0x21d   :  { %v984_v59 = vpop.permute.xlu1 %983  ;;  %1518 = vmatprep.subr.bf16.mxu0 %v6391_v30  ;;  %v6393_v28 = vpop.eup %6392  ;;  %v8637_v30 = vld [vmem:[%s12446_s1 + $0x20] sm:$0xff] }
 0x21e   :  { %v1039_v8 = vmul.f32 %v7482_v56, %v984_v59  ;;  %6141 = vset.pattern.permute.xlu1 %v13104_v15  ;;  %v6395_v9 = vpop.eup %6394  ;;  %v2129_v0 = vxor.u32 2147483648, %v6393_v28  ;;  %v485_v59 = vadd.f32 %v13141_v3, %v8600_v47 }
 0x21f   :  { %2566 = vperm.xlu1 %6141, %v8425_v37   ;;  %v2126_v12 = vxor.u32 2147483648, %v6395_v9 }
 0x220   :  { %v1071_v16 = vadd.f32 %v1039_v8, %v8511_v10  ;;  %v5189_v26 = vadd.f32 %v1039_v8, %v8402_v46  ;;  %v2130_v46 = vsel %vm2128_vm0, %v2129_v0, %v6395_v9  ;;  %v484_v10 = vadd.f32 %v8523_v54, %v8517_v62 }
 0x221   :  { %v2127_v50 = vsel %vm2125_vm15, %v6393_v28, %v2126_v12  ;;  %v2231_v23 = vsel %vm2229_vm1, %v6393_v28, %v2126_v12  ;;  %v2234_v18 = vsel %vm2232_vm2, %v2129_v0, %v6395_v9  ;;  %v1882_v8 = vsel %vm1880_vm14, %v1881_v41, %v8575_v32  ;;  %v6242_v32 = vld [vmem:[%s12447_s2 + $0x4] ss:$8 sps:$4 sm:$0xff]   ;;  %v8668_v0 = vpop.permute.xlu0 %2562 }
 0x222   :  { %v1090_v35 = vpack.c.bf16 %v1071_v16, %v1070_v19  ;;  %v8620_v51 = vadd.f32 %v5189_v26, %v8432_v55  ;;  %v8622_v63 = vpop.permute.xlu1 %281  ;;  %v649_v55 = vmul.f32 %v7613_v42, %v8584_v1  ;;  %v2131_v62 = vsel %vm2124_vm4, %v2127_v50, %v2130_v46  ;;  %13144 = vst [vmem:[#allocation144_spill] sm:$0xff] %v8668_v0 }
 0x223   :  { %6142 = vset.pattern.permute.xlu1 %v13140_v25  ;;  %v2235_v54 = vsel %vm2228_vm5, %v2231_v23, %v2234_v18  ;;  %v2132_v19 = vsel %vm2122_vm3, nan, %v2131_v62  ;;  %v680_v9 = vadd.f32 %v648_v21, %v484_v10  ;;  %v1883_v12 = vadd.s32 %v1882_v8, %v1878_v49  ;;  %1526 = vmatprep.mubr.bf16.mxu0 %v6242_v32  ;;  %v6886_v23 = vld [vmem:[%s12446_s1 + $0x18] sm:$0xff] }
 0x224   :  { %13138 = vst [vmem:[#allocation37_spill] sm:$0xff] %v8620_v51  ;;  %6396 = vtanh.bf16 %v1090_v35  ;;  %2254 = vperm.xlu1 %6142, %v8637_v30   ;;  %v2236_v28 = vsel %vm2122_vm3, nan, %v2235_v54  ;;  %v8655_v22 = vrot.slane %v2132_v19, %v8612_v24  ;;  %v681_v41 = vadd.f32 %v649_v55, %v485_v59 }
 0x225   :  { %v8658_v16 = vrot.slane %v2236_v28, %v8612_v24  ;;  %v876_v21 = vadd.f32 %v844_v13, %v680_v9  ;;  %v1884_v50 = vadd.s32 536870912, %v1883_v12  ;;  %v8676_v18 = vpop.permute.xlu0 %2570  ;;  %vm1915_vm15 = vweird.f32 %v8311_v39 }
 0x226   :  { %13145 = vst [vmem:[#allocation145_spill] sm:$0xff] %v8676_v18 }
 0x227   :  { %v8660_v26 = vpop.permute.xlu1 %795  ;;  %v8678_v49 = vshrl.u32 %v1884_v50, 30 }
 0x228   :  { %13143 = vst [vmem:[#allocation143_spill] sm:$0xff] %v8660_v26  ;;  %v845_v60 = vmul.f32 %v7628_v53, %v8660_v26  ;;  %2258 = vperm.xlu1 %6142, %v8003_v20  }
 0x229   :  { %v8684_v62 = vpop.permute.xlu0 %2578  ;;  %v1886_v54 = vshll.u32 %v8678_v49, 30 }
 0x22a   :  { %v877_v35 = vadd.f32 %v845_v60, %v681_v41  ;;  %13147 = vst [vmem:[#allocation147_spill] sm:$0xff] %v8684_v62  ;;  %v1072_v41 = vadd.f32 %v8449_v33, %v876_v21 }
 0x22b   :  { %v8691_v8 = vsub.s32 %v1883_v12, %v1886_v54  ;;  %v8705_v12 = vld [vmem:[%s12446_s1 + $0x28] sm:$0xff] }
 0x22c   :  { %v1139_v46 = vpack.c.bf16 %v877_v35, %v876_v21  ;;  %6143 = vset.pattern.permute.xlu1 %v13121_v43  ;;  %v8671_v10 = vpop.permute.xlu1 %443  ;;  %v8715_v21 = vmul.f32 %v7488_v57, %v8622_v63 }
 0x22d   :  { %2830 = vperm.xlu1 %6143, %v6886_v23   ;;  %v8693_v13 = vpop.permute.xlu0 %2586  ;;  %v1889_v32 = vsub.s32 0, %v8691_v8 }
 0x22e   :  { %6398 = vtanh.bf16 %v1139_v46  ;;  %13149 = vst [vmem:[#allocation149_spill] sm:$0xff] %v8693_v13 }
 0x22f   :  { %v6397_v20 = vpop.eup %6396 }
 0x230   :  { %1519 = vmatpush1.bf16.msra.mxu0 %v6397_v20  ;;  %v13152_v20 = vld [vmem:[#allocation28_spill] sm:$0xff] }
 0x231   :  { %6144 = vset.pattern.permute.xlu1 %v13124_v48  ;;  %v8681_v55 = vpop.permute.xlu1 %603  ;;  %v8708_v50 = vpop.permute.xlu0 %2594  ;;  %v326_v33 = vmul.f32 %v7488_v57, %v13152_v20 }
 0x232   :  { %13146 = vst [vmem:[#allocation146_spill] sm:$0xff] %v8681_v55  ;;  %3086 = vperm.xlu1 %6144, %v8425_v37   ;;  %13151 = vst [vmem:[#allocation151_spill] sm:$0xff] %v8708_v50 }
 0x233   :  { %v486_v63 = vadd.f32 %v8671_v10, %v326_v33 }
 0x235   :  { %v8687_v59 = vpop.permute.xlu1 %607 }
 0x236   :  { %13148 = vst [vmem:[#allocation148_spill] sm:$0xff] %v8687_v59  ;;  %6145 = vset.pattern.permute.xlu1 %v12597_v61 }
 0x237   :  { %3250 = vperm.xlu1 %6145, %v8425_v37  }
 0x239   :  { %v6399_v19 = vpop.eup %6398 }
 0x23a   :  { %v992_v28 = vpop.permute.xlu1 %991  ;;  %1520 = vmatprep.subr.bf16.mxu0 %v6399_v19  ;;  %v650_v19 = vmul.f32 %v7613_v42, %v8681_v55 }
 0x23b   :  { %v8696_v9 = vmul.f32 %v7482_v56, %v992_v28  ;;  %3254 = vperm.xlu1 %6145, %v6886_v23   ;;  %v5711_v23 = vmin.u32 %v1889_v32, %v8691_v8  ;;  %v651_v28 = vmul.f32 %v7613_v42, %v8687_v59  ;;  %v8725_v32 = vpop.permute.xlu0 %2602 }
 0x23c   :  { %13154 = vst [vmem:[#allocation152_spill] sm:$0xff] %v8725_v32  ;;  %v682_v61 = vadd.f32 %v650_v19, %v486_v63 }
 0x23d   :  { %13150 = vst [vmem:[#allocation150_spill] sm:$0xff] %v8696_v9  ;;  %v1073_v60 = vadd.f32 %v8696_v9, %v877_v35  ;;  %v1891_v54 = vclz %v5711_v23 }
 0x23f   :  { %v1091_v46 = vpack.c.bf16 %v1073_v60, %v1072_v41  ;;  %6146 = vset.pattern.permute.xlu1 %v13103_v31  ;;  %v287_v37 = vpop.permute.xlu1 %286  ;;  %v13155_v41 = vld [vmem:[#allocation51_spill] sm:$0xff]  ;;  %v5712_v23 = vadd.s32 4294967294, %v1891_v54 }
 0x240   :  { %2418 = vperm.xlu1 %6146, %v8705_v12   ;;  %v487_v60 = vadd.f32 %v13155_v41, %v8715_v21 }
 0x241   :  { %6400 = vtanh.bf16 %v1091_v46  ;;  %vm5713_vm6 = vcmp.lt.s32.totalorder %v5712_v23, 0 }
 0x242   :  { %v683_v6 = vadd.f32 %v651_v28, %v487_v60  ;;  %v8747_v28 = vpop.permute.xlu0 %2610 }
 0x243   :  { %13157 = vst [vmem:[#allocation153_spill] sm:$0xff] %v8747_v28 }
 0x244   :  { %6147 = vset.pattern.permute.xlu1 %v13104_v15  ;;  %v8718_v35 = vpop.permute.xlu1 %799 }
 0x245   :  { %13153 = vst [vmem:[#allocation28_spill] sm:$0xff] %v8718_v35  ;;  %2574 = vperm.xlu1 %6147, %v8637_v30   ;;  %v846_v46 = vmul.f32 %v7628_v53, %v8718_v35 }
 0x247   :  { %v878_v35 = vadd.f32 %v846_v46, %v682_v61  ;;  %v1894_v61 = vsel %vm5713_vm6, 0, %v5712_v23  ;;  %v8763_v46 = vpop.permute.xlu0 %2618 }
 0x248   :  { %v8732_v20 = vpop.permute.xlu1 %803  ;;  %13161 = vst [vmem:[#allocation155_spill] sm:$0xff] %v8763_v46  ;;  %v1895_v59 = vsub.s32 32, %v1894_v61  ;;  %v1896_v1 = vshll.u32 %v8691_v8, %v1894_v61  ;;  %v13166_v8 = vld [vmem:[#allocation53_spill] sm:$0xff] }
 0x249   :  { %13156 = vst [vmem:[#allocation51_spill] sm:$0xff] %v8732_v20  ;;  %v847_v51 = vmul.f32 %v7628_v53, %v8732_v20  ;;  %6148 = vset.pattern.permute.xlu1 %v13140_v25  ;;  %v13158_v20 = vld [vmem:[#allocation30_spill] sm:$0xff] }
 0x24a   :  { %2262 = vperm.xlu1 %6148, %v8744_v7   ;;  %v329_v40 = vmul.f32 %v7488_v57, %v13158_v20  ;;  %v1899_v20 = vsub.s32 4294967266, %v1894_v61 }
 0x24b   :  { %v879_v54 = vadd.f32 %v847_v51, %v683_v6  ;;  %v8771_v23 = vpop.permute.xlu0 %2626 }
 0x24c   :  { %v6401_v19 = vpop.eup %6400  ;;  %v1900_v55 = vadd.s32 127, %v1899_v20  ;;  %13162 = vst [vmem:[#allocation156_spill] sm:$0xff] %v8771_v23 }
 0x24d   :  { %v1140_v60 = vpack.c.bf16 %v879_v54, %v878_v35  ;;  %v456_v63 = vpop.permute.xlu1 %455  ;;  %1521 = vmatpush1.bf16.msra.mxu0 %v6401_v19  ;;  %v1879_v19 = vadd.s32 %v8574_v2, %v8569_v17 }
 0x24e   :  { %v5195_v26 = vadd.f32 %v8739_v38, %v456_v63  ;;  %2266 = vperm.xlu1 %6148, %v8755_v5   ;;  %v1901_v17 = vshll.u32 %v1900_v55, 23  ;;  %v489_v61 = vadd.f32 %v456_v63, %v329_v40 }
 0x24f   :  { %6402 = vtanh.bf16 %v1140_v60  ;;  %v1897_v11 = vshrl.u32 %v1879_v19, %v1895_v59 }
 0x250   :  { %v8758_v6 = vadd.f32 %v5195_v26, %v329_v40 }
 0x252   :  { %13159 = vst [vmem:[#allocation30_spill] sm:$0xff] %v8758_v6  ;;  %6149 = vset.pattern.permute.xlu1 %v13121_v43  ;;  %v8761_v51 = vpop.permute.xlu1 %611  ;;  %v328_v6 = vmul.f32 %v7488_v57, %v287_v37  ;;  %v653_v37 = vmul.f32 %v7613_v42, %v13165_v14 }
 0x253   :  { %13160 = vst [vmem:[#allocation154_spill] sm:$0xff] %v8761_v51  ;;  %2838 = vperm.xlu1 %6149, %v8705_v12   ;;  %v652_v2 = vmul.f32 %v7613_v42, %v8761_v51 }
 0x254   :  { %v488_v59 = vadd.f32 %v13166_v8, %v328_v6  ;;  %v685_v63 = vadd.f32 %v653_v37, %v489_v61 }
 0x257   :  { %6150 = vset.pattern.permute.xlu1 %v13124_v48  ;;  %v996_v60 = vpop.permute.xlu1 %995 }
 0x258   :  { %v1042_v26 = vmul.f32 %v7482_v56, %v996_v60  ;;  %3094 = vperm.xlu1 %6150, %v8637_v30  }
 0x25a   :  { %v6403_v47 = vpop.eup %6402  ;;  %v5192_v9 = vadd.f32 %v1042_v26, %v8671_v10  ;;  %v1898_v10 = vor.u32 %v1897_v11, %v1896_v1  ;;  %v1074_v55 = vadd.f32 %v1042_v26, %v878_v35 }
 0x25b   :  { %v1000_v20 = vpop.permute.xlu1 %999  ;;  %1522 = vmatprep.subr.bf16.mxu0 %v6403_v47  ;;  %v8787_v47 = vpop.permute.xlu0 %2634 }
 0x25c   :  { %v8778_v3 = vadd.f32 %v5192_v9, %v326_v33  ;;  %v1043_v60 = vmul.f32 %v7482_v56, %v1000_v20  ;;  %6151 = vset.pattern.permute.xlu1 %v13164_v52  ;;  %13167 = vst [vmem:[#allocation53_spill] sm:$0xff] %v8787_v47  ;;  %v1902_v9 = vor.u32 4788187, %v1901_v17  ;;  %v848_v33 = vmul.f32 %v7628_v53, %v7749_v44 }
 0x25d   :  { %3258 = vperm.xlu1 %6151, %v8637_v30   ;;  %v684_v20 = vadd.f32 %v652_v2, %v488_v59  ;;  %v1905_v30 = vcvt.s32.f32 %v1898_v10 }
 0x25e   :  { %13163 = vst [vmem:[#allocation157_spill] sm:$0xff] %v8778_v3  ;;  %v1075_v19 = vadd.f32 %v1043_v60, %v879_v54  ;;  %v5193_v51 = vadd.f32 %v1043_v60, %v13155_v41  ;;  %v1903_v1 = vand.u32 2147483647, %v1902_v9 }
 0x25f   :  { %v880_v41 = vadd.f32 %v848_v33, %v684_v20  ;;  %v8799_v54 = vpop.permute.xlu0 %2642  ;;  %v1909_v33 = vsub.s32 4, %v8678_v49 }
 0x260   :  { %v1092_v3 = vpack.c.bf16 %v1075_v19, %v1074_v55  ;;  %v8792_v14 = vadd.f32 %v5193_v51, %v8715_v21  ;;  %v8794_v36 = vpop.permute.xlu1 %811  ;;  %13170 = vst [vmem:[#allocation160_spill] sm:$0xff] %v8799_v54  ;;  %v1906_v26 = vmul.f32 %v1905_v30, %v1903_v1  ;;  %v8825_v19 = vld [vmem:[%s12446_s1 + $0x40] sm:$0xff]  ;;  %v8837_v1 = vld [vmem:[%s12446_s1 + $0x48] sm:$0xff] }
 0x261   :  { %13169 = vst [vmem:[#allocation159_spill] sm:$0xff] %v8794_v36  ;;  %v849_v11 = vmul.f32 %v7628_v53, %v8794_v36  ;;  %3262 = vperm.xlu1 %6151, %v8705_v12   ;;  %v1910_v30 = vsel %vm1825_vm7, %v1909_v33, %v8678_v49 }
 0x262   :  { %13168 = vst [vmem:[#allocation158_spill] sm:$0xff] %v8792_v14  ;;  %6404 = vtanh.bf16 %v1092_v3  ;;  %v1907_v61 = vxor.u32 2147483648, %v1906_v26 }
 0x263   :  { %v881_v35 = vadd.f32 %v849_v11, %v685_v63  ;;  %v8809_v59 = vpop.permute.xlu0 %2650 }
 0x264   :  { %13172 = vst [vmem:[#allocation162_spill] sm:$0xff] %v8809_v59 }
 0x265   :  { %6152 = vset.pattern.permute.xlu1 %v13103_v31  ;;  %v1004_v40 = vpop.permute.xlu1 %1003  ;;  %v1141_v21 = vpack.c.bf16 %v881_v35, %v880_v41  ;;  %v1077_v17 = vadd.f32 %v8739_v38, %v881_v35  ;;  %v13173_v38 = vand.u32 2147483647, %v8311_v39 }
 0x266   :  { %v1044_v51 = vmul.f32 %v7482_v56, %v1004_v40  ;;  %2426 = vperm.xlu1 %6152, %v8755_v5   ;;  %v6240_v40 = vld [vmem:[%s12447_s2] ss:$8 sps:$4 sm:$0xff]  }
 0x267   :  { %6406 = vtanh.bf16 %v1141_v21  ;;  %vm8815_vm8 = vcmp.le.f32.partialorder %v13173_v38, 0.7853982  ;;  %v8828_v9 = vpop.permute.xlu0 %2658 }
 0x268   :  { %v1076_v12 = vadd.f32 %v1044_v51, %v880_v41  ;;  %v5194_v3 = vadd.f32 %v1044_v51, %v13166_v8  ;;  %13176 = vst [vmem:[#allocation163_spill] sm:$0xff] %v8828_v9  ;;  %v1912_v51 = vsel %vm8815_vm8, 0, %v1910_v30  ;;  %v2686_v30 = vmul.f32 %v8668_v0, %v7613_v42  ;;  %v6290_v0 = vld [vmem:[#allocation3 + $0x4] ss:$8 sps:$4 sm:$0xff]  }
 0x26a   :  { %v1093_v2 = vpack.c.bf16 %v1077_v17, %v1076_v12  ;;  %v8806_v60 = vadd.f32 %v5194_v3, %v328_v6  ;;  %6153 = vset.pattern.permute.xlu1 %v13104_v15  ;;  %v2239_v37 = vpop.permute.xlu1 %2238  ;;  %v1908_v6 = vsel %vm1825_vm7, %v1907_v61, %v1906_v26  ;;  %v2019_v26 = vadd.s32 3, %v1912_v51 }
 0x26b   :  { %2582 = vperm.xlu1 %6153, %v8744_v7   ;;  %v1911_v20 = vsel %vm8815_vm8, %v8311_v39, %v1908_v6  ;;  %v8843_v35 = vpop.permute.xlu0 %2666  ;;  %v1916_v61 = vand.u32 3, %v1912_v51  ;;  %v2945_v51 = vmul.f32 %v7941_v58, %v7628_v53 }
 0x26c   :  { %13171 = vst [vmem:[#allocation161_spill] sm:$0xff] %v8806_v60  ;;  %6408 = vtanh.bf16 %v1093_v2  ;;  %13177 = vst [vmem:[#allocation164_spill] sm:$0xff] %v8843_v35  ;;  %v2020_v12 = vand.u32 3, %v2019_v26 }
 0x26d   :  { %v6405_v10 = vpop.eup %6404  ;;  %6410 = vcosq.f32 %v1911_v20  ;;  %vm1918_vm11 = vcmp.eq.s32.totalorder %v1916_v61, 0  ;;  %vm1921_vm12 = vcmp.eq.s32.totalorder %v1916_v61, 2  ;;  %vm1917_vm14 = vcmp.lt.s32.totalorder %v1916_v61, 2 }
 0x26e   :  { %v2243_v55 = vpop.permute.xlu1 %2242  ;;  %1523 = vmatpush1.bf16.msra.mxu0 %v6405_v10  ;;  %6412 = vsinq.f32 %v1911_v20  ;;  %v2365_v10 = vmul.f32 %v2239_v37, %v7488_v57  ;;  %vm2022_vm9 = vcmp.eq.s32.totalorder %v2020_v12, 0  ;;  %vm2025_vm10 = vcmp.eq.s32.totalorder %v2020_v12, 2 }
 0x26f   :  { %6154 = vset.pattern.permute.xlu1 %v13140_v25  ;;  %v8854_v49 = vpop.permute.xlu0 %2674  ;;  %v2366_v38 = vmul.f32 %v2243_v55, %v7488_v57  ;;  %vm2021_vm13 = vcmp.lt.s32.totalorder %v2020_v12, 2 }
 0x270   :  { %2270 = vperm.xlu1 %6154, %v8825_v19   ;;  %13179 = vst [vmem:[#allocation166_spill] sm:$0xff] %v8854_v49  ;;  %v8875_v37 = vadd.f32 %v8221_v29, %v2365_v10 }
 0x272   :  { %v6407_v63 = vpop.eup %6406  ;;  %13182 = vst [vmem:[#allocation169_spill] sm:$0xff] %v8875_v37 }
 0x273   :  { %v2403_v11 = vpop.permute.xlu1 %2402  ;;  %1524 = vmatprep.subr.bf16.mxu0 %v6407_v63  ;;  %v8867_v33 = vpop.permute.xlu0 %2682 }
 0x274   :  { %2274 = vperm.xlu1 %6154, %v8837_v1   ;;  %13180 = vst [vmem:[#allocation167_spill] sm:$0xff] %v8867_v33 }
 0x277   :  { %v6409_v41 = vpop.eup %6408  ;;  %v8886_v12 = vpop.permute.xlu0 %3082 }
 0x278   :  { %6155 = vset.pattern.permute.xlu1 %v13121_v43  ;;  %v8849_v21 = vpop.permute.xlu1 %2558  ;;  %1525 = vmatpush1.bf16.msra.mxu0 %v6409_v41  ;;  %v6411_v3 = vpop.eup %6410  ;;  %v8871_v41 = vadd.f32 %v2403_v11, %v2366_v38  ;;  %13184 = vst [vmem:[#allocation171_spill] sm:$0xff] %v8886_v12 }
 0x279   :  { %13178 = vst [vmem:[#allocation165_spill] sm:$0xff] %v8849_v21  ;;  %2846 = vperm.xlu1 %6155, %v8755_v5   ;;  %v6413_v2 = vpop.eup %6412  ;;  %v2685_v6 = vmul.f32 %v8849_v21, %v7613_v42  ;;  %v1922_v63 = vxor.u32 2147483648, %v6411_v3 }
 0x27a   :  { %v1919_v20 = vxor.u32 2147483648, %v6413_v2  ;;  %13181 = vst [vmem:[#allocation168_spill] sm:$0xff] %v8871_v41 }
 0x27b   :  { %1527 = vmatmul.mubr.bf16.vlgmr.msra.gmra.mrb[0].mxu0 %v6240_v40  ;;  %v2027_v40 = vsel %vm2025_vm10, %v1922_v63, %v6413_v2  ;;  %v2717_v26 = vadd.f32 %v2685_v6, %v8875_v37  ;;  %v1923_v38 = vsel %vm1921_vm12, %v1922_v63, %v6413_v2  ;;  %v9358_v37 = vld [vmem:[%s12446_s1 + $0xa8] sm:$0xff] }
 0x27c   :  { %v2024_v55 = vsel %vm2022_vm9, %v6411_v3, %v1919_v20  ;;  %v1920_v11 = vsel %vm1918_vm11, %v6411_v3, %v1919_v20 }
 0x27d   :  { %6156 = vset.pattern.permute.xlu1 %v13124_v48  ;;  %v8857_v17 = vpop.permute.xlu1 %2246  ;;  %v2028_v29 = vsel %vm2021_vm13, %v2024_v55, %v2027_v40  ;;  %v1924_v36 = vsel %vm1917_vm14, %v1920_v11, %v1923_v38  ;;  %v2977_v6 = vadd.f32 %v2945_v51, %v2717_v26 }
 0x27e   :  { %3102 = vperm.xlu1 %6156, %v8744_v7   ;;  %v2029_v44 = vsel %vm1915_vm15, nan, %v2028_v29  ;;  %v1925_v2 = vsel %vm1915_vm15, nan, %v1924_v36 }
 0x27f   :  { %v8899_v39 = vrot.slane %v1925_v2, %v8612_v24 }
 0x281   :  { %v8862_v8 = vpop.permute.xlu1 %2250 }
 0x282   :  { %6157 = vset.pattern.permute.xlu1 %v13164_v52 }
 0x283   :  { %3266 = vperm.xlu1 %6157, %v8744_v7   ;;  %v2718_v7 = vadd.f32 %v2686_v30, %v8871_v41 }
 0x286   :  { %v8880_v60 = vpop.permute.xlu1 %2822 }
 0x287   :  { %13183 = vst [vmem:[#allocation170_spill] sm:$0xff] %v8880_v60  ;;  %v2946_v14 = vmul.f32 %v8880_v60, %v7628_v53  ;;  %3270 = vperm.xlu1 %6157, %v8755_v5   ;;  %v8896_v5 = vrot.slane %v2029_v44, %v8612_v24  ;;  %v3210_v44 = vmul.f32 %v8899_v39, %v8886_v12 }
 0x288   :  { %v3442_v24 = vmul.f32 %v8655_v22, %v8886_v12 }
 0x289   :  { %v2978_v10 = vadd.f32 %v2946_v14, %v2718_v7 }
 0x28b   :  { %v3782_v61 = vadd.f32 %v8886_v12, %v2978_v10  ;;  %6158 = vset.pattern.permute.xlu1 %v13103_v31  ;;  %v8891_v3 = vpop.permute.xlu1 %3078 }
 0x28c   :  { %13185 = vst [vmem:[#allocation172_spill] sm:$0xff] %v8891_v3  ;;  %v3781_v20 = vadd.f32 %v8891_v3, %v2977_v6  ;;  %2434 = vperm.xlu1 %6158, %v8837_v1   ;;  %v3441_v36 = vmul.f32 %v8655_v22, %v8891_v3  ;;  %v3209_v40 = vmul.f32 %v8899_v39, %v8891_v3 }
 0x28e   :  { %v3813_v14 = vpack.c.bf16 %v3782_v61, %v3781_v20  ;;  %v8923_v61 = vld [vmem:[%s12446_s1 + $0x50] sm:$0xff] }
 0x290   :  { %6414 = vtanh.bf16 %v3813_v14  ;;  %6159 = vset.pattern.permute.xlu1 %v13104_v15  ;;  %v3243_v63 = vpop.permute.xlu1 %3242 }
 0x291   :  { %v3373_v30 = vmul.f32 %v8896_v5, %v3243_v63  ;;  %v3477_v55 = vmul.f32 %v8658_v16, %v3243_v63  ;;  %2590 = vperm.xlu1 %6159, %v8825_v19  }
 0x293   :  { %v3509_v51 = vadd.f32 %v3477_v55, %v3441_v36  ;;  %v8913_v11 = vadd.f32 %v3373_v30, %v3209_v40  ;;  %v8935_v55 = vld [vmem:[%s12446_s1 + $0x58] sm:$0xff] }
 0x294   :  { %v3247_v26 = vpop.permute.xlu1 %3246 }
 0x295   :  { %13186 = vst [vmem:[#allocation173_spill] sm:$0xff] %v8913_v11  ;;  %v8915_v38 = vadd.f32 %v3509_v51, %v2977_v6  ;;  %v3374_v7 = vmul.f32 %v8896_v5, %v3247_v26  ;;  %v3478_v29 = vmul.f32 %v8658_v16, %v3247_v26  ;;  %6160 = vset.pattern.permute.xlu1 %v13140_v25 }
 0x296   :  { %2278 = vperm.xlu1 %6160, %v8923_v61   ;;  %v3701_v14 = vadd.f32 %v8913_v11, %v2977_v6  ;;  %v2368_v26 = vmul.f32 %v8862_v8, %v7488_v57  ;;  %v13194_v8 = vld [vmem:[#allocation15_spill] sm:$0xff] }
 0x297   :  { %13187 = vst [vmem:[#allocation174_spill] sm:$0xff] %v8915_v38  ;;  %v8926_v2 = vadd.f32 %v3374_v7, %v3210_v44  ;;  %v3510_v20 = vadd.f32 %v3478_v29, %v3442_v24  ;;  %v2367_v24 = vmul.f32 %v8857_v17, %v7488_v57  ;;  %v13192_v17 = vld [vmem:[#allocation121_spill] sm:$0xff] }
 0x299   :  { %13188 = vst [vmem:[#allocation175_spill] sm:$0xff] %v8926_v2  ;;  %v3702_v63 = vadd.f32 %v8926_v2, %v2978_v10  ;;  %v8930_v30 = vadd.f32 %v3510_v20, %v2978_v10  ;;  %v2411_v36 = vpop.permute.xlu1 %2410 }
 0x29a   :  { %2282 = vperm.xlu1 %6160, %v8935_v55  }
 0x29b   :  { %13189 = vst [vmem:[#allocation176_spill] sm:$0xff] %v8930_v30  ;;  %v6415_v40 = vpop.eup %6414  ;;  %v3733_v51 = vpack.c.bf16 %v3702_v63, %v3701_v14  ;;  %v2688_v14 = vmul.f32 %v8676_v18, %v7613_v42  ;;  %v8959_v63 = vadd.f32 %v2411_v36, %v2368_v26  ;;  %v8974_v36 = vpop.permute.xlu0 %3090 }
 0x29c   :  { %4502 = vmatprep.subr.bf16.mxu0 %v6415_v40  ;;  %v8963_v40 = vadd.f32 %v13192_v17, %v2367_v24  ;;  %13196 = vst [vmem:[#allocation180_spill] sm:$0xff] %v8974_v36 }
 0x29d   :  { %6416 = vtanh.bf16 %v3733_v51  ;;  %13191 = vst [vmem:[#allocation178_spill] sm:$0xff] %v8959_v63  ;;  %v2947_v51 = vmul.f32 %v13194_v8, %v7628_v53  ;;  %v2720_v30 = vadd.f32 %v2688_v14, %v8959_v63  ;;  %v9004_v63 = vld [vmem:[%s12446_s1 + $0x60] sm:$0xff] }
 0x29e   :  { %6161 = vset.pattern.permute.xlu1 %v13121_v43  ;;  %v8941_v6 = vpop.permute.xlu1 %2566  ;;  %13193 = vst [vmem:[#allocation121_spill] sm:$0xff] %v8963_v40 }
 0x29f   :  { %13190 = vst [vmem:[#allocation177_spill] sm:$0xff] %v8941_v6  ;;  %2854 = vperm.xlu1 %6161, %v8837_v1   ;;  %v2687_v20 = vmul.f32 %v8941_v6, %v7613_v42  ;;  %v10072_v6 = vld [vmem:[%s12446_s1 + $0x30] sm:$0xff] }
 0x2a1   :  { %v2719_v44 = vadd.f32 %v2687_v20, %v8963_v40 }
 0x2a3   :  { %6162 = vset.pattern.permute.xlu1 %v13124_v48  ;;  %v8945_v10 = vpop.permute.xlu1 %2254  ;;  %v2979_v26 = vadd.f32 %v2947_v51, %v2719_v44  ;;  %v3212_v44 = vmul.f32 %v8899_v39, %v8974_v36  ;;  %v3444_v51 = vmul.f32 %v8655_v22, %v8974_v36 }
 0x2a4   :  { %3110 = vperm.xlu1 %6162, %v8825_v19  }
 0x2a7   :  { %v8952_v7 = vpop.permute.xlu1 %2258 }
 0x2a8   :  { %v6417_v29 = vpop.eup %6416  ;;  %6163 = vset.pattern.permute.xlu1 %v13164_v52 }
 0x2a9   :  { %3274 = vperm.xlu1 %6163, %v8825_v19   ;;  %4503 = vmatpush1.bf16.msra.mxu0 %v6417_v29 }
 0x2ac   :  { %v8968_v38 = vpop.permute.xlu1 %2830 }
 0x2ad   :  { %13195 = vst [vmem:[#allocation179_spill] sm:$0xff] %v8968_v38  ;;  %v2948_v12 = vmul.f32 %v8968_v38, %v7628_v53  ;;  %3278 = vperm.xlu1 %6163, %v8837_v1  }
 0x2af   :  { %v2980_v19 = vadd.f32 %v2948_v12, %v2720_v30 }
 0x2b1   :  { %v3784_v24 = vadd.f32 %v8974_v36, %v2980_v19  ;;  %6164 = vset.pattern.permute.xlu1 %v13103_v31  ;;  %v8978_v29 = vpop.permute.xlu1 %3086 }
 0x2b2   :  { %13197 = vst [vmem:[#allocation181_spill] sm:$0xff] %v8978_v29  ;;  %v3783_v20 = vadd.f32 %v8978_v29, %v2979_v26  ;;  %2442 = vperm.xlu1 %6164, %v8935_v55   ;;  %v3443_v12 = vmul.f32 %v8655_v22, %v8978_v29 }
 0x2b4   :  { %v3814_v14 = vpack.c.bf16 %v3784_v24, %v3783_v20  ;;  %v3211_v24 = vmul.f32 %v8899_v39, %v8978_v29 }
 0x2b6   :  { %6418 = vtanh.bf16 %v3814_v14  ;;  %6165 = vset.pattern.permute.xlu1 %v13104_v15  ;;  %v3251_v17 = vpop.permute.xlu1 %3250 }
 0x2b7   :  { %v3375_v1 = vmul.f32 %v8896_v5, %v3251_v17  ;;  %v3479_v30 = vmul.f32 %v8658_v16, %v3251_v17  ;;  %2598 = vperm.xlu1 %6165, %v8923_v61  }
 0x2b9   :  { %v3511_v20 = vadd.f32 %v3479_v30, %v3443_v12  ;;  %v8994_v3 = vadd.f32 %v3375_v1, %v3211_v24 }
 0x2ba   :  { %v3255_v14 = vpop.permute.xlu1 %3254 }
 0x2bb   :  { %13198 = vst [vmem:[#allocation182_spill] sm:$0xff] %v8994_v3  ;;  %v8996_v2 = vadd.f32 %v3511_v20, %v2979_v26  ;;  %v3376_v11 = vmul.f32 %v8896_v5, %v3255_v14  ;;  %v3480_v17 = vmul.f32 %v8658_v16, %v3255_v14  ;;  %6166 = vset.pattern.permute.xlu1 %v13140_v25  ;;  %v9016_v14 = vld [vmem:[%s12446_s1 + $0x68] sm:$0xff] }
 0x2bc   :  { %2286 = vperm.xlu1 %6166, %v9004_v63   ;;  %v3703_v1 = vadd.f32 %v8994_v3, %v2979_v26 }
 0x2bd   :  { %13199 = vst [vmem:[#allocation183_spill] sm:$0xff] %v8996_v2  ;;  %v9007_v36 = vadd.f32 %v3376_v11, %v3212_v44  ;;  %v3512_v12 = vadd.f32 %v3480_v17, %v3444_v51  ;;  %v2369_v44 = vmul.f32 %v8945_v10, %v7488_v57  ;;  %v2370_v51 = vmul.f32 %v8952_v7, %v7488_v57  ;;  %v13204_v10 = vld [vmem:[#allocation21_spill] sm:$0xff] }
 0x2be   :  { %v13206_v7 = vld [vmem:[#allocation101_spill] sm:$0xff] }
 0x2bf   :  { %13200 = vst [vmem:[#allocation184_spill] sm:$0xff] %v9007_v36  ;;  %v3704_v30 = vadd.f32 %v9007_v36, %v2980_v19  ;;  %v9011_v24 = vadd.f32 %v3512_v12, %v2980_v19  ;;  %v2419_v20 = vpop.permute.xlu1 %2418  ;;  %v2690_v12 = vmul.f32 %v8684_v62, %v7613_v42  ;;  %v2949_v11 = vmul.f32 %v13206_v7, %v7628_v53  ;;  %v9085_v7 = vld [vmem:[%s12446_s1 + $0x70] sm:$0xff] }
 0x2c0   :  { %2290 = vperm.xlu1 %6166, %v9016_v14  }
 0x2c1   :  { %13201 = vst [vmem:[#allocation185_spill] sm:$0xff] %v9011_v24  ;;  %v6419_v29 = vpop.eup %6418  ;;  %v3734_v38 = vpack.c.bf16 %v3704_v30, %v3703_v1  ;;  %v9040_v1 = vadd.f32 %v2419_v20, %v2370_v51  ;;  %v9044_v30 = vadd.f32 %v13204_v10, %v2369_v44  ;;  %v9055_v20 = vpop.permute.xlu0 %3098 }
 0x2c2   :  { %4504 = vmatprep.subr.bf16.mxu0 %v6419_v29  ;;  %13208 = vst [vmem:[#allocation189_spill] sm:$0xff] %v9055_v20 }
 0x2c3   :  { %6420 = vtanh.bf16 %v3734_v38  ;;  %13203 = vst [vmem:[#allocation187_spill] sm:$0xff] %v9040_v1  ;;  %13205 = vst [vmem:[#allocation21_spill] sm:$0xff] %v9044_v30  ;;  %v2722_v36 = vadd.f32 %v2690_v12, %v9040_v1 }
 0x2c4   :  { %6167 = vset.pattern.permute.xlu1 %v13121_v43  ;;  %v9022_v26 = vpop.permute.xlu1 %2574 }
 0x2c5   :  { %13202 = vst [vmem:[#allocation186_spill] sm:$0xff] %v9022_v26  ;;  %2862 = vperm.xlu1 %6167, %v8935_v55   ;;  %v2689_v17 = vmul.f32 %v9022_v26, %v7613_v42 }
 0x2c7   :  { %v2721_v2 = vadd.f32 %v2689_v17, %v9044_v30 }
 0x2c9   :  { %6168 = vset.pattern.permute.xlu1 %v13124_v48  ;;  %v9026_v19 = vpop.permute.xlu1 %2262  ;;  %v2981_v51 = vadd.f32 %v2949_v11, %v2721_v2  ;;  %v3446_v11 = vmul.f32 %v8655_v22, %v9055_v20 }
 0x2ca   :  { %3118 = vperm.xlu1 %6168, %v8923_v61  }
 0x2cd   :  { %v9033_v29 = vpop.permute.xlu1 %2266 }
 0x2ce   :  { %v6421_v38 = vpop.eup %6420  ;;  %6169 = vset.pattern.permute.xlu1 %v13164_v52 }
 0x2cf   :  { %3282 = vperm.xlu1 %6169, %v8923_v61   ;;  %4505 = vmatpush1.bf16.msra.mxu0 %v6421_v38 }
 0x2d2   :  { %v9049_v24 = vpop.permute.xlu1 %2838 }
 0x2d3   :  { %13207 = vst [vmem:[#allocation188_spill] sm:$0xff] %v9049_v24  ;;  %v2950_v3 = vmul.f32 %v9049_v24, %v7628_v53  ;;  %3286 = vperm.xlu1 %6169, %v8935_v55  }
 0x2d5   :  { %v2982_v61 = vadd.f32 %v2950_v3, %v2722_v36  ;;  %v3214_v36 = vmul.f32 %v8899_v39, %v9055_v20 }
 0x2d7   :  { %v3786_v44 = vadd.f32 %v9055_v20, %v2982_v61  ;;  %6170 = vset.pattern.permute.xlu1 %v13103_v31  ;;  %v9059_v38 = vpop.permute.xlu1 %3094 }
 0x2d8   :  { %13209 = vst [vmem:[#allocation190_spill] sm:$0xff] %v9059_v38  ;;  %v3785_v17 = vadd.f32 %v9059_v38, %v2981_v51  ;;  %2450 = vperm.xlu1 %6170, %v9016_v14   ;;  %v3445_v3 = vmul.f32 %v8655_v22, %v9059_v38 }
 0x2da   :  { %v3815_v12 = vpack.c.bf16 %v3786_v44, %v3785_v17  ;;  %v3213_v44 = vmul.f32 %v8899_v39, %v9059_v38 }
 0x2dc   :  { %6422 = vtanh.bf16 %v3815_v12  ;;  %6171 = vset.pattern.permute.xlu1 %v13104_v15  ;;  %v3259_v10 = vpop.permute.xlu1 %3258 }
 0x2dd   :  { %v3377_v55 = vmul.f32 %v8896_v5, %v3259_v10  ;;  %v3481_v2 = vmul.f32 %v8658_v16, %v3259_v10  ;;  %2606 = vperm.xlu1 %6171, %v9004_v63  }
 0x2df   :  { %v3513_v17 = vadd.f32 %v3481_v2, %v3445_v3  ;;  %v9075_v1 = vadd.f32 %v3377_v55, %v3213_v44 }
 0x2e0   :  { %v3263_v12 = vpop.permute.xlu1 %3262 }
 0x2e1   :  { %13210 = vst [vmem:[#allocation191_spill] sm:$0xff] %v9075_v1  ;;  %v9077_v30 = vadd.f32 %v3513_v17, %v2981_v51  ;;  %v3378_v24 = vmul.f32 %v8896_v5, %v3263_v12  ;;  %v3482_v10 = vmul.f32 %v8658_v16, %v3263_v12  ;;  %6172 = vset.pattern.permute.xlu1 %v13140_v25  ;;  %v9097_v12 = vld [vmem:[%s12446_s1 + $0x78] sm:$0xff] }
 0x2e2   :  { %2294 = vperm.xlu1 %6172, %v9085_v7   ;;  %v3705_v55 = vadd.f32 %v9075_v1, %v2981_v51 }
 0x2e3   :  { %13211 = vst [vmem:[#allocation192_spill] sm:$0xff] %v9077_v30  ;;  %v9088_v20 = vadd.f32 %v3378_v24, %v3214_v36  ;;  %v3514_v3 = vadd.f32 %v3482_v10, %v3446_v11  ;;  %v2371_v36 = vmul.f32 %v9026_v19, %v7488_v57  ;;  %v2372_v11 = vmul.f32 %v9033_v29, %v7488_v57  ;;  %v13216_v19 = vld [vmem:[#allocation125_spill] sm:$0xff]  ;;  %v13218_v29 = vld [vmem:[#allocation102_spill] sm:$0xff] }
 0x2e4   :  { %v2951_v24 = vmul.f32 %v13218_v29, %v7628_v53  ;;  %v9166_v29 = vld [vmem:[%s12446_s1 + $0x80] sm:$0xff] }
 0x2e5   :  { %13212 = vst [vmem:[#allocation193_spill] sm:$0xff] %v9088_v20  ;;  %v3706_v2 = vadd.f32 %v9088_v20, %v2982_v61  ;;  %v9092_v44 = vadd.f32 %v3514_v3, %v2982_v61  ;;  %v2427_v17 = vpop.permute.xlu1 %2426  ;;  %v2692_v3 = vmul.f32 %v8693_v13, %v7613_v42 }
 0x2e6   :  { %2298 = vperm.xlu1 %6172, %v9097_v12  }
 0x2e7   :  { %13213 = vst [vmem:[#allocation194_spill] sm:$0xff] %v9092_v44  ;;  %v6423_v38 = vpop.eup %6422  ;;  %v3735_v40 = vpack.c.bf16 %v3706_v2, %v3705_v55  ;;  %v9121_v55 = vadd.f32 %v2427_v17, %v2372_v11  ;;  %v9125_v2 = vadd.f32 %v13216_v19, %v2371_v36  ;;  %v9136_v17 = vpop.permute.xlu0 %3106 }
 0x2e8   :  { %4506 = vmatprep.subr.bf16.mxu0 %v6423_v38  ;;  %13220 = vst [vmem:[#allocation198_spill] sm:$0xff] %v9136_v17 }
 0x2e9   :  { %6424 = vtanh.bf16 %v3735_v40  ;;  %13215 = vst [vmem:[#allocation196_spill] sm:$0xff] %v9121_v55  ;;  %13217 = vst [vmem:[#allocation125_spill] sm:$0xff] %v9125_v2  ;;  %v2724_v20 = vadd.f32 %v2692_v3, %v9121_v55 }
 0x2ea   :  { %6173 = vset.pattern.permute.xlu1 %v13121_v43  ;;  %v9103_v51 = vpop.permute.xlu1 %2582 }
 0x2eb   :  { %13214 = vst [vmem:[#allocation195_spill] sm:$0xff] %v9103_v51  ;;  %2870 = vperm.xlu1 %6173, %v9016_v14   ;;  %v2691_v10 = vmul.f32 %v9103_v51, %v7613_v42 }
 0x2ed   :  { %v2723_v30 = vadd.f32 %v2691_v10, %v9125_v2 }
 0x2ef   :  { %6174 = vset.pattern.permute.xlu1 %v13124_v48  ;;  %v9107_v61 = vpop.permute.xlu1 %2270  ;;  %v2983_v11 = vadd.f32 %v2951_v24, %v2723_v30  ;;  %v3448_v24 = vmul.f32 %v8655_v22, %v9136_v17 }
 0x2f0   :  { %3126 = vperm.xlu1 %6174, %v9004_v63  }
 0x2f3   :  { %v9114_v38 = vpop.permute.xlu1 %2274 }
 0x2f4   :  { %v6425_v40 = vpop.eup %6424  ;;  %6175 = vset.pattern.permute.xlu1 %v13164_v52 }
 0x2f5   :  { %3290 = vperm.xlu1 %6175, %v9004_v63   ;;  %4507 = vmatpush1.bf16.msra.mxu0 %v6425_v40 }
 0x2f8   :  { %v9130_v44 = vpop.permute.xlu1 %2846 }
 0x2f9   :  { %13219 = vst [vmem:[#allocation197_spill] sm:$0xff] %v9130_v44  ;;  %v2952_v1 = vmul.f32 %v9130_v44, %v7628_v53  ;;  %3294 = vperm.xlu1 %6175, %v9016_v14  }
 0x2fb   :  { %v2984_v63 = vadd.f32 %v2952_v1, %v2724_v20  ;;  %v3216_v20 = vmul.f32 %v8899_v39, %v9136_v17 }
 0x2fd   :  { %v3788_v36 = vadd.f32 %v9136_v17, %v2984_v63  ;;  %6176 = vset.pattern.permute.xlu1 %v13103_v31  ;;  %v9140_v40 = vpop.permute.xlu1 %3102 }
 0x2fe   :  { %13221 = vst [vmem:[#allocation199_spill] sm:$0xff] %v9140_v40  ;;  %v3787_v10 = vadd.f32 %v9140_v40, %v2983_v11  ;;  %2458 = vperm.xlu1 %6176, %v9097_v12   ;;  %v3447_v1 = vmul.f32 %v8655_v22, %v9140_v40 }
 0x300   :  { %v3816_v3 = vpack.c.bf16 %v3788_v36, %v3787_v10  ;;  %v3215_v36 = vmul.f32 %v8899_v39, %v9140_v40 }
 0x302   :  { %6426 = vtanh.bf16 %v3816_v3  ;;  %6177 = vset.pattern.permute.xlu1 %v13104_v15  ;;  %v3267_v19 = vpop.permute.xlu1 %3266 }
 0x303   :  { %v3379_v14 = vmul.f32 %v8896_v5, %v3267_v19  ;;  %v3483_v30 = vmul.f32 %v8658_v16, %v3267_v19  ;;  %2614 = vperm.xlu1 %6177, %v9085_v7  }
 0x305   :  { %v3515_v10 = vadd.f32 %v3483_v30, %v3447_v1  ;;  %v9156_v55 = vadd.f32 %v3379_v14, %v3215_v36 }
 0x306   :  { %v3271_v3 = vpop.permute.xlu1 %3270 }
 0x307   :  { %13222 = vst [vmem:[#allocation200_spill] sm:$0xff] %v9156_v55  ;;  %v9158_v2 = vadd.f32 %v3515_v10, %v2983_v11  ;;  %v3380_v44 = vmul.f32 %v8896_v5, %v3271_v3  ;;  %v3484_v19 = vmul.f32 %v8658_v16, %v3271_v3  ;;  %6178 = vset.pattern.permute.xlu1 %v13140_v25  ;;  %v9178_v3 = vld [vmem:[%s12446_s1 + $0x88] sm:$0xff] }
 0x308   :  { %2302 = vperm.xlu1 %6178, %v9166_v29   ;;  %v3707_v14 = vadd.f32 %v9156_v55, %v2983_v11 }
 0x309   :  { %13223 = vst [vmem:[#allocation201_spill] sm:$0xff] %v9158_v2  ;;  %v9169_v17 = vadd.f32 %v3380_v44, %v3216_v20  ;;  %v3516_v1 = vadd.f32 %v3484_v19, %v3448_v24  ;;  %v2373_v20 = vmul.f32 %v9107_v61, %v7488_v57  ;;  %v2374_v24 = vmul.f32 %v9114_v38, %v7488_v57  ;;  %v13229_v38 = vld [vmem:[#allocation103_spill] sm:$0xff] }
 0x30b   :  { %13224 = vst [vmem:[#allocation202_spill] sm:$0xff] %v9169_v17  ;;  %v3708_v30 = vadd.f32 %v9169_v17, %v2984_v63  ;;  %v9173_v36 = vadd.f32 %v3516_v1, %v2984_v63  ;;  %v2435_v10 = vpop.permute.xlu1 %2434  ;;  %v2694_v1 = vmul.f32 %v8708_v50, %v7613_v42  ;;  %v9206_v61 = vadd.f32 %v8305_v45, %v2373_v20 }
 0x30c   :  { %2306 = vperm.xlu1 %6178, %v9178_v3  }
 0x30d   :  { %13225 = vst [vmem:[#allocation203_spill] sm:$0xff] %v9173_v36  ;;  %v6427_v40 = vpop.eup %6426  ;;  %v3736_v41 = vpack.c.bf16 %v3708_v30, %v3707_v14  ;;  %v9202_v14 = vadd.f32 %v2435_v10, %v2374_v24  ;;  %13228 = vst [vmem:[#allocation206_spill] sm:$0xff] %v9206_v61  ;;  %v2953_v30 = vmul.f32 %v13229_v38, %v7628_v53  ;;  %v9217_v10 = vpop.permute.xlu0 %3114  ;;  %v9247_v38 = vld [vmem:[%s12446_s1 + $0x90] sm:$0xff] }
 0x30e   :  { %4508 = vmatprep.subr.bf16.mxu0 %v6427_v40  ;;  %13231 = vst [vmem:[#allocation208_spill] sm:$0xff] %v9217_v10 }
 0x30f   :  { %6428 = vtanh.bf16 %v3736_v41  ;;  %13227 = vst [vmem:[#allocation205_spill] sm:$0xff] %v9202_v14  ;;  %v2726_v36 = vadd.f32 %v2694_v1, %v9202_v14 }
 0x310   :  { %6179 = vset.pattern.permute.xlu1 %v13121_v43  ;;  %v9184_v11 = vpop.permute.xlu1 %2590 }
 0x311   :  { %13226 = vst [vmem:[#allocation204_spill] sm:$0xff] %v9184_v11  ;;  %2878 = vperm.xlu1 %6179, %v9097_v12   ;;  %v2693_v19 = vmul.f32 %v9184_v11, %v7613_v42 }
 0x313   :  { %v2725_v44 = vadd.f32 %v2693_v19, %v9206_v61 }
 0x315   :  { %6180 = vset.pattern.permute.xlu1 %v13124_v48  ;;  %v9188_v63 = vpop.permute.xlu1 %2278  ;;  %v2985_v24 = vadd.f32 %v2953_v30, %v2725_v44  ;;  %v3218_v44 = vmul.f32 %v8899_v39, %v9217_v10  ;;  %v3450_v30 = vmul.f32 %v8655_v22, %v9217_v10 }
 0x316   :  { %3134 = vperm.xlu1 %6180, %v9085_v7  }
 0x319   :  { %v9195_v40 = vpop.permute.xlu1 %2282 }
 0x31a   :  { %v6429_v41 = vpop.eup %6428  ;;  %6181 = vset.pattern.permute.xlu1 %v13164_v52 }
 0x31b   :  { %3298 = vperm.xlu1 %6181, %v9085_v7   ;;  %4509 = vmatpush1.bf16.msra.mxu0 %v6429_v41 }
 0x31e   :  { %v9211_v2 = vpop.permute.xlu1 %2854 }
 0x31f   :  { %13230 = vst [vmem:[#allocation207_spill] sm:$0xff] %v9211_v2  ;;  %v2954_v17 = vmul.f32 %v9211_v2, %v7628_v53  ;;  %3302 = vperm.xlu1 %6181, %v9097_v12  }
 0x321   :  { %v2986_v7 = vadd.f32 %v2954_v17, %v2726_v36 }
 0x323   :  { %v3790_v45 = vadd.f32 %v9217_v10, %v2986_v7  ;;  %6182 = vset.pattern.permute.xlu1 %v13103_v31  ;;  %v9221_v20 = vpop.permute.xlu1 %3110 }
 0x324   :  { %13232 = vst [vmem:[#allocation209_spill] sm:$0xff] %v9221_v20  ;;  %v3789_v41 = vadd.f32 %v9221_v20, %v2985_v24  ;;  %2466 = vperm.xlu1 %6182, %v9178_v3   ;;  %v3449_v17 = vmul.f32 %v8655_v22, %v9221_v20 }
 0x326   :  { %v3817_v19 = vpack.c.bf16 %v3790_v45, %v3789_v41  ;;  %v3217_v45 = vmul.f32 %v8899_v39, %v9221_v20 }
 0x328   :  { %6430 = vtanh.bf16 %v3817_v19  ;;  %6183 = vset.pattern.permute.xlu1 %v13104_v15  ;;  %v3275_v1 = vpop.permute.xlu1 %3274 }
 0x329   :  { %v3381_v55 = vmul.f32 %v8896_v5, %v3275_v1  ;;  %v3485_v36 = vmul.f32 %v8658_v16, %v3275_v1  ;;  %2622 = vperm.xlu1 %6183, %v9166_v29  }
 0x32b   :  { %v3517_v41 = vadd.f32 %v3485_v36, %v3449_v17  ;;  %v9237_v14 = vadd.f32 %v3381_v55, %v3217_v45 }
 0x32c   :  { %v3279_v19 = vpop.permute.xlu1 %3278 }
 0x32d   :  { %13233 = vst [vmem:[#allocation210_spill] sm:$0xff] %v9237_v14  ;;  %v9239_v61 = vadd.f32 %v3517_v41, %v2985_v24  ;;  %v3382_v2 = vmul.f32 %v8896_v5, %v3279_v19  ;;  %v3486_v1 = vmul.f32 %v8658_v16, %v3279_v19  ;;  %6184 = vset.pattern.permute.xlu1 %v13140_v25  ;;  %v9259_v19 = vld [vmem:[%s12446_s1 + $0x98] sm:$0xff] }
 0x32e   :  { %2310 = vperm.xlu1 %6184, %v9247_v38   ;;  %v3709_v55 = vadd.f32 %v9237_v14, %v2985_v24 }
 0x32f   :  { %13234 = vst [vmem:[#allocation211_spill] sm:$0xff] %v9239_v61  ;;  %v9250_v10 = vadd.f32 %v3382_v2, %v3218_v44  ;;  %v3518_v17 = vadd.f32 %v3486_v1, %v3450_v30  ;;  %v2375_v44 = vmul.f32 %v9188_v63, %v7488_v57  ;;  %v2376_v30 = vmul.f32 %v9195_v40, %v7488_v57  ;;  %v13239_v63 = vld [vmem:[#allocation127_spill] sm:$0xff]  ;;  %v6243_v40 = vld [vmem:[%s12447_s2 + $0x14] ss:$8 sps:$4 sm:$0xff]   ;;  %v6245_v2 = vld [vmem:[%s12447_s2 + $0x10] ss:$8 sps:$4 sm:$0xff]  }
 0x330   :  { %v13241_v61 = vld [vmem:[#allocation105_spill] sm:$0xff]  ;;  %1536 = vmatprep.mubr.bf16.mxu0 %v6243_v40 }
 0x331   :  { %13235 = vst [vmem:[#allocation212_spill] sm:$0xff] %v9250_v10  ;;  %v3710_v36 = vadd.f32 %v9250_v10, %v2986_v7  ;;  %v9254_v45 = vadd.f32 %v3518_v17, %v2986_v7  ;;  %v2443_v41 = vpop.permute.xlu1 %2442  ;;  %v2696_v17 = vmul.f32 %v8725_v32, %v7613_v42  ;;  %1537 = vmatmul.mubr.bf16.gmra.mrb[4].mxu0 %v6245_v2  ;;  %v6248_v2 = vld [vmem:[%s12447_s2 + $0x20] ss:$8 sps:$4 sm:$0xff]  }
 0x332   :  { %2314 = vperm.xlu1 %6184, %v9259_v19  }
 0x333   :  { %13236 = vst [vmem:[#allocation213_spill] sm:$0xff] %v9254_v45  ;;  %v6431_v20 = vpop.eup %6430  ;;  %v3737_v8 = vpack.c.bf16 %v3710_v36, %v3709_v55  ;;  %v9283_v55 = vadd.f32 %v2443_v41, %v2376_v30  ;;  %v9287_v36 = vadd.f32 %v13239_v63, %v2375_v44  ;;  %v2955_v45 = vmul.f32 %v13241_v61, %v7628_v53 }
 0x334   :  { %4510 = vmatprep.subr.bf16.mxu0 %v6431_v20 }
 0x335   :  { %6432 = vtanh.bf16 %v3737_v8  ;;  %13238 = vst [vmem:[#allocation215_spill] sm:$0xff] %v9283_v55  ;;  %13240 = vst [vmem:[#allocation127_spill] sm:$0xff] %v9287_v36 }
 0x336   :  { %6185 = vset.pattern.permute.xlu1 %v13121_v43  ;;  %v9265_v24 = vpop.permute.xlu1 %2598 }
 0x337   :  { %13237 = vst [vmem:[#allocation214_spill] sm:$0xff] %v9265_v24  ;;  %2886 = vperm.xlu1 %6185, %v9178_v3   ;;  %v2695_v1 = vmul.f32 %v9265_v24, %v7613_v42 }
 0x339   :  { %v2727_v41 = vadd.f32 %v2695_v1, %v9287_v36 }
 0x33b   :  { %6186 = vset.pattern.permute.xlu1 %v13124_v48  ;;  %v9269_v7 = vpop.permute.xlu1 %2286  ;;  %v2987_v10 = vadd.f32 %v2955_v45, %v2727_v41 }
 0x33c   :  { %3142 = vperm.xlu1 %6186, %v9166_v29  }
 0x33f   :  { %v9276_v20 = vpop.permute.xlu1 %2290 }
 0x340   :  { %v6433_v8 = vpop.eup %6432  ;;  %6187 = vset.pattern.permute.xlu1 %v13164_v52 }
 0x341   :  { %3306 = vperm.xlu1 %6187, %v9166_v29   ;;  %4511 = vmatpush1.bf16.msra.mxu0 %v6433_v8  ;;  %v2728_v29 = vadd.f32 %v2696_v17, %v9283_v55  ;;  %v9304_v8 = vpop.permute.xlu0 %3122  ;;  %v6246_v17 = vld [vmem:[%s12447_s2 + $0x24] ss:$8 sps:$4 sm:$0xff]  }
 0x342   :  { %13243 = vst [vmem:[#allocation217_spill] sm:$0xff] %v9304_v8  ;;  %1546 = vmatprep.mubr.bf16.mxu0 %v6246_v17  ;;  %v3220_v36 = vmul.f32 %v8899_v39, %v9304_v8 }
 0x343   :  { %1547 = vmatmul.mubr.bf16.gmra.mrb[8].mxu0 %v6248_v2 }
 0x344   :  { %v9298_v30 = vpop.permute.xlu1 %2862 }
 0x345   :  { %13242 = vst [vmem:[#allocation216_spill] sm:$0xff] %v9298_v30  ;;  %v2956_v44 = vmul.f32 %v9298_v30, %v7628_v53  ;;  %3310 = vperm.xlu1 %6187, %v9178_v3  }
 0x347   :  { %v2988_v63 = vadd.f32 %v2956_v44, %v2728_v29 }
 0x349   :  { %v3792_v14 = vadd.f32 %v9304_v8, %v2988_v63  ;;  %6188 = vset.pattern.permute.xlu1 %v13103_v31  ;;  %v9308_v1 = vpop.permute.xlu1 %3118 }
 0x34a   :  { %13244 = vst [vmem:[#allocation218_spill] sm:$0xff] %v9308_v1  ;;  %v3791_v40 = vadd.f32 %v9308_v1, %v2987_v10  ;;  %2474 = vperm.xlu1 %6188, %v9259_v19   ;;  %v3451_v44 = vmul.f32 %v8655_v22, %v9308_v1 }
 0x34c   :  { %v3818_v29 = vpack.c.bf16 %v3792_v14, %v3791_v40  ;;  %v3452_v14 = vmul.f32 %v8655_v22, %v9304_v8  ;;  %v3219_v40 = vmul.f32 %v8899_v39, %v9308_v1  ;;  %v6251_v8 = vld [vmem:[%s12447_s2 + $0x30] ss:$8 sps:$4 sm:$0xff]  }
 0x34e   :  { %6434 = vtanh.bf16 %v3818_v29  ;;  %6189 = vset.pattern.permute.xlu1 %v13104_v15  ;;  %v3283_v45 = vpop.permute.xlu1 %3282  ;;  %v6249_v29 = vld [vmem:[%s12447_s2 + $0x34] ss:$8 sps:$4 sm:$0xff]  }
 0x34f   :  { %v3383_v41 = vmul.f32 %v8896_v5, %v3283_v45  ;;  %v3487_v55 = vmul.f32 %v8658_v16, %v3283_v45  ;;  %2630 = vperm.xlu1 %6189, %v9247_v38   ;;  %1556 = vmatprep.mubr.bf16.mxu0 %v6249_v29 }
 0x350   :  { %1557 = vmatmul.mubr.bf16.gmra.mrb[12].mxu0 %v6251_v8 }
 0x351   :  { %v3519_v17 = vadd.f32 %v3487_v55, %v3451_v44  ;;  %v9333_v30 = vadd.f32 %v3383_v41, %v3219_v40  ;;  %v9346_v55 = vld [vmem:[%s12446_s1 + $0xa0] sm:$0xff] }
 0x352   :  { %v3287_v2 = vpop.permute.xlu1 %3286 }
 0x353   :  { %13245 = vst [vmem:[#allocation219_spill] sm:$0xff] %v9333_v30  ;;  %v9335_v45 = vadd.f32 %v3519_v17, %v2987_v10  ;;  %v3384_v61 = vmul.f32 %v8896_v5, %v3287_v2  ;;  %v3488_v60 = vmul.f32 %v8658_v16, %v3287_v2  ;;  %6190 = vset.pattern.permute.xlu1 %v13140_v25 }
 0x354   :  { %2318 = vperm.xlu1 %6190, %v9346_v55   ;;  %v3711_v40 = vadd.f32 %v9333_v30, %v2987_v10  ;;  %v6254_v10 = vld [vmem:[%s12447_s2 + $0x40] ss:$8 sps:$4 sm:$0xff]  }
 0x355   :  { %13246 = vst [vmem:[#allocation220_spill] sm:$0xff] %v9335_v45  ;;  %v9349_v41 = vadd.f32 %v3384_v61, %v3220_v36  ;;  %v3520_v44 = vadd.f32 %v3488_v60, %v3452_v14  ;;  %v6252_v61 = vld [vmem:[%s12447_s2 + $0x44] ss:$8 sps:$4 sm:$0xff]   ;;  %v2377_v14 = vmul.f32 %v9269_v7, %v7488_v57 }
 0x356   :  { %1566 = vmatprep.mubr.bf16.mxu0 %v6252_v61  ;;  %v2698_v61 = vmul.f32 %v8747_v28, %v7613_v42  ;;  %v13251_v7 = vld [vmem:[#allocation23_spill] sm:$0xff]  ;;  %v9469_v28 = vld [vmem:[%s12446_s1 + $0xb8] sm:$0xff] }
 0x357   :  { %13247 = vst [vmem:[#allocation221_spill] sm:$0xff] %v9349_v41  ;;  %v3712_v17 = vadd.f32 %v9349_v41, %v2988_v63  ;;  %v9353_v2 = vadd.f32 %v3520_v44, %v2988_v63  ;;  %v2451_v1 = vpop.permute.xlu1 %2450  ;;  %v6257_v63 = vld [vmem:[%s12447_s2 + $0x50] ss:$8 sps:$4 sm:$0xff]   ;;  %v2378_v44 = vmul.f32 %v9276_v20, %v7488_v57  ;;  %v13253_v20 = vld [vmem:[#allocation106_spill] sm:$0xff] }
 0x358   :  { %2322 = vperm.xlu1 %6190, %v9358_v37   ;;  %1567 = vmatmul.mubr.bf16.gmra.mrb[16].mxu0 %v6254_v10 }
 0x359   :  { %13248 = vst [vmem:[#allocation222_spill] sm:$0xff] %v9353_v2  ;;  %v6435_v58 = vpop.eup %6434  ;;  %v3738_v29 = vpack.c.bf16 %v3712_v17, %v3711_v40  ;;  %v9394_v10 = vadd.f32 %v2451_v1, %v2378_v44  ;;  %v6258_v2 = vld [vmem:[%s12447_s2 + $0x64] ss:$8 sps:$4 sm:$0xff]   ;;  %v9415_v44 = vpop.permute.xlu0 %3130 }
 0x35a   :  { %4512 = vmatprep.subr.bf16.mxu0 %v6435_v58  ;;  %v6255_v58 = vld [vmem:[%s12447_s2 + $0x54] ss:$8 sps:$4 sm:$0xff]   ;;  %13255 = vst [vmem:[#allocation226_spill] sm:$0xff] %v9415_v44 }
 0x35b   :  { %6436 = vtanh.bf16 %v3738_v29  ;;  %1576 = vmatprep.mubr.bf16.mxu0 %v6255_v58  ;;  %13250 = vst [vmem:[#allocation224_spill] sm:$0xff] %v9394_v10  ;;  %v9398_v58 = vadd.f32 %v13251_v7, %v2377_v14  ;;  %v2730_v1 = vadd.f32 %v2698_v61, %v9394_v10  ;;  %v6260_v14 = vld [vmem:[%s12447_s2 + $0x60] ss:$8 sps:$4 sm:$0xff]   ;;  %v6261_v10 = vld [vmem:[%s12447_s2 + $0x74] ss:$8 sps:$4 sm:$0xff]  }
 0x35c   :  { %6191 = vset.pattern.permute.xlu1 %v13121_v43  ;;  %v9370_v36 = vpop.permute.xlu1 %2606 }
 0x35d   :  { %13249 = vst [vmem:[#allocation223_spill] sm:$0xff] %v9370_v36  ;;  %2894 = vperm.xlu1 %6191, %v9259_v19   ;;  %v2697_v29 = vmul.f32 %v9370_v36, %v7613_v42  ;;  %13252 = vst [vmem:[#allocation23_spill] sm:$0xff] %v9398_v58 }
 0x35f   :  { %v2729_v60 = vadd.f32 %v2697_v29, %v9398_v58 }
 0x360   :  { %1577 = vmatmul.mubr.bf16.gmra.mrb[20].mxu0 %v6257_v63  ;;  %v2957_v63 = vmul.f32 %v13253_v20, %v7628_v53 }
 0x361   :  { %6192 = vset.pattern.permute.xlu1 %v13124_v48  ;;  %v9374_v8 = vpop.permute.xlu1 %2294  ;;  %1586 = vmatprep.mubr.bf16.mxu0 %v6258_v2  ;;  %v6263_v2 = vld [vmem:[%s12447_s2 + $0x70] ss:$8 sps:$4 sm:$0xff]  }
 0x362   :  { %3150 = vperm.xlu1 %6192, %v9247_v38   ;;  %v2989_v29 = vadd.f32 %v2957_v63, %v2729_v60 }
 0x365   :  { %v9387_v40 = vpop.permute.xlu1 %2298 }
 0x366   :  { %v6437_v17 = vpop.eup %6436  ;;  %6193 = vset.pattern.permute.xlu1 %v13164_v52 }
 0x367   :  { %3314 = vperm.xlu1 %6193, %v9247_v38   ;;  %4513 = vmatpush1.bf16.msra.mxu0 %v6437_v17 }
 0x368   :  { %1587 = vmatmul.mubr.bf16.gmra.mrb[24].mxu0 %v6260_v14 }
 0x369   :  { %1596 = vmatprep.mubr.bf16.mxu0 %v6261_v10 }
 0x36a   :  { %v9403_v45 = vpop.permute.xlu1 %2870 }
 0x36b   :  { %13254 = vst [vmem:[#allocation225_spill] sm:$0xff] %v9403_v45  ;;  %v2958_v38 = vmul.f32 %v9403_v45, %v7628_v53  ;;  %3318 = vperm.xlu1 %6193, %v9259_v19  }
 0x36d   :  { %v2990_v17 = vadd.f32 %v2958_v38, %v2730_v1  ;;  %v3222_v38 = vmul.f32 %v8899_v39, %v9415_v44 }
 0x36f   :  { %v3794_v7 = vadd.f32 %v9415_v44, %v2990_v17  ;;  %6194 = vset.pattern.permute.xlu1 %v13103_v31  ;;  %v9419_v61 = vpop.permute.xlu1 %3126 }
 0x370   :  { %13256 = vst [vmem:[#allocation227_spill] sm:$0xff] %v9419_v61  ;;  %v3793_v41 = vadd.f32 %v9419_v61, %v2989_v29  ;;  %2482 = vperm.xlu1 %6194, %v9358_v37   ;;  %v3453_v1 = vmul.f32 %v8655_v22, %v9419_v61  ;;  %1597 = vmatmul.mubr.bf16.gmra.mrb[28].mxu0 %v6263_v2  ;;  %v9451_v2 = vld [vmem:[%s12446_s1 + $0xb0] sm:$0xff] }
 0x371   :  { %v3221_v14 = vmul.f32 %v8899_v39, %v9419_v61 }
 0x372   :  { %v3819_v30 = vpack.c.bf16 %v3794_v7, %v3793_v41 }
 0x374   :  { %6438 = vtanh.bf16 %v3819_v30  ;;  %6195 = vset.pattern.permute.xlu1 %v13104_v15  ;;  %v3291_v60 = vpop.permute.xlu1 %3290  ;;  %v3454_v30 = vmul.f32 %v8655_v22, %v9415_v44 }
 0x375   :  { %v3385_v63 = vmul.f32 %v8896_v5, %v3291_v60  ;;  %v3489_v41 = vmul.f32 %v8658_v16, %v3291_v60  ;;  %2638 = vperm.xlu1 %6195, %v9346_v55  }
 0x377   :  { %v3521_v10 = vadd.f32 %v3489_v41, %v3453_v1  ;;  %v9441_v58 = vadd.f32 %v3385_v63, %v3221_v14  ;;  %v6264_v63 = vld [vmem:[%s12447_s2 + $0x84] ss:$8 sps:$4 sm:$0xff]   ;;  %v6266_v14 = vld [vmem:[%s12447_s2 + $0x80] ss:$8 sps:$4 sm:$0xff]  }
 0x378   :  { %v3295_v7 = vpop.permute.xlu1 %3294  ;;  %1606 = vmatprep.mubr.bf16.mxu0 %v6264_v63 }
 0x379   :  { %13257 = vst [vmem:[#allocation228_spill] sm:$0xff] %v9441_v58  ;;  %v9443_v45 = vadd.f32 %v3521_v10, %v2989_v29  ;;  %v3386_v60 = vmul.f32 %v8896_v5, %v3295_v7  ;;  %v3490_v20 = vmul.f32 %v8658_v16, %v3295_v7  ;;  %6196 = vset.pattern.permute.xlu1 %v13140_v25 }
 0x37a   :  { %2326 = vperm.xlu1 %6196, %v9451_v2   ;;  %v3713_v10 = vadd.f32 %v9441_v58, %v2989_v29  ;;  %1607 = vmatmul.mubr.bf16.gmra.mrb[32].mxu0 %v6266_v14  ;;  %v6267_v29 = vld [vmem:[%s12447_s2 + $0x94] ss:$8 sps:$4 sm:$0xff]   ;;  %v6270_v14 = vld [vmem:[%s12447_s2 + $0xa4] ss:$8 sps:$4 sm:$0xff]  }
 0x37b   :  { %13258 = vst [vmem:[#allocation229_spill] sm:$0xff] %v9443_v45  ;;  %v9457_v1 = vadd.f32 %v3386_v60, %v3222_v38  ;;  %v3522_v41 = vadd.f32 %v3490_v20, %v3454_v30  ;;  %v6269_v60 = vld [vmem:[%s12447_s2 + $0x90] ss:$8 sps:$4 sm:$0xff]   ;;  %1616 = vmatprep.mubr.bf16.mxu0 %v6267_v29 }
 0x37c   :  { %v13265_v45 = vld [vmem:[#allocation17_spill] sm:$0xff] }
 0x37d   :  { %13259 = vst [vmem:[#allocation230_spill] sm:$0xff] %v9457_v1  ;;  %v3714_v7 = vadd.f32 %v9457_v1, %v2990_v17  ;;  %v9464_v44 = vadd.f32 %v3522_v41, %v2990_v17  ;;  %v2459_v61 = vpop.permute.xlu1 %2458  ;;  %v2379_v41 = vmul.f32 %v9374_v8, %v7488_v57  ;;  %v2700_v8 = vmul.f32 %v8763_v46, %v7613_v42 }
 0x37e   :  { %2330 = vperm.xlu1 %6196, %v9469_v28  }
 0x37f   :  { %13260 = vst [vmem:[#allocation231_spill] sm:$0xff] %v9464_v44  ;;  %v6439_v20 = vpop.eup %6438  ;;  %v3739_v38 = vpack.c.bf16 %v3714_v7, %v3713_v10  ;;  %v2380_v10 = vmul.f32 %v9387_v40, %v7488_v57  ;;  %v13263_v40 = vld [vmem:[#allocation131_spill] sm:$0xff]  ;;  %v2959_v44 = vmul.f32 %v13265_v45, %v7628_v53 }
 0x380   :  { %4514 = vmatprep.subr.bf16.mxu0 %v6439_v20  ;;  %v6272_v20 = vld [vmem:[%s12447_s2 + $0xa0] ss:$8 sps:$4 sm:$0xff]   ;;  %v9509_v30 = vadd.f32 %v13263_v40, %v2379_v41  ;;  %v6273_v41 = vld [vmem:[%s12447_s2 + $0xb4] ss:$8 sps:$4 sm:$0xff]  }
 0x381   :  { %6440 = vtanh.bf16 %v3739_v38 }
 0x382   :  { %6197 = vset.pattern.permute.xlu1 %v13121_v43  ;;  %v9475_v17 = vpop.permute.xlu1 %2614  ;;  %1617 = vmatmul.mubr.bf16.gmra.mrb[36].mxu0 %v6269_v60  ;;  %v9505_v60 = vadd.f32 %v2459_v61, %v2380_v10  ;;  %13264 = vst [vmem:[#allocation131_spill] sm:$0xff] %v9509_v30 }
 0x383   :  { %13261 = vst [vmem:[#allocation232_spill] sm:$0xff] %v9475_v17  ;;  %2902 = vperm.xlu1 %6197, %v9358_v37   ;;  %v2699_v29 = vmul.f32 %v9475_v17, %v7613_v42  ;;  %1626 = vmatprep.mubr.bf16.mxu0 %v6270_v14 }
 0x384   :  { %13262 = vst [vmem:[#allocation233_spill] sm:$0xff] %v9505_v60  ;;  %v2732_v14 = vadd.f32 %v2700_v8, %v9505_v60 }
 0x385   :  { %v2731_v1 = vadd.f32 %v2699_v29, %v9509_v30 }
 0x387   :  { %6198 = vset.pattern.permute.xlu1 %v13124_v48  ;;  %v9485_v63 = vpop.permute.xlu1 %2302 }
 0x388   :  { %3158 = vperm.xlu1 %6198, %v9346_v55  }
 0x38a   :  { %1627 = vmatmul.mubr.bf16.gmra.mrb[40].mxu0 %v6272_v20  ;;  %v6275_v20 = vld [vmem:[%s12447_s2 + $0xb0] ss:$8 sps:$4 sm:$0xff]  }
 0x38b   :  { %v9495_v7 = vpop.permute.xlu1 %2306  ;;  %1636 = vmatprep.mubr.bf16.mxu0 %v6273_v41 }
 0x38c   :  { %v6441_v38 = vpop.eup %6440  ;;  %6199 = vset.pattern.permute.xlu1 %v13164_v52 }
 0x38d   :  { %3322 = vperm.xlu1 %6199, %v9346_v55   ;;  %4515 = vmatpush1.bf16.msra.mxu0 %v6441_v38  ;;  %v9520_v55 = vpop.permute.xlu0 %3138  ;;  %v2991_v38 = vadd.f32 %v2959_v44, %v2731_v1  ;;  %v6276_v44 = vld [vmem:[%s12447_s2 + $0xc4] ss:$8 sps:$4 sm:$0xff]  }
 0x38e   :  { %13267 = vst [vmem:[#allocation235_spill] sm:$0xff] %v9520_v55 }
 0x390   :  { %v9514_v58 = vpop.permute.xlu1 %2878 }
 0x391   :  { %13266 = vst [vmem:[#allocation234_spill] sm:$0xff] %v9514_v58  ;;  %v2960_v61 = vmul.f32 %v9514_v58, %v7628_v53  ;;  %3326 = vperm.xlu1 %6199, %v9358_v37  }
 0x392   :  { %1637 = vmatmul.mubr.bf16.gmra.mrb[44].mxu0 %v6275_v20  ;;  %v3224_v20 = vmul.f32 %v8899_v39, %v9520_v55 }
 0x393   :  { %v2992_v10 = vadd.f32 %v2960_v61, %v2732_v14  ;;  %1646 = vmatprep.mubr.bf16.mxu0 %v6276_v44 }
 0x395   :  { %v3796_v29 = vadd.f32 %v9520_v55, %v2992_v10  ;;  %6200 = vset.pattern.permute.xlu1 %v13103_v31  ;;  %v9530_v8 = vpop.permute.xlu1 %3134 }
 0x396   :  { %13268 = vst [vmem:[#allocation236_spill] sm:$0xff] %v9530_v8  ;;  %v3795_v40 = vadd.f32 %v9530_v8, %v2991_v38  ;;  %2490 = vperm.xlu1 %6200, %v9469_v28   ;;  %v3455_v61 = vmul.f32 %v8655_v22, %v9530_v8 }
 0x398   :  { %v3820_v58 = vpack.c.bf16 %v3796_v29, %v3795_v40  ;;  %v3456_v29 = vmul.f32 %v8655_v22, %v9520_v55  ;;  %v3223_v40 = vmul.f32 %v8899_v39, %v9530_v8  ;;  %v9562_v55 = vld [vmem:[%s12446_s1 + $0xc0] sm:$0xff]  ;;  %v6281_v8 = vld [vmem:[%s12447_s2 + $0xd0] ss:$8 sps:$4 sm:$0xff]  }
 0x39a   :  { %6442 = vtanh.bf16 %v3820_v58  ;;  %6201 = vset.pattern.permute.xlu1 %v13104_v15  ;;  %v3299_v14 = vpop.permute.xlu1 %3298  ;;  %v6278_v58 = vld [vmem:[%s12447_s2 + $0xc0] ss:$8 sps:$4 sm:$0xff]  }
 0x39b   :  { %v3387_v1 = vmul.f32 %v8896_v5, %v3299_v14  ;;  %v3491_v41 = vmul.f32 %v8658_v16, %v3299_v14  ;;  %2646 = vperm.xlu1 %6201, %v9451_v2   ;;  %1647 = vmatmul.mubr.bf16.gmra.mrb[48].mxu0 %v6278_v58 }
 0x39d   :  { %v3523_v45 = vadd.f32 %v3491_v41, %v3455_v61  ;;  %v9552_v14 = vadd.f32 %v3387_v1, %v3223_v40 }
 0x39e   :  { %v3303_v60 = vpop.permute.xlu1 %3302 }
 0x39f   :  { %13269 = vst [vmem:[#allocation237_spill] sm:$0xff] %v9552_v14  ;;  %v9554_v30 = vadd.f32 %v3523_v45, %v2991_v38  ;;  %v3388_v46 = vmul.f32 %v8896_v5, %v3303_v60  ;;  %v3492_v44 = vmul.f32 %v8658_v16, %v3303_v60  ;;  %6202 = vset.pattern.permute.xlu1 %v13140_v25  ;;  %v6279_v45 = vld [vmem:[%s12447_s2 + $0xd4] ss:$8 sps:$4 sm:$0xff]  }
 0x3a0   :  { %2334 = vperm.xlu1 %6202, %v9562_v55   ;;  %v3715_v1 = vadd.f32 %v9552_v14, %v2991_v38  ;;  %1656 = vmatprep.mubr.bf16.mxu0 %v6279_v45 }
 0x3a1   :  { %13270 = vst [vmem:[#allocation238_spill] sm:$0xff] %v9554_v30  ;;  %v9565_v61 = vadd.f32 %v3388_v46, %v3224_v20  ;;  %v3524_v41 = vadd.f32 %v3492_v44, %v3456_v29  ;;  %v9580_v46 = vld [vmem:[%s12446_s1 + $0xc8] sm:$0xff] }
 0x3a2   :  { %v6282_v44 = vld [vmem:[%s12447_s2 + $0xe4] ss:$8 sps:$4 sm:$0xff]  }
 0x3a3   :  { %13271 = vst [vmem:[#allocation239_spill] sm:$0xff] %v9565_v61  ;;  %v3716_v60 = vadd.f32 %v9565_v61, %v2992_v10  ;;  %v9572_v58 = vadd.f32 %v3524_v41, %v2992_v10  ;;  %v2467_v40 = vpop.permute.xlu1 %2466  ;;  %1657 = vmatmul.mubr.bf16.gmra.mrb[52].mxu0 %v6281_v8  ;;  %v6284_v41 = vld [vmem:[%s12447_s2 + $0xe0] ss:$8 sps:$4 sm:$0xff]   ;;  %v2381_v8 = vmul.f32 %v9485_v63, %v7488_v57  ;;  %v6287_v63 = vld [vmem:[%s12447_s2 + $0xf0] ss:$8 sps:$4 sm:$0xff]  }
 0x3a4   :  { %2338 = vperm.xlu1 %6202, %v9580_v46   ;;  %1666 = vmatprep.mubr.bf16.mxu0 %v6282_v44  ;;  %v6285_v44 = vld [vmem:[%s12447_s2 + $0xf4] ss:$8 sps:$4 sm:$0xff]  }
 0x3a5   :  { %13272 = vst [vmem:[#allocation240_spill] sm:$0xff] %v9572_v58  ;;  %v6443_v20 = vpop.eup %6442  ;;  %v3740_v29 = vpack.c.bf16 %v3716_v60, %v3715_v1  ;;  %v2382_v1 = vmul.f32 %v9495_v7, %v7488_v57  ;;  %v13275_v7 = vld [vmem:[#allocation132_spill] sm:$0xff] }
 0x3a6   :  { %4516 = vmatprep.subr.bf16.mxu0 %v6443_v20  ;;  %v9620_v30 = vadd.f32 %v13275_v7, %v2381_v8  ;;  %v13277_v58 = vld [vmem:[#allocation16_spill] sm:$0xff] }
 0x3a7   :  { %6444 = vtanh.bf16 %v3740_v29  ;;  %v9613_v38 = vadd.f32 %v2467_v40, %v2382_v1  ;;  %v2961_v61 = vmul.f32 %v13277_v58, %v7628_v53  ;;  %v9631_v1 = vpop.permute.xlu0 %3146 }
 0x3a8   :  { %6203 = vset.pattern.permute.xlu1 %v13121_v43  ;;  %v9586_v10 = vpop.permute.xlu1 %2622  ;;  %13276 = vst [vmem:[#allocation132_spill] sm:$0xff] %v9620_v30  ;;  %13279 = vst [vmem:[#allocation244_spill] sm:$0xff] %v9631_v1 }
 0x3a9   :  { %13273 = vst [vmem:[#allocation241_spill] sm:$0xff] %v9586_v10  ;;  %2910 = vperm.xlu1 %6203, %v9469_v28   ;;  %v2701_v29 = vmul.f32 %v9586_v10, %v7613_v42  ;;  %13274 = vst [vmem:[#allocation242_spill] sm:$0xff] %v9613_v38 }
 0x3ab   :  { %1667 = vmatmul.mubr.bf16.gmra.mrb[56].mxu0 %v6284_v41  ;;  %v2702_v41 = vmul.f32 %v8771_v23, %v7613_v42  ;;  %v2733_v14 = vadd.f32 %v2701_v29, %v9620_v30  ;;  %v9661_v23 = vld [vmem:[%s12446_s1 + $0xd0] sm:$0xff] }
 0x3ac   :  { %1676 = vmatprep.mubr.bf16.mxu0 %v6285_v44 }
 0x3ad   :  { %6204 = vset.pattern.permute.xlu1 %v13124_v48  ;;  %v9596_v45 = vpop.permute.xlu1 %2310  ;;  %v2734_v40 = vadd.f32 %v2702_v41, %v9613_v38 }
 0x3ae   :  { %3166 = vperm.xlu1 %6204, %v9451_v2  }
 0x3b1   :  { %v9603_v60 = vpop.permute.xlu1 %2314 }
 0x3b2   :  { %v6445_v20 = vpop.eup %6444  ;;  %6205 = vset.pattern.permute.xlu1 %v13164_v52 }
 0x3b3   :  { %3330 = vperm.xlu1 %6205, %v9451_v2   ;;  %4517 = vmatpush1.bf16.msra.mxu0 %v6445_v20  ;;  %v2993_v20 = vadd.f32 %v2961_v61, %v2733_v14 }
 0x3b4   :  { %1677 = vmatmul.mubr.bf16.gmra.mrb[60].mxu0 %v6287_v63 }
 0x3b5   :  { %4534 = vmatprep.mubr.bf16.mxu0 %v6290_v0 }
 0x3b6   :  { %v9625_v10 = vpop.permute.xlu1 %2886 }
 0x3b7   :  { %13278 = vst [vmem:[#allocation243_spill] sm:$0xff] %v9625_v10  ;;  %v2962_v2 = vmul.f32 %v9625_v10, %v7628_v53  ;;  %3334 = vperm.xlu1 %6205, %v9469_v28  }
 0x3b9   :  { %v2994_v8 = vadd.f32 %v2962_v2, %v2734_v40  ;;  %v3226_v40 = vmul.f32 %v8899_v39, %v9631_v1  ;;  %v3458_v2 = vmul.f32 %v8655_v22, %v9631_v1 }
 0x3bb   :  { %v3798_v44 = vadd.f32 %v9631_v1, %v2994_v8  ;;  %6206 = vset.pattern.permute.xlu1 %v13103_v31  ;;  %v9635_v7 = vpop.permute.xlu1 %3142 }
 0x3bc   :  { %13280 = vst [vmem:[#allocation245_spill] sm:$0xff] %v9635_v7  ;;  %v3797_v29 = vadd.f32 %v9635_v7, %v2993_v20  ;;  %2498 = vperm.xlu1 %6206, %v9580_v46   ;;  %v3457_v14 = vmul.f32 %v8655_v22, %v9635_v7 }
 0x3be   :  { %v3821_v41 = vpack.c.bf16 %v3798_v44, %v3797_v29  ;;  %v3225_v44 = vmul.f32 %v8899_v39, %v9635_v7 }
 0x3c0   :  { %6446 = vtanh.bf16 %v3821_v41  ;;  %6207 = vset.pattern.permute.xlu1 %v13104_v15  ;;  %v3307_v63 = vpop.permute.xlu1 %3306 }
 0x3c1   :  { %v3389_v10 = vmul.f32 %v8896_v5, %v3307_v63  ;;  %v3493_v61 = vmul.f32 %v8658_v16, %v3307_v63  ;;  %2654 = vperm.xlu1 %6207, %v9562_v55  }
 0x3c3   :  { %v3525_v29 = vadd.f32 %v3493_v61, %v3457_v14  ;;  %v9651_v38 = vadd.f32 %v3389_v10, %v3225_v44 }
 0x3c4   :  { %v3311_v41 = vpop.permute.xlu1 %3310 }
 0x3c5   :  { %13281 = vst [vmem:[#allocation246_spill] sm:$0xff] %v9651_v38  ;;  %v9653_v30 = vadd.f32 %v3525_v29, %v2993_v20  ;;  %v3390_v58 = vmul.f32 %v8896_v5, %v3311_v41  ;;  %v3494_v63 = vmul.f32 %v8658_v16, %v3311_v41  ;;  %6208 = vset.pattern.permute.xlu1 %v13140_v25  ;;  %v9673_v41 = vld [vmem:[%s12446_s1 + $0xd8] sm:$0xff] }
 0x3c6   :  { %2342 = vperm.xlu1 %6208, %v9661_v23   ;;  %v3717_v10 = vadd.f32 %v9651_v38, %v2993_v20 }
 0x3c7   :  { %13282 = vst [vmem:[#allocation247_spill] sm:$0xff] %v9653_v30  ;;  %v9664_v1 = vadd.f32 %v3390_v58, %v3226_v40  ;;  %v3526_v14 = vadd.f32 %v3494_v63, %v3458_v2  ;;  %v12696_v40 = vmov 11   ;;  %v9692_v2 = vld [vmem:[%s12446_s1 + $0x28] sm:$0xff]  ;;  %v2383_v63 = vmul.f32 %v9596_v45, %v7488_v57 }
 0x3c8   :  { %6234 = vset.pattern.permute.xlu0 %v12696_v40  ;;  %v9717_v40 = vld [vmem:[%s12446_s1 + $0x48] sm:$0xff]  ;;  %v2704_v45 = vmul.f32 %v8787_v47, %v7613_v42 }
 0x3c9   :  { %13283 = vst [vmem:[#allocation248_spill] sm:$0xff] %v9664_v1  ;;  %v3718_v61 = vadd.f32 %v9664_v1, %v2994_v8  ;;  %v9668_v44 = vadd.f32 %v3526_v14, %v2994_v8  ;;  %v2475_v29 = vpop.permute.xlu1 %2474  ;;  %v9682_v8 = vld [vmem:[%s12446_s1 + $0x10] sm:$0xff]  ;;  %v2384_v14 = vmul.f32 %v9603_v60, %v7488_v57  ;;  %v13287_v60 = vld [vmem:[#allocation134_spill] sm:$0xff]  ;;  %v9748_v47 = vld [vmem:[%s12446_s1 + $0x68] sm:$0xff] }
 0x3ca   :  { %2346 = vperm.xlu1 %6208, %v9673_v41   ;;  %1215 = vperm.xlu0 %6234, %v9682_v8  }
 0x3cb   :  { %13284 = vst [vmem:[#allocation249_spill] sm:$0xff] %v9668_v44  ;;  %v6447_v7 = vpop.eup %6446  ;;  %v3741_v17 = vpack.c.bf16 %v3718_v61, %v3717_v10  ;;  %v9722_v30 = vadd.f32 %v2475_v29, %v2384_v14  ;;  %v9726_v44 = vadd.f32 %v13287_v60, %v2383_v63  ;;  %v13290_v63 = vld [vmem:[#allocation111_spill] sm:$0xff] }
 0x3cc   :  { %4518 = vmatprep.subr.bf16.mxu0 %v6447_v7 }
 0x3cd   :  { %6448 = vtanh.bf16 %v3741_v17  ;;  %v9702_v17 = vld [vmem:[%s12446_s1 + $0x38] sm:$0xff]  ;;  %13286 = vst [vmem:[#allocation251_spill] sm:$0xff] %v9722_v30  ;;  %13288 = vst [vmem:[#allocation134_spill] sm:$0xff] %v9726_v44  ;;  %v2736_v29 = vadd.f32 %v2704_v45, %v9722_v30 }
 0x3ce   :  { %6209 = vset.pattern.permute.xlu1 %v13121_v43  ;;  %v9686_v20 = vpop.permute.xlu1 %2630  ;;  %1227 = vperm.xlu0 %6234, %v9692_v2  }
 0x3cf   :  { %13285 = vst [vmem:[#allocation250_spill] sm:$0xff] %v9686_v20  ;;  %2918 = vperm.xlu1 %6209, %v9580_v46   ;;  %v2703_v58 = vmul.f32 %v9686_v20, %v7613_v42  ;;  %v9734_v20 = vld [vmem:[%s12446_s1 + $0x58] sm:$0xff] }
 0x3d1   :  { %v2735_v1 = vadd.f32 %v2703_v58, %v9726_v44  ;;  %v9743_v58 = vpop.permute.xlu0 %3154 }
 0x3d2   :  { %1235 = vperm.xlu0 %6234, %v9702_v17   ;;  %13291 = vst [vmem:[#allocation253_spill] sm:$0xff] %v9743_v58 }
 0x3d3   :  { %6210 = vset.pattern.permute.xlu1 %v13124_v48  ;;  %v9696_v7 = vpop.permute.xlu1 %2318 }
 0x3d4   :  { %3174 = vperm.xlu1 %6210, %v9562_v55  }
 0x3d6   :  { %1243 = vperm.xlu0 %6234, %v9717_v40  }
 0x3d7   :  { %v9709_v10 = vpop.permute.xlu1 %2322 }
 0x3d8   :  { %v6449_v61 = vpop.eup %6448  ;;  %6211 = vset.pattern.permute.xlu1 %v13164_v52 }
 0x3d9   :  { %3338 = vperm.xlu1 %6211, %v9562_v55   ;;  %4519 = vmatpush1.bf16.msra.mxu0 %v6449_v61  ;;  %v2963_v61 = vmul.f32 %v13290_v63, %v7628_v53 }
 0x3da   :  { %1251 = vperm.xlu0 %6234, %v9734_v20  }
 0x3db   :  { %v2995_v44 = vadd.f32 %v2963_v61, %v2735_v1 }
 0x3dc   :  { %v9729_v38 = vpop.permute.xlu1 %2894 }
 0x3dd   :  { %13289 = vst [vmem:[#allocation252_spill] sm:$0xff] %v9729_v38  ;;  %v2964_v14 = vmul.f32 %v9729_v38, %v7628_v53  ;;  %3342 = vperm.xlu1 %6211, %v9580_v46  }
 0x3de   :  { %1259 = vperm.xlu0 %6234, %v9748_v47  }
 0x3df   :  { %v2996_v60 = vadd.f32 %v2964_v14, %v2736_v29 }
 0x3e1   :  { %v3800_v45 = vadd.f32 %v9743_v58, %v2996_v60  ;;  %6212 = vset.pattern.permute.xlu1 %v13103_v31  ;;  %v9753_v30 = vpop.permute.xlu1 %3150 }
 0x3e2   :  { %13292 = vst [vmem:[#allocation254_spill] sm:$0xff] %v9753_v30  ;;  %v3799_v38 = vadd.f32 %v9753_v30, %v2995_v44  ;;  %2506 = vperm.xlu1 %6212, %v9673_v41   ;;  %1267 = vperm.xlu0 %6234, %v9097_v12   ;;  %v3459_v14 = vmul.f32 %v8655_v22, %v9753_v30 }
 0x3e3   :  { %v3460_v12 = vmul.f32 %v8655_v22, %v9743_v58 }
 0x3e4   :  { %v3822_v63 = vpack.c.bf16 %v3800_v45, %v3799_v38  ;;  %v3228_v38 = vmul.f32 %v8899_v39, %v9743_v58  ;;  %v9794_v58 = vld [vmem:[%s12446_s1 + $0xe8] sm:$0xff] }
 0x3e6   :  { %6450 = vtanh.bf16 %v3822_v63  ;;  %6213 = vset.pattern.permute.xlu1 %v13104_v15  ;;  %v3315_v1 = vpop.permute.xlu1 %3314  ;;  %1275 = vperm.xlu0 %6234, %v9178_v3   ;;  %v3227_v63 = vmul.f32 %v8899_v39, %v9753_v30  ;;  %v9781_v3 = vld [vmem:[%s12446_s1 + $0xe0] sm:$0xff] }
 0x3e7   :  { %v3391_v29 = vmul.f32 %v8896_v5, %v3315_v1  ;;  %v3495_v61 = vmul.f32 %v8658_v16, %v3315_v1  ;;  %2662 = vperm.xlu1 %6213, %v9661_v23  }
 0x3e9   :  { %v3527_v45 = vadd.f32 %v3495_v61, %v3459_v14  ;;  %v9771_v32 = vadd.f32 %v3391_v29, %v3227_v63 }
 0x3ea   :  { %v3319_v36 = vpop.permute.xlu1 %3318  ;;  %1283 = vperm.xlu0 %6234, %v9259_v19  }
 0x3eb   :  { %13293 = vst [vmem:[#allocation255_spill] sm:$0xff] %v9771_v32  ;;  %v9773_v24 = vadd.f32 %v3527_v45, %v2995_v44  ;;  %v3392_v1 = vmul.f32 %v8896_v5, %v3319_v36  ;;  %v3496_v50 = vmul.f32 %v8658_v16, %v3319_v36  ;;  %6214 = vset.pattern.permute.xlu1 %v13140_v25 }
 0x3ec   :  { %2350 = vperm.xlu1 %6214, %v9781_v3   ;;  %v3719_v61 = vadd.f32 %v9771_v32, %v2995_v44 }
 0x3ed   :  { %13294 = vst [vmem:[#allocation256_spill] sm:$0xff] %v9773_v24  ;;  %v9785_v14 = vadd.f32 %v3392_v1, %v3228_v38  ;;  %v3528_v29 = vadd.f32 %v3496_v50, %v3460_v12  ;;  %v2386_v12 = vmul.f32 %v9709_v10, %v7488_v57 }
 0x3ee   :  { %1291 = vperm.xlu0 %6234, %v9358_v37  }
 0x3ef   :  { %13295 = vst [vmem:[#allocation257_spill] sm:$0xff] %v9785_v14  ;;  %v3720_v63 = vadd.f32 %v9785_v14, %v2996_v60  ;;  %v9789_v45 = vadd.f32 %v3528_v29, %v2996_v60  ;;  %v2483_v36 = vpop.permute.xlu1 %2482  ;;  %v2385_v60 = vmul.f32 %v9696_v7, %v7488_v57  ;;  %v2706_v29 = vmul.f32 %v8799_v54, %v7613_v42  ;;  %v13299_v7 = vld [vmem:[#allocation24_spill] sm:$0xff] }
 0x3f0   :  { %2354 = vperm.xlu1 %6214, %v9794_v58  }
 0x3f1   :  { %13296 = vst [vmem:[#allocation258_spill] sm:$0xff] %v9789_v45  ;;  %v6451_v19 = vpop.eup %6450  ;;  %v3742_v38 = vpack.c.bf16 %v3720_v63, %v3719_v61  ;;  %v9822_v61 = vadd.f32 %v2483_v36, %v2386_v12  ;;  %v9826_v63 = vadd.f32 %v13299_v7, %v2385_v60  ;;  %v13302_v36 = vld [vmem:[#allocation42_spill] sm:$0xff]  ;;  %v9843_v60 = vld [vmem:[%s12446_s1 + $0xf8] sm:$0xff] }
 0x3f2   :  { %4520 = vmatprep.subr.bf16.mxu0 %v6451_v19  ;;  %1299 = vperm.xlu0 %6234, %v9469_v28   ;;  %v2965_v12 = vmul.f32 %v13302_v36, %v7628_v53 }
 0x3f3   :  { %6452 = vtanh.bf16 %v3742_v38  ;;  %13298 = vst [vmem:[#allocation260_spill] sm:$0xff] %v9822_v61  ;;  %13300 = vst [vmem:[#allocation24_spill] sm:$0xff] %v9826_v63  ;;  %v2738_v38 = vadd.f32 %v2706_v29, %v9822_v61  ;;  %v9874_v61 = vld [vmem:[%s12446_s1 + $0xf0] sm:$0xff] }
 0x3f4   :  { %6215 = vset.pattern.permute.xlu1 %v13121_v43  ;;  %v9801_v44 = vpop.permute.xlu1 %2638 }
 0x3f5   :  { %13297 = vst [vmem:[#allocation259_spill] sm:$0xff] %v9801_v44  ;;  %2926 = vperm.xlu1 %6215, %v9673_v41  }
 0x3f6   :  { %1307 = vperm.xlu0 %6234, %v9580_v46   ;;  %v2705_v46 = vmul.f32 %v9801_v44, %v7613_v42 }
 0x3f8   :  { %v2737_v10 = vadd.f32 %v2705_v46, %v9826_v63 }
 0x3f9   :  { %6216 = vset.pattern.permute.xlu1 %v13124_v48  ;;  %v9807_v37 = vpop.permute.xlu1 %2326 }
 0x3fa   :  { %3182 = vperm.xlu1 %6216, %v9661_v23   ;;  %1315 = vperm.xlu0 %6234, %v9673_v41   ;;  %v2997_v7 = vadd.f32 %v2965_v12, %v2737_v10 }
 0x3fd   :  { %v9815_v1 = vpop.permute.xlu1 %2330 }
 0x3fe   :  { %v6453_v28 = vpop.eup %6452  ;;  %6217 = vset.pattern.permute.xlu1 %v13164_v52  ;;  %1323 = vperm.xlu0 %6234, %v9794_v58  }
 0x3ff   :  { %3346 = vperm.xlu1 %6217, %v9661_v23   ;;  %4521 = vmatpush1.bf16.msra.mxu0 %v6453_v28  ;;  %v9838_v28 = vpop.permute.xlu0 %3162 }
 0x400   :  { %13303 = vst [vmem:[#allocation262_spill] sm:$0xff] %v9838_v28  ;;  %v3462_v12 = vmul.f32 %v8655_v22, %v9838_v28 }
 0x402   :  { %v9830_v19 = vpop.permute.xlu1 %2902  ;;  %1331 = vperm.xlu0 %6234, %v9843_v60  }
 0x403   :  { %13301 = vst [vmem:[#allocation261_spill] sm:$0xff] %v9830_v19  ;;  %v2966_v50 = vmul.f32 %v9830_v19, %v7628_v53  ;;  %3350 = vperm.xlu1 %6217, %v9673_v41  }
 0x405   :  { %v2998_v46 = vadd.f32 %v2966_v50, %v2738_v38  ;;  %v3230_v38 = vmul.f32 %v8899_v39, %v9838_v28 }
 0x407   :  { %v3802_v29 = vadd.f32 %v9838_v28, %v2998_v46  ;;  %6218 = vset.pattern.permute.xlu1 %v13103_v31  ;;  %v9848_v24 = vpop.permute.xlu1 %3158 }
 0x408   :  { %13304 = vst [vmem:[#allocation263_spill] sm:$0xff] %v9848_v24  ;;  %v3801_v41 = vadd.f32 %v9848_v24, %v2997_v7  ;;  %2514 = vperm.xlu1 %6218, %v9794_v58   ;;  %v3461_v50 = vmul.f32 %v8655_v22, %v9848_v24 }
 0x40a   :  { %v3823_v45 = vpack.c.bf16 %v3802_v29, %v3801_v41 }
 0x40c   :  { %6454 = vtanh.bf16 %v3823_v45  ;;  %6219 = vset.pattern.permute.xlu1 %v13104_v15  ;;  %v3323_v14 = vpop.permute.xlu1 %3322  ;;  %v3229_v45 = vmul.f32 %v8899_v39, %v9848_v24 }
 0x40d   :  { %v3393_v32 = vmul.f32 %v8896_v5, %v3323_v14  ;;  %v3497_v10 = vmul.f32 %v8658_v16, %v3323_v14  ;;  %2670 = vperm.xlu1 %6219, %v9781_v3  }
 0x40f   :  { %v3529_v29 = vadd.f32 %v3497_v10, %v3461_v50  ;;  %v9864_v30 = vadd.f32 %v3393_v32, %v3229_v45 }
 0x410   :  { %v3327_v41 = vpop.permute.xlu1 %3326 }
 0x411   :  { %13305 = vst [vmem:[#allocation264_spill] sm:$0xff] %v9864_v30  ;;  %v9866_v19 = vadd.f32 %v3529_v29, %v2997_v7  ;;  %v3394_v36 = vmul.f32 %v8896_v5, %v3327_v41  ;;  %v3498_v14 = vmul.f32 %v8658_v16, %v3327_v41  ;;  %6220 = vset.pattern.permute.xlu1 %v13140_v25 }
 0x412   :  { %2358 = vperm.xlu1 %6220, %v9874_v61   ;;  %v3721_v32 = vadd.f32 %v9864_v30, %v2997_v7  ;;  %v2387_v7 = vmul.f32 %v9807_v37, %v7488_v57 }
 0x413   :  { %13306 = vst [vmem:[#allocation265_spill] sm:$0xff] %v9866_v19  ;;  %v9877_v28 = vadd.f32 %v3394_v36, %v3230_v38  ;;  %v3530_v50 = vadd.f32 %v3498_v14, %v3462_v12  ;;  %v2388_v38 = vmul.f32 %v9815_v1, %v7488_v57  ;;  %v9920_v19 = vpop.permute.xlu0 %3170 }
 0x414   :  { %v9909_v37 = vadd.f32 %v8501_v34, %v2387_v7  ;;  %13314 = vst [vmem:[#allocation272_spill] sm:$0xff] %v9920_v19 }
 0x415   :  { %13307 = vst [vmem:[#allocation266_spill] sm:$0xff] %v9877_v28  ;;  %v3722_v10 = vadd.f32 %v9877_v28, %v2998_v46  ;;  %v9881_v45 = vadd.f32 %v3530_v50, %v2998_v46  ;;  %v2491_v29 = vpop.permute.xlu1 %2490 }
 0x416   :  { %2362 = vperm.xlu1 %6220, %v9843_v60   ;;  %13311 = vst [vmem:[#allocation270_spill] sm:$0xff] %v9909_v37 }
 0x417   :  { %13308 = vst [vmem:[#allocation267_spill] sm:$0xff] %v9881_v45  ;;  %v6455_v25 = vpop.eup %6454  ;;  %v3743_v41 = vpack.c.bf16 %v3722_v10, %v3721_v32  ;;  %v2708_v32 = vmul.f32 %v8809_v59, %v7613_v42  ;;  %v9905_v10 = vadd.f32 %v2491_v29, %v2388_v38  ;;  %v13313_v29 = vld [vmem:[#allocation113_spill] sm:$0xff] }
 0x418   :  { %4522 = vmatprep.subr.bf16.mxu0 %v6455_v25  ;;  %v2967_v38 = vmul.f32 %v13313_v29, %v7628_v53 }
 0x419   :  { %6456 = vtanh.bf16 %v3743_v41  ;;  %13310 = vst [vmem:[#allocation269_spill] sm:$0xff] %v9905_v10  ;;  %v2740_v41 = vadd.f32 %v2708_v32, %v9905_v10  ;;  %v9928_v32 = vpop.permute.xlu0 %3178 }
 0x41a   :  { %6222 = vset.pattern.permute.xlu1 %v13121_v43  ;;  %v9887_v36 = vpop.permute.xlu1 %2646  ;;  %13316 = vst [vmem:[#allocation274_spill] sm:$0xff] %v9928_v32  ;;  %v3234_v62 = vmul.f32 %v8899_v39, %v9928_v32 }
 0x41b   :  { %13309 = vst [vmem:[#allocation268_spill] sm:$0xff] %v9887_v36  ;;  %2934 = vperm.xlu1 %6222, %v9794_v58   ;;  %v2707_v50 = vmul.f32 %v9887_v36, %v7613_v42 }
 0x41d   :  { %v2739_v1 = vadd.f32 %v2707_v50, %v9909_v37 }
 0x41f   :  { %6223 = vset.pattern.permute.xlu1 %v13124_v48  ;;  %v9891_v46 = vpop.permute.xlu1 %2334  ;;  %v2999_v45 = vadd.f32 %v2967_v38, %v2739_v1  ;;  %v3232_v38 = vmul.f32 %v8899_v39, %v9920_v19 }
 0x420   :  { %3190 = vperm.xlu1 %6223, %v9781_v3  }
 0x423   :  { %v9898_v12 = vpop.permute.xlu1 %2338 }
 0x424   :  { %v6457_v14 = vpop.eup %6456  ;;  %6224 = vset.pattern.permute.xlu1 %v13164_v52 }
 0x425   :  { %3354 = vperm.xlu1 %6224, %v9781_v3   ;;  %4523 = vmatpush1.bf16.msra.mxu0 %v6457_v14 }
 0x428   :  { %v9912_v25 = vpop.permute.xlu1 %2910 }
 0x429   :  { %13312 = vst [vmem:[#allocation271_spill] sm:$0xff] %v9912_v25  ;;  %v2968_v24 = vmul.f32 %v9912_v25, %v7628_v53  ;;  %3358 = vperm.xlu1 %6224, %v9794_v58  }
 0x42b   :  { %v3000_v14 = vadd.f32 %v2968_v24, %v2740_v41  ;;  %v9936_v41 = vpop.permute.xlu0 %3186 }
 0x42c   :  { %13317 = vst [vmem:[#allocation275_spill] sm:$0xff] %v9936_v41 }
 0x42d   :  { %v3804_v34 = vadd.f32 %v9920_v19, %v3000_v14  ;;  %6226 = vset.pattern.permute.xlu1 %v13103_v31  ;;  %v9924_v7 = vpop.permute.xlu1 %3166 }
 0x42e   :  { %13315 = vst [vmem:[#allocation273_spill] sm:$0xff] %v9924_v7  ;;  %v3803_v50 = vadd.f32 %v9924_v7, %v2999_v45  ;;  %2522 = vperm.xlu1 %6226, %v9843_v60   ;;  %v3463_v1 = vmul.f32 %v8655_v22, %v9924_v7 }
 0x42f   :  { %v9951_v29 = vpop.permute.xlu0 %3194 }
 0x430   :  { %v3824_v28 = vpack.c.bf16 %v3804_v34, %v3803_v50  ;;  %13320 = vst [vmem:[#allocation278_spill] sm:$0xff] %v9951_v29 }
 0x432   :  { %6458 = vtanh.bf16 %v3824_v28  ;;  %6227 = vset.pattern.permute.xlu1 %v13104_v15  ;;  %v3331_v30 = vpop.permute.xlu1 %3330  ;;  %v3464_v28 = vmul.f32 %v8655_v22, %v9920_v19  ;;  %v3231_v15 = vmul.f32 %v8899_v39, %v9924_v7 }
 0x433   :  { %v3395_v24 = vmul.f32 %v8896_v5, %v3331_v30  ;;  %v3499_v31 = vmul.f32 %v8658_v16, %v3331_v30  ;;  %2678 = vperm.xlu1 %6227, %v9874_v61   ;;  %v9963_v7 = vpop.permute.xlu0 %3198 }
 0x434   :  { %13323 = vst [vmem:[#allocation281_spill] sm:$0xff] %v9963_v7 }
 0x435   :  { %v3531_v34 = vadd.f32 %v3499_v31, %v3463_v1  ;;  %v9944_v10 = vadd.f32 %v3395_v24, %v3231_v15 }
 0x436   :  { %v3335_v50 = vpop.permute.xlu1 %3334 }
 0x437   :  { %13318 = vst [vmem:[#allocation276_spill] sm:$0xff] %v9944_v10  ;;  %v9946_v37 = vadd.f32 %v3531_v34, %v2999_v45  ;;  %v3396_v30 = vmul.f32 %v8896_v5, %v3335_v50  ;;  %v3500_v25 = vmul.f32 %v8658_v16, %v3335_v50  ;;  %6229 = vset.pattern.permute.xlu1 %v13121_v43 }
 0x438   :  { %2938 = vperm.xlu1 %6229, %v9874_v61   ;;  %v3723_v1 = vadd.f32 %v9944_v10, %v2999_v45 }
 0x439   :  { %13319 = vst [vmem:[#allocation277_spill] sm:$0xff] %v9946_v37  ;;  %v9954_v19 = vadd.f32 %v3396_v30, %v3232_v38  ;;  %v3532_v63 = vadd.f32 %v3500_v25, %v3464_v28  ;;  %v2389_v38 = vmul.f32 %v9891_v46, %v7488_v57  ;;  %v9995_v46 = vld [vmem:[%s12446_s1] sm:$0xff] }
 0x43b   :  { %13321 = vst [vmem:[#allocation279_spill] sm:$0xff] %v9954_v19  ;;  %v3724_v24 = vadd.f32 %v9954_v19, %v3000_v14  ;;  %v9958_v31 = vadd.f32 %v3532_v63, %v3000_v14  ;;  %v2499_v15 = vpop.permute.xlu1 %2498  ;;  %v9969_v63 = vpop.permute.xlu0 %3366 }
 0x43c   :  { %2942 = vperm.xlu1 %6229, %v9843_v60   ;;  %v9973_v45 = vmul.f32 %v8658_v16, %v9969_v63 }
 0x43d   :  { %13322 = vst [vmem:[#allocation280_spill] sm:$0xff] %v9958_v31  ;;  %v6459_v34 = vpop.eup %6458  ;;  %v3744_v50 = vpack.c.bf16 %v3724_v24, %v3723_v1  ;;  %v13325_v24 = vmov 11  }
 0x43e   :  { %4524 = vmatprep.subr.bf16.mxu0 %v6459_v34 }
 0x43f   :  { %6460 = vtanh.bf16 %v3744_v50  ;;  %v10001_v50 = vpop.f32.mrb[0].mxu0 }
 0x440   :  { %6230 = vset.pattern.permute.xlu1 %v13124_v48  ;;  %v9966_v25 = vpop.permute.xlu1 %2654  ;;  %v2390_v48 = vmul.f32 %v9898_v12, %v7488_v57  ;;  %v9999_v12 = vadd.f32 %v8531_v4, %v2389_v38  ;;  %v10003_v43 = vpop.f32.mrb[1].mxu0  ;;  %v10016_v4 = vld [vmem:[%s12446_s1 + $0x8] sm:$0xff] }
 0x441   :  { %13324 = vst [vmem:[#allocation282_spill] sm:$0xff] %v9966_v25  ;;  %3202 = vperm.xlu1 %6230, %v9843_v60   ;;  %v2709_v1 = vmul.f32 %v9966_v25, %v7613_v42 }
 0x442   :  { %v9990_v34 = vadd.f32 %v2499_v15, %v2390_v48  ;;  %13327 = vst [vmem:[#allocation284_spill] sm:$0xff] %v9999_v12  ;;  %v10008_v15 = vpop.f32.mrb[2].mxu0 }
 0x443   :  { %v10019_v38 = vpop.f32.mrb[3].mxu0 }
 0x444   :  { %13326 = vst [vmem:[#allocation283_spill] sm:$0xff] %v9990_v34  ;;  %v10023_v19 = vpop.f32.mrb[4].mxu0 }
 0x445   :  { %6231 = vset.pattern.permute.xlu1 %v13164_v52  ;;  %v9976_v14 = vpop.permute.xlu1 %2342  ;;  %v2710_v52 = vmul.f32 %v8828_v9, %v7613_v42  ;;  %v10033_v9 = vld [vmem:[%s12446_s1 + $0x18] sm:$0xff] }
 0x446   :  { %3362 = vperm.xlu1 %6231, %v9874_v61  }
 0x447   :  { %v2742_v48 = vadd.f32 %v2710_v52, %v9990_v34 }
 0x449   :  { %v9983_v28 = vpop.permute.xlu1 %2346 }
 0x44a   :  { %v6461_v30 = vpop.eup %6460  ;;  %6233 = vset.pattern.permute.xlu1 %v13325_v24  ;;  %v2741_v24 = vadd.f32 %v2709_v1, %v9999_v12  ;;  %v10025_v12 = vpop.f32.mrb[5].mxu0 }
 0x44b   :  { %1207 = vperm.xlu1 %6233, %v9995_v46   ;;  %4525 = vmatpush1.bf16.msra.mxu0 %v6461_v30  ;;  %v13329_v30 = vld [vmem:[#allocation114_spill] sm:$0xff]  ;;  %v10027_v34 = vpop.f32.mrb[6].mxu0 }
 0x44c   :  { %v2969_v1 = vmul.f32 %v13329_v30, %v7628_v53  ;;  %v10039_v59 = vpop.f32.mrb[7].mxu0 }
 0x44e   :  { %v10006_v37 = vpop.permute.xlu1 %2918  ;;  %v3001_v52 = vadd.f32 %v2969_v1, %v2741_v24  ;;  %v10048_v1 = vld [vmem:[%s12446_s1 + $0x20] sm:$0xff] }
 0x44f   :  { %13328 = vst [vmem:[#allocation285_spill] sm:$0xff] %v10006_v37  ;;  %v2970_v31 = vmul.f32 %v10006_v37, %v7628_v53  ;;  %1211 = vperm.xlu1 %6233, %v10016_v4  }
 0x451   :  { %v3002_v10 = vadd.f32 %v2970_v31, %v2742_v48  ;;  %v10041_v31 = vpop.f32.mrb[8].mxu0 }
 0x452   :  { %13331 = vst [vmem:[#allocation287_spill] sm:$0xff] %v10041_v31  ;;  %v10043_v48 = vpop.f32.mrb[9].mxu0 }
 0x453   :  { %v3806_v37 = vadd.f32 %v9928_v32, %v3002_v10  ;;  %1219 = vperm.xlu1 %6233, %v10033_v9   ;;  %v10036_v25 = vpop.permute.xlu1 %3174  ;;  %13332 = vst [vmem:[#allocation288_spill] sm:$0xff] %v10043_v48  ;;  %v10051_v36 = vpop.f32.mrb[10].mxu0 }
 0x454   :  { %13330 = vst [vmem:[#allocation286_spill] sm:$0xff] %v10036_v25  ;;  %v3805_v30 = vadd.f32 %v10036_v25, %v3001_v52  ;;  %13333 = vst [vmem:[#allocation289_spill] sm:$0xff] %v10051_v36  ;;  %v10053_v44 = vpop.f32.mrb[11].mxu0  ;;  %v3233_v26 = vmul.f32 %v8899_v39, %v10036_v25 }
 0x455   :  { %13334 = vst [vmem:[#allocation290_spill] sm:$0xff] %v10053_v44  ;;  %v10059_v13 = vpop.f32.mrb[12].mxu0 }
 0x456   :  { %v3825_v24 = vpack.c.bf16 %v3806_v37, %v3805_v30  ;;  %v3465_v37 = vmul.f32 %v8655_v22, %v10036_v25  ;;  %13335 = vst [vmem:[#allocation291_spill] sm:$0xff] %v10059_v13  ;;  %v10061_v51 = vpop.f32.mrb[13].mxu0 }
 0x457   :  { %1223 = vperm.xlu1 %6233, %v10048_v1   ;;  %13336 = vst [vmem:[#allocation292_spill] sm:$0xff] %v10061_v51 }
 0x458   :  { %6462 = vtanh.bf16 %v3825_v24  ;;  %v3339_v54 = vpop.permute.xlu1 %3338  ;;  %v3466_v24 = vmul.f32 %v8655_v22, %v9928_v32 }
 0x459   :  { %v3397_v11 = vmul.f32 %v8896_v5, %v3339_v54  ;;  %v3501_v30 = vmul.f32 %v8658_v16, %v3339_v54  ;;  %v10075_v54 = vpop.f32.mrb[14].mxu0 }
 0x45a   :  { %13337 = vst [vmem:[#allocation293_spill] sm:$0xff] %v10075_v54  ;;  %v10077_v56 = vpop.f32.mrb[15].mxu0 }
 0x45b   :  { %v3533_v18 = vadd.f32 %v3501_v30, %v3465_v37  ;;  %1231 = vperm.xlu1 %6233, %v10072_v6   ;;  %13338 = vst [vmem:[#allocation294_spill] sm:$0xff] %v10077_v56  ;;  %v10079_v51 = vadd.f32 %v3397_v11, %v3233_v26  ;;  %v10085_v30 = vpop.f32.mrb[16].mxu0  ;;  %v10094_v56 = vld [vmem:[%s12446_s1 + $0x40] sm:$0xff] }
 0x45c   :  { %v3343_v21 = vpop.permute.xlu1 %3342  ;;  %13341 = vst [vmem:[#allocation297_spill] sm:$0xff] %v10085_v30  ;;  %v10087_v13 = vpop.f32.mrb[17].mxu0 }
 0x45d   :  { %13339 = vst [vmem:[#allocation295_spill] sm:$0xff] %v10079_v51  ;;  %v10081_v32 = vadd.f32 %v3533_v18, %v3001_v52  ;;  %v3398_v25 = vmul.f32 %v8896_v5, %v3343_v21  ;;  %v3502_v37 = vmul.f32 %v8658_v16, %v3343_v21  ;;  %13342 = vst [vmem:[#allocation298_spill] sm:$0xff] %v10087_v13  ;;  %v10097_v18 = vpop.f32.mrb[18].mxu0 }
 0x45e   :  { %13344 = vst [vmem:[#allocation300_spill] sm:$0xff] %v10097_v18  ;;  %v10099_v26 = vpop.f32.mrb[19].mxu0  ;;  %v3725_v21 = vadd.f32 %v10079_v51, %v3001_v52  ;;  %v2712_v18 = vmul.f32 %v8843_v35, %v7613_v42  ;;  %v13371_v35 = vld [vmem:[#allocation115_spill] sm:$0xff] }
 0x45f   :  { %13340 = vst [vmem:[#allocation296_spill] sm:$0xff] %v10081_v32  ;;  %v10089_v48 = vadd.f32 %v3398_v25, %v3234_v62  ;;  %v3534_v54 = vadd.f32 %v3502_v37, %v3466_v24  ;;  %1239 = vperm.xlu1 %6233, %v10094_v56   ;;  %13345 = vst [vmem:[#allocation301_spill] sm:$0xff] %v10099_v26  ;;  %v10105_v25 = vpop.f32.mrb[20].mxu0  ;;  %v10114_v26 = vld [vmem:[%s12446_s1 + $0x50] sm:$0xff] }
 0x460   :  { %13347 = vst [vmem:[#allocation303_spill] sm:$0xff] %v10105_v25  ;;  %v10107_v24 = vpop.f32.mrb[21].mxu0 }
 0x461   :  { %13343 = vst [vmem:[#allocation299_spill] sm:$0xff] %v10089_v48  ;;  %v3726_v0 = vadd.f32 %v10089_v48, %v3002_v10  ;;  %v10103_v11 = vadd.f32 %v3534_v54, %v3002_v10  ;;  %v2507_v62 = vpop.permute.xlu1 %2506  ;;  %13348 = vst [vmem:[#allocation304_spill] sm:$0xff] %v10107_v24  ;;  %v10117_v52 = vpop.f32.mrb[22].mxu0  ;;  %v10164_v24 = vld [vmem:[%s12446_s1 + $0x80] sm:$0xff] }
 0x462   :  { %13349 = vst [vmem:[#allocation305_spill] sm:$0xff] %v10117_v52  ;;  %v10119_v10 = vpop.f32.mrb[23].mxu0 }
 0x463   :  { %13346 = vst [vmem:[#allocation302_spill] sm:$0xff] %v10103_v11  ;;  %v6463_v37 = vpop.eup %6462  ;;  %v3745_v13 = vpack.c.bf16 %v3726_v0, %v3725_v21  ;;  %1247 = vperm.xlu1 %6233, %v10114_v26   ;;  %13350 = vst [vmem:[#allocation306_spill] sm:$0xff] %v10119_v10  ;;  %v10121_v54 = vpop.f32.mrb[24].mxu0  ;;  %v10130_v0 = vld [vmem:[%s12446_s1 + $0x60] sm:$0xff]  ;;  %v10144_v11 = vld [vmem:[%s12446_s1 + $0x70] sm:$0xff] }
 0x464   :  { %4526 = vmatprep.subr.bf16.mxu0 %v6463_v37  ;;  %13351 = vst [vmem:[#allocation307_spill] sm:$0xff] %v10121_v54  ;;  %v10125_v21 = vpop.f32.mrb[25].mxu0 }
 0x465   :  { %6464 = vtanh.bf16 %v3745_v13  ;;  %13353 = vst [vmem:[#allocation309_spill] sm:$0xff] %v10125_v21  ;;  %v10133_v30 = vpop.f32.mrb[26].mxu0 }
 0x466   :  { %v10123_v48 = vpop.permute.xlu1 %2662  ;;  %13354 = vst [vmem:[#allocation310_spill] sm:$0xff] %v10133_v30  ;;  %v10135_v32 = vpop.f32.mrb[27].mxu0 }
 0x467   :  { %13352 = vst [vmem:[#allocation308_spill] sm:$0xff] %v10123_v48  ;;  %1255 = vperm.xlu1 %6233, %v10130_v0   ;;  %13355 = vst [vmem:[#allocation311_spill] sm:$0xff] %v10135_v32  ;;  %v10137_v37 = vpop.f32.mrb[28].mxu0 }
 0x468   :  { %13356 = vst [vmem:[#allocation312_spill] sm:$0xff] %v10137_v37  ;;  %v10139_v13 = vpop.f32.mrb[29].mxu0  ;;  %v2391_v37 = vmul.f32 %v9976_v14, %v7488_v57  ;;  %v2711_v14 = vmul.f32 %v10123_v48, %v7613_v42 }
 0x469   :  { %13357 = vst [vmem:[#allocation313_spill] sm:$0xff] %v10139_v13  ;;  %v10149_v21 = vpop.f32.mrb[30].mxu0  ;;  %v2392_v13 = vmul.f32 %v9983_v28, %v7488_v57 }
 0x46a   :  { %13358 = vst [vmem:[#allocation314_spill] sm:$0xff] %v10149_v21  ;;  %v10151_v54 = vpop.f32.mrb[31].mxu0  ;;  %v10180_v10 = vadd.f32 %v8571_v27, %v2391_v37 }
 0x46b   :  { %1263 = vperm.xlu1 %6233, %v10144_v11   ;;  %v10147_v51 = vpop.permute.xlu1 %2350  ;;  %13359 = vst [vmem:[#allocation315_spill] sm:$0xff] %v10151_v54  ;;  %v10153_v30 = vpop.f32.mrb[32].mxu0 }
 0x46c   :  { %13360 = vst [vmem:[#allocation316_spill] sm:$0xff] %v10153_v30  ;;  %v10157_v32 = vpop.f32.mrb[33].mxu0  ;;  %13366 = vst [vmem:[#allocation322_spill] sm:$0xff] %v10180_v10 }
 0x46d   :  { %13361 = vst [vmem:[#allocation317_spill] sm:$0xff] %v10157_v32  ;;  %v10169_v54 = vpop.f32.mrb[34].mxu0  ;;  %v10175_v32 = vadd.f32 %v2507_v62, %v2392_v13 }
 0x46e   :  { %13362 = vst [vmem:[#allocation318_spill] sm:$0xff] %v10169_v54  ;;  %v10173_v25 = vpop.f32.mrb[35].mxu0  ;;  %v10189_v54 = vld [vmem:[%s12446_s1 + $0x90] sm:$0xff] }
 0x46f   :  { %1271 = vperm.xlu1 %6233, %v10164_v24   ;;  %v10167_v21 = vpop.permute.xlu1 %2354  ;;  %13363 = vst [vmem:[#allocation319_spill] sm:$0xff] %v10173_v25  ;;  %13364 = vst [vmem:[#allocation320_spill] sm:$0xff] %v10175_v32  ;;  %v10177_v28 = vpop.f32.mrb[36].mxu0  ;;  %v2744_v27 = vadd.f32 %v2712_v18, %v10175_v32 }
 0x470   :  { %v6465_v30 = vpop.eup %6464  ;;  %13365 = vst [vmem:[#allocation321_spill] sm:$0xff] %v10177_v28  ;;  %v10182_v52 = vpop.f32.mrb[37].mxu0 }
 0x471   :  { %4527 = vmatpush1.bf16.msra.mxu0 %v6465_v30  ;;  %13367 = vst [vmem:[#allocation323_spill] sm:$0xff] %v10182_v52  ;;  %v10192_v62 = vpop.f32.mrb[38].mxu0  ;;  %v2743_v30 = vadd.f32 %v2711_v14, %v10180_v10  ;;  %v2971_v52 = vmul.f32 %v13371_v35, %v7628_v53 }
 0x472   :  { %13368 = vst [vmem:[#allocation324_spill] sm:$0xff] %v10192_v62  ;;  %v10200_v48 = vpop.f32.mrb[39].mxu0  ;;  %v10209_v62 = vld [vmem:[%s12446_s1 + $0xa0] sm:$0xff] }
 0x473   :  { %1279 = vperm.xlu1 %6233, %v10189_v54   ;;  %13370 = vst [vmem:[#allocation326_spill] sm:$0xff] %v10200_v48  ;;  %v10204_v28 = vpop.f32.mrb[40].mxu0  ;;  %v3003_v18 = vadd.f32 %v2971_v52, %v2743_v30  ;;  %v10228_v52 = vld [vmem:[%s12446_s1 + $0xb0] sm:$0xff] }
 0x474   :  { %v10195_v13 = vpop.permute.xlu1 %2926  ;;  %13372 = vst [vmem:[#allocation327_spill] sm:$0xff] %v10204_v28  ;;  %v10212_v14 = vpop.f32.mrb[41].mxu0  ;;  %v7055_v28 = vmov 12  }
 0x475   :  { %13369 = vst [vmem:[#allocation325_spill] sm:$0xff] %v10195_v13  ;;  %v2972_v37 = vmul.f32 %v10195_v13, %v7628_v53  ;;  %13373 = vst [vmem:[#allocation328_spill] sm:$0xff] %v10212_v14  ;;  %v10214_v32 = vpop.f32.mrb[42].mxu0  ;;  %6236 = vset.pattern.permute.xlu0 %v7055_v28 }
 0x476   :  { %13374 = vst [vmem:[#allocation329_spill] sm:$0xff] %v10214_v32  ;;  %v10219_v35 = vpop.f32.mrb[43].mxu0  ;;  %4026 = vperm.xlu0 %6236, %v10016_v4  }
 0x477   :  { %v3004_v25 = vadd.f32 %v2972_v37, %v2744_v27  ;;  %1287 = vperm.xlu1 %6233, %v10209_v62   ;;  %13376 = vst [vmem:[#allocation331_spill] sm:$0xff] %v10219_v35  ;;  %v10222_v37 = vpop.f32.mrb[44].mxu0 }
 0x478   :  { %13377 = vst [vmem:[#allocation332_spill] sm:$0xff] %v10222_v37  ;;  %v10231_v30 = vpop.f32.mrb[45].mxu0 }
 0x479   :  { %v3808_v10 = vadd.f32 %v9936_v41, %v3004_v25  ;;  %v10217_v13 = vpop.permute.xlu1 %3182  ;;  %13378 = vst [vmem:[#allocation333_spill] sm:$0xff] %v10231_v30  ;;  %v10233_v32 = vpop.f32.mrb[46].mxu0 }
 0x47a   :  { %13375 = vst [vmem:[#allocation330_spill] sm:$0xff] %v10217_v13  ;;  %v3807_v27 = vadd.f32 %v10217_v13, %v3003_v18  ;;  %13379 = vst [vmem:[#allocation334_spill] sm:$0xff] %v10233_v32  ;;  %v10235_v35 = vpop.f32.mrb[47].mxu0  ;;  %4038 = vperm.xlu0 %6236, %v10048_v1   ;;  %v3467_v37 = vmul.f32 %v8655_v22, %v10217_v13  ;;  %v3235_v1 = vmul.f32 %v8899_v39, %v10217_v13 }
 0x47b   :  { %1295 = vperm.xlu1 %6233, %v10228_v52   ;;  %13380 = vst [vmem:[#allocation335_spill] sm:$0xff] %v10235_v35  ;;  %v10237_v31 = vpop.f32.mrb[48].mxu0 }
 0x47c   :  { %v3826_v14 = vpack.c.bf16 %v3808_v10, %v3807_v27  ;;  %13381 = vst [vmem:[#allocation336_spill] sm:$0xff] %v10237_v31  ;;  %v10245_v10 = vpop.f32.mrb[49].mxu0  ;;  %v3468_v31 = vmul.f32 %v8655_v22, %v9936_v41 }
 0x47d   :  { %13382 = vst [vmem:[#allocation337_spill] sm:$0xff] %v10245_v10  ;;  %v10247_v27 = vpop.f32.mrb[50].mxu0 }
 0x47e   :  { %6466 = vtanh.bf16 %v3826_v14  ;;  %v3347_v48 = vpop.permute.xlu1 %3346  ;;  %13383 = vst [vmem:[#allocation338_spill] sm:$0xff] %v10247_v27  ;;  %v3236_v14 = vmul.f32 %v8899_v39, %v9936_v41  ;;  %v10255_v35 = vpop.f32.mrb[51].mxu0  ;;  %4046 = vperm.xlu0 %6236, %v10072_v6  }
 0x47f   :  { %v3399_v4 = vmul.f32 %v8896_v5, %v3347_v48  ;;  %v3503_v44 = vmul.f32 %v8658_v16, %v3347_v48  ;;  %1303 = vperm.xlu1 %6233, %v9562_v55   ;;  %v10257_v48 = vpop.f32.mrb[52].mxu0 }
 0x480   :  { %13384 = vst [vmem:[#allocation339_spill] sm:$0xff] %v10257_v48  ;;  %v10267_v41 = vpop.f32.mrb[53].mxu0 }
 0x481   :  { %v3535_v30 = vadd.f32 %v3503_v44, %v3467_v37  ;;  %v10260_v55 = vadd.f32 %v3399_v4, %v3235_v1  ;;  %13387 = vst [vmem:[#allocation342_spill] sm:$0xff] %v10267_v41  ;;  %v10269_v44 = vpop.f32.mrb[54].mxu0 }
 0x482   :  { %v3351_v32 = vpop.permute.xlu1 %3350  ;;  %v10273_v48 = vpop.f32.mrb[55].mxu0  ;;  %4054 = vperm.xlu0 %6236, %v10094_v56  }
 0x483   :  { %13385 = vst [vmem:[#allocation340_spill] sm:$0xff] %v10260_v55  ;;  %v10262_v10 = vadd.f32 %v3535_v30, %v3003_v18  ;;  %v3400_v27 = vmul.f32 %v8896_v5, %v3351_v32  ;;  %v3504_v36 = vmul.f32 %v8658_v16, %v3351_v32  ;;  %1311 = vperm.xlu1 %6233, %v9661_v23   ;;  %v10275_v6 = vpop.f32.mrb[56].mxu0 }
 0x484   :  { %13389 = vst [vmem:[#allocation344_spill] sm:$0xff] %v10275_v6  ;;  %v3727_v30 = vadd.f32 %v10260_v55, %v3003_v18  ;;  %v10283_v41 = vpop.f32.mrb[57].mxu0 }
 0x485   :  { %13386 = vst [vmem:[#allocation341_spill] sm:$0xff] %v10262_v10  ;;  %v10271_v37 = vadd.f32 %v3400_v27, %v3236_v14  ;;  %v3536_v13 = vadd.f32 %v3504_v36, %v3468_v31  ;;  %v10285_v27 = vpop.f32.mrb[58].mxu0 }
 0x486   :  { %v10289_v6 = vpop.f32.mrb[59].mxu0  ;;  %4062 = vperm.xlu0 %6236, %v10114_v26   ;;  %v2393_v26 = vmul.f32 %v10147_v51, %v7488_v57  ;;  %v2714_v51 = vmul.f32 %v8854_v49, %v7613_v42  ;;  %v13567_v49 = vld [vmem:[#allocation268_spill] sm:$0xff] }
 0x487   :  { %13388 = vst [vmem:[#allocation343_spill] sm:$0xff] %v10271_v37  ;;  %v3728_v4 = vadd.f32 %v10271_v37, %v3004_v25  ;;  %v10280_v32 = vadd.f32 %v3536_v13, %v3004_v25  ;;  %1319 = vperm.xlu1 %6233, %v9781_v3   ;;  %v2515_v1 = vpop.permute.xlu1 %2514  ;;  %v10291_v56 = vpop.f32.mrb[60].mxu0  ;;  %v13541_v37 = vld [vmem:[#allocation151_spill] sm:$0xff] }
 0x488   :  { %v10295_v25 = vpop.f32.mrb[61].mxu0 }
 0x489   :  { %13390 = vst [vmem:[#allocation345_spill] sm:$0xff] %v10280_v32  ;;  %v6467_v36 = vpop.eup %6466  ;;  %v3746_v31 = vpack.c.bf16 %v3728_v4, %v3727_v30  ;;  %v10299_v18 = vpop.f32.mrb[62].mxu0 }
 0x48a   :  { %4528 = vmatprep.subr.bf16.mxu0 %v6467_v36  ;;  %v10301_v30 = vpop.f32.mrb[63].mxu0  ;;  %4070 = vperm.xlu0 %6236, %v10130_v0   ;;  %v2394_v36 = vmul.f32 %v10167_v21, %v7488_v57 }
 0x48b   :  { %6468 = vtanh.bf16 %v3746_v31  ;;  %1327 = vperm.xlu1 %6233, %v9874_v61  }
 0x48c   :  { %v10297_v13 = vpop.permute.xlu1 %2670 }
 0x48d   :  { %13391 = vst [vmem:[#allocation346_spill] sm:$0xff] %v10297_v13  ;;  %v2713_v0 = vmul.f32 %v10297_v13, %v7613_v42  ;;  %v13569_v13 = vld [vmem:[#allocation162_spill] sm:$0xff] }
 0x48e   :  { %4078 = vperm.xlu0 %6236, %v10144_v11   ;;  %v13393_v11 = vld [vmem:[#allocation141_spill] sm:$0xff] }
 0x48f   :  { %6235 = vset.pattern.permute.xlu1 %v7055_v28  ;;  %v10318_v28 = vadd.f32 %v2515_v1, %v2394_v36  ;;  %v10321_v10 = vadd.f32 %v13393_v11, %v2393_v26  ;;  %v13396_v1 = vld [vmem:[#allocation118_spill] sm:$0xff] }
 0x490   :  { %4022 = vperm.xlu1 %6235, %v9995_v46  }
 0x491   :  { %v10305_v4 = vpop.permute.xlu1 %2358  ;;  %13392 = vst [vmem:[#allocation347_spill] sm:$0xff] %v10318_v28  ;;  %13394 = vst [vmem:[#allocation141_spill] sm:$0xff] %v10321_v10  ;;  %v2746_v32 = vadd.f32 %v2714_v51, %v10318_v28  ;;  %v13555_v28 = vld [vmem:[#allocation241_spill] sm:$0xff] }
 0x492   :  { %4086 = vperm.xlu0 %6236, %v10164_v24  }
 0x494   :  { %4030 = vperm.xlu1 %6235, %v9682_v8   ;;  %v2745_v8 = vadd.f32 %v2713_v0, %v10321_v10  ;;  %v13557_v10 = vld [vmem:[#allocation156_spill] sm:$0xff] }
 0x495   :  { %v10313_v31 = vpop.permute.xlu1 %2362 }
 0x496   :  { %v6469_v14 = vpop.eup %6468  ;;  %4094 = vperm.xlu0 %6236, %v10189_v54  }
 0x497   :  { %4529 = vmatpush1.bf16.msra.mxu0 %v6469_v14  ;;  %v2973_v14 = vmul.f32 %v13396_v1, %v7628_v53  ;;  %v13561_v1 = vld [vmem:[#allocation53_spill] sm:$0xff] }
 0x498   :  { %4034 = vperm.xlu1 %6235, %v10033_v9   ;;  %v10339_v9 = vld [vmem:[%s12449_s4] sm:$0xff] }
 0x499   :  { %v10343_v36 = vcombine.high %v10339_v9, %v10339_v9  ;;  %v3005_v54 = vadd.f32 %v2973_v14, %v2745_v8  ;;  %v6933_v14 = vld [vmem:[%s12446_s1 + $0xc0] sm:$0xff] }
 0x49a   :  { %v10327_v21 = vpop.permute.xlu1 %2934  ;;  %4102 = vperm.xlu0 %6236, %v10209_v62  }
 0x49b   :  { %13395 = vst [vmem:[#allocation348_spill] sm:$0xff] %v10327_v21  ;;  %v2974_v24 = vmul.f32 %v10327_v21, %v7628_v53  ;;  %13397 = vst [vmem:[#allocation349_spill] sm:$0xff] %v10343_v36  ;;  %1794 = vmatprep.mubr.bf16.mxu1 %v10343_v36  ;;  %v13559_v21 = vld [vmem:[#allocation250_spill] sm:$0xff] }
 0x49c   :  { %4042 = vperm.xlu1 %6235, %v9692_v2  }
 0x49d   :  { %v3006_v26 = vadd.f32 %v2974_v24, %v2746_v32 }
 0x49e   :  { %4110 = vperm.xlu0 %6236, %v10228_v52  }
 0x49f   :  { %v3810_v0 = vadd.f32 %v9951_v29, %v3006_v26  ;;  %v10347_v11 = vpop.permute.xlu1 %3190 }
 0x4a0   :  { %13398 = vst [vmem:[#allocation350_spill] sm:$0xff] %v10347_v11  ;;  %v3809_v2 = vadd.f32 %v10347_v11, %v3005_v54  ;;  %4050 = vperm.xlu1 %6235, %v9702_v17   ;;  %v3469_v62 = vmul.f32 %v8655_v22, %v10347_v11  ;;  %v3237_v17 = vmul.f32 %v8899_v39, %v10347_v11 }
 0x4a2   :  { %v3827_v51 = vpack.c.bf16 %v3810_v0, %v3809_v2  ;;  %4118 = vperm.xlu0 %6236, %v6933_v14   ;;  %v3470_v2 = vmul.f32 %v8655_v22, %v9951_v29 }
 0x4a4   :  { %6470 = vtanh.bf16 %v3827_v51  ;;  %v3355_v32 = vpop.permute.xlu1 %3354  ;;  %4058 = vperm.xlu1 %6235, %v9717_v40   ;;  %v3238_v40 = vmul.f32 %v8899_v39, %v9951_v29 }
 0x4a5   :  { %v3401_v8 = vmul.f32 %v8896_v5, %v3355_v32  ;;  %v3505_v24 = vmul.f32 %v8658_v16, %v3355_v32 }
 0x4a6   :  { %4126 = vperm.xlu0 %6236, %v9661_v23   ;;  %v6934_v23 = vld [vmem:[%s12446_s1 + $0x78] sm:$0xff] }
 0x4a7   :  { %v3537_v52 = vadd.f32 %v3505_v24, %v3469_v62  ;;  %v10368_v51 = vadd.f32 %v3401_v8, %v3237_v17 }
 0x4a8   :  { %v3359_v0 = vpop.permute.xlu1 %3358  ;;  %4066 = vperm.xlu1 %6235, %v9734_v20  }
 0x4a9   :  { %13399 = vst [vmem:[#allocation351_spill] sm:$0xff] %v10368_v51  ;;  %v10370_v32 = vadd.f32 %v3537_v52, %v3005_v54  ;;  %v3402_v36 = vmul.f32 %v8896_v5, %v3359_v0  ;;  %v3506_v14 = vmul.f32 %v8658_v16, %v3359_v0  ;;  %v3729_v11 = vadd.f32 %v10368_v51, %v3005_v54 }
 0x4aa   :  { %4134 = vperm.xlu0 %6236, %v9781_v3   ;;  %v6935_v3 = vld [vmem:[%s12446_s1 + $0x88] sm:$0xff] }
 0x4ab   :  { %13400 = vst [vmem:[#allocation352_spill] sm:$0xff] %v10370_v32  ;;  %v10375_v62 = vadd.f32 %v3402_v36, %v3238_v40  ;;  %v3538_v24 = vadd.f32 %v3506_v14, %v3470_v2  ;;  %v10390_v36 = vpop.permute.xlu0 %1215  ;;  %v13408_v14 = vld [vmem:[#allocation142_spill] sm:$0xff]  ;;  %v3239_v32 = vmul.f32 %v8899_v39, %v9963_v7 }
 0x4ac   :  { %4074 = vperm.xlu1 %6235, %v9748_v47   ;;  %13404 = vst [vmem:[#allocation356_spill] sm:$0xff] %v10390_v36 }
 0x4ad   :  { %13401 = vst [vmem:[#allocation353_spill] sm:$0xff] %v10375_v62  ;;  %v3730_v29 = vadd.f32 %v10375_v62, %v3006_v26  ;;  %v10380_v20 = vadd.f32 %v3538_v24, %v3006_v26  ;;  %v2523_v8 = vpop.permute.xlu1 %2522  ;;  %v2396_v26 = vmul.f32 %v10313_v31, %v7488_v57 }
 0x4ae   :  { %4142 = vperm.xlu0 %6236, %v9874_v61   ;;  %v6936_v61 = vld [vmem:[%s12446_s1 + $0x98] sm:$0xff] }
 0x4af   :  { %13402 = vst [vmem:[#allocation354_spill] sm:$0xff] %v10380_v20  ;;  %v6471_v17 = vpop.eup %6470  ;;  %v3747_v52 = vpack.c.bf16 %v3730_v29, %v3729_v11  ;;  %v2395_v29 = vmul.f32 %v10305_v4, %v7488_v57  ;;  %v10404_v40 = vadd.f32 %v2523_v8, %v2396_v26  ;;  %v10406_v2 = vpop.permute.xlu0 %1227  ;;  %v2716_v4 = vmul.f32 %v8867_v33, %v7613_v42  ;;  %v13563_v33 = vld [vmem:[#allocation259_spill] sm:$0xff] }
 0x4b0   :  { %4530 = vmatprep.subr.bf16.mxu0 %v6471_v17  ;;  %4082 = vperm.xlu1 %6235, %v6934_v23   ;;  %13407 = vst [vmem:[#allocation359_spill] sm:$0xff] %v10406_v2 }
 0x4b1   :  { %6472 = vtanh.bf16 %v3747_v52  ;;  %13406 = vst [vmem:[#allocation358_spill] sm:$0xff] %v10404_v40  ;;  %v10412_v24 = vadd.f32 %v13408_v14, %v2395_v29  ;;  %v2748_v52 = vadd.f32 %v2716_v4, %v10404_v40  ;;  %v13547_v40 = vld [vmem:[#allocation223_spill] sm:$0xff] }
 0x4b2   :  { %v10388_v47 = vpop.permute.xlu1 %2678 }
 0x4b3   :  { %13403 = vst [vmem:[#allocation355_spill] sm:$0xff] %v10388_v47  ;;  %v2715_v54 = vmul.f32 %v10388_v47, %v7613_v42  ;;  %13409 = vst [vmem:[#allocation142_spill] sm:$0xff] %v10412_v24  ;;  %v13565_v47 = vld [vmem:[#allocation160_spill] sm:$0xff] }
 0x4b4   :  { %4090 = vperm.xlu1 %6235, %v6935_v3   ;;  %v6937_v3 = vld [vmem:[%s12446_s1 + $0xa8] sm:$0xff] }
 0x4b5   :  { %v2747_v31 = vadd.f32 %v2715_v54, %v10412_v24  ;;  %v6938_v54 = vld [vmem:[%s12446_s1 + $0xb8] sm:$0xff] }
 0x4b7   :  { %v10402_v11 = vpop.permute.xlu1 %2938 }
 0x4b8   :  { %13405 = vst [vmem:[#allocation357_spill] sm:$0xff] %v10402_v11  ;;  %4098 = vperm.xlu1 %6235, %v6936_v61   ;;  %v2975_v57 = vmul.f32 %v10402_v11, %v7628_v53  ;;  %v10427_v61 = vpop.permute.xlu0 %1235  ;;  %v13553_v11 = vld [vmem:[#allocation155_spill] sm:$0xff] }
 0x4b9   :  { %13411 = vst [vmem:[#allocation361_spill] sm:$0xff] %v10427_v61 }
 0x4ba   :  { %v3007_v29 = vadd.f32 %v2975_v57, %v2747_v31  ;;  %v3404_v31 = vmul.f32 %v8896_v5, %v9969_v63 }
 0x4bb   :  { %v10419_v8 = vpop.permute.xlu1 %2942 }
 0x4bc   :  { %13410 = vst [vmem:[#allocation360_spill] sm:$0xff] %v10419_v8  ;;  %v6473_v17 = vpop.eup %6472  ;;  %v2976_v23 = vmul.f32 %v10419_v8, %v7628_v53  ;;  %4106 = vperm.xlu1 %6235, %v6937_v3   ;;  %v3811_v14 = vadd.f32 %v9963_v7, %v3007_v29  ;;  %v6939_v3 = vld [vmem:[%s12446_s1 + $0xc8] sm:$0xff]  ;;  %v13551_v8 = vld [vmem:[#allocation232_spill] sm:$0xff] }
 0x4bd   :  { %4531 = vmatpush1.bf16.msra.mxu0 %v6473_v17 }
 0x4be   :  { %v3008_v26 = vadd.f32 %v2976_v23, %v2748_v52  ;;  %v10443_v23 = vpop.permute.xlu0 %1243 }
 0x4bf   :  { %13413 = vst [vmem:[#allocation363_spill] sm:$0xff] %v10443_v23 }
 0x4c0   :  { %v10429_v42 = vpop.permute.xlu1 %3202  ;;  %4114 = vperm.xlu1 %6235, %v6938_v54  }
 0x4c1   :  { %13412 = vst [vmem:[#allocation362_spill] sm:$0xff] %v10429_v42  ;;  %v3812_v53 = vadd.f32 %v10429_v42, %v3008_v26  ;;  %v3472_v4 = vmul.f32 %v8655_v22, %v10429_v42  ;;  %v3240_v57 = vmul.f32 %v8899_v39, %v10429_v42 }
 0x4c3   :  { %v3828_v17 = vpack.c.bf16 %v3812_v53, %v3811_v14  ;;  %v3540_v52 = vadd.f32 %v9973_v45, %v3472_v4  ;;  %v10452_v20 = vadd.f32 %v3404_v31, %v3240_v57  ;;  %v3471_v45 = vmul.f32 %v8655_v22, %v9963_v7  ;;  %v10469_v31 = vpop.permute.xlu0 %1251  ;;  %v13535_v7 = vld [vmem:[#allocation147_spill] sm:$0xff] }
 0x4c4   :  { %4122 = vperm.xlu1 %6235, %v6939_v3   ;;  %13419 = vst [vmem:[#allocation369_spill] sm:$0xff] %v10469_v31 }
 0x4c5   :  { %6474 = vtanh.bf16 %v3828_v17  ;;  %v10448_v54 = vadd.f32 %v3540_v52, %v3008_v26  ;;  %v3363_v0 = vpop.permute.xlu1 %3362  ;;  %13415 = vst [vmem:[#allocation365_spill] sm:$0xff] %v10452_v20  ;;  %v6940_v17 = vld [vmem:[%s12446_s1 + $0xd8] sm:$0xff]  ;;  %v3732_v52 = vadd.f32 %v10452_v20, %v3008_v26 }
 0x4c6   :  { %v3403_v63 = vmul.f32 %v8896_v5, %v3363_v0  ;;  %v3507_v14 = vmul.f32 %v8658_v16, %v3363_v0  ;;  %v13439_v16 = vld [vmem:[#allocation298_spill] sm:$0xff]  ;;  %v13533_v20 = vld [vmem:[#allocation145_spill] sm:$0xff] }
 0x4c7   :  { %13414 = vst [vmem:[#allocation364_spill] sm:$0xff] %v10448_v54 }
 0x4c8   :  { %v10458_v53 = vadd.f32 %v3403_v63, %v3239_v32  ;;  %v3539_v4 = vadd.f32 %v3507_v14, %v3471_v45  ;;  %4130 = vperm.xlu1 %6235, %v6940_v17   ;;  %v10484_v45 = vpop.permute.xlu0 %1259 }
 0x4c9   :  { %13421 = vst [vmem:[#allocation371_spill] sm:$0xff] %v10484_v45 }
 0x4ca   :  { %13416 = vst [vmem:[#allocation366_spill] sm:$0xff] %v10458_v53  ;;  %v3731_v39 = vadd.f32 %v10458_v53, %v3007_v29  ;;  %v10465_v57 = vadd.f32 %v3539_v4, %v3007_v29  ;;  %v10467_v5 = vpop.permute.xlu1 %1207  ;;  %v13534_v53 = vld [vmem:[#allocation186_spill] sm:$0xff] }
 0x4cb   :  { %13418 = vst [vmem:[#allocation368_spill] sm:$0xff] %v10467_v5  ;;  %v1529_v32 = vadd.f32 %v10001_v50, %v10467_v5  ;;  %v1531_v0 = vadd.f32 %v10003_v43, %v10467_v5  ;;  %v1539_v43 = vadd.f32 %v10023_v19, %v10390_v36  ;;  %v1541_v50 = vadd.f32 %v10025_v12, %v10390_v36  ;;  %v13424_v19 = vld [vmem:[#allocation290_spill] sm:$0xff] }
 0x4cc   :  { %13417 = vst [vmem:[#allocation367_spill] sm:$0xff] %v10465_v57  ;;  %v3748_v22 = vpack.c.bf16 %v3732_v52, %v3731_v39  ;;  %4138 = vperm.xlu1 %6235, %v9794_v58   ;;  %v10503_v12 = vpop.permute.xlu0 %1267  ;;  %v13532_v57 = vld [vmem:[#allocation177_spill] sm:$0xff] }
 0x4cd   :  { %13426 = vst [vmem:[#allocation290_spill] sm:$0xff] %v10503_v12 }
 0x4ce   :  { %6476 = vtanh.bf16 %v3748_v22  ;;  %v10478_v26 = vpop.permute.xlu1 %1211  ;;  %v1555_v22 = vadd.f32 %v13424_v19, %v10406_v2  ;;  %v6291_v19 = vld [vmem:[#allocation3 + $0x14] ss:$8 sps:$4 sm:$0xff]  }
 0x4cf   :  { %13420 = vst [vmem:[#allocation370_spill] sm:$0xff] %v10478_v26  ;;  %v1533_v29 = vadd.f32 %v10008_v15, %v10478_v26  ;;  %v1535_v3 = vadd.f32 %v10019_v38, %v10478_v26 }
 0x4d0   :  { %v6475_v63 = vpop.eup %6474  ;;  %4146 = vperm.xlu1 %6235, %v9843_v60   ;;  %v13423_v60 = vld [vmem:[#allocation289_spill] sm:$0xff] }
 0x4d1   :  { %v1687_v58 = vpack.c.bf16 %v1533_v29, %v1529_v32  ;;  %v1688_v14 = vpack.c.bf16 %v1535_v3, %v1531_v0  ;;  %4532 = vmatprep.subr.bf16.mxu0 %v6475_v63  ;;  %v1553_v17 = vadd.f32 %v13423_v60, %v10406_v2  ;;  %v7056_v0 = vmov 13   ;;  %v6288_v60 = vld [vmem:[#allocation3] ss:$8 sps:$4 sm:$0xff]  }
 0x4d2   :  { %v10491_v4 = vpop.permute.xlu1 %1219  ;;  %6237 = vset.pattern.permute.xlu0 %v7056_v0  ;;  %v13432_v0 = vld [vmem:[#allocation291_spill] sm:$0xff] }
 0x4d3   :  { %13422 = vst [vmem:[#allocation372_spill] sm:$0xff] %v10491_v4  ;;  %6478 = vtanh.bf16 %v1687_v58  ;;  %v1543_v15 = vadd.f32 %v10027_v34, %v10491_v4  ;;  %v1545_v38 = vadd.f32 %v10039_v59, %v10491_v4  ;;  %v13427_v34 = vld [vmem:[#allocation287_spill] sm:$0xff]  ;;  %v13428_v59 = vld [vmem:[#allocation288_spill] sm:$0xff]  ;;  %1752 = vperm.xlu0 %6237, %v9995_v46  }
 0x4d4   :  { %6480 = vtanh.bf16 %v1688_v14  ;;  %v13433_v46 = vld [vmem:[#allocation292_spill] sm:$0xff] }
 0x4d5   :  { %v1689_v52 = vpack.c.bf16 %v1543_v15, %v1539_v43  ;;  %v1690_v39 = vpack.c.bf16 %v1545_v38, %v1541_v50  ;;  %v13429_v43 = vld [vmem:[#allocation293_spill] sm:$0xff]  ;;  %v13430_v15 = vld [vmem:[#allocation294_spill] sm:$0xff] }
 0x4d6   :  { %v10501_v32 = vpop.permute.xlu1 %1223  ;;  %v1563_v50 = vadd.f32 %v13429_v43, %v10427_v61  ;;  %v1565_v38 = vadd.f32 %v13430_v15, %v10427_v61  ;;  %v13436_v43 = vld [vmem:[#allocation301_spill] sm:$0xff]  ;;  %v6294_v61 = vld [vmem:[#allocation3 + $0x24] ss:$8 sps:$4 sm:$0xff]  }
 0x4d7   :  { %13425 = vst [vmem:[#allocation289_spill] sm:$0xff] %v10501_v32  ;;  %6482 = vtanh.bf16 %v1689_v52  ;;  %v1549_v29 = vadd.f32 %v13427_v34, %v10501_v32  ;;  %v1551_v3 = vadd.f32 %v13428_v59, %v10501_v32  ;;  %v13435_v59 = vld [vmem:[#allocation300_spill] sm:$0xff] }
 0x4d8   :  { %6484 = vtanh.bf16 %v1690_v39 }
 0x4d9   :  { %v6477_v63 = vpop.eup %6476  ;;  %v1691_v58 = vpack.c.bf16 %v1553_v17, %v1549_v29  ;;  %v1692_v14 = vpack.c.bf16 %v1555_v22, %v1551_v3  ;;  %v10520_v17 = vpop.permute.xlu0 %1275  ;;  %v1573_v3 = vadd.f32 %v13435_v59, %v10443_v23  ;;  %v13441_v59 = vld [vmem:[#allocation306_spill] sm:$0xff] }
 0x4da   :  { %v10514_v52 = vpop.permute.xlu1 %1231  ;;  %4533 = vmatpush1.bf16.msra.mxu0 %v6477_v63  ;;  %13434 = vst [vmem:[#allocation288_spill] sm:$0xff] %v10520_v17  ;;  %v1575_v63 = vadd.f32 %v13436_v43, %v10443_v23  ;;  %v1585_v43 = vadd.f32 %v13441_v59, %v10469_v31 }
 0x4db   :  { %13431 = vst [vmem:[#allocation287_spill] sm:$0xff] %v10514_v52  ;;  %6486 = vtanh.bf16 %v1691_v58  ;;  %v1559_v34 = vadd.f32 %v13432_v0, %v10514_v52  ;;  %v1561_v39 = vadd.f32 %v13433_v46, %v10514_v52  ;;  %v13438_v46 = vld [vmem:[#allocation297_spill] sm:$0xff] }
 0x4dc   :  { %6488 = vtanh.bf16 %v1692_v14 }
 0x4dd   :  { %v1693_v22 = vpack.c.bf16 %v1563_v50, %v1559_v34  ;;  %v1694_v29 = vpack.c.bf16 %v1565_v38, %v1561_v39  ;;  %4535 = vmatmul.mubr.bf16.vlgmr.msra.gmra.mrb[64].mxu0 %v6288_v60  ;;  %v13440_v34 = vld [vmem:[#allocation305_spill] sm:$0xff] }
 0x4de   :  { %v6479_v15 = vpop.eup %6478  ;;  %v10526_v58 = vpop.permute.xlu1 %1239  ;;  %4544 = vmatprep.mubr.bf16.mxu0 %v6291_v19  ;;  %v1583_v39 = vadd.f32 %v13440_v34, %v10469_v31  ;;  %v6293_v19 = vld [vmem:[#allocation3 + $0x10] ss:$8 sps:$4 sm:$0xff]   ;;  %v13447_v34 = vld [vmem:[#allocation311_spill] sm:$0xff] }
 0x4df   :  { %13437 = vst [vmem:[#allocation293_spill] sm:$0xff] %v10526_v58  ;;  %v6481_v0 = vpop.eup %6480  ;;  %6490 = vtanh.bf16 %v1693_v22  ;;  %v1569_v14 = vadd.f32 %v13438_v46, %v10526_v58  ;;  %v1571_v50 = vadd.f32 %v13439_v16, %v10526_v58  ;;  %v10538_v46 = vpop.permute.xlu0 %1283  ;;  %v13444_v16 = vld [vmem:[#allocation303_spill] sm:$0xff]  ;;  %v1595_v59 = vadd.f32 %v13447_v34, %v10484_v45 }
 0x4e0   :  { %6492 = vtanh.bf16 %v1694_v29  ;;  %1762 = vmatprep.subr.bf16.mxu1 %v6481_v0  ;;  %13443 = vst [vmem:[#allocation291_spill] sm:$0xff] %v10538_v46 }
 0x4e1   :  { %v1695_v38 = vpack.c.bf16 %v1573_v3, %v1569_v14  ;;  %v1696_v60 = vpack.c.bf16 %v1575_v63, %v1571_v50  ;;  %1763 = vmatpush1.bf16.msra.mxu1 %v6479_v15  ;;  %v13445_v3 = vld [vmem:[#allocation304_spill] sm:$0xff]  ;;  %v13446_v15 = vld [vmem:[#allocation310_spill] sm:$0xff] }
 0x4e2   :  { %v6483_v23 = vpop.eup %6482  ;;  %v10536_v22 = vpop.permute.xlu1 %1247  ;;  %v1593_v0 = vadd.f32 %v13446_v15, %v10484_v45  ;;  %v6296_v15 = vld [vmem:[#allocation3 + $0x20] ss:$8 sps:$4 sm:$0xff]  }
 0x4e3   :  { %13442 = vst [vmem:[#allocation294_spill] sm:$0xff] %v10536_v22  ;;  %v6485_v52 = vpop.eup %6484  ;;  %6494 = vtanh.bf16 %v1695_v38  ;;  %v1579_v29 = vadd.f32 %v13444_v16, %v10536_v22  ;;  %v1581_v63 = vadd.f32 %v13445_v3, %v10536_v22  ;;  %v13449_v3 = vld [vmem:[#allocation307_spill] sm:$0xff] }
 0x4e4   :  { %6496 = vtanh.bf16 %v1696_v60  ;;  %1764 = vmatprep.subr.bf16.mxu1 %v6485_v52  ;;  %v13450_v52 = vld [vmem:[#allocation309_spill] sm:$0xff] }
 0x4e5   :  { %v1697_v14 = vpack.c.bf16 %v1583_v39, %v1579_v29  ;;  %v1698_v50 = vpack.c.bf16 %v1585_v43, %v1581_v63  ;;  %1765 = vmatpush1.bf16.msra.mxu1 %v6483_v23  ;;  %4545 = vmatmul.mubr.bf16.gmra.mrb[68].mxu0 %v6293_v19  ;;  %v10554_v39 = vpop.permute.xlu0 %1291  ;;  %v13452_v19 = vld [vmem:[#allocation314_spill] sm:$0xff] }
 0x4e6   :  { %v6487_v31 = vpop.eup %6486  ;;  %v10548_v38 = vpop.permute.xlu1 %1255  ;;  %4554 = vmatprep.mubr.bf16.mxu0 %v6294_v61  ;;  %13451 = vst [vmem:[#allocation300_spill] sm:$0xff] %v10554_v39  ;;  %v1603_v29 = vadd.f32 %v13452_v19, %v10503_v12  ;;  %v13453_v61 = vld [vmem:[#allocation315_spill] sm:$0xff] }
 0x4e7   :  { %13448 = vst [vmem:[#allocation292_spill] sm:$0xff] %v10548_v38  ;;  %v6489_v16 = vpop.eup %6488  ;;  %6498 = vtanh.bf16 %v1697_v14  ;;  %v1589_v60 = vadd.f32 %v13449_v3, %v10548_v38  ;;  %v1591_v22 = vadd.f32 %v13450_v52, %v10548_v38  ;;  %v1605_v63 = vadd.f32 %v13453_v61, %v10503_v12  ;;  %v6297_v3 = vld [vmem:[#allocation3 + $0x34] ss:$8 sps:$4 sm:$0xff]   ;;  %v13458_v19 = vld [vmem:[#allocation319_spill] sm:$0xff] }
 0x4e8   :  { %6500 = vtanh.bf16 %v1698_v50  ;;  %1766 = vmatprep.subr.bf16.mxu1 %v6489_v16  ;;  %v13455_v50 = vld [vmem:[#allocation312_spill] sm:$0xff]  ;;  %v1615_v61 = vadd.f32 %v13458_v19, %v10520_v17 }
 0x4e9   :  { %v1699_v23 = vpack.c.bf16 %v1593_v0, %v1589_v60  ;;  %v1700_v43 = vpack.c.bf16 %v1595_v59, %v1591_v22  ;;  %1767 = vmatpush1.bf16.msra.mxu1 %v6487_v31  ;;  %v13456_v0 = vld [vmem:[#allocation313_spill] sm:$0xff]  ;;  %v13457_v31 = vld [vmem:[#allocation318_spill] sm:$0xff] }
 0x4ea   :  { %v6491_v14 = vpop.eup %6490  ;;  %v10560_v34 = vpop.permute.xlu1 %1263  ;;  %v1613_v59 = vadd.f32 %v13457_v31, %v10520_v17  ;;  %v6299_v31 = vld [vmem:[#allocation3 + $0x30] ss:$8 sps:$4 sm:$0xff]   ;;  %v6300_v17 = vld [vmem:[#allocation3 + $0x44] ss:$8 sps:$4 sm:$0xff]  }
 0x4eb   :  { %13454 = vst [vmem:[#allocation301_spill] sm:$0xff] %v10560_v34  ;;  %v6493_v45 = vpop.eup %6492  ;;  %6502 = vtanh.bf16 %v1699_v23  ;;  %v1599_v16 = vadd.f32 %v13455_v50, %v10560_v34  ;;  %v1601_v22 = vadd.f32 %v13456_v0, %v10560_v34  ;;  %v10572_v50 = vpop.permute.xlu0 %1299  ;;  %v13462_v0 = vld [vmem:[#allocation317_spill] sm:$0xff] }
 0x4ec   :  { %6504 = vtanh.bf16 %v1700_v43  ;;  %1768 = vmatprep.subr.bf16.mxu1 %v6493_v45  ;;  %13460 = vst [vmem:[#allocation298_spill] sm:$0xff] %v10572_v50  ;;  %v13461_v45 = vld [vmem:[#allocation316_spill] sm:$0xff] }
 0x4ed   :  { %v1701_v60 = vpack.c.bf16 %v1603_v29, %v1599_v16  ;;  %v1702_v52 = vpack.c.bf16 %v1605_v63, %v1601_v22  ;;  %1769 = vmatpush1.bf16.msra.mxu1 %v6491_v14  ;;  %4555 = vmatmul.mubr.bf16.gmra.mrb[72].mxu0 %v6296_v15  ;;  %v13463_v14 = vld [vmem:[#allocation324_spill] sm:$0xff] }
 0x4ee   :  { %v6495_v12 = vpop.eup %6494  ;;  %v10570_v23 = vpop.permute.xlu1 %1271  ;;  %4564 = vmatprep.mubr.bf16.mxu0 %v6297_v3  ;;  %v1623_v16 = vadd.f32 %v13463_v14, %v10538_v46  ;;  %v13464_v3 = vld [vmem:[#allocation326_spill] sm:$0xff] }
 0x4ef   :  { %13459 = vst [vmem:[#allocation297_spill] sm:$0xff] %v10570_v23  ;;  %v6497_v38 = vpop.eup %6496  ;;  %6506 = vtanh.bf16 %v1701_v60  ;;  %v1609_v43 = vadd.f32 %v13461_v45, %v10570_v23  ;;  %v1611_v29 = vadd.f32 %v13462_v0, %v10570_v23  ;;  %v1625_v22 = vadd.f32 %v13464_v3, %v10538_v46  ;;  %v13466_v0 = vld [vmem:[#allocation321_spill] sm:$0xff]  ;;  %v13470_v3 = vld [vmem:[#allocation331_spill] sm:$0xff] }
 0x4f0   :  { %6508 = vtanh.bf16 %v1702_v52  ;;  %1770 = vmatprep.subr.bf16.mxu1 %v6497_v38  ;;  %v13467_v38 = vld [vmem:[#allocation323_spill] sm:$0xff] }
 0x4f1   :  { %v1703_v63 = vpack.c.bf16 %v1613_v59, %v1609_v43  ;;  %v1704_v15 = vpack.c.bf16 %v1615_v61, %v1611_v29  ;;  %1771 = vmatpush1.bf16.msra.mxu1 %v6495_v12  ;;  %v13468_v12 = vld [vmem:[#allocation329_spill] sm:$0xff]  ;;  %v10590_v43 = vpop.permute.xlu0 %1307 }
 0x4f2   :  { %v6499_v19 = vpop.eup %6498  ;;  %v10582_v60 = vpop.permute.xlu1 %1279  ;;  %v1633_v61 = vadd.f32 %v13468_v12, %v10554_v39  ;;  %13469 = vst [vmem:[#allocation306_spill] sm:$0xff] %v10590_v43 }
 0x4f3   :  { %13465 = vst [vmem:[#allocation305_spill] sm:$0xff] %v10582_v60  ;;  %v6501_v45 = vpop.eup %6500  ;;  %6510 = vtanh.bf16 %v1703_v63  ;;  %v1619_v52 = vadd.f32 %v13466_v0, %v10582_v60  ;;  %v1621_v59 = vadd.f32 %v13467_v38, %v10582_v60  ;;  %v1635_v63 = vadd.f32 %v13470_v3, %v10554_v39  ;;  %v13473_v38 = vld [vmem:[#allocation328_spill] sm:$0xff] }
 0x4f4   :  { %6512 = vtanh.bf16 %v1704_v15  ;;  %1772 = vmatprep.subr.bf16.mxu1 %v6501_v45  ;;  %v13472_v15 = vld [vmem:[#allocation327_spill] sm:$0xff] }
 0x4f5   :  { %v1705_v29 = vpack.c.bf16 %v1623_v16, %v1619_v52  ;;  %v1706_v14 = vpack.c.bf16 %v1625_v22, %v1621_v59  ;;  %1773 = vmatpush1.bf16.msra.mxu1 %v6499_v19  ;;  %4565 = vmatmul.mubr.bf16.gmra.mrb[76].mxu0 %v6299_v31  ;;  %v13474_v31 = vld [vmem:[#allocation334_spill] sm:$0xff]  ;;  %v13475_v52 = vld [vmem:[#allocation335_spill] sm:$0xff]  ;;  %v10606_v39 = vpop.permute.xlu0 %1315 }
 0x4f6   :  { %v6503_v46 = vpop.eup %6502  ;;  %v10594_v23 = vpop.permute.xlu1 %1287  ;;  %4574 = vmatprep.mubr.bf16.mxu0 %v6300_v17  ;;  %v1643_v19 = vadd.f32 %v13474_v31, %v10572_v50  ;;  %v1645_v59 = vadd.f32 %v13475_v52, %v10572_v50  ;;  %v6302_v17 = vld [vmem:[#allocation3 + $0x40] ss:$8 sps:$4 sm:$0xff]   ;;  %13477 = vst [vmem:[#allocation310_spill] sm:$0xff] %v10606_v39  ;;  %v1655_v31 = vadd.f32 %v10255_v35, %v10590_v43 }
 0x4f7   :  { %13471 = vst [vmem:[#allocation303_spill] sm:$0xff] %v10594_v23  ;;  %v6505_v0 = vpop.eup %6504  ;;  %6514 = vtanh.bf16 %v1705_v29  ;;  %v1629_v45 = vadd.f32 %v13472_v15, %v10594_v23  ;;  %v1631_v12 = vadd.f32 %v13473_v38, %v10594_v23  ;;  %v6303_v15 = vld [vmem:[#allocation3 + $0x54] ss:$8 sps:$4 sm:$0xff]   ;;  %v1663_v35 = vadd.f32 %v10269_v44, %v10606_v39 }
 0x4f8   :  { %6516 = vtanh.bf16 %v1706_v14  ;;  %1774 = vmatprep.subr.bf16.mxu1 %v6505_v0  ;;  %v13478_v14 = vld [vmem:[#allocation332_spill] sm:$0xff]  ;;  %v13480_v0 = vld [vmem:[#allocation338_spill] sm:$0xff] }
 0x4f9   :  { %v1707_v16 = vpack.c.bf16 %v1633_v61, %v1629_v45  ;;  %v1708_v22 = vpack.c.bf16 %v1635_v63, %v1631_v12  ;;  %1775 = vmatpush1.bf16.msra.mxu1 %v6503_v46  ;;  %v13479_v46 = vld [vmem:[#allocation333_spill] sm:$0xff]  ;;  %v1653_v45 = vadd.f32 %v13480_v0, %v10590_v43  ;;  %v6306_v0 = vld [vmem:[#allocation3 + $0x64] ss:$8 sps:$4 sm:$0xff]  }
 0x4fa   :  { %v6507_v3 = vpop.eup %6506  ;;  %v10604_v29 = vpop.permute.xlu1 %1295 }
 0x4fb   :  { %13476 = vst [vmem:[#allocation304_spill] sm:$0xff] %v10604_v29  ;;  %v6509_v60 = vpop.eup %6508  ;;  %6518 = vtanh.bf16 %v1707_v16  ;;  %v1639_v61 = vadd.f32 %v13478_v14, %v10604_v29  ;;  %v1641_v63 = vadd.f32 %v13479_v46, %v10604_v29  ;;  %v13482_v46 = vld [vmem:[#allocation336_spill] sm:$0xff] }
 0x4fc   :  { %6520 = vtanh.bf16 %v1708_v22  ;;  %1776 = vmatprep.subr.bf16.mxu1 %v6509_v60  ;;  %v13483_v60 = vld [vmem:[#allocation337_spill] sm:$0xff] }
 0x4fd   :  { %v1709_v38 = vpack.c.bf16 %v1643_v19, %v1639_v61  ;;  %v1710_v12 = vpack.c.bf16 %v1645_v59, %v1641_v63  ;;  %1777 = vmatpush1.bf16.msra.mxu1 %v6507_v3  ;;  %4575 = vmatmul.mubr.bf16.gmra.mrb[80].mxu0 %v6302_v17  ;;  %v10622_v19 = vpop.permute.xlu0 %1323  ;;  %v1665_v3 = vadd.f32 %v10273_v48, %v10606_v39 }
 0x4fe   :  { %v6511_v52 = vpop.eup %6510  ;;  %v10616_v16 = vpop.permute.xlu1 %1303  ;;  %4584 = vmatprep.mubr.bf16.mxu0 %v6303_v15  ;;  %13484 = vst [vmem:[#allocation307_spill] sm:$0xff] %v10622_v19  ;;  %v6305_v15 = vld [vmem:[#allocation3 + $0x50] ss:$8 sps:$4 sm:$0xff]   ;;  %v1673_v44 = vadd.f32 %v10285_v27, %v10622_v19 }
 0x4ff   :  { %13481 = vst [vmem:[#allocation311_spill] sm:$0xff] %v10616_v16  ;;  %v6513_v14 = vpop.eup %6512  ;;  %6522 = vtanh.bf16 %v1709_v38  ;;  %v1649_v22 = vadd.f32 %v13482_v46, %v10616_v16  ;;  %v1651_v50 = vadd.f32 %v13483_v60, %v10616_v16 }
 0x500   :  { %6524 = vtanh.bf16 %v1710_v12  ;;  %1778 = vmatprep.subr.bf16.mxu1 %v6513_v14  ;;  %v13486_v12 = vld [vmem:[#allocation339_spill] sm:$0xff] }
 0x501   :  { %v1711_v59 = vpack.c.bf16 %v1653_v45, %v1649_v22  ;;  %v1712_v17 = vpack.c.bf16 %v1655_v31, %v1651_v50  ;;  %1779 = vmatpush1.bf16.msra.mxu1 %v6511_v52  ;;  %v13487_v45 = vld [vmem:[#allocation342_spill] sm:$0xff]  ;;  %v1675_v52 = vadd.f32 %v10289_v6, %v10622_v19  ;;  %v10640_v60 = vpop.permute.xlu0 %1331 }
 0x502   :  { %v6515_v61 = vpop.eup %6514  ;;  %v10628_v63 = vpop.permute.xlu1 %1311  ;;  %13489 = vst [vmem:[#allocation315_spill] sm:$0xff] %v10640_v60  ;;  %v1683_v6 = vadd.f32 %v10299_v18, %v10640_v60 }
 0x503   :  { %13485 = vst [vmem:[#allocation309_spill] sm:$0xff] %v10628_v63  ;;  %v6517_v38 = vpop.eup %6516  ;;  %6526 = vtanh.bf16 %v1711_v59  ;;  %v1659_v14 = vadd.f32 %v13486_v12, %v10628_v63  ;;  %v1661_v50 = vadd.f32 %v13487_v45, %v10628_v63 }
 0x504   :  { %6528 = vtanh.bf16 %v1712_v17  ;;  %1780 = vmatprep.subr.bf16.mxu1 %v6517_v38  ;;  %v13490_v17 = vld [vmem:[#allocation344_spill] sm:$0xff] }
 0x505   :  { %v1713_v31 = vpack.c.bf16 %v1663_v35, %v1659_v14  ;;  %v1714_v48 = vpack.c.bf16 %v1665_v3, %v1661_v50  ;;  %1781 = vmatpush1.bf16.msra.mxu1 %v6515_v61  ;;  %4585 = vmatmul.mubr.bf16.gmra.mrb[84].mxu0 %v6305_v15  ;;  %v1685_v15 = vadd.f32 %v10301_v30, %v10640_v60  ;;  %v6308_v61 = vld [vmem:[#allocation3 + $0x60] ss:$8 sps:$4 sm:$0xff]   ;;  %v6309_v14 = vld [vmem:[#allocation3 + $0x74] ss:$8 sps:$4 sm:$0xff]  }
 0x506   :  { %v6519_v46 = vpop.eup %6518  ;;  %v10638_v22 = vpop.permute.xlu1 %1319  ;;  %4594 = vmatprep.mubr.bf16.mxu0 %v6306_v0 }
 0x507   :  { %13488 = vst [vmem:[#allocation314_spill] sm:$0xff] %v10638_v22  ;;  %v6521_v59 = vpop.eup %6520  ;;  %6530 = vtanh.bf16 %v1713_v31  ;;  %v1669_v38 = vadd.f32 %v13490_v17, %v10638_v22  ;;  %v1671_v27 = vadd.f32 %v10283_v41, %v10638_v22  ;;  %v6314_v17 = vld [vmem:[#allocation3 + $0x80] ss:$8 sps:$4 sm:$0xff]  }
 0x508   :  { %6532 = vtanh.bf16 %v1714_v48  ;;  %1782 = vmatprep.subr.bf16.mxu1 %v6521_v59  ;;  %v6311_v48 = vld [vmem:[#allocation3 + $0x70] ss:$8 sps:$4 sm:$0xff]  }
 0x509   :  { %v1715_v35 = vpack.c.bf16 %v1673_v44, %v1669_v38  ;;  %v1716_v3 = vpack.c.bf16 %v1675_v52, %v1671_v27  ;;  %1783 = vmatpush1.bf16.msra.mxu1 %v6519_v46  ;;  %v6312_v46 = vld [vmem:[#allocation3 + $0x84] ss:$8 sps:$4 sm:$0xff]   ;;  %v6317_v27 = vld [vmem:[#allocation3 + $0x94] ss:$8 sps:$4 sm:$0xff]  }
 0x50a   :  { %v6523_v0 = vpop.eup %6522  ;;  %v10650_v12 = vpop.permute.xlu1 %1327 }
 0x50b   :  { %13491 = vst [vmem:[#allocation312_spill] sm:$0xff] %v10650_v12  ;;  %v6525_v45 = vpop.eup %6524  ;;  %6534 = vtanh.bf16 %v1715_v35  ;;  %v1679_v41 = vadd.f32 %v10291_v56, %v10650_v12  ;;  %v1681_v50 = vadd.f32 %v10295_v25, %v10650_v12 }
 0x50c   :  { %6536 = vtanh.bf16 %v1716_v3  ;;  %1784 = vmatprep.subr.bf16.mxu1 %v6525_v45  ;;  %v10658_v3 = vcombine.low %v10339_v9, %v10339_v9  ;;  %v6325_v45 = vld [vmem:[#allocation3 + $0xb0] ss:$8 sps:$4 sm:$0xff]   ;;  %v6328_v9 = vld [vmem:[#allocation3 + $0xc0] ss:$8 sps:$4 sm:$0xff]  }
 0x50d   :  { %v1717_v44 = vpack.c.bf16 %v1683_v6, %v1679_v41  ;;  %v1718_v18 = vpack.c.bf16 %v1685_v15, %v1681_v50  ;;  %1785 = vmatpush1.bf16.msra.mxu1 %v6523_v0  ;;  %4595 = vmatmul.mubr.bf16.gmra.mrb[88].mxu0 %v6308_v61  ;;  %v6319_v6 = vld [vmem:[#allocation3 + $0x90] ss:$8 sps:$4 sm:$0xff]   ;;  %v6941_v15 = vld [vmem:[#allocation3 + $0x4] ss:$8 sps:$4 sm:$0xff]   ;;  %v6322_v0 = vld [vmem:[#allocation3 + $0xa0] ss:$8 sps:$4 sm:$0xff]  }
 0x50e   :  { %v6527_v30 = vpop.eup %6526  ;;  %4604 = vmatprep.mubr.bf16.mxu0 %v6309_v14  ;;  %13492 = vst [vmem:[#allocation313_spill] sm:$0xff] %v10658_v3  ;;  %v6320_v61 = vld [vmem:[#allocation3 + $0xa4] ss:$8 sps:$4 sm:$0xff]   ;;  %v6323_v14 = vld [vmem:[#allocation3 + $0xb4] ss:$8 sps:$4 sm:$0xff]  }
 0x50f   :  { %v6529_v31 = vpop.eup %6528  ;;  %6538 = vtanh.bf16 %v1717_v44  ;;  %v6326_v41 = vld [vmem:[#allocation3 + $0xc4] ss:$8 sps:$4 sm:$0xff]   ;;  %v6329_v50 = vld [vmem:[#allocation3 + $0xd4] ss:$8 sps:$4 sm:$0xff]   ;;  %v6331_v44 = vld [vmem:[#allocation3 + $0xd0] ss:$8 sps:$4 sm:$0xff]  }
 0x510   :  { %6540 = vtanh.bf16 %v1718_v18  ;;  %1786 = vmatprep.subr.bf16.mxu1 %v6529_v31  ;;  %v6332_v18 = vld [vmem:[#allocation3 + $0xe4] ss:$8 sps:$4 sm:$0xff]   ;;  %v6335_v31 = vld [vmem:[#allocation3 + $0xf4] ss:$8 sps:$4 sm:$0xff]  }
 0x511   :  { %1787 = vmatpush1.bf16.msra.mxu1 %v6527_v30  ;;  %v6334_v30 = vld [vmem:[#allocation3 + $0xe0] ss:$8 sps:$4 sm:$0xff]  }
 0x512   :  { %v6531_v52 = vpop.eup %6530 }
 0x513   :  { %v6533_v56 = vpop.eup %6532 }
 0x514   :  { %1788 = vmatprep.subr.bf16.mxu1 %v6533_v56 }
 0x515   :  { %1789 = vmatpush1.bf16.msra.mxu1 %v6531_v52  ;;  %4605 = vmatmul.mubr.bf16.gmra.mrb[92].mxu0 %v6311_v48  ;;  %v6337_v48 = vld [vmem:[#allocation3 + $0xf0] ss:$8 sps:$4 sm:$0xff]   ;;  %v10661_v52 = vpop.permute.xlu0 %4026 }
 0x516   :  { %v6535_v25 = vpop.eup %6534  ;;  %4614 = vmatprep.mubr.bf16.mxu0 %v6312_v46  ;;  %13493 = vst [vmem:[#allocation318_spill] sm:$0xff] %v10661_v52 }
 0x517   :  { %v6537_v59 = vpop.eup %6536 }
 0x518   :  { %1790 = vmatprep.subr.bf16.mxu1 %v6537_v59  ;;  %v10669_v59 = vpop.permute.xlu1 %4022 }
 0x519   :  { %1791 = vmatpush1.bf16.msra.mxu1 %v6535_v25  ;;  %v10663_v46 = vpop.permute.xlu0 %4038  ;;  %13497 = vst [vmem:[#allocation324_spill] sm:$0xff] %v10669_v59 }
 0x51a   :  { %v6539_v38 = vpop.eup %6538  ;;  %13494 = vst [vmem:[#allocation319_spill] sm:$0xff] %v10663_v46 }
 0x51b   :  { %v6541_v35 = vpop.eup %6540 }
 0x51c   :  { %1792 = vmatprep.subr.bf16.mxu1 %v6541_v35 }
 0x51d   :  { %1793 = vmatpush1.bf16.msra.mxu1 %v6539_v38  ;;  %4615 = vmatmul.mubr.bf16.gmra.mrb[96].mxu0 %v6314_v17  ;;  %v10665_v56 = vpop.permute.xlu0 %4046 }
 0x51e   :  { %4624 = vmatprep.mubr.bf16.mxu0 %v6317_v27  ;;  %13495 = vst [vmem:[#allocation316_spill] sm:$0xff] %v10665_v56 }
 0x520   :  { %1795 = vmatmul.mubr.bf16.vlgmr.msra.gmra.mrb[0].mxu1 %v10658_v3 }
 0x521   :  { %4341 = vmatprep.mubr.bf16.mxu1 %v6941_v15  ;;  %v10667_v25 = vpop.permute.xlu0 %4054 }
 0x522   :  { %13496 = vst [vmem:[#allocation317_spill] sm:$0xff] %v10667_v25 }
 0x525   :  { %4625 = vmatmul.mubr.bf16.gmra.mrb[100].mxu0 %v6319_v6  ;;  %v10671_v17 = vpop.permute.xlu0 %4062 }
 0x526   :  { %4634 = vmatprep.mubr.bf16.mxu0 %v6320_v61  ;;  %13498 = vst [vmem:[#allocation326_spill] sm:$0xff] %v10671_v17 }
 0x52d   :  { %4635 = vmatmul.mubr.bf16.gmra.mrb[104].mxu0 %v6322_v0  ;;  %v10675_v0 = vpop.permute.xlu1 %4030 }
 0x52e   :  { %4644 = vmatprep.mubr.bf16.mxu0 %v6323_v14  ;;  %13499 = vst [vmem:[#allocation321_spill] sm:$0xff] %v10675_v0 }
 0x535   :  { %4645 = vmatmul.mubr.bf16.gmra.mrb[108].mxu0 %v6325_v45 }
 0x536   :  { %4654 = vmatprep.mubr.bf16.mxu0 %v6326_v41  ;;  %v10679_v41 = vpop.permute.xlu0 %4070 }
 0x537   :  { %13500 = vst [vmem:[#allocation323_spill] sm:$0xff] %v10679_v41 }
 0x53d   :  { %4655 = vmatmul.mubr.bf16.gmra.mrb[112].mxu0 %v6328_v9 }
 0x53e   :  { %4664 = vmatprep.mubr.bf16.mxu0 %v6329_v50 }
 0x545   :  { %4665 = vmatmul.mubr.bf16.gmra.mrb[116].mxu0 %v6331_v44 }
 0x546   :  { %4674 = vmatprep.mubr.bf16.mxu0 %v6332_v18 }
 0x54d   :  { %4675 = vmatmul.mubr.bf16.gmra.mrb[120].mxu0 %v6334_v30  ;;  %v10681_v30 = vpop.permute.xlu1 %4034 }
 0x54e   :  { %4684 = vmatprep.mubr.bf16.mxu0 %v6335_v31  ;;  %13501 = vst [vmem:[#allocation329_spill] sm:$0xff] %v10681_v30 }
 0x555   :  { %4685 = vmatmul.mubr.bf16.gmra.mrb[124].mxu0 %v6337_v48  ;;  %v10683_v48 = vpop.permute.xlu0 %4078 }
 0x556   :  { %13502 = vst [vmem:[#allocation331_spill] sm:$0xff] %v10683_v48 }
 0x5b0   :  { %v4536_v38 = vpop.f32.mrb[64].mxu0 }
 0x5b1   :  { %v4538_v27 = vpop.f32.mrb[65].mxu0  ;;  %v4537_v6 = vadd.f32 %v4536_v38, %v10669_v59 }
 0x5b2   :  { %v4540_v35 = vpop.f32.mrb[66].mxu0  ;;  %v4539_v14 = vadd.f32 %v4538_v27, %v10669_v59 }
 0x5b3   :  { %v4541_v15 = vadd.f32 %v4540_v35, %v10661_v52  ;;  %v4542_v61 = vpop.f32.mrb[67].mxu0 }
 0x5b4   :  { %v4543_v45 = vadd.f32 %v4542_v61, %v10661_v52  ;;  %v13531_v52 = vld [vmem:[#allocation144_spill] sm:$0xff] }
 0x5b5   :  { %v4858_v9 = vpack.c.bf16 %v4541_v15, %v4537_v6 }
 0x5b6   :  { %v4859_v50 = vpack.c.bf16 %v4543_v45, %v4539_v14  ;;  %v10689_v45 = vpop.permute.xlu0 %4086 }
 0x5b7   :  { %13503 = vst [vmem:[#allocation327_spill] sm:$0xff] %v10689_v45 }
 0x5b8   :  { %6542 = vtanh.bf16 %v4859_v50  ;;  %v4546_v44 = vpop.f32.mrb[68].mxu0  ;;  %v10691_v50 = vpop.permute.xlu1 %4042 }
 0x5b9   :  { %6544 = vtanh.bf16 %v4858_v9  ;;  %v4548_v18 = vpop.f32.mrb[69].mxu0  ;;  %v4547_v38 = vadd.f32 %v4546_v44, %v10675_v0  ;;  %13504 = vst [vmem:[#allocation328_spill] sm:$0xff] %v10691_v50 }
 0x5ba   :  { %v4550_v31 = vpop.f32.mrb[70].mxu0  ;;  %v4549_v61 = vadd.f32 %v4548_v18, %v10675_v0 }
 0x5bb   :  { %v4551_v35 = vadd.f32 %v4550_v31, %v10681_v30  ;;  %v4552_v27 = vpop.f32.mrb[71].mxu0 }
 0x5bc   :  { %v4553_v3 = vadd.f32 %v4552_v27, %v10681_v30  ;;  %v10699_v22 = vpop.permute.xlu1 %4050  ;;  %v13529_v30 = vld [vmem:[#allocation67_spill] sm:$0xff] }
 0x5bd   :  { %v4863_v6 = vpack.c.bf16 %v4551_v35, %v4547_v38  ;;  %13506 = vst [vmem:[#allocation335_spill] sm:$0xff] %v10699_v22 }
 0x5be   :  { %v4864_v15 = vpack.c.bf16 %v4553_v3, %v4549_v61  ;;  %v10697_v61 = vpop.permute.xlu0 %4094 }
 0x5bf   :  { %13505 = vst [vmem:[#allocation334_spill] sm:$0xff] %v10697_v61 }
 0x5c0   :  { %6546 = vtanh.bf16 %v4864_v15  ;;  %v4556_v14 = vpop.f32.mrb[72].mxu0 }
 0x5c1   :  { %6548 = vtanh.bf16 %v4863_v6  ;;  %v4558_v9 = vpop.f32.mrb[73].mxu0  ;;  %v4557_v44 = vadd.f32 %v4556_v14, %v10663_v46 }
 0x5c2   :  { %v4560_v60 = vpop.f32.mrb[74].mxu0  ;;  %v4559_v27 = vadd.f32 %v4558_v9, %v10663_v46 }
 0x5c3   :  { %v6543_v12 = vpop.eup %6542  ;;  %v4561_v31 = vadd.f32 %v4560_v60, %v10691_v50  ;;  %v4562_v19 = vpop.f32.mrb[75].mxu0 }
 0x5c4   :  { %v6545_v18 = vpop.eup %6544  ;;  %v4563_v3 = vadd.f32 %v4562_v19, %v10691_v50  ;;  %5068 = vmatprep.subr.bf16.mxu0 %v6543_v12 }
 0x5c5   :  { %v4868_v38 = vpack.c.bf16 %v4561_v31, %v4557_v44  ;;  %5069 = vmatpush1.bf16.msra.mxu0 %v6545_v18  ;;  %v10705_v31 = vpop.permute.xlu0 %4102 }
 0x5c6   :  { %v4869_v35 = vpack.c.bf16 %v4563_v3, %v4559_v27  ;;  %13507 = vst [vmem:[#allocation332_spill] sm:$0xff] %v10705_v31 }
 0x5c8   :  { %6550 = vtanh.bf16 %v4869_v35  ;;  %v4566_v6 = vpop.f32.mrb[76].mxu0  ;;  %v10707_v35 = vpop.permute.xlu1 %4058 }
 0x5c9   :  { %6552 = vtanh.bf16 %v4868_v38  ;;  %v4568_v15 = vpop.f32.mrb[77].mxu0  ;;  %v4567_v39 = vadd.f32 %v4566_v6, %v10665_v56  ;;  %13508 = vst [vmem:[#allocation333_spill] sm:$0xff] %v10707_v35  ;;  %v10709_v43 = vpop.permute.xlu0 %4110 }
 0x5ca   :  { %v4570_v14 = vpop.f32.mrb[78].mxu0  ;;  %v4569_v12 = vadd.f32 %v4568_v15, %v10665_v56  ;;  %13509 = vst [vmem:[#allocation338_spill] sm:$0xff] %v10709_v43 }
 0x5cb   :  { %v6547_v60 = vpop.eup %6546  ;;  %v4571_v9 = vadd.f32 %v4570_v14, %v10699_v22  ;;  %v4572_v63 = vpop.f32.mrb[79].mxu0 }
 0x5cc   :  { %v6549_v19 = vpop.eup %6548  ;;  %v4573_v44 = vadd.f32 %v4572_v63, %v10699_v22  ;;  %5070 = vmatprep.subr.bf16.mxu0 %v6547_v60  ;;  %v10717_v29 = vpop.permute.xlu1 %4066 }
 0x5cd   :  { %v4873_v18 = vpack.c.bf16 %v4571_v9, %v4567_v39  ;;  %5071 = vmatpush1.bf16.msra.mxu0 %v6549_v19  ;;  %13511 = vst [vmem:[#allocation337_spill] sm:$0xff] %v10717_v29 }
 0x5ce   :  { %v4874_v27 = vpack.c.bf16 %v4573_v44, %v4569_v12 }
 0x5d0   :  { %6554 = vtanh.bf16 %v4874_v27  ;;  %v4576_v3 = vpop.f32.mrb[80].mxu0 }
 0x5d1   :  { %6556 = vtanh.bf16 %v4873_v18  ;;  %v4578_v38 = vpop.f32.mrb[81].mxu0  ;;  %v4577_v15 = vadd.f32 %v4576_v3, %v10667_v25  ;;  %v10715_v18 = vpop.permute.xlu0 %4118 }
 0x5d2   :  { %v4580_v6 = vpop.f32.mrb[82].mxu0  ;;  %v4579_v39 = vadd.f32 %v4578_v38, %v10667_v25  ;;  %13510 = vst [vmem:[#allocation336_spill] sm:$0xff] %v10715_v18 }
 0x5d3   :  { %v6551_v14 = vpop.eup %6550  ;;  %v4581_v63 = vadd.f32 %v4580_v6, %v10707_v35  ;;  %v4582_v60 = vpop.f32.mrb[83].mxu0 }
 0x5d4   :  { %v6553_v16 = vpop.eup %6552  ;;  %v4583_v9 = vadd.f32 %v4582_v60, %v10707_v35  ;;  %5072 = vmatprep.subr.bf16.mxu0 %v6551_v14 }
 0x5d5   :  { %v4878_v19 = vpack.c.bf16 %v4581_v63, %v4577_v15  ;;  %5073 = vmatpush1.bf16.msra.mxu0 %v6553_v16 }
 0x5d6   :  { %v4879_v12 = vpack.c.bf16 %v4583_v9, %v4579_v39  ;;  %v10723_v39 = vpop.permute.xlu0 %4126 }
 0x5d7   :  { %13512 = vst [vmem:[#allocation339_spill] sm:$0xff] %v10723_v39 }
 0x5d8   :  { %6558 = vtanh.bf16 %v4879_v12  ;;  %v4586_v44 = vpop.f32.mrb[84].mxu0  ;;  %v10725_v12 = vpop.permute.xlu1 %4074 }
 0x5d9   :  { %6560 = vtanh.bf16 %v4878_v19  ;;  %v4588_v27 = vpop.f32.mrb[85].mxu0  ;;  %v4587_v23 = vadd.f32 %v4586_v44, %v10671_v17  ;;  %13513 = vst [vmem:[#allocation342_spill] sm:$0xff] %v10725_v12 }
 0x5da   :  { %v4590_v3 = vpop.f32.mrb[86].mxu0  ;;  %v4589_v14 = vadd.f32 %v4588_v27, %v10671_v17 }
 0x5db   :  { %v6555_v6 = vpop.eup %6554  ;;  %v4591_v38 = vadd.f32 %v4590_v3, %v10717_v29  ;;  %v4592_v34 = vpop.f32.mrb[87].mxu0 }
 0x5dc   :  { %v6557_v60 = vpop.eup %6556  ;;  %v4593_v16 = vadd.f32 %v4592_v34, %v10717_v29  ;;  %5074 = vmatprep.subr.bf16.mxu0 %v6555_v6 }
 0x5dd   :  { %v4883_v15 = vpack.c.bf16 %v4591_v38, %v4587_v23  ;;  %5075 = vmatpush1.bf16.msra.mxu0 %v6557_v60  ;;  %v10731_v38 = vpop.permute.xlu0 %4134 }
 0x5de   :  { %v4884_v63 = vpack.c.bf16 %v4593_v16, %v4589_v14  ;;  %13514 = vst [vmem:[#allocation344_spill] sm:$0xff] %v10731_v38 }
 0x5e0   :  { %6562 = vtanh.bf16 %v4884_v63  ;;  %v4596_v9 = vpop.f32.mrb[88].mxu0  ;;  %v10733_v63 = vpop.permute.xlu1 %4082 }
 0x5e1   :  { %6564 = vtanh.bf16 %v4883_v15  ;;  %v4598_v19 = vpop.f32.mrb[89].mxu0  ;;  %v4597_v58 = vadd.f32 %v4596_v9, %v10679_v41  ;;  %13515 = vst [vmem:[#allocation373_spill] sm:$0xff] %v10733_v63  ;;  %v10735_v32 = vpop.permute.xlu0 %4142 }
 0x5e2   :  { %v4600_v44 = vpop.f32.mrb[90].mxu0  ;;  %v4599_v23 = vadd.f32 %v4598_v19, %v10679_v41  ;;  %13516 = vst [vmem:[#allocation374_spill] sm:$0xff] %v10735_v32 }
 0x5e3   :  { %v6559_v3 = vpop.eup %6558  ;;  %v4601_v27 = vadd.f32 %v4600_v44, %v10725_v12  ;;  %v4602_v2 = vpop.f32.mrb[91].mxu0 }
 0x5e4   :  { %v6561_v34 = vpop.eup %6560  ;;  %v4603_v6 = vadd.f32 %v4602_v2, %v10725_v12  ;;  %5076 = vmatprep.subr.bf16.mxu0 %v6559_v3  ;;  %v10743_v36 = vpop.permute.xlu1 %4090 }
 0x5e5   :  { %v4888_v60 = vpack.c.bf16 %v4601_v27, %v4597_v58  ;;  %5077 = vmatpush1.bf16.msra.mxu0 %v6561_v34  ;;  %13518 = vst [vmem:[#allocation376_spill] sm:$0xff] %v10743_v36 }
 0x5e6   :  { %v4889_v14 = vpack.c.bf16 %v4603_v6, %v4599_v23 }
 0x5e8   :  { %6566 = vtanh.bf16 %v4889_v14  ;;  %v4606_v16 = vpop.f32.mrb[92].mxu0  ;;  %v10741_v14 = vpop.permute.xlu0 %1752 }
 0x5e9   :  { %6568 = vtanh.bf16 %v4888_v60  ;;  %v4608_v15 = vpop.f32.mrb[93].mxu0  ;;  %v4607_v19 = vadd.f32 %v4606_v16, %v10683_v48  ;;  %13517 = vst [vmem:[#allocation375_spill] sm:$0xff] %v10741_v14  ;;  %v10756_v41 = vpop.permute.xlu1 %4098 }
 0x5ea   :  { %v4610_v9 = vpop.f32.mrb[94].mxu0  ;;  %v4609_v58 = vadd.f32 %v4608_v15, %v10683_v48  ;;  %13520 = vst [vmem:[#allocation377_spill] sm:$0xff] %v10756_v41 }
 0x5eb   :  { %v6563_v44 = vpop.eup %6562  ;;  %v4611_v2 = vadd.f32 %v4610_v9, %v10733_v63  ;;  %v4612_v3 = vpop.f32.mrb[95].mxu0 }
 0x5ec   :  { %v6565_v4 = vpop.eup %6564  ;;  %v4613_v27 = vadd.f32 %v4612_v3, %v10733_v63  ;;  %5078 = vmatprep.subr.bf16.mxu0 %v6563_v44 }
 0x5ed   :  { %v4893_v34 = vpack.c.bf16 %v4611_v2, %v4607_v19  ;;  %5079 = vmatpush1.bf16.msra.mxu0 %v6565_v4  ;;  %v10819_v35 = vpop.permute.xlu1 %4106 }
 0x5ee   :  { %v4894_v23 = vpack.c.bf16 %v4613_v27, %v4609_v58  ;;  %13523 = vst [vmem:[#allocation380_spill] sm:$0xff] %v10819_v35 }
 0x5f0   :  { %6570 = vtanh.bf16 %v4894_v23  ;;  %v4616_v6 = vpop.f32.mrb[96].mxu0 }
 0x5f1   :  { %6572 = vtanh.bf16 %v4893_v34  ;;  %v4618_v60 = vpop.f32.mrb[97].mxu0  ;;  %v4617_v26 = vadd.f32 %v4616_v6, %v10689_v45  ;;  %v13519_v6 = vld [vmem:[#allocation43_spill] sm:$0xff]  ;;  %v10827_v50 = vpop.permute.xlu1 %4114 }
 0x5f2   :  { %v4620_v16 = vpop.f32.mrb[98].mxu0  ;;  %v4619_v4 = vadd.f32 %v4618_v60, %v10689_v45  ;;  %13525 = vst [vmem:[#allocation382_spill] sm:$0xff] %v10827_v50 }
 0x5f3   :  { %v6567_v9 = vpop.eup %6566  ;;  %v1796_v5 = vpop.f32.mrb[0].mxu1  ;;  %v4621_v15 = vadd.f32 %v4620_v16, %v10743_v36 }
 0x5f4   :  { %v4622_v3 = vpop.f32.mrb[99].mxu0  ;;  %v6569_v44 = vpop.eup %6568  ;;  %v10749_v19 = vadd.f32 %v1796_v5, %v10741_v14  ;;  %5080 = vmatprep.subr.bf16.mxu0 %v6567_v9 }
 0x5f5   :  { %v1798_v2 = vpop.f32.mrb[1].mxu1  ;;  %v4623_v58 = vadd.f32 %v4622_v3, %v10743_v36  ;;  %v4898_v27 = vpack.c.bf16 %v4621_v15, %v4617_v26  ;;  %5081 = vmatpush1.bf16.msra.mxu0 %v6569_v44  ;;  %v6942_v26 = vld [vmem:[%s12445_s0] sm:$0xff]  ;;  %v10855_v51 = vpop.permute.xlu1 %4122 }
 0x5f6   :  { %v1799_v34 = vadd.f32 %v1798_v2, %v10741_v14  ;;  %v1800_v23 = vpop.f32.mrb[2].mxu1  ;;  %v1809_v63 = vmul.f32 %v10749_v19, %v13519_v6 }
 0x5f7   :  { %v4899_v16 = vpack.c.bf16 %v4623_v58, %v4619_v4  ;;  %v1801_v48 = vpop.f32.mrb[3].mxu1 }
 0x5f8   :  { %v1803_v12 = vsub.f32 %v10749_v19, %v1799_v34  ;;  %v1811_v60 = vrot.slane %v1809_v63, 7  ;;  %v4626_v5 = vpop.f32.mrb[100].mxu0  ;;  %v10771_v34 = vld [vmem:[%s12449_s4 + $0x8] sm:$0xff] }
 0x5f9   :  { %6574 = vtanh.bf16 %v4899_v16  ;;  %v4628_v45 = vpop.f32.mrb[101].mxu0  ;;  %v4627_v44 = vadd.f32 %v4626_v5, %v10697_v61  ;;  %13521 = vst [vmem:[#allocation378_spill] sm:$0xff] %v10771_v34  ;;  %v10777_v16 = vcombine.high %v10771_v34, %v10771_v34  ;;  %v13539_v34 = vld [vmem:[#allocation204_spill] sm:$0xff] }
 0x5fa   :  { %6576 = vtanh.bf16 %v4898_v27  ;;  %v1813_v9 = vadd.f32 %v6942_v26, %v1811_v60  ;;  %v4630_v15 = vpop.f32.mrb[102].mxu0  ;;  %v4629_v63 = vadd.f32 %v4628_v45, %v10697_v61  ;;  %v1804_v36 = vmul.f32 %v1803_v12, %v13519_v6  ;;  %v13526_v12 = vld [vmem:[#allocation66_spill] sm:$0xff] }
 0x5fb   :  { %v6571_v3 = vpop.eup %6570  ;;  %v4631_v48 = vadd.f32 %v4630_v15, %v10756_v41  ;;  %v4632_v4 = vpop.f32.mrb[103].mxu0  ;;  %13522 = vst [vmem:[#allocation379_spill] sm:$0xff] %v10777_v16  ;;  %5100 = vmatprep.mubr.bf16.mxu0 %v10777_v16 }
 0x5fc   :  { %v6573_v19 = vpop.eup %6572  ;;  %5670 = vst [vmem:[%s12450_s5 + $0x5] sm:$0x6] %v1813_v9  ;;  %v4633_v2 = vadd.f32 %v4632_v4, %v10756_v41  ;;  %5082 = vmatprep.subr.bf16.mxu0 %v6571_v3  ;;  %v1806_v29 = vrot.slane %v1804_v36, 7 }
 0x5fd   :  { %v4903_v58 = vpack.c.bf16 %v4631_v48, %v4627_v44  ;;  %5083 = vmatpush1.bf16.msra.mxu0 %v6573_v19 }
 0x5fe   :  { %v4904_v27 = vpack.c.bf16 %v4633_v2, %v4629_v63  ;;  %v10821_v25 = vadd.f32 %v6942_v26, %v1806_v29  ;;  %v13530_v29 = vld [vmem:[#allocation165_spill] sm:$0xff] }
 0x5ff   :  { %13537 = vst [vmem:[#allocation165_spill] sm:$0xff] %v10855_v51 }
 0x600   :  { %6578 = vtanh.bf16 %v4904_v27  ;;  %v10773_v23 = vpop.f32.mrb[104].mxu0  ;;  %13524 = vst [vmem:[#allocation381_spill] sm:$0xff] %v10821_v25  ;;  %v10831_v6 = vrot.slane %v10821_v25, %v13526_v12  ;;  %v10839_v0 = vrot.slane %v10821_v25, %v13529_v30  ;;  %v13536_v25 = vld [vmem:[#allocation195_spill] sm:$0xff] }
 0x601   :  { %6580 = vtanh.bf16 %v4903_v58  ;;  %v10779_v45 = vpop.f32.mrb[105].mxu0 }
 0x602   :  { %v10781_v60 = vpop.f32.mrb[106].mxu0  ;;  %13527 = vst [vmem:[#allocation383_spill] sm:$0xff] %v10831_v6  ;;  %v2753_v26 = vmul.f32 %v10831_v6, %v13530_v29  ;;  %v2754_v59 = vmul.f32 %v10831_v6, %v13531_v52  ;;  %v2755_v54 = vmul.f32 %v10831_v6, %v13532_v57  ;;  %v2756_v12 = vmul.f32 %v10831_v6, %v13533_v20  ;;  %v13538_v29 = vld [vmem:[#allocation149_spill] sm:$0xff] }
 0x603   :  { %v10784_v9 = vpop.f32.mrb[107].mxu0  ;;  %v2757_v42 = vmul.f32 %v10831_v6, %v13534_v53  ;;  %v2758_v62 = vmul.f32 %v10831_v6, %v13535_v7  ;;  %v2759_v30 = vmul.f32 %v10831_v6, %v13536_v25  ;;  %v2760_v52 = vmul.f32 %v10831_v6, %v13538_v29  ;;  %v13543_v53 = vld [vmem:[#allocation214_spill] sm:$0xff]  ;;  %v13545_v7 = vld [vmem:[#allocation152_spill] sm:$0xff]  ;;  %v13549_v29 = vld [vmem:[#allocation153_spill] sm:$0xff] }
 0x604   :  { %v6575_v5 = vpop.eup %6574  ;;  %v10861_v57 = vmul.f32 %v10831_v6, %v13539_v34  ;;  %v10865_v20 = vmul.f32 %v10831_v6, %v13541_v37  ;;  %v10869_v55 = vmul.f32 %v10831_v6, %v13543_v53  ;;  %v10873_v25 = vmul.f32 %v10831_v6, %v13545_v7 }
 0x605   :  { %v6577_v15 = vpop.eup %6576  ;;  %5084 = vmatprep.subr.bf16.mxu0 %v6575_v5  ;;  %v10877_v24 = vmul.f32 %v10831_v6, %v13547_v40  ;;  %v10881_v34 = vmul.f32 %v10831_v6, %v13549_v29  ;;  %v10885_v37 = vmul.f32 %v10831_v6, %v13551_v8  ;;  %v10889_v53 = vmul.f32 %v10831_v6, %v13553_v11 }
 0x606   :  { %5085 = vmatpush1.bf16.msra.mxu0 %v6577_v15  ;;  %13540 = vst [vmem:[#allocation144_spill] sm:$0xff] %v10861_v57  ;;  %13542 = vst [vmem:[#allocation177_spill] sm:$0xff] %v10865_v20  ;;  %v10893_v7 = vmul.f32 %v10831_v6, %v13555_v28  ;;  %v10897_v40 = vmul.f32 %v10831_v6, %v13557_v10  ;;  %v10901_v29 = vmul.f32 %v10831_v6, %v13559_v21  ;;  %v13590_v20 = vld [vmem:[#allocation125_spill] sm:$0xff]  ;;  %v13591_v57 = vld [vmem:[#allocation196_spill] sm:$0xff] }
 0x607   :  { %13544 = vst [vmem:[#allocation145_spill] sm:$0xff] %v10869_v55  ;;  %13546 = vst [vmem:[#allocation186_spill] sm:$0xff] %v10873_v25  ;;  %v10905_v8 = vmul.f32 %v10831_v6, %v13561_v1  ;;  %v10909_v11 = vmul.f32 %v10831_v6, %v13563_v33  ;;  %v10913_v28 = vmul.f32 %v10831_v6, %v13565_v47 }
 0x608   :  { %v10786_v3 = vpop.f32.mrb[108].mxu0  ;;  %13548 = vst [vmem:[#allocation147_spill] sm:$0xff] %v10877_v24  ;;  %13550 = vst [vmem:[#allocation195_spill] sm:$0xff] %v10881_v34  ;;  %v10917_v10 = vmul.f32 %v10831_v6, %v13567_v49  ;;  %v10921_v21 = vmul.f32 %v10831_v6, %v13569_v13  ;;  %v13580_v34 = vld [vmem:[#allocation179_spill] sm:$0xff]  ;;  %v13584_v24 = vld [vmem:[#allocation102_spill] sm:$0xff] }
 0x609   :  { %v10788_v44 = vpop.f32.mrb[109].mxu0  ;;  %13552 = vst [vmem:[#allocation149_spill] sm:$0xff] %v10885_v37  ;;  %13554 = vst [vmem:[#allocation204_spill] sm:$0xff] %v10889_v53  ;;  %v13578_v37 = vld [vmem:[#allocation121_spill] sm:$0xff] }
 0x60a   :  { %v10790_v48 = vpop.f32.mrb[110].mxu0  ;;  %13556 = vst [vmem:[#allocation151_spill] sm:$0xff] %v10893_v7  ;;  %13558 = vst [vmem:[#allocation214_spill] sm:$0xff] %v10897_v40  ;;  %v13575_v7 = vld [vmem:[#allocation170_spill] sm:$0xff]  ;;  %v2787_v13 = vadd.f32 %v2755_v54, %v13578_v37  ;;  %v13587_v37 = vld [vmem:[#allocation103_spill] sm:$0xff] }
 0x60b   :  { %v6579_v4 = vpop.eup %6578  ;;  %v10792_v19 = vpop.f32.mrb[111].mxu0  ;;  %13560 = vst [vmem:[#allocation152_spill] sm:$0xff] %v10901_v29  ;;  %13562 = vst [vmem:[#allocation223_spill] sm:$0xff] %v10905_v8  ;;  %v13571_v29 = vld [vmem:[#allocation282_spill] sm:$0xff]  ;;  %v3014_v47 = vmul.f32 %v10839_v0, %v13575_v7 }
 0x60c   :  { %v6581_v63 = vpop.eup %6580  ;;  %5086 = vmatprep.subr.bf16.mxu0 %v6579_v4  ;;  %13564 = vst [vmem:[#allocation153_spill] sm:$0xff] %v10909_v11  ;;  %13566 = vst [vmem:[#allocation232_spill] sm:$0xff] %v10913_v28  ;;  %v10925_v1 = vmul.f32 %v10831_v6, %v13571_v29  ;;  %v13573_v8 = vld [vmem:[#allocation98_spill] sm:$0xff]  ;;  %v13574_v11 = vld [vmem:[#allocation169_spill] sm:$0xff]  ;;  %v3016_v29 = vmul.f32 %v10839_v0, %v13580_v34 }
 0x60d   :  { %5087 = vmatpush1.bf16.msra.mxu0 %v6581_v63  ;;  %13568 = vst [vmem:[#allocation155_spill] sm:$0xff] %v10917_v10  ;;  %13570 = vst [vmem:[#allocation241_spill] sm:$0xff] %v10921_v21  ;;  %v3013_v33 = vmul.f32 %v10839_v0, %v13573_v8  ;;  %v2785_v40 = vadd.f32 %v2753_v26, %v13574_v11  ;;  %v13576_v28 = vld [vmem:[#allocation15_spill] sm:$0xff]  ;;  %v13577_v10 = vld [vmem:[#allocation168_spill] sm:$0xff]  ;;  %v10936_v21 = vpop.permute.xlu1 %4130 }
 0x60e   :  { %13572 = vst [vmem:[#allocation156_spill] sm:$0xff] %v10925_v1  ;;  %v3015_v49 = vmul.f32 %v10839_v0, %v13576_v28  ;;  %v2786_v53 = vadd.f32 %v2754_v59, %v13577_v10  ;;  %13579 = vst [vmem:[#allocation250_spill] sm:$0xff] %v10936_v21  ;;  %v13581_v1 = vld [vmem:[#allocation101_spill] sm:$0xff]  ;;  %v13582_v6 = vld [vmem:[#allocation188_spill] sm:$0xff]  ;;  %v10947_v28 = vmul.f32 %v10839_v0, %v13584_v24 }
 0x60f   :  { %v3017_v8 = vmul.f32 %v10839_v0, %v13581_v1  ;;  %v3018_v26 = vmul.f32 %v10839_v0, %v13582_v6  ;;  %v13583_v11 = vld [vmem:[#allocation178_spill] sm:$0xff]  ;;  %v13586_v59 = vld [vmem:[#allocation197_spill] sm:$0xff]  ;;  %v10955_v10 = vmul.f32 %v10839_v0, %v13587_v37  ;;  %v13589_v1 = vld [vmem:[#allocation187_spill] sm:$0xff]  ;;  %v2791_v6 = vadd.f32 %v2759_v30, %v13590_v20 }
 0x610   :  { %v10794_v2 = vpop.f32.mrb[112].mxu0  ;;  %v2788_v7 = vadd.f32 %v2756_v12, %v13583_v11  ;;  %13585 = vst [vmem:[#allocation53_spill] sm:$0xff] %v10947_v28  ;;  %v10951_v54 = vmul.f32 %v10839_v0, %v13586_v59  ;;  %v13588_v34 = vld [vmem:[#allocation21_spill] sm:$0xff]  ;;  %v2790_v55 = vadd.f32 %v2758_v62, %v13589_v1  ;;  %v2792_v12 = vadd.f32 %v2760_v52, %v13591_v57  ;;  %v13604_v1 = vld [vmem:[#allocation144_spill] sm:$0xff] }
 0x611   :  { %v10796_v58 = vpop.f32.mrb[113].mxu0  ;;  %v2789_v25 = vadd.f32 %v2757_v42, %v13588_v34  ;;  %v3045_v11 = vadd.f32 %v3013_v33, %v2785_v40  ;;  %v3047_v24 = vadd.f32 %v3015_v49, %v2787_v13  ;;  %v10963_v28 = vadd.f32 %v10773_v23, %v10705_v31  ;;  %v13593_v20 = vld [vmem:[#allocation173_spill] sm:$0xff] }
 0x612   :  { %v10798_v27 = vpop.f32.mrb[114].mxu0  ;;  %v10967_v59 = vadd.f32 %v10781_v60, %v10819_v35  ;;  %v3048_v37 = vadd.f32 %v3016_v29, %v2788_v7  ;;  %v10971_v42 = vadd.f32 %v10779_v45, %v10705_v31  ;;  %v10975_v62 = vadd.f32 %v10784_v9, %v10819_v35  ;;  %v10995_v9 = vpop.permute.xlu1 %4138  ;;  %v13597_v7 = vld [vmem:[#allocation181_spill] sm:$0xff] }
 0x613   :  { %v10800_v5 = vpop.f32.mrb[115].mxu0  ;;  %v10979_v30 = vadd.f32 %v10786_v3, %v10709_v43  ;;  %v10985_v60 = vadd.f32 %v10788_v44, %v10709_v43  ;;  %v10989_v52 = vadd.f32 %v10790_v48, %v10827_v50  ;;  %v10993_v45 = vadd.f32 %v10792_v19, %v10827_v50  ;;  %13592 = vst [vmem:[#allocation259_spill] sm:$0xff] %v10995_v9  ;;  %v13605_v40 = vld [vmem:[#allocation205_spill] sm:$0xff]  ;;  %v13625_v43 = vld [vmem:[#allocation224_spill] sm:$0xff] }
 0x614   :  { %v3049_v57 = vadd.f32 %v3017_v8, %v2789_v25  ;;  %v3050_v3 = vadd.f32 %v3018_v26, %v2790_v55  ;;  %v11006_v33 = vadd.f32 %v10794_v2, %v10715_v18  ;;  %v11010_v19 = vadd.f32 %v10798_v27, %v10855_v51  ;;  %v13594_v55 = vld [vmem:[#allocation175_spill] sm:$0xff] }
 0x615   :  { %v11019_v49 = vadd.f32 %v10800_v5, %v10855_v51  ;;  %v13595_v5 = vld [vmem:[#allocation172_spill] sm:$0xff]  ;;  %v13596_v26 = vld [vmem:[#allocation171_spill] sm:$0xff]  ;;  %v3623_v34 = vadd.f32 %v13597_v7, %v3047_v24  ;;  %v13614_v51 = vld [vmem:[#allocation145_spill] sm:$0xff] }
 0x616   :  { %v3621_v8 = vadd.f32 %v13595_v5, %v3045_v11 }
 0x618   :  { %v10802_v15 = vpop.f32.mrb[116].mxu0 }
 0x619   :  { %v10804_v14 = vpop.f32.mrb[117].mxu0  ;;  %v11023_v13 = vadd.f32 %v10802_v15, %v10723_v39 }
 0x61a   :  { %v10806_v41 = vpop.f32.mrb[118].mxu0  ;;  %v11029_v27 = vadd.f32 %v10804_v14, %v10723_v39 }
 0x61b   :  { %v10808_v61 = vpop.f32.mrb[119].mxu0  ;;  %v11033_v29 = vadd.f32 %v10806_v41, %v10936_v21 }
 0x620   :  { %v10811_v4 = vpop.f32.mrb[120].mxu0 }
 0x621   :  { %v10813_v63 = vpop.f32.mrb[121].mxu0 }
 0x622   :  { %v10815_v17 = vpop.f32.mrb[122].mxu0  ;;  %v11061_v5 = vadd.f32 %v10813_v63, %v10731_v38 }
 0x623   :  { %v10817_v16 = vpop.f32.mrb[123].mxu0 }
 0x628   :  { %v10823_v22 = vpop.f32.mrb[124].mxu0 }
 0x629   :  { %v10825_v56 = vpop.f32.mrb[125].mxu0 }
 0x62a   :  { %v10833_v46 = vpop.f32.mrb[126].mxu0  ;;  %v11075_v7 = vadd.f32 %v10825_v56, %v10735_v32  ;;  %v13603_v56 = vld [vmem:[#allocation206_spill] sm:$0xff] }
 0x62b   :  { %v10835_v36 = vpop.f32.mrb[127].mxu0  ;;  %v2793_v48 = vadd.f32 %v13604_v1, %v13603_v56 }
 0x62c   :  { %13528 = vst [vmem:[#allocation384_spill] sm:$0xff] %v10835_v36  ;;  %v3046_v36 = vadd.f32 %v3014_v47, %v2786_v53  ;;  %v3541_v53 = vadd.f32 %v13593_v20, %v3045_v11  ;;  %v11015_v47 = vadd.f32 %v10796_v58, %v10715_v18  ;;  %v11037_v58 = vadd.f32 %v10808_v61, %v10936_v21  ;;  %v13599_v11 = vld [vmem:[#allocation180_spill] sm:$0xff]  ;;  %v13610_v21 = vld [vmem:[#allocation190_spill] sm:$0xff] }
 0x62d   :  { %v11050_v20 = vadd.f32 %v10811_v4, %v10731_v38  ;;  %v11054_v61 = vadd.f32 %v10815_v17, %v10995_v9  ;;  %v11069_v4 = vadd.f32 %v10823_v22, %v10735_v32  ;;  %v13602_v22 = vld [vmem:[#allocation105_spill] sm:$0xff]  ;;  %v3052_v17 = vadd.f32 %v10951_v54, %v2792_v12 }
 0x62e   :  { %v3542_v25 = vadd.f32 %v13594_v55, %v3046_v36  ;;  %v3622_v15 = vadd.f32 %v13596_v26, %v3046_v36  ;;  %v11056_v36 = vpop.permute.xlu1 %4146  ;;  %v3624_v55 = vadd.f32 %v13599_v11, %v3048_v37  ;;  %v11065_v26 = vadd.f32 %v10817_v16, %v10995_v9  ;;  %v13601_v16 = vld [vmem:[#allocation207_spill] sm:$0xff]  ;;  %v13607_v32 = vld [vmem:[#allocation53_spill] sm:$0xff] }
 0x62f   :  { %13598 = vst [vmem:[#allocation160_spill] sm:$0xff] %v11056_v36  ;;  %v11079_v11 = vadd.f32 %v10833_v46, %v11056_v36  ;;  %v3022_v2 = vmul.f32 %v10839_v0, %v13601_v16  ;;  %v3023_v41 = vmul.f32 %v10839_v0, %v13602_v22  ;;  %v3051_v9 = vadd.f32 %v13607_v32, %v2791_v6  ;;  %v13608_v22 = vld [vmem:[#allocation182_spill] sm:$0xff]  ;;  %v13612_v46 = vld [vmem:[#allocation216_spill] sm:$0xff] }
 0x630   :  { %v3573_v44 = vpack.c.bf16 %v3542_v25, %v3541_v53  ;;  %v3653_v23 = vpack.c.bf16 %v3622_v15, %v3621_v8  ;;  %v3543_v53 = vadd.f32 %v13608_v22, %v3047_v24  ;;  %v13609_v25 = vld [vmem:[#allocation184_spill] sm:$0xff]  ;;  %v3625_v1 = vadd.f32 %v13610_v21, %v3049_v57  ;;  %v13611_v8 = vld [vmem:[#allocation189_spill] sm:$0xff]  ;;  %v13617_v6 = vld [vmem:[#allocation106_spill] sm:$0xff] }
 0x631   :  { %v3544_v38 = vadd.f32 %v13609_v25, %v3048_v37  ;;  %v3626_v15 = vadd.f32 %v13611_v8, %v3050_v3  ;;  %v3654_v56 = vpack.c.bf16 %v3624_v55, %v3623_v34  ;;  %v3024_v39 = vmul.f32 %v10839_v0, %v13612_v46  ;;  %v13618_v37 = vld [vmem:[#allocation225_spill] sm:$0xff]  ;;  %v13619_v34 = vld [vmem:[#allocation191_spill] sm:$0xff]  ;;  %v13622_v8 = vld [vmem:[#allocation198_spill] sm:$0xff] }
 0x632   :  { %6582 = vtanh.bf16 %v3573_v44  ;;  %v3025_v24 = vmul.f32 %v10839_v0, %v13617_v6  ;;  %v3026_v54 = vmul.f32 %v10839_v0, %v13618_v37  ;;  %v3053_v21 = vadd.f32 %v10955_v10, %v2793_v48  ;;  %v13620_v46 = vld [vmem:[#allocation193_spill] sm:$0xff]  ;;  %v13624_v6 = vld [vmem:[#allocation147_spill] sm:$0xff] }
 0x633   :  { %v13600_v63 = vld [vmem:[#allocation384_spill] sm:$0xff]  ;;  %6584 = vtanh.bf16 %v3653_v23  ;;  %v3545_v55 = vadd.f32 %v13619_v34, %v3049_v57  ;;  %v3546_v22 = vadd.f32 %v13620_v46, %v3050_v3  ;;  %v3574_v25 = vpack.c.bf16 %v3544_v38, %v3543_v53  ;;  %v13626_v37 = vld [vmem:[#allocation195_spill] sm:$0xff]  ;;  %v13630_v38 = vld [vmem:[#allocation202_spill] sm:$0xff] }
 0x634   :  { %v11083_v14 = vadd.f32 %v13600_v63, %v11056_v36  ;;  %v13606_v36 = vld [vmem:[#allocation177_spill] sm:$0xff]  ;;  %v13613_v63 = vld [vmem:[#allocation127_spill] sm:$0xff]  ;;  %v3655_v44 = vpack.c.bf16 %v3626_v15, %v3625_v1  ;;  %6586 = vtanh.bf16 %v3654_v56  ;;  %v2798_v35 = vadd.f32 %v13626_v37, %v13625_v43  ;;  %v13631_v34 = vld [vmem:[#allocation210_spill] sm:$0xff] }
 0x635   :  { %v2794_v16 = vadd.f32 %v13606_v36, %v13605_v40  ;;  %v2795_v18 = vadd.f32 %v13614_v51, %v13613_v63  ;;  %v13615_v40 = vld [vmem:[#allocation215_spill] sm:$0xff]  ;;  %v13616_v36 = vld [vmem:[#allocation186_spill] sm:$0xff]  ;;  %v3548_v53 = vadd.f32 %v13630_v38, %v3052_v17  ;;  %v3549_v46 = vadd.f32 %v13631_v34, %v3053_v21 }
 0x636   :  { %v2796_v32 = vadd.f32 %v13616_v36, %v13615_v40  ;;  %v13621_v51 = vld [vmem:[#allocation199_spill] sm:$0xff]  ;;  %v3628_v40 = vadd.f32 %v13622_v8, %v3052_v17  ;;  %v3575_v15 = vpack.c.bf16 %v3546_v22, %v3545_v55  ;;  %6588 = vtanh.bf16 %v3574_v25  ;;  %v13633_v8 = vld [vmem:[#allocation209_spill] sm:$0xff]  ;;  %v13642_v38 = vld [vmem:[#allocation234_spill] sm:$0xff] }
 0x637   :  { %v3054_v12 = vadd.f32 %v3022_v2, %v2794_v16  ;;  %v3627_v63 = vadd.f32 %v13621_v51, %v3051_v9  ;;  %v13623_v36 = vld [vmem:[#allocation23_spill] sm:$0xff]  ;;  %v3055_v10 = vadd.f32 %v3023_v41, %v2795_v18  ;;  %v13628_v2 = vld [vmem:[#allocation149_spill] sm:$0xff]  ;;  %v13629_v16 = vld [vmem:[#allocation200_spill] sm:$0xff]  ;;  %v7057_v56 = vmov 14  }
 0x638   :  { %v2797_v50 = vadd.f32 %v13624_v6, %v13623_v36  ;;  %v3056_v23 = vadd.f32 %v3024_v39, %v2796_v32  ;;  %v13627_v48 = vld [vmem:[#allocation131_spill] sm:$0xff]  ;;  %v3547_v3 = vadd.f32 %v13629_v16, %v3051_v9  ;;  %v13632_v51 = vld [vmem:[#allocation212_spill] sm:$0xff]  ;;  %6238 = vset.pattern.permute.xlu1 %v7057_v56  ;;  %6239 = vset.pattern.permute.xlu0 %v7057_v56  ;;  %6590 = vtanh.bf16 %v3655_v44  ;;  %v6943_v9 = vld [vmem:[%s12446_s1] sm:$0xff] }
 0x639   :  { %v2799_v57 = vadd.f32 %v13628_v2, %v13627_v48  ;;  %v3550_v1 = vadd.f32 %v13632_v51, %v3054_v12  ;;  %v3629_v43 = vadd.f32 %v13633_v8, %v3053_v21  ;;  %v13634_v18 = vld [vmem:[#allocation208_spill] sm:$0xff]  ;;  %v3656_v41 = vpack.c.bf16 %v3628_v40, %v3627_v63  ;;  %5017 = vperm.xlu1 %6238, %v6943_v9   ;;  %v13635_v17 = vld [vmem:[#allocation233_spill] sm:$0xff]  ;;  %v13637_v55 = vld [vmem:[#allocation219_spill] sm:$0xff] }
 0x63a   :  { %v3630_v39 = vadd.f32 %v13634_v18, %v3054_v12  ;;  %v13636_v32 = vld [vmem:[#allocation204_spill] sm:$0xff]  ;;  %v3057_v6 = vadd.f32 %v3025_v24, %v2797_v50  ;;  %v3551_v22 = vadd.f32 %v13637_v55, %v3055_v10  ;;  %v13638_v25 = vld [vmem:[#allocation221_spill] sm:$0xff]  ;;  %v3058_v48 = vadd.f32 %v3026_v54, %v2798_v35  ;;  %v13639_v2 = vld [vmem:[#allocation218_spill] sm:$0xff] }
 0x63b   :  { %v2800_v36 = vadd.f32 %v13636_v32, %v13635_v17  ;;  %v3552_v37 = vadd.f32 %v13638_v25, %v3056_v23  ;;  %v3631_v21 = vadd.f32 %v13639_v2, %v3055_v10  ;;  %v13640_v16 = vld [vmem:[#allocation217_spill] sm:$0xff]  ;;  %v3576_v63 = vpack.c.bf16 %v3548_v53, %v3547_v3  ;;  %v13643_v50 = vld [vmem:[#allocation16_spill] sm:$0xff]  ;;  %v13645_v18 = vld [vmem:[#allocation151_spill] sm:$0xff] }
 0x63c   :  { %v3632_v12 = vadd.f32 %v13640_v16, %v3056_v23  ;;  %v13641_v40 = vld [vmem:[#allocation17_spill] sm:$0xff]  ;;  %v3028_v34 = vmul.f32 %v10839_v0, %v13642_v38  ;;  %v3577_v51 = vpack.c.bf16 %v3550_v1, %v3549_v46  ;;  %6592 = vtanh.bf16 %v3575_v15  ;;  %v13644_v8 = vld [vmem:[#allocation132_spill] sm:$0xff]  ;;  %v13646_v23 = vld [vmem:[#allocation242_spill] sm:$0xff] }
 0x63d   :  { %v3027_v44 = vmul.f32 %v10839_v0, %v13641_v40  ;;  %v6583_v56 = vpop.eup %6582  ;;  %v3029_v24 = vmul.f32 %v10839_v0, %v13643_v50  ;;  %v2801_v35 = vadd.f32 %v13645_v18, %v13644_v8  ;;  %v3657_v54 = vpack.c.bf16 %v3630_v39, %v3629_v43  ;;  %v13647_v3 = vld [vmem:[#allocation214_spill] sm:$0xff]  ;;  %v13648_v55 = vld [vmem:[#allocation227_spill] sm:$0xff] }
 0x63e   :  { %6594 = vtanh.bf16 %v3656_v41  ;;  %v6585_v10 = vpop.eup %6584  ;;  %v2802_v53 = vadd.f32 %v13647_v3, %v13646_v23  ;;  %v3060_v17 = vadd.f32 %v3028_v34, %v2800_v36  ;;  %v3578_v32 = vpack.c.bf16 %v3552_v37, %v3551_v22  ;;  %v13649_v46 = vld [vmem:[#allocation226_spill] sm:$0xff]  ;;  %v13650_v16 = vld [vmem:[#allocation243_spill] sm:$0xff]  ;;  %v13652_v41 = vld [vmem:[#allocation252_spill] sm:$0xff] }
 0x63f   :  { %v3059_v9 = vadd.f32 %v3027_v44, %v2799_v57  ;;  %v3633_v25 = vadd.f32 %v13648_v55, %v3057_v6  ;;  %v3634_v1 = vadd.f32 %v13649_v46, %v3058_v48  ;;  %v3658_v15 = vpack.c.bf16 %v3632_v12, %v3631_v21  ;;  %4309 = vmatprep.subr.bf16.mxu1 %v6585_v10  ;;  %v6587_v2 = vpop.eup %6586  ;;  %v13651_v43 = vld [vmem:[#allocation111_spill] sm:$0xff]  ;;  %v13653_v57 = vld [vmem:[#allocation134_spill] sm:$0xff]  ;;  %v13654_v36 = vld [vmem:[#allocation152_spill] sm:$0xff] }
 0x640   :  { %6596 = vtanh.bf16 %v3576_v63  ;;  %v3030_v40 = vmul.f32 %v10839_v0, %v13650_v16  ;;  %v3031_v39 = vmul.f32 %v10839_v0, %v13651_v43  ;;  %v3032_v38 = vmul.f32 %v10839_v0, %v13652_v41  ;;  %4310 = vmatpush1.bf16.msra.mxu1 %v6583_v56  ;;  %v13655_v37 = vld [vmem:[#allocation251_spill] sm:$0xff]  ;;  %v13657_v34 = vld [vmem:[#allocation228_spill] sm:$0xff]  ;;  %v13658_v8 = vld [vmem:[#allocation230_spill] sm:$0xff] }
 0x641   :  { %6598 = vtanh.bf16 %v3577_v51  ;;  %v2803_v22 = vadd.f32 %v13654_v36, %v13653_v57  ;;  %v13656_v44 = vld [vmem:[#allocation223_spill] sm:$0xff]  ;;  %v3061_v12 = vadd.f32 %v3029_v24, %v2801_v35  ;;  %4311 = vmatprep.subr.bf16.mxu1 %v6587_v2  ;;  %v3553_v50 = vadd.f32 %v13657_v34, %v3057_v6  ;;  %v6589_v10 = vpop.eup %6588  ;;  %v13659_v23 = vld [vmem:[#allocation236_spill] sm:$0xff]  ;;  %v13668_v2 = vld [vmem:[#allocation237_spill] sm:$0xff] }
 0x642   :  { %v2804_v21 = vadd.f32 %v13656_v44, %v13655_v37  ;;  %6600 = vtanh.bf16 %v3657_v54  ;;  %v3062_v63 = vadd.f32 %v3030_v40, %v2802_v53  ;;  %v3554_v18 = vadd.f32 %v13658_v8, %v3058_v48  ;;  %v13660_v51 = vld [vmem:[#allocation235_spill] sm:$0xff]  ;;  %v13663_v24 = vld [vmem:[#allocation308_spill] sm:$0xff]  ;;  %v13666_v53 = vld [vmem:[#allocation346_spill] sm:$0xff] }
 0x643   :  { %6602 = vtanh.bf16 %v3578_v32  ;;  %v3635_v3 = vadd.f32 %v13659_v23, %v3059_v9  ;;  %v3636_v56 = vadd.f32 %v13660_v51, %v3060_v17  ;;  %v3659_v55 = vpack.c.bf16 %v3634_v1, %v3633_v25  ;;  %v6591_v46 = vpop.eup %6590  ;;  %v13661_v16 = vld [vmem:[#allocation163_spill] sm:$0xff]  ;;  %v13664_v6 = vld [vmem:[#allocation164_spill] sm:$0xff]  ;;  %v13671_v44 = vld [vmem:[#allocation245_spill] sm:$0xff] }
 0x644   :  { %6604 = vtanh.bf16 %v3658_v15  ;;  %v13662_v43 = vld [vmem:[#allocation383_spill] sm:$0xff]  ;;  %v13665_v54 = vpack.c.bf16 %v10975_v62, %v10971_v42  ;;  %4312 = vmatpush1.bf16.msra.mxu1 %v6589_v10  ;;  %v3063_v25 = vadd.f32 %v3031_v39, %v2803_v22  ;;  %v3064_v1 = vadd.f32 %v3032_v38, %v2804_v21  ;;  %v13672_v8 = vld [vmem:[#allocation244_spill] sm:$0xff]  ;;  %v13675_v21 = vld [vmem:[#allocation153_spill] sm:$0xff] }
 0x645   :  { %v11169_v41 = vmul.f32 %v13662_v43, %v13661_v16  ;;  %v11173_v35 = vmul.f32 %v13662_v43, %v13663_v24  ;;  %v11177_v48 = vmul.f32 %v13662_v43, %v13664_v6  ;;  %v11184_v32 = vmul.f32 %v13662_v43, %v13666_v53  ;;  %4313 = vmatprep.subr.bf16.mxu1 %v6591_v46  ;;  %v13669_v57 = vld [vmem:[#allocation239_spill] sm:$0xff]  ;;  %v13683_v24 = vld [vmem:[#allocation246_spill] sm:$0xff] }
 0x646   :  { %6606 = vtanh.bf16 %v13665_v54  ;;  %v13667_v15 = vpack.c.bf16 %v10967_v59, %v10963_v28  ;;  %v3555_v40 = vadd.f32 %v13668_v2, %v3059_v9  ;;  %v3556_v36 = vadd.f32 %v13669_v57, %v3060_v17  ;;  %v13673_v28 = vld [vmem:[#allocation166_spill] sm:$0xff]  ;;  %v13674_v9 = vld [vmem:[#allocation24_spill] sm:$0xff]  ;;  %v13686_v57 = vld [vmem:[#allocation253_spill] sm:$0xff] }
 0x647   :  { %v3579_v37 = vpack.c.bf16 %v3554_v18, %v3553_v50  ;;  %v13670_v42 = vpack.c.bf16 %v10993_v45, %v10985_v60  ;;  %v6593_v62 = vpop.eup %6592  ;;  %v3637_v34 = vadd.f32 %v13671_v44, %v3061_v12  ;;  %v3638_v39 = vadd.f32 %v13672_v8, %v3062_v63  ;;  %v13676_v50 = vld [vmem:[#allocation260_spill] sm:$0xff]  ;;  %v13679_v45 = vld [vmem:[#allocation355_spill] sm:$0xff]  ;;  %v13687_v8 = vld [vmem:[#allocation113_spill] sm:$0xff] }
 0x648   :  { %6608 = vtanh.bf16 %v13667_v15  ;;  %v3660_v38 = vpack.c.bf16 %v3636_v56, %v3635_v3  ;;  %v11198_v59 = vmul.f32 %v13662_v43, %v13673_v28  ;;  %v2805_v17 = vadd.f32 %v13675_v21, %v13674_v9  ;;  %v13677_v18 = vld [vmem:[#allocation232_spill] sm:$0xff]  ;;  %4314 = vmatpush1.bf16.msra.mxu1 %v6593_v62  ;;  %v13680_v3 = vld [vmem:[#allocation42_spill] sm:$0xff]  ;;  %v13681_v56 = vld [vmem:[#allocation261_spill] sm:$0xff] }
 0x649   :  { %6610 = vtanh.bf16 %v13670_v42  ;;  %v6595_v22 = vpop.eup %6594  ;;  %v2806_v10 = vadd.f32 %v13677_v18, %v13676_v50  ;;  %v13678_v60 = vpack.c.bf16 %v11019_v49, %v11015_v47  ;;  %v11209_v23 = vmul.f32 %v13662_v43, %v13679_v45  ;;  %v13684_v49 = vld [vmem:[#allocation248_spill] sm:$0xff]  ;;  %v13685_v15 = vld [vmem:[#allocation254_spill] sm:$0xff]  ;;  %v13691_v28 = vld [vmem:[#allocation155_spill] sm:$0xff] }
 0x64a   :  { %6612 = vtanh.bf16 %v3659_v55  ;;  %v3033_v51 = vmul.f32 %v10839_v0, %v13680_v3  ;;  %v3034_v55 = vmul.f32 %v10839_v0, %v13681_v56  ;;  %v13682_v46 = vpack.c.bf16 %v10989_v52, %v10979_v30  ;;  %4315 = vmatprep.subr.bf16.mxu1 %v6595_v22  ;;  %v13695_v50 = vld [vmem:[#allocation114_spill] sm:$0xff]  ;;  %v13697_v18 = vld [vmem:[#allocation156_spill] sm:$0xff]  ;;  %v13698_v3 = vld [vmem:[#allocation255_spill] sm:$0xff] }
 0x64b   :  { %6614 = vtanh.bf16 %v13678_v60  ;;  %v6597_v16 = vpop.eup %6596  ;;  %v3557_v47 = vadd.f32 %v13683_v24, %v3061_v12  ;;  %v3558_v6 = vadd.f32 %v13684_v49, %v3062_v63  ;;  %v3580_v54 = vpack.c.bf16 %v3556_v36, %v3555_v40  ;;  %v13689_v40 = vld [vmem:[#allocation271_spill] sm:$0xff]  ;;  %v13699_v56 = vld [vmem:[#allocation257_spill] sm:$0xff] }
 0x64c   :  { %6616 = vtanh.bf16 %v13682_v46  ;;  %v6599_v53 = vpop.eup %6598  ;;  %v3639_v2 = vadd.f32 %v13685_v15, %v3063_v25  ;;  %v3640_v42 = vadd.f32 %v13686_v57, %v3064_v1  ;;  %v3661_v62 = vpack.c.bf16 %v3638_v39, %v3637_v34  ;;  %4316 = vmatpush1.bf16.msra.mxu1 %v6597_v16  ;;  %v13692_v34 = vld [vmem:[#allocation269_spill] sm:$0xff]  ;;  %v13701_v24 = vld [vmem:[#allocation263_spill] sm:$0xff]  ;;  %v13702_v15 = vld [vmem:[#allocation262_spill] sm:$0xff] }
 0x64d   :  { %6618 = vtanh.bf16 %v3579_v37  ;;  %v6601_v44 = vpop.eup %6600  ;;  %v3035_v30 = vmul.f32 %v10839_v0, %v13687_v8  ;;  %v3065_v52 = vadd.f32 %v3033_v51, %v2805_v17  ;;  %v3066_v22 = vadd.f32 %v3034_v55, %v2806_v10  ;;  %v13690_v37 = vld [vmem:[#allocation270_spill] sm:$0xff]  ;;  %v13693_v39 = vld [vmem:[#allocation241_spill] sm:$0xff] }
 0x64e   :  { %6620 = vtanh.bf16 %v3660_v38  ;;  %v13688_v12 = vpack.c.bf16 %v11037_v58, %v11029_v27  ;;  %v6603_v63 = vpop.eup %6602  ;;  %v3036_v36 = vmul.f32 %v10839_v0, %v13689_v40  ;;  %v2807_v9 = vadd.f32 %v13691_v28, %v13690_v37  ;;  %4317 = vmatprep.subr.bf16.mxu1 %v6601_v44  ;;  %v13696_v58 = vld [vmem:[#allocation284_spill] sm:$0xff]  ;;  %v13706_v44 = vld [vmem:[#allocation115_spill] sm:$0xff] }
 0x64f   :  { %v2808_v38 = vadd.f32 %v13693_v39, %v13692_v34  ;;  %v13694_v21 = vpack.c.bf16 %v11010_v19, %v11006_v33  ;;  %v6605_v17 = vpop.eup %6604  ;;  %v3037_v27 = vmul.f32 %v10839_v0, %v13695_v50  ;;  %v2809_v10 = vadd.f32 %v13697_v18, %v13696_v58  ;;  %v13700_v33 = vld [vmem:[#allocation285_spill] sm:$0xff]  ;;  %v13710_v37 = vld [vmem:[#allocation264_spill] sm:$0xff]  ;;  %v13717_v18 = vld [vmem:[#allocation118_spill] sm:$0xff] }
 0x650   :  { %6622 = vtanh.bf16 %v13688_v12  ;;  %v3581_v60 = vpack.c.bf16 %v3558_v6, %v3557_v47  ;;  %v3559_v51 = vadd.f32 %v13698_v3, %v3063_v25  ;;  %v3560_v55 = vadd.f32 %v13699_v56, %v3064_v1  ;;  %4318 = vmatpush1.bf16.msra.mxu1 %v6599_v53  ;;  %v13704_v25 = vld [vmem:[#allocation283_spill] sm:$0xff]  ;;  %v13707_v12 = vld [vmem:[#allocation325_spill] sm:$0xff]  ;;  %v13714_v58 = vld [vmem:[#allocation272_spill] sm:$0xff] }
 0x651   :  { %6624 = vtanh.bf16 %v13694_v21  ;;  %v6607_v45 = vpop.eup %6606  ;;  %v3662_v46 = vpack.c.bf16 %v3640_v42, %v3639_v2  ;;  %v3038_v19 = vmul.f32 %v10839_v0, %v13700_v33  ;;  %v3641_v49 = vadd.f32 %v13701_v24, %v3065_v52  ;;  %4319 = vmatprep.subr.bf16.mxu1 %v6605_v17  ;;  %v13713_v17 = vld [vmem:[#allocation273_spill] sm:$0xff] }
 0x652   :  { %6626 = vtanh.bf16 %v3580_v54  ;;  %v3642_v57 = vadd.f32 %v13702_v15, %v3066_v22  ;;  %5088 = vmatprep.subr.bf16.mxu0 %v6607_v45  ;;  %v13703_v47 = vpack.c.bf16 %v11065_v26, %v11061_v5  ;;  %v2810_v1 = vadd.f32 %v11169_v41, %v13704_v25  ;;  %v13708_v26 = vld [vmem:[#allocation322_spill] sm:$0xff]  ;;  %v13726_v25 = vld [vmem:[#allocation357_spill] sm:$0xff] }
 0x653   :  { %6628 = vtanh.bf16 %v3661_v62  ;;  %v6609_v16 = vpop.eup %6608  ;;  %v3067_v54 = vadd.f32 %v3035_v30, %v2807_v9  ;;  %v3068_v2 = vadd.f32 %v3036_v36, %v2808_v38  ;;  %v13705_v42 = vpack.c.bf16 %v11033_v29, %v11023_v13  ;;  %v13709_v30 = vld [vmem:[#allocation320_spill] sm:$0xff]  ;;  %v13711_v9 = vld [vmem:[#allocation266_spill] sm:$0xff] }
 0x654   :  { %6630 = vtanh.bf16 %v13703_v47  ;;  %v6611_v6 = vpop.eup %6610  ;;  %5089 = vmatpush1.bf16.msra.mxu0 %v6609_v16  ;;  %v3039_v8 = vmul.f32 %v10839_v0, %v13706_v44  ;;  %v3040_v5 = vmul.f32 %v10839_v0, %v13707_v12  ;;  %v2811_v53 = vadd.f32 %v11173_v35, %v13708_v26  ;;  %4320 = vmatpush1.bf16.msra.mxu1 %v6603_v63  ;;  %v13722_v16 = vld [vmem:[#allocation279_spill] sm:$0xff] }
 0x655   :  { %6632 = vtanh.bf16 %v13705_v42  ;;  %v6613_v62 = vpop.eup %6612  ;;  %5090 = vmatprep.subr.bf16.mxu0 %v6611_v6  ;;  %v2812_v40 = vadd.f32 %v11177_v48, %v13709_v30  ;;  %v3069_v36 = vadd.f32 %v3037_v27, %v2809_v10  ;;  %v3582_v13 = vpack.c.bf16 %v3560_v55, %v3559_v51  ;;  %v13720_v51 = vld [vmem:[#allocation347_spill] sm:$0xff] }
 0x656   :  { %6634 = vtanh.bf16 %v3581_v60  ;;  %v6615_v41 = vpop.eup %6614  ;;  %v3561_v28 = vadd.f32 %v13710_v37, %v3065_v52  ;;  %v3562_v34 = vadd.f32 %v13711_v9, %v3066_v22  ;;  %v3663_v39 = vpack.c.bf16 %v3642_v57, %v3641_v49  ;;  %4321 = vmatprep.subr.bf16.mxu1 %v6613_v62  ;;  %v13716_v22 = vld [vmem:[#allocation167_spill] sm:$0xff]  ;;  %v13719_v60 = vld [vmem:[#allocation141_spill] sm:$0xff]  ;;  %v13723_v49 = vld [vmem:[#allocation286_spill] sm:$0xff] }
 0x657   :  { %6636 = vtanh.bf16 %v3662_v46  ;;  %v6617_v29 = vpop.eup %6616  ;;  %v13712_v38 = vpack.c.bf16 %v11083_v14, %v11075_v7  ;;  %v3070_v21 = vadd.f32 %v3038_v19, %v2810_v1  ;;  %v3643_v50 = vadd.f32 %v13713_v17, %v3067_v54  ;;  %v13718_v7 = vld [vmem:[#allocation348_spill] sm:$0xff]  ;;  %v13728_v62 = vld [vmem:[#allocation142_spill] sm:$0xff]  ;;  %v13733_v37 = vld [vmem:[#allocation275_spill] sm:$0xff] }
 0x658   :  { %v6619_v35 = vpop.eup %6618  ;;  %v3644_v48 = vadd.f32 %v13714_v58, %v3068_v2  ;;  %5091 = vmatpush1.bf16.msra.mxu0 %v6617_v29  ;;  %v13715_v27 = vpack.c.bf16 %v11054_v61, %v11050_v20  ;;  %v2784_v63 = vmul.f32 %v13662_v43, %v13716_v22  ;;  %v3041_v14 = vmul.f32 %v10839_v0, %v13717_v18  ;;  %v13721_v46 = vld [vmem:[#allocation276_spill] sm:$0xff]  ;;  %v13732_v29 = vld [vmem:[#allocation330_spill] sm:$0xff]  ;;  %v13735_v17 = vld [vmem:[#allocation343_spill] sm:$0xff] }
 0x659   :  { %6638 = vtanh.bf16 %v13712_v38  ;;  %v6621_v52 = vpop.eup %6620  ;;  %v3042_v10 = vmul.f32 %v10839_v0, %v13718_v7  ;;  %v2813_v45 = vadd.f32 %v11184_v32, %v13719_v60  ;;  %5092 = vmatprep.subr.bf16.mxu0 %v6615_v41  ;;  %v2814_v20 = vadd.f32 %v11198_v59, %v13720_v51  ;;  %4322 = vmatpush1.bf16.msra.mxu1 %v6619_v35  ;;  %v13724_v32 = vld [vmem:[#allocation274_spill] sm:$0xff]  ;;  %v13731_v41 = vld [vmem:[#allocation299_spill] sm:$0xff]  ;;  %v13734_v35 = vld [vmem:[#allocation340_spill] sm:$0xff] }
 0x65a   :  { %6640 = vtanh.bf16 %v13715_v27  ;;  %v3071_v61 = vadd.f32 %v3039_v8, %v2811_v53  ;;  %v3072_v56 = vadd.f32 %v3040_v5, %v2812_v40  ;;  %v3563_v43 = vadd.f32 %v13721_v46, %v3067_v54  ;;  %4323 = vmatprep.subr.bf16.mxu1 %v6621_v52  ;;  %v13727_v54 = vld [vmem:[#allocation360_spill] sm:$0xff]  ;;  %v13729_v8 = vld [vmem:[#allocation358_spill] sm:$0xff]  ;;  %v13741_v51 = vld [vmem:[#allocation353_spill] sm:$0xff] }
 0x65b   :  { %v6623_v3 = vpop.eup %6622  ;;  %6642 = vtanh.bf16 %v3582_v13  ;;  %v3564_v33 = vadd.f32 %v13722_v16, %v3068_v2  ;;  %v3583_v19 = vpack.c.bf16 %v3562_v34, %v3561_v28  ;;  %v3645_v15 = vadd.f32 %v13723_v49, %v3069_v36  ;;  %v13737_v52 = vld [vmem:[#allocation278_spill] sm:$0xff] }
 0x65c   :  { %v6625_v55 = vpop.eup %6624  ;;  %6644 = vtanh.bf16 %v3663_v39  ;;  %v3646_v57 = vadd.f32 %v13724_v32, %v3070_v21  ;;  %v3664_v47 = vpack.c.bf16 %v3644_v48, %v3643_v50  ;;  %v13725_v59 = vpack.c.bf16 %v11079_v11, %v11069_v4  ;;  %v13730_v4 = vld [vmem:[#allocation295_spill] sm:$0xff]  ;;  %v13736_v48 = vld [vmem:[#allocation350_spill] sm:$0xff] }
 0x65d   :  { %v6627_v24 = vpop.eup %6626  ;;  %5093 = vmatpush1.bf16.msra.mxu0 %v6625_v55  ;;  %v3043_v1 = vmul.f32 %v10839_v0, %v13726_v25  ;;  %v3044_v2 = vmul.f32 %v10839_v0, %v13727_v54  ;;  %v2815_v44 = vadd.f32 %v11209_v23, %v13728_v62  ;;  %v2816_v12 = vadd.f32 %v2784_v63, %v13729_v8  ;;  %v13738_v7 = vld [vmem:[#allocation378_spill] sm:$0xff]  ;;  %v13747_v62 = vld [vmem:[#allocation247_spill] sm:$0xff] }
 0x65e   :  { %6646 = vtanh.bf16 %v13725_v59  ;;  %v6629_v6 = vpop.eup %6628  ;;  %5094 = vmatprep.subr.bf16.mxu0 %v6623_v3  ;;  %v3073_v5 = vadd.f32 %v3041_v14, %v2813_v45  ;;  %v3074_v26 = vadd.f32 %v3042_v10, %v2814_v20  ;;  %v3565_v11 = vadd.f32 %v13730_v4, %v3069_v36  ;;  %4324 = vmatpush1.bf16.msra.mxu1 %v6627_v24  ;;  %v13740_v45 = vld [vmem:[#allocation351_spill] sm:$0xff]  ;;  %v13743_v46 = vld [vmem:[#allocation362_spill] sm:$0xff] }
 0x65f   :  { %v6631_v42 = vpop.eup %6630  ;;  %v3566_v30 = vadd.f32 %v13731_v41, %v3070_v21  ;;  %v3584_v40 = vpack.c.bf16 %v3564_v33, %v3563_v43  ;;  %6648 = vtanh.bf16 %v3583_v19  ;;  %v3647_v0 = vadd.f32 %v13732_v29, %v3071_v61  ;;  %4325 = vmatprep.subr.bf16.mxu1 %v6629_v6  ;;  %v13744_v24 = vld [vmem:[#allocation366_spill] sm:$0xff]  ;;  %v13756_v29 = vld [vmem:[#allocation183_spill] sm:$0xff] }
 0x660   :  { %v6633_v53 = vpop.eup %6632  ;;  %v3648_v28 = vadd.f32 %v13733_v37, %v3072_v56  ;;  %v3665_v9 = vpack.c.bf16 %v3646_v57, %v3645_v15  ;;  %6650 = vtanh.bf16 %v3664_v47  ;;  %v3075_v39 = vadd.f32 %v3043_v1, %v2815_v44  ;;  %v13745_v15 = vld [vmem:[#allocation365_spill] sm:$0xff]  ;;  %v6944_v59 = vld [vmem:[%s12447_s2 + $0x4] ss:$8 sps:$4 sm:$0xff]  }
 0x661   :  { %v6635_v13 = vpop.eup %6634  ;;  %5095 = vmatpush1.bf16.msra.mxu0 %v6633_v53  ;;  %v3076_v38 = vadd.f32 %v3044_v2, %v2816_v12  ;;  %v3567_v21 = vadd.f32 %v13734_v35, %v3071_v61  ;;  %v3568_v50 = vadd.f32 %v13735_v17, %v3072_v56  ;;  %v3585_v58 = vpack.c.bf16 %v3566_v30, %v3565_v11  ;;  %v13742_v56 = vld [vmem:[#allocation281_spill] sm:$0xff]  ;;  %v13752_v4 = vld [vmem:[#allocation258_spill] sm:$0xff]  ;;  %v13753_v11 = vld [vmem:[#allocation256_spill] sm:$0xff] }
 0x662   :  { %v6637_v23 = vpop.eup %6636  ;;  %5096 = vmatprep.subr.bf16.mxu0 %v6631_v42  ;;  %6652 = vtanh.bf16 %v3584_v40  ;;  %4326 = vmatpush1.bf16.msra.mxu1 %v6635_v13  ;;  %v3649_v27 = vadd.f32 %v13736_v48, %v3073_v5  ;;  %v3650_v22 = vadd.f32 %v13737_v52, %v3074_v26  ;;  %v3666_v63 = vpack.c.bf16 %v3648_v28, %v3647_v0  ;;  %v13746_v42 = vld [vmem:[#allocation249_spill] sm:$0xff]  ;;  %v13758_v37 = vld [vmem:[#allocation267_spill] sm:$0xff]  ;;  %v13764_v35 = vld [vmem:[#allocation280_spill] sm:$0xff] }
 0x663   :  { %6654 = vtanh.bf16 %v3665_v9  ;;  %4327 = vmatprep.subr.bf16.mxu1 %v6637_v23  ;;  %v11306_v10 = vcombine.low %v13738_v7, %v13738_v7  ;;  %v3569_v3 = vadd.f32 %v13740_v45, %v3073_v5  ;;  %v3570_v20 = vadd.f32 %v13741_v51, %v3074_v26  ;;  %v13749_v5 = vld [vmem:[#allocation176_spill] sm:$0xff]  ;;  %v13750_v26 = vld [vmem:[#allocation174_spill] sm:$0xff]  ;;  %v13755_v13 = vld [vmem:[#allocation185_spill] sm:$0xff] }
 0x664   :  { %v6639_v34 = vpop.eup %6638  ;;  %v3586_v61 = vpack.c.bf16 %v3568_v50, %v3567_v21  ;;  %6656 = vtanh.bf16 %v3585_v58  ;;  %v3651_v55 = vadd.f32 %v13742_v56, %v3075_v39  ;;  %v3652_v43 = vadd.f32 %v13743_v46, %v3076_v38  ;;  %v13759_v28 = vld [vmem:[#allocation265_spill] sm:$0xff]  ;;  %v11339_v58 = vld [vmem:[#allocation3] ss:$8 sps:$4 sm:$0xff]  }
 0x665   :  { %v6641_v36 = vpop.eup %6640  ;;  %13739 = vst [vmem:[#allocation268_spill] sm:$0xff] %v11306_v10  ;;  %v3667_v16 = vpack.c.bf16 %v3650_v22, %v3649_v27  ;;  %6658 = vtanh.bf16 %v3666_v63  ;;  %v3571_v49 = vadd.f32 %v13744_v24, %v3075_v39  ;;  %v3572_v32 = vadd.f32 %v13745_v15, %v3076_v38  ;;  %v13761_v39 = vld [vmem:[#allocation194_spill] sm:$0xff]  ;;  %v13762_v38 = vld [vmem:[#allocation192_spill] sm:$0xff]  ;;  %v13765_v21 = vld [vmem:[#allocation277_spill] sm:$0xff] }
 0x666   :  { %5097 = vmatpush1.bf16.msra.mxu0 %v6641_v36  ;;  %v6643_v18 = vpop.eup %6642  ;;  %v3587_v57 = vpack.c.bf16 %v3570_v20, %v3569_v3  ;;  %6660 = vtanh.bf16 %v3586_v61  ;;  %v3668_v47 = vpack.c.bf16 %v3652_v43, %v3651_v55  ;;  %v13748_v44 = vpack.c.bf16 %v13746_v42, %v13747_v62  ;;  %v13767_v27 = vld [vmem:[#allocation203_spill] sm:$0xff]  ;;  %v13768_v52 = vld [vmem:[#allocation201_spill] sm:$0xff]  ;;  %v13782_v15 = vld [vmem:[#allocation354_spill] sm:$0xff] }
 0x667   :  { %5098 = vmatprep.subr.bf16.mxu0 %v6639_v34  ;;  %v6645_v14 = vpop.eup %6644  ;;  %4328 = vmatpush1.bf16.msra.mxu1 %v6643_v18  ;;  %6662 = vtanh.bf16 %v3667_v16  ;;  %v3588_v1 = vpack.c.bf16 %v3572_v32, %v3571_v49  ;;  %v13751_v53 = vpack.c.bf16 %v13749_v5, %v13750_v26  ;;  %v13754_v41 = vpack.c.bf16 %v13752_v4, %v13753_v11  ;;  %v11345_v63 = vld [vmem:[#allocation3 + $0x14] ss:$8 sps:$4 sm:$0xff]   ;;  %v13770_v18 = vld [vmem:[#allocation302_spill] sm:$0xff]  ;;  %v13774_v51 = vld [vmem:[#allocation211_spill] sm:$0xff] }
 0x668   :  { %4329 = vmatprep.subr.bf16.mxu1 %v6645_v14  ;;  %6664 = vtanh.bf16 %v3587_v57  ;;  %v13757_v0 = vpack.c.bf16 %v13755_v13, %v13756_v29  ;;  %v13760_v9 = vpack.c.bf16 %v13758_v37, %v13759_v28  ;;  %v13763_v36 = vpack.c.bf16 %v13761_v39, %v13762_v38  ;;  %v13771_v14 = vld [vmem:[#allocation296_spill] sm:$0xff]  ;;  %v13773_v3 = vld [vmem:[#allocation213_spill] sm:$0xff]  ;;  %v11363_v49 = vld [vmem:[#allocation3 + $0x24] ss:$8 sps:$4 sm:$0xff]  }
 0x669   :  { %v6647_v60 = vpop.eup %6646  ;;  %6666 = vtanh.bf16 %v3668_v47  ;;  %v13766_v17 = vpack.c.bf16 %v13764_v35, %v13765_v21  ;;  %v13769_v22 = vpack.c.bf16 %v13767_v27, %v13768_v52  ;;  %v13772_v7 = vpack.c.bf16 %v13770_v18, %v13771_v14  ;;  %v13776_v61 = vld [vmem:[#allocation345_spill] sm:$0xff]  ;;  %v13783_v32 = vld [vmem:[#allocation352_spill] sm:$0xff]  ;;  %v13792_v5 = vld [vmem:[#allocation238_spill] sm:$0xff] }
 0x66a   :  { %5099 = vmatpush1.bf16.msra.mxu0 %v6647_v60  ;;  %v6649_v33 = vpop.eup %6648  ;;  %6668 = vtanh.bf16 %v3588_v1  ;;  %v13775_v20 = vpack.c.bf16 %v13773_v3, %v13774_v51  ;;  %v13777_v56 = vld [vmem:[#allocation341_spill] sm:$0xff]  ;;  %v13784_v57 = vpack.c.bf16 %v13782_v15, %v13783_v32  ;;  %v6952_v13 = vld [vmem:[#allocation3 + $0x44] ss:$8 sps:$4 sm:$0xff]  }
 0x66b   :  { %v6651_v19 = vpop.eup %6650  ;;  %4330 = vmatpush1.bf16.msra.mxu1 %v6649_v33  ;;  %6670 = vtanh.bf16 %v13748_v44  ;;  %v13778_v55 = vpack.c.bf16 %v13776_v61, %v13777_v56  ;;  %v11357_v43 = vld [vmem:[#allocation3 + $0x10] ss:$8 sps:$4 sm:$0xff]   ;;  %v13779_v33 = vld [vmem:[#allocation222_spill] sm:$0xff]  ;;  %v6954_v37 = vld [vmem:[#allocation3 + $0x54] ss:$8 sps:$4 sm:$0xff]  }
 0x66c   :  { %4331 = vmatprep.subr.bf16.mxu1 %v6651_v19  ;;  %6672 = vtanh.bf16 %v13751_v53  ;;  %v13780_v19 = vld [vmem:[#allocation220_spill] sm:$0xff]  ;;  %v11375_v44 = vld [vmem:[#allocation3 + $0x20] ss:$8 sps:$4 sm:$0xff]   ;;  %v6960_v38 = vld [vmem:[#allocation3 + $0x84] ss:$8 sps:$4 sm:$0xff]  }
 0x66d   :  { %5101 = vmatmul.mubr.bf16.vlgmr.msra.gmra.mrb[128].mxu0 %v11306_v10  ;;  %v6653_v6 = vpop.eup %6652  ;;  %6674 = vtanh.bf16 %v13754_v41  ;;  %v13781_v24 = vpack.c.bf16 %v13779_v33, %v13780_v19  ;;  %v11381_v53 = vld [vmem:[#allocation3 + $0x34] ss:$8 sps:$4 sm:$0xff]   ;;  %v6955_v28 = vld [vmem:[#allocation3 + $0x50] ss:$8 sps:$4 sm:$0xff]   ;;  %v11399_v52 = vld [vmem:[#allocation3 + $0xc4] ss:$8 sps:$4 sm:$0xff]  }
 0x66e   :  { %5460 = vmatprep.mubr.bf16.mxu0 %v6944_v59  ;;  %v6655_v25 = vpop.eup %6654  ;;  %6676 = vtanh.bf16 %v13757_v0  ;;  %v6953_v0 = vld [vmem:[#allocation3 + $0x40] ss:$8 sps:$4 sm:$0xff]   ;;  %v6959_v39 = vld [vmem:[#allocation3 + $0x70] ss:$8 sps:$4 sm:$0xff]   ;;  %v6962_v35 = vld [vmem:[#allocation3 + $0x94] ss:$8 sps:$4 sm:$0xff]  }
 0x66f   :  { %4332 = vmatpush1.bf16.msra.mxu1 %v6653_v6  ;;  %v6657_v54 = vpop.eup %6656  ;;  %6678 = vtanh.bf16 %v13760_v9  ;;  %v13785_v6 = vld [vmem:[#allocation231_spill] sm:$0xff]  ;;  %v11384_v21 = vld [vmem:[#allocation3 + $0x90] ss:$8 sps:$4 sm:$0xff]   ;;  %v11405_v18 = vld [vmem:[#allocation3 + $0xd4] ss:$8 sps:$4 sm:$0xff]  }
 0x670   :  { %4333 = vmatprep.subr.bf16.mxu1 %v6655_v25  ;;  %v6659_v2 = vpop.eup %6658  ;;  %6680 = vtanh.bf16 %v13763_v36  ;;  %v13786_v25 = vld [vmem:[#allocation229_spill] sm:$0xff]  ;;  %v6956_v9 = vld [vmem:[#allocation3 + $0x64] ss:$8 sps:$4 sm:$0xff]   ;;  %v6961_v36 = vld [vmem:[#allocation3 + $0x80] ss:$8 sps:$4 sm:$0xff]  }
 0x671   :  { %v6661_v8 = vpop.eup %6660  ;;  %6682 = vtanh.bf16 %v13766_v17  ;;  %v13787_v1 = vpack.c.bf16 %v13785_v6, %v13786_v25  ;;  %v11387_v17 = vld [vmem:[#allocation3 + $0xa4] ss:$8 sps:$4 sm:$0xff]   ;;  %v11396_v27 = vld [vmem:[#allocation3 + $0xb0] ss:$8 sps:$4 sm:$0xff]  }
 0x672   :  { %v6663_v12 = vpop.eup %6662  ;;  %6684 = vtanh.bf16 %v13769_v22  ;;  %v11402_v22 = vld [vmem:[#allocation3 + $0xc0] ss:$8 sps:$4 sm:$0xff]   ;;  %v11408_v14 = vld [vmem:[#allocation3 + $0xd0] ss:$8 sps:$4 sm:$0xff]   ;;  %v6976_v51 = vld [vmem:[#allocation3 + $0x4] ss:$8 sps:$4 sm:$0xff]  }
 0x673   :  { %4334 = vmatpush1.bf16.msra.mxu1 %v6657_v54  ;;  %v6665_v30 = vpop.eup %6664  ;;  %6686 = vtanh.bf16 %v13772_v7  ;;  %v13788_v54 = vld [vmem:[#allocation364_spill] sm:$0xff]  ;;  %13794 = vst [vmem:[#allocation162_spill] sm:$0xff] %v11408_v14  ;;  %v11411_v7 = vld [vmem:[#allocation3 + $0xe4] ss:$8 sps:$4 sm:$0xff]   ;;  %v13804_v32 = vld [vmem:[#allocation33_spill] sm:$0xff] }
 0x674   :  { %4335 = vmatprep.subr.bf16.mxu1 %v6659_v2  ;;  %v6667_v40 = vpop.eup %6666  ;;  %6688 = vtanh.bf16 %v13775_v20  ;;  %v13789_v2 = vld [vmem:[#allocation367_spill] sm:$0xff]  ;;  %13795 = vst [vmem:[#allocation282_spill] sm:$0xff] %v11411_v7  ;;  %v11420_v3 = vld [vmem:[#allocation3 + $0xf0] ss:$8 sps:$4 sm:$0xff]   ;;  %v6977_v33 = vld [vmem:[%s12445_s0] sm:$0xff] }
 0x675   :  { %v6669_v23 = vpop.eup %6668  ;;  %6690 = vtanh.bf16 %v13778_v55  ;;  %v13790_v42 = vpack.c.bf16 %v13788_v54, %v13789_v2  ;;  %13798 = vst [vmem:[#allocation170_spill] sm:$0xff] %v11420_v3  ;;  %v13807_v6 = vld [vmem:[#allocation55_spill] sm:$0xff]  ;;  %v13809_v54 = vld [vmem:[#allocation70_spill] sm:$0xff] }
 0x676   :  { %v6671_v34 = vpop.eup %6670  ;;  %6692 = vtanh.bf16 %v13781_v24  ;;  %v13802_v24 = vld [vmem:[#allocation29_spill] sm:$0xff] }
 0x677   :  { %4336 = vmatpush1.bf16.msra.mxu1 %v6661_v8  ;;  %v6673_v50 = vpop.eup %6672  ;;  %6694 = vtanh.bf16 %v13784_v57  ;;  %v13805_v57 = vld [vmem:[#allocation6_spill] sm:$0xff] }
 0x678   :  { %4337 = vmatprep.subr.bf16.mxu1 %v6663_v12  ;;  %v6675_v48 = vpop.eup %6674  ;;  %6696 = vtanh.bf16 %v13787_v1  ;;  %v13791_v12 = vld [vmem:[#allocation240_spill] sm:$0xff] }
 0x679   :  { %v6677_v60 = vpop.eup %6676  ;;  %6698 = vtanh.bf16 %v13790_v42  ;;  %v13793_v26 = vpack.c.bf16 %v13791_v12, %v13792_v5  ;;  %v13808_v1 = vld [vmem:[#allocation36_spill] sm:$0xff]  ;;  %v13810_v42 = vld [vmem:[#allocation39_spill] sm:$0xff] }
 0x67a   :  { %v6679_v45 = vpop.eup %6678  ;;  %v5173_v2 = vadd.f32 %v13809_v54, %v13808_v1  ;;  %v13813_v12 = vld [vmem:[#allocation107_spill] sm:$0xff]  ;;  %v13839_v54 = vld [vmem:[#allocation38_spill] sm:$0xff] }
 0x67b   :  { %4338 = vmatpush1.bf16.msra.mxu1 %v6665_v30  ;;  %v6681_v46 = vpop.eup %6680  ;;  %6700 = vtanh.bf16 %v13793_v26  ;;  %v6951_v30 = vld [vmem:[#allocation3 + $0x30] ss:$8 sps:$4 sm:$0xff]  }
 0x67c   :  { %4339 = vmatprep.subr.bf16.mxu1 %v6667_v40  ;;  %v6683_v16 = vpop.eup %6682  ;;  %v13814_v26 = vld [vmem:[#allocation44_spill] sm:$0xff] }
 0x67d   :  { %v6685_v47 = vpop.eup %6684 }
 0x67e   :  { %v6687_v59 = vpop.eup %6686 }
 0x67f   :  { %4340 = vmatpush1.bf16.msra.mxu1 %v6669_v23  ;;  %v6689_v62 = vpop.eup %6688  ;;  %v6957_v23 = vld [vmem:[#allocation3 + $0x60] ss:$8 sps:$4 sm:$0xff]  }
 0x680   :  { %5760 = vmatprep.subr.bf16.mxu1 %v6671_v34  ;;  %v6691_v8 = vpop.eup %6690  ;;  %v6958_v34 = vld [vmem:[#allocation3 + $0x74] ss:$8 sps:$4 sm:$0xff]  }
 0x681   :  { %v6693_v4 = vpop.eup %6692 }
 0x682   :  { %4342 = vmatmul.mubr.bf16.vlgmr.msra.gmra.mrb[4].mxu1 %v11339_v58  ;;  %v6695_v11 = vpop.eup %6694 }
 0x683   :  { %5761 = vmatpush3.bf16.msra.mxu1 %v6673_v50  ;;  %4351 = vmatprep.mubr.bf16.mxu1 %v11345_v63  ;;  %v6697_v41 = vpop.eup %6696  ;;  %v11390_v50 = vld [vmem:[#allocation3 + $0xa0] ss:$8 sps:$4 sm:$0xff]  }
 0x684   :  { %5762 = vmatprep.subr.bf16.mxu1 %v6675_v48  ;;  %v6699_v40 = vpop.eup %6698  ;;  %v11393_v48 = vld [vmem:[#allocation3 + $0xb4] ss:$8 sps:$4 sm:$0xff]  }
 0x686   :  { %v6701_v29 = vpop.eup %6700 }
 0x687   :  { %5763 = vmatpush3.bf16.msra.mxu1 %v6677_v60  ;;  %v11414_v60 = vld [vmem:[#allocation3 + $0xe0] ss:$8 sps:$4 sm:$0xff]  }
 0x688   :  { %5764 = vmatprep.subr.bf16.mxu1 %v6679_v45  ;;  %13796 = vst [vmem:[#allocation98_spill] sm:$0xff] %v11414_v60  ;;  %v11417_v45 = vld [vmem:[#allocation3 + $0xf4] ss:$8 sps:$4 sm:$0xff]  }
 0x689   :  { %13797 = vst [vmem:[#allocation169_spill] sm:$0xff] %v11417_v45 }
 0x68a   :  { %4352 = vmatmul.mubr.bf16.gmra.mrb[8].mxu1 %v11357_v43 }
 0x68b   :  { %5765 = vmatpush3.bf16.msra.mxu1 %v6681_v46  ;;  %4361 = vmatprep.mubr.bf16.mxu1 %v11363_v49 }
 0x68c   :  { %5766 = vmatprep.subr.bf16.mxu1 %v6683_v16 }
 0x68f   :  { %5767 = vmatpush3.bf16.msra.mxu1 %v6685_v47  ;;  %v5167_v47 = vadd.f32 %v13805_v57, %v13804_v32  ;;  %v13835_v32 = vld [vmem:[#allocation26_spill] sm:$0xff] }
 0x690   :  { %5768 = vmatprep.subr.bf16.mxu1 %v6687_v59  ;;  %v13806_v59 = vld [vmem:[#allocation35_spill] sm:$0xff] }
 0x691   :  { %v5170_v25 = vadd.f32 %v13807_v6, %v13806_v59  ;;  %v13837_v59 = vld [vmem:[#allocation31_spill] sm:$0xff] }
 0x692   :  { %4362 = vmatmul.mubr.bf16.gmra.mrb[12].mxu1 %v11375_v44 }
 0x693   :  { %5769 = vmatpush3.bf16.msra.mxu1 %v6689_v62  ;;  %4371 = vmatprep.mubr.bf16.mxu1 %v11381_v53  ;;  %v13811_v62 = vld [vmem:[#allocation11_spill] sm:$0xff] }
 0x694   :  { %5770 = vmatprep.subr.bf16.mxu1 %v6691_v8  ;;  %v13812_v8 = vld [vmem:[#allocation41_spill] sm:$0xff] }
 0x695   :  { %v5179_v5 = vadd.f32 %v13813_v12, %v13812_v8  ;;  %v13842_v12 = vld [vmem:[#allocation52_spill] sm:$0xff] }
 0x697   :  { %5771 = vmatpush3.bf16.msra.mxu1 %v6693_v4 }
 0x698   :  { %5772 = vmatprep.subr.bf16.mxu1 %v6695_v11  ;;  %v13816_v11 = vld [vmem:[#allocation46_spill] sm:$0xff] }
 0x69a   :  { %4372 = vmatmul.mubr.bf16.gmra.mrb[16].mxu1 %v6951_v30 }
 0x69b   :  { %5773 = vmatpush3.bf16.msra.mxu1 %v6697_v41  ;;  %4381 = vmatprep.mubr.bf16.mxu1 %v6952_v13  ;;  %v13817_v41 = vld [vmem:[#allocation128_spill] sm:$0xff] }
 0x69c   :  { %5774 = vmatprep.subr.bf16.mxu1 %v6699_v40  ;;  %v13818_v40 = vld [vmem:[#allocation49_spill] sm:$0xff] }
 0x69f   :  { %5775 = vmatpush3.bf16.msra.mxu1 %v6701_v29 }
 0x6a2   :  { %4382 = vmatmul.mubr.bf16.gmra.mrb[20].mxu1 %v6953_v0 }
 0x6a3   :  { %4391 = vmatprep.mubr.bf16.mxu1 %v6954_v37 }
 0x6aa   :  { %4392 = vmatmul.mubr.bf16.gmra.mrb[24].mxu1 %v6955_v28 }
 0x6ab   :  { %4401 = vmatprep.mubr.bf16.mxu1 %v6956_v9 }
 0x6b2   :  { %4402 = vmatmul.mubr.bf16.gmra.mrb[28].mxu1 %v6957_v23 }
 0x6b3   :  { %4411 = vmatprep.mubr.bf16.mxu1 %v6958_v34 }
 0x6ba   :  { %4412 = vmatmul.mubr.bf16.gmra.mrb[32].mxu1 %v6959_v39 }
 0x6bb   :  { %4421 = vmatprep.mubr.bf16.mxu1 %v6960_v38 }
 0x6c2   :  { %4422 = vmatmul.mubr.bf16.gmra.mrb[36].mxu1 %v6961_v36 }
 0x6c3   :  { %4431 = vmatprep.mubr.bf16.mxu1 %v6962_v35 }
 0x6ca   :  { %4432 = vmatmul.mubr.bf16.gmra.mrb[40].mxu1 %v11384_v21 }
 0x6cb   :  { %4441 = vmatprep.mubr.bf16.mxu1 %v11387_v17 }
 0x6d2   :  { %4442 = vmatmul.mubr.bf16.gmra.mrb[44].mxu1 %v11390_v50 }
 0x6d3   :  { %4451 = vmatprep.mubr.bf16.mxu1 %v11393_v48 }
 0x6da   :  { %4452 = vmatmul.mubr.bf16.gmra.mrb[48].mxu1 %v11396_v27 }
 0x6db   :  { %4461 = vmatprep.mubr.bf16.mxu1 %v11399_v52 }
 0x6e2   :  { %4462 = vmatmul.mubr.bf16.gmra.mrb[52].mxu1 %v11402_v22 }
 0x6e3   :  { %4471 = vmatprep.mubr.bf16.mxu1 %v11405_v18 }
 0x6ea   :  { %4472 = vmatmul.mubr.bf16.gmra.mrb[56].mxu1 %v11408_v14 }
 0x6eb   :  { %4481 = vmatprep.mubr.bf16.mxu1 %v11411_v7 }
 0x6f2   :  { %4482 = vmatmul.mubr.bf16.gmra.mrb[60].mxu1 %v11414_v60 }
 0x6f3   :  { %4491 = vmatprep.mubr.bf16.mxu1 %v11417_v45 }
 0x6fa   :  { %4492 = vmatmul.mubr.bf16.gmra.mrb[64].mxu1 %v11420_v3  ;;  %v13879_v3 = vld [vmem:[#allocation78_spill] sm:$0xff] }
 0x6fb   :  { %4727 = vmatprep.mubr.bf16.mxu1 %v6976_v51 }
 0x702   :  { %4728 = vmatmul.mubr.bf16.vlgmr.msra.gmra.mrb[68].mxu1 %v11339_v58  ;;  %v11429_v58 = vpop.permute.xlu1 %5017 }
 0x703   :  { %4735 = vmatprep.mubr.bf16.mxu1 %v11345_v63  ;;  %13799 = vst [vmem:[#allocation15_spill] sm:$0xff] %v11429_v58 }
 0x70a   :  { %4736 = vmatmul.mubr.bf16.gmra.mrb[72].mxu1 %v11357_v43 }
 0x70b   :  { %4743 = vmatprep.mubr.bf16.mxu1 %v11363_v49  ;;  %v13803_v49 = vld [vmem:[#allocation96_spill] sm:$0xff] }
 0x70c   :  { %v5164_v15 = vadd.f32 %v13803_v49, %v13802_v24  ;;  %v13833_v49 = vld [vmem:[#allocation25_spill] sm:$0xff] }
 0x712   :  { %4744 = vmatmul.mubr.bf16.gmra.mrb[76].mxu1 %v11375_v44  ;;  %v5176_v44 = vadd.f32 %v13811_v62, %v13810_v42  ;;  %v13840_v42 = vld [vmem:[#allocation40_spill] sm:$0xff] }
 0x713   :  { %4751 = vmatprep.mubr.bf16.mxu1 %v11381_v53  ;;  %v13815_v53 = vld [vmem:[#allocation122_spill] sm:$0xff] }
 0x714   :  { %v5182_v4 = vadd.f32 %v13815_v53, %v13814_v26  ;;  %v13843_v26 = vld [vmem:[#allocation63_spill] sm:$0xff] }
 0x71a   :  { %4752 = vmatmul.mubr.bf16.gmra.mrb[80].mxu1 %v6951_v30  ;;  %v5185_v30 = vadd.f32 %v13817_v41, %v13816_v11  ;;  %v13845_v41 = vld [vmem:[#allocation77_spill] sm:$0xff] }
 0x71b   :  { %4759 = vmatprep.mubr.bf16.mxu1 %v6952_v13  ;;  %v13819_v13 = vld [vmem:[#allocation140_spill] sm:$0xff] }
 0x71c   :  { %v5188_v29 = vadd.f32 %v13819_v13, %v13818_v40  ;;  %v13846_v40 = vld [vmem:[#allocation79_spill] sm:$0xff] }
 0x722   :  { %4760 = vmatmul.mubr.bf16.gmra.mrb[84].mxu1 %v6953_v0  ;;  %v13820_v0 = vld [vmem:[#allocation50_spill] sm:$0xff] }
 0x723   :  { %4767 = vmatprep.mubr.bf16.mxu1 %v6954_v37  ;;  %v13821_v37 = vld [vmem:[#allocation150_spill] sm:$0xff] }
 0x72a   :  { %4768 = vmatmul.mubr.bf16.gmra.mrb[88].mxu1 %v6955_v28  ;;  %v5191_v28 = vadd.f32 %v13821_v37, %v13820_v0  ;;  %v13848_v37 = vld [vmem:[#allocation88_spill] sm:$0xff] }
 0x72b   :  { %4775 = vmatprep.mubr.bf16.mxu1 %v6956_v9  ;;  %v13822_v9 = vld [vmem:[#allocation66_spill] sm:$0xff] }
 0x72c   :  { %v11495_v57 = vadd.f32 %v5191_v28, %v13835_v32  ;;  %v13854_v32 = vld [vmem:[#allocation104_spill] sm:$0xff] }
 0x732   :  { %4776 = vmatmul.mubr.bf16.gmra.mrb[92].mxu1 %v6957_v23 }
 0x733   :  { %4783 = vmatprep.mubr.bf16.mxu1 %v6958_v34  ;;  %v13824_v34 = vld [vmem:[#allocation71_spill] sm:$0xff] }
 0x73a   :  { %4784 = vmatmul.mubr.bf16.gmra.mrb[96].mxu1 %v6959_v39  ;;  %v11467_v39 = vadd.f32 %v5164_v15, %v13824_v34  ;;  %v11492_v15 = vadd.f32 %v5188_v29, %v13833_v49  ;;  %v13847_v29 = vld [vmem:[#allocation59_spill] sm:$0xff] }
 0x73b   :  { %4791 = vmatprep.mubr.bf16.mxu1 %v6960_v38  ;;  %v13825_v38 = vld [vmem:[#allocation90_spill] sm:$0xff] }
 0x73c   :  { %13834 = vst [vmem:[#allocation188_spill] sm:$0xff] %v11492_v15 }
 0x740   :  { %v5102_v63 = vpop.f32.mrb[128].mxu0 }
 0x741   :  { %v5103_v20 = vadd.f32 %v5102_v63, %v11429_v58  ;;  %v5104_v61 = vpop.f32.mrb[129].mxu0  ;;  %v13827_v63 = vld [vmem:[#allocation92_spill] sm:$0xff] }
 0x742   :  { %v11433_v56 = vadd.f32 %v5104_v61, %v11429_v58  ;;  %v5106_v55 = vpop.f32.mrb[130].mxu0  ;;  %4792 = vmatmul.mubr.bf16.gmra.mrb[100].mxu1 %v6961_v36  ;;  %v11470_v36 = vadd.f32 %v5167_v47, %v13825_v38  ;;  %v13828_v61 = vld [vmem:[#allocation8_spill] sm:$0xff]  ;;  %v13836_v47 = vld [vmem:[#allocation67_spill] sm:$0xff]  ;;  %v13850_v38 = vld [vmem:[#allocation61_spill] sm:$0xff] }
 0x743   :  { %v5107_v46 = vpop.f32.mrb[131].mxu0  ;;  %4799 = vmatprep.mubr.bf16.mxu1 %v6962_v35  ;;  %v13826_v35 = vld [vmem:[#allocation91_spill] sm:$0xff]  ;;  %v11480_v55 = vadd.f32 %v5176_v44, %v13828_v61  ;;  %v13841_v44 = vld [vmem:[#allocation54_spill] sm:$0xff] }
 0x744   :  { %13800 = vst [vmem:[#allocation168_spill] sm:$0xff] %v11433_v56  ;;  %v5154_v43 = vsub.f32 %v5103_v20, %v11433_v56  ;;  %v11473_v51 = vadd.f32 %v5170_v25, %v13826_v35  ;;  %v11476_v20 = vadd.f32 %v5173_v2, %v13827_v63  ;;  %v13829_v46 = vld [vmem:[#allocation14_spill] sm:$0xff]  ;;  %v13838_v25 = vld [vmem:[#allocation32_spill] sm:$0xff]  ;;  %v13851_v63 = vld [vmem:[#allocation9_spill] sm:$0xff] }
 0x746   :  { %v5156_v16 = vrot.slane %v5154_v43, 7  ;;  %v11483_v43 = vadd.f32 %v5179_v5, %v13829_v46  ;;  %v13852_v46 = vld [vmem:[#allocation10_spill] sm:$0xff] }
 0x748   :  { %v11439_v19 = vadd.f32 %v6977_v33, %v5156_v16  ;;  %v13831_v33 = vld [vmem:[#allocation20_spill] sm:$0xff] }
 0x749   :  { %v11489_v24 = vadd.f32 %v5185_v30, %v13831_v33  ;;  %v13853_v33 = vld [vmem:[#allocation62_spill] sm:$0xff] }
 0x74a   :  { %13801 = vst [vmem:[#allocation121_spill] sm:$0xff] %v11439_v19  ;;  %v11463_v23 = vrot.slane %v11439_v19, %v13822_v9  ;;  %4800 = vmatmul.mubr.bf16.gmra.mrb[104].mxu1 %v11384_v21  ;;  %v13830_v21 = vld [vmem:[#allocation19_spill] sm:$0xff] }
 0x74b   :  { %4807 = vmatprep.mubr.bf16.mxu1 %v11387_v17  ;;  %v11486_v16 = vadd.f32 %v5182_v4, %v13830_v21  ;;  %13832 = vst [vmem:[#allocation101_spill] sm:$0xff] %v11489_v24  ;;  %v11499_v17 = vrot.slane %v11439_v19, %v13836_v47  ;;  %v13844_v4 = vld [vmem:[#allocation56_spill] sm:$0xff]  ;;  %v13849_v9 = vld [vmem:[#allocation7_spill] sm:$0xff] }
 0x74c   :  { %13823 = vst [vmem:[#allocation179_spill] sm:$0xff] %v11463_v23  ;;  %v11503_v6 = vmul.f32 %v11463_v23, %v13837_v59  ;;  %v11507_v1 = vmul.f32 %v11463_v23, %v13838_v25  ;;  %v11511_v2 = vmul.f32 %v11463_v23, %v13839_v54  ;;  %v11515_v62 = vmul.f32 %v11463_v23, %v13840_v42  ;;  %v13855_v59 = vld [vmem:[#allocation112_spill] sm:$0xff] }
 0x74d   :  { %v11519_v8 = vmul.f32 %v11463_v23, %v13841_v44  ;;  %v11523_v5 = vmul.f32 %v11463_v23, %v13842_v12  ;;  %v11527_v53 = vmul.f32 %v11463_v23, %v13843_v26  ;;  %v11531_v11 = vmul.f32 %v11463_v23, %v13844_v4  ;;  %v13856_v54 = vld [vmem:[#allocation64_spill] sm:$0xff]  ;;  %v13857_v44 = vld [vmem:[#allocation119_spill] sm:$0xff] }
 0x74e   :  { %v11535_v30 = vmul.f32 %v11463_v23, %v13845_v41  ;;  %v11539_v13 = vmul.f32 %v11463_v23, %v13846_v40  ;;  %v11543_v0 = vmul.f32 %v11463_v23, %v13847_v29  ;;  %v11547_v28 = vmul.f32 %v11463_v23, %v13848_v37  ;;  %v13859_v26 = vld [vmem:[#allocation120_spill] sm:$0xff]  ;;  %v13861_v41 = vld [vmem:[#allocation65_spill] sm:$0xff]  ;;  %v13862_v29 = vld [vmem:[#allocation126_spill] sm:$0xff] }
 0x74f   :  { %v11551_v34 = vmul.f32 %v11463_v23, %v13849_v9  ;;  %v11555_v35 = vmul.f32 %v11463_v23, %v13850_v38  ;;  %v11559_v61 = vmul.f32 %v11463_v23, %v13851_v63  ;;  %v11563_v21 = vmul.f32 %v11463_v23, %v13852_v46  ;;  %v13863_v9 = vld [vmem:[#allocation133_spill] sm:$0xff]  ;;  %v13865_v63 = vld [vmem:[#allocation138_spill] sm:$0xff]  ;;  %v13866_v46 = vld [vmem:[#allocation139_spill] sm:$0xff] }
 0x750   :  { %v11567_v49 = vmul.f32 %v11463_v23, %v13853_v33  ;;  %v11571_v47 = vmul.f32 %v11463_v23, %v13854_v32  ;;  %v11575_v25 = vmul.f32 %v11463_v23, %v13855_v59  ;;  %v11579_v42 = vmul.f32 %v11463_v23, %v13856_v54  ;;  %v13867_v32 = vld [vmem:[#allocation146_spill] sm:$0xff]  ;;  %v13868_v54 = vld [vmem:[#allocation148_spill] sm:$0xff] }
 0x751   :  { %v11583_v12 = vmul.f32 %v11463_v23, %v13857_v44  ;;  %v11588_v4 = vmul.f32 %v11463_v23, %v13859_v26  ;;  %v11592_v40 = vmul.f32 %v11463_v23, %v13861_v41  ;;  %v11596_v37 = vmul.f32 %v11463_v23, %v13862_v29  ;;  %v13869_v26 = vld [vmem:[#allocation154_spill] sm:$0xff] }
 0x752   :  { %4808 = vmatmul.mubr.bf16.gmra.mrb[108].mxu1 %v11390_v50  ;;  %v11600_v38 = vmul.f32 %v11463_v23, %v13863_v9  ;;  %v11605_v50 = vmul.f32 %v11463_v23, %v13865_v63  ;;  %v11609_v33 = vmul.f32 %v11463_v23, %v13866_v46  ;;  %v11613_v59 = vmul.f32 %v11463_v23, %v13867_v32  ;;  %v13871_v9 = vld [vmem:[#allocation75_spill] sm:$0xff]  ;;  %v13872_v46 = vld [vmem:[#allocation34_spill] sm:$0xff] }
 0x753   :  { %13858 = vst [vmem:[#allocation178_spill] sm:$0xff] %v11583_v12  ;;  %13860 = vst [vmem:[#allocation102_spill] sm:$0xff] %v11588_v4  ;;  %4815 = vmatprep.mubr.bf16.mxu1 %v11393_v48  ;;  %v11617_v44 = vmul.f32 %v11463_v23, %v13868_v54  ;;  %v11621_v41 = vmul.f32 %v11463_v23, %v13869_v26  ;;  %v13870_v48 = vld [vmem:[#allocation72_spill] sm:$0xff]  ;;  %v11629_v63 = vmul.f32 %v11499_v17, %v13871_v9 }
 0x754   :  { %13864 = vst [vmem:[#allocation197_spill] sm:$0xff] %v11600_v38  ;;  %v11625_v29 = vmul.f32 %v11463_v23, %v13870_v48  ;;  %v11633_v32 = vmul.f32 %v11499_v17, %v13872_v46  ;;  %v13874_v54 = vld [vmem:[#allocation48_spill] sm:$0xff]  ;;  %v13876_v48 = vld [vmem:[#allocation58_spill] sm:$0xff]  ;;  %v11657_v38 = vmul.f32 %v11499_v17, %v13879_v3  ;;  %v13884_v23 = vld [vmem:[#allocation95_spill] sm:$0xff] }
 0x755   :  { %v11635_v19 = vpop.f32.mrb[4].mxu1  ;;  %v11639_v56 = vmul.f32 %v11499_v17, %v13874_v54  ;;  %v13875_v26 = vld [vmem:[#allocation76_spill] sm:$0xff]  ;;  %v11647_v10 = vmul.f32 %v11499_v17, %v13876_v48  ;;  %v13880_v54 = vld [vmem:[#allocation74_spill] sm:$0xff]  ;;  %v13885_v3 = vld [vmem:[#allocation45_spill] sm:$0xff] }
 0x756   :  { %13873 = vst [vmem:[#allocation103_spill] sm:$0xff] %v11635_v19  ;;  %v11643_v58 = vmul.f32 %v11499_v17, %v13875_v26  ;;  %v13877_v9 = vld [vmem:[#allocation60_spill] sm:$0xff]  ;;  %v11653_v46 = vpop.f32.mrb[5].mxu1  ;;  %v11661_v15 = vmul.f32 %v11499_v17, %v13880_v54  ;;  %v13881_v26 = vld [vmem:[#allocation83_spill] sm:$0xff]  ;;  %v11679_v19 = vmul.f32 %v11499_v17, %v13885_v3  ;;  %v13886_v54 = vld [vmem:[#allocation81_spill] sm:$0xff] }
 0x757   :  { %v11651_v31 = vmul.f32 %v11499_v17, %v13877_v9  ;;  %13878 = vst [vmem:[#allocation21_spill] sm:$0xff] %v11653_v46  ;;  %v11665_v45 = vmul.f32 %v11499_v17, %v13881_v26  ;;  %v13882_v48 = vld [vmem:[#allocation80_spill] sm:$0xff]  ;;  %v11671_v9 = vpop.f32.mrb[6].mxu1  ;;  %v11675_v46 = vmul.f32 %v11499_v17, %v13884_v23  ;;  %v11683_v4 = vmul.f32 %v11499_v17, %v13886_v54  ;;  %v13888_v26 = vld [vmem:[#allocation97_spill] sm:$0xff]  ;;  %v13896_v54 = vld [vmem:[#allocation110_spill] sm:$0xff] }
 0x758   :  { %v11669_v60 = vmul.f32 %v11499_v17, %v13882_v48  ;;  %13883 = vst [vmem:[#allocation187_spill] sm:$0xff] %v11671_v9  ;;  %v11687_v24 = vmul.f32 %v11499_v17, %v13888_v26  ;;  %v11689_v48 = vpop.f32.mrb[7].mxu1  ;;  %v13891_v12 = vld [vmem:[#allocation100_spill] sm:$0xff]  ;;  %v13895_v3 = vld [vmem:[#allocation109_spill] sm:$0xff] }
 0x759   :  { %13887 = vst [vmem:[#allocation125_spill] sm:$0xff] %v11683_v4  ;;  %13890 = vst [vmem:[#allocation173_spill] sm:$0xff] %v11689_v48  ;;  %v11693_v9 = vmul.f32 %v11499_v17, %v13891_v12  ;;  %v13893_v23 = vld [vmem:[#allocation84_spill] sm:$0xff]  ;;  %v11701_v14 = vmul.f32 %v11499_v17, %v13895_v3  ;;  %v11705_v4 = vmul.f32 %v11499_v17, %v13896_v54  ;;  %v13898_v26 = vld [vmem:[#allocation85_spill] sm:$0xff] }
 0x75a   :  { %13889 = vst [vmem:[#allocation196_spill] sm:$0xff] %v11687_v24  ;;  %v11697_v7 = vmul.f32 %v11499_v17, %v13893_v23  ;;  %v11709_v24 = vmul.f32 %v11499_v17, %v13898_v26  ;;  %v13900_v48 = vld [vmem:[#allocation117_spill] sm:$0xff]  ;;  %4816 = vmatmul.mubr.bf16.gmra.mrb[112].mxu1 %v11396_v27  ;;  %v13908_v26 = vld [vmem:[#allocation143_spill] sm:$0xff] }
 0x75b   :  { %13892 = vst [vmem:[#allocation175_spill] sm:$0xff] %v11693_v9  ;;  %13897 = vst [vmem:[#allocation171_spill] sm:$0xff] %v11705_v4  ;;  %v11713_v12 = vmul.f32 %v11499_v17, %v13900_v48  ;;  %v13902_v9 = vld [vmem:[#allocation129_spill] sm:$0xff]  ;;  %v13910_v48 = vld [vmem:[#allocation28_spill] sm:$0xff]  ;;  %4823 = vmatprep.mubr.bf16.mxu1 %v11399_v52  ;;  %v5267_v52 = vadd.f32 %v11515_v62, %v11470_v36  ;;  %v5273_v36 = vadd.f32 %v11539_v13, %v11476_v20 }
 0x75c   :  { %13894 = vst [vmem:[#allocation172_spill] sm:$0xff] %v11697_v7  ;;  %13899 = vst [vmem:[#allocation181_spill] sm:$0xff] %v11709_v24  ;;  %v11717_v23 = vmul.f32 %v11499_v17, %v13902_v9  ;;  %v13904_v7 = vld [vmem:[#allocation130_spill] sm:$0xff]  ;;  %v13906_v54 = vld [vmem:[#allocation89_spill] sm:$0xff]  ;;  %v11730_v24 = vmul.f32 %v11499_v17, %v13908_v26  ;;  %v5264_v26 = vadd.f32 %v11503_v6, %v11467_v39 }
 0x75d   :  { %13901 = vst [vmem:[#allocation180_spill] sm:$0xff] %v11713_v12  ;;  %v11721_v3 = vmul.f32 %v11499_v17, %v13904_v7  ;;  %v11726_v4 = vmul.f32 %v11499_v17, %v13906_v54  ;;  %v11734_v12 = vmul.f32 %v11499_v17, %v13910_v48  ;;  %v13912_v9 = vld [vmem:[#allocation51_spill] sm:$0xff]  ;;  %v13914_v7 = vld [vmem:[#allocation93_spill] sm:$0xff]  ;;  %v5270_v39 = vadd.f32 %v11527_v53, %v11473_v51  ;;  %v13921_v6 = vld [vmem:[#allocation82_spill] sm:$0xff] }
 0x75e   :  { %13903 = vst [vmem:[#allocation384_spill] sm:$0xff] %v11717_v23  ;;  %13909 = vst [vmem:[#allocation206_spill] sm:$0xff] %v11730_v24  ;;  %v11738_v23 = vmul.f32 %v11499_v17, %v13912_v9  ;;  %v11743_v27 = vmul.f32 %v11499_v17, %v13914_v7  ;;  %v13916_v54 = vld [vmem:[#allocation159_spill] sm:$0xff]  ;;  %v5276_v51 = vadd.f32 %v11551_v34, %v11480_v55  ;;  %v13927_v13 = vld [vmem:[#allocation18_spill] sm:$0xff] }
 0x75f   :  { %13905 = vst [vmem:[#allocation207_spill] sm:$0xff] %v11721_v3  ;;  %13907 = vst [vmem:[#allocation105_spill] sm:$0xff] %v11726_v4  ;;  %v11747_v4 = vmul.f32 %v11499_v17, %v13916_v54  ;;  %v13917_v24 = vld [vmem:[#allocation47_spill] sm:$0xff]  ;;  %v11761_v54 = vpop.f32.mrb[8].mxu1  ;;  %v5279_v20 = vadd.f32 %v11563_v21, %v11483_v43  ;;  %v5282_v55 = vadd.f32 %v11575_v25, %v11486_v16  ;;  %v13934_v16 = vld [vmem:[#allocation158_spill] sm:$0xff] }
 0x760   :  { %13911 = vst [vmem:[#allocation144_spill] sm:$0xff] %v11734_v12  ;;  %13913 = vst [vmem:[#allocation205_spill] sm:$0xff] %v11738_v23  ;;  %v5265_v48 = vadd.f32 %v11507_v1, %v13917_v24  ;;  %v13918_v12 = vld [vmem:[#allocation57_spill] sm:$0xff]  ;;  %v5271_v24 = vadd.f32 %v11531_v11, %v13921_v6  ;;  %v13922_v1 = vld [vmem:[#allocation94_spill] sm:$0xff]  ;;  %v11771_v62 = vpop.f32.mrb[9].mxu1  ;;  %v5293_v25 = vadd.f32 %v11617_v44, %v13934_v16 }
 0x761   :  { %13915 = vst [vmem:[#allocation177_spill] sm:$0xff] %v11743_v27  ;;  %v5266_v9 = vadd.f32 %v11511_v2, %v13918_v12  ;;  %v13919_v23 = vld [vmem:[#allocation69_spill] sm:$0xff]  ;;  %v5272_v2 = vadd.f32 %v11535_v30, %v13922_v1  ;;  %v13925_v53 = vld [vmem:[#allocation99_spill] sm:$0xff]  ;;  %v13926_v30 = vld [vmem:[#allocation108_spill] sm:$0xff]  ;;  %v11836_v44 = vadd.f32 %v11657_v38, %v5270_v39 }
 0x762   :  { %v5268_v7 = vadd.f32 %v11519_v8, %v13919_v23  ;;  %v13920_v27 = vld [vmem:[#allocation73_spill] sm:$0xff]  ;;  %v5277_v11 = vadd.f32 %v11555_v35, %v13925_v53  ;;  %v5278_v6 = vadd.f32 %v11559_v61, %v13926_v30  ;;  %v13928_v1 = vld [vmem:[#allocation116_spill] sm:$0xff]  ;;  %v13929_v34 = vld [vmem:[#allocation123_spill] sm:$0xff]  ;;  %4824 = vmatmul.mubr.bf16.gmra.mrb[116].mxu1 %v11402_v22 }
 0x763   :  { %v5269_v3 = vadd.f32 %v11523_v5, %v13920_v27  ;;  %v13923_v8 = vld [vmem:[#allocation13_spill] sm:$0xff]  ;;  %v13924_v5 = vld [vmem:[#allocation12_spill] sm:$0xff]  ;;  %v11781_v27 = vpop.f32.mrb[10].mxu1  ;;  %v11797_v35 = vadd.f32 %v11579_v42, %v13929_v34  ;;  %v13932_v21 = vld [vmem:[#allocation27_spill] sm:$0xff]  ;;  %v11817_v34 = vadd.f32 %v11629_v63, %v5264_v26  ;;  %4831 = vmatprep.mubr.bf16.mxu1 %v11405_v18  ;;  %v11842_v18 = vadd.f32 %v11665_v45, %v5272_v2 }
 0x764   :  { %v5274_v12 = vadd.f32 %v11543_v0, %v13923_v8  ;;  %v5275_v23 = vadd.f32 %v11547_v28, %v13924_v5  ;;  %v5280_v0 = vadd.f32 %v11567_v49, %v13927_v13  ;;  %v5281_v28 = vadd.f32 %v11571_v47, %v13928_v1  ;;  %v11791_v8 = vpop.f32.mrb[11].mxu1  ;;  %v13930_v5 = vld [vmem:[#allocation135_spill] sm:$0xff]  ;;  %v13931_v53 = vld [vmem:[#allocation136_spill] sm:$0xff]  ;;  %v13933_v30 = vld [vmem:[#allocation157_spill] sm:$0xff] }
 0x765   :  { %v5286_v61 = vadd.f32 %v11592_v40, %v13930_v5  ;;  %v5287_v43 = vadd.f32 %v11596_v37, %v13931_v53  ;;  %v5290_v49 = vadd.f32 %v11605_v50, %v13932_v21  ;;  %v5291_v47 = vadd.f32 %v11609_v33, %v11495_v57  ;;  %v13935_v42 = vld [vmem:[#allocation161_spill] sm:$0xff]  ;;  %v13936_v1 = vld [vmem:[#allocation30_spill] sm:$0xff]  ;;  %v13938_v38 = vld [vmem:[#allocation196_spill] sm:$0xff] }
 0x766   :  { %v5292_v13 = vadd.f32 %v11613_v59, %v13933_v30  ;;  %v5294_v40 = vadd.f32 %v11621_v41, %v13935_v42  ;;  %v5295_v37 = vadd.f32 %v11625_v29, %v13936_v1  ;;  %v11820_v50 = vadd.f32 %v11633_v32, %v5265_v48  ;;  %v13940_v26 = vld [vmem:[#allocation172_spill] sm:$0xff]  ;;  %v13943_v39 = vld [vmem:[#allocation207_spill] sm:$0xff]  ;;  %v13944_v2 = vld [vmem:[#allocation105_spill] sm:$0xff] }
 0x767   :  { %v11824_v57 = vadd.f32 %v11639_v56, %v5266_v9  ;;  %v11827_v33 = vadd.f32 %v11643_v58, %v5267_v52  ;;  %v11830_v22 = vadd.f32 %v11647_v10, %v5268_v7  ;;  %v11833_v59 = vadd.f32 %v11651_v31, %v5269_v3  ;;  %v4363_v58 = vpop.f32.mrb[12].mxu1  ;;  %v13937_v31 = vld [vmem:[#allocation125_spill] sm:$0xff]  ;;  %v13939_v3 = vld [vmem:[#allocation175_spill] sm:$0xff]  ;;  %v13942_v52 = vld [vmem:[#allocation384_spill] sm:$0xff] }
 0x768   :  { %v11839_v41 = vadd.f32 %v11661_v15, %v5271_v24  ;;  %v11845_v56 = vadd.f32 %v11669_v60, %v5273_v36  ;;  %v11848_v29 = vadd.f32 %v11675_v46, %v5274_v12  ;;  %v11851_v10 = vadd.f32 %v11679_v19, %v5275_v23  ;;  %v4365_v15 = vpop.f32.mrb[13].mxu1  ;;  %v13941_v46 = vld [vmem:[#allocation171_spill] sm:$0xff]  ;;  %v13945_v12 = vld [vmem:[#allocation206_spill] sm:$0xff]  ;;  %v13965_v30 = vld [vmem:[#allocation321_spill] sm:$0xff] }
 0x769   :  { %v11854_v63 = vadd.f32 %v13937_v31, %v5276_v51  ;;  %v11857_v32 = vadd.f32 %v13938_v38, %v5277_v11  ;;  %v11860_v45 = vadd.f32 %v13939_v3, %v5278_v6  ;;  %v11863_v60 = vadd.f32 %v13940_v26, %v5279_v20  ;;  %v4367_v19 = vpop.f32.mrb[14].mxu1  ;;  %v13946_v11 = vld [vmem:[#allocation144_spill] sm:$0xff]  ;;  %v13947_v6 = vld [vmem:[#allocation205_spill] sm:$0xff]  ;;  %v13950_v16 = vld [vmem:[#allocation282_spill] sm:$0xff] }
 0x76a   :  { %v11866_v48 = vadd.f32 %v11701_v14, %v5280_v0  ;;  %v11869_v9 = vadd.f32 %v13941_v46, %v5281_v28  ;;  %v11872_v7 = vadd.f32 %v13942_v52, %v5286_v61  ;;  %v11875_v24 = vadd.f32 %v13943_v39, %v5287_v43  ;;  %v4369_v51 = vpop.f32.mrb[15].mxu1  ;;  %v13948_v0 = vld [vmem:[#allocation177_spill] sm:$0xff]  ;;  %v13953_v1 = vld [vmem:[#allocation178_spill] sm:$0xff] }
 0x76b   :  { %v11878_v36 = vadd.f32 %v13944_v2, %v5290_v49  ;;  %v11881_v23 = vadd.f32 %v13945_v12, %v5291_v47  ;;  %v11884_v14 = vadd.f32 %v13946_v11, %v5292_v13  ;;  %v11887_v20 = vadd.f32 %v13947_v6, %v5293_v25  ;;  %v13949_v49 = vld [vmem:[#allocation162_spill] sm:$0xff]  ;;  %v13951_v25 = vld [vmem:[#allocation124_spill] sm:$0xff]  ;;  %v13954_v31 = vld [vmem:[#allocation101_spill] sm:$0xff] }
 0x76c   :  { %v11890_v28 = vadd.f32 %v13948_v0, %v5294_v40  ;;  %v11893_v5 = vadd.f32 %v11747_v4, %v5295_v37  ;;  %v5364_v61 = vpack.c.bf16 %v11820_v50, %v11817_v34  ;;  %4832 = vmatmul.mubr.bf16.gmra.mrb[120].mxu1 %v13949_v49  ;;  %v5320_v42 = vmul.f32 %v11499_v17, %v13951_v25  ;;  %v13952_v40 = vld [vmem:[#allocation22_spill] sm:$0xff]  ;;  %v13958_v11 = vld [vmem:[#allocation324_spill] sm:$0xff]  ;;  %v13959_v6 = vld [vmem:[#allocation103_spill] sm:$0xff] }
 0x76d   :  { %4839 = vmatprep.mubr.bf16.mxu1 %v13950_v16  ;;  %v5284_v37 = vadd.f32 %v13953_v1, %v13952_v40  ;;  %v5372_v34 = vpack.c.bf16 %v11869_v9, %v11866_v48  ;;  %v13955_v38 = vld [vmem:[#allocation102_spill] sm:$0xff]  ;;  %v4373_v39 = vpop.f32.mrb[16].mxu1  ;;  %v13957_v48 = vld [vmem:[#allocation181_spill] sm:$0xff]  ;;  %v11934_v0 = vadd.f32 %v13959_v6, %v13958_v11  ;;  %v13961_v16 = vld [vmem:[#allocation187_spill] sm:$0xff] }
 0x76e   :  { %v5285_v3 = vadd.f32 %v13955_v38, %v13954_v31  ;;  %v13956_v2 = vld [vmem:[#allocation86_spill] sm:$0xff]  ;;  %v5350_v9 = vadd.f32 %v13957_v48, %v5282_v55  ;;  %v4375_v40 = vpop.f32.mrb[17].mxu1  ;;  %v13962_v1 = vld [vmem:[#allocation180_spill] sm:$0xff]  ;;  %v13963_v38 = vld [vmem:[#allocation21_spill] sm:$0xff]  ;;  %v11948_v55 = vadd.f32 %v11761_v54, %v13965_v30  ;;  %6702 = vtanh.bf16 %v5364_v61 }
 0x76f   :  { %v5321_v12 = vmul.f32 %v11499_v17, %v13956_v2  ;;  %v13960_v49 = vld [vmem:[#allocation318_spill] sm:$0xff]  ;;  %v5351_v31 = vadd.f32 %v13962_v1, %v11797_v35  ;;  %v4346_v13 = vadd.f32 %v13963_v38, %v13958_v11  ;;  %v13964_v52 = vld [vmem:[#allocation173_spill] sm:$0xff]  ;;  %v4377_v48 = vpop.f32.mrb[18].mxu1  ;;  %v13967_v38 = vld [vmem:[#allocation68_spill] sm:$0xff]  ;;  %v5352_v26 = vadd.f32 %v5320_v42, %v5284_v37 }
 0x770   :  { %v11938_v25 = vadd.f32 %v13961_v16, %v13960_v49  ;;  %v4350_v2 = vadd.f32 %v13964_v52, %v13960_v49  ;;  %v11954_v16 = vadd.f32 %v11771_v62, %v13965_v30  ;;  %v13966_v46 = vld [vmem:[#allocation329_spill] sm:$0xff]  ;;  %v4379_v52 = vpop.f32.mrb[19].mxu1  ;;  %v13968_v4 = vld [vmem:[#allocation179_spill] sm:$0xff]  ;;  %v13971_v53 = vld [vmem:[#allocation98_spill] sm:$0xff]  ;;  %6704 = vtanh.bf16 %v5372_v34 }
 0x771   :  { %v11958_v35 = vadd.f32 %v11781_v27, %v13966_v46  ;;  %v4360_v1 = vadd.f32 %v11791_v8, %v13966_v46  ;;  %v5257_v54 = vmul.f32 %v13968_v4, %v13967_v38  ;;  %v5353_v47 = vadd.f32 %v5321_v12, %v5285_v3  ;;  %v13970_v27 = vld [vmem:[#allocation328_spill] sm:$0xff]  ;;  %v13973_v37 = vld [vmem:[#allocation169_spill] sm:$0xff] }
 0x772   :  { %v4856_v6 = vpack.c.bf16 %v11938_v25, %v11934_v0  ;;  %v4857_v50 = vpack.c.bf16 %v4350_v2, %v4346_v13  ;;  %v13969_v25 = vld [vmem:[#allocation319_spill] sm:$0xff]  ;;  %v11971_v43 = vadd.f32 %v4367_v19, %v13970_v27  ;;  %v5373_v8 = vpack.c.bf16 %v5351_v31, %v5350_v9  ;;  %v13972_v42 = vld [vmem:[#allocation316_spill] sm:$0xff]  ;;  %v13977_v2 = vld [vmem:[#allocation37_spill] sm:$0xff] }
 0x773   :  { %v4862_v62 = vpack.c.bf16 %v4360_v1, %v11954_v16  ;;  %v11968_v21 = vadd.f32 %v4363_v58, %v13969_v25  ;;  %v4366_v46 = vadd.f32 %v4365_v15, %v13969_v25  ;;  %v4370_v4 = vadd.f32 %v4369_v51, %v13970_v27  ;;  %v13974_v19 = vld [vmem:[#allocation335_spill] sm:$0xff]  ;;  %v13975_v9 = vld [vmem:[#allocation188_spill] sm:$0xff]  ;;  %v13976_v15 = vld [vmem:[#allocation197_spill] sm:$0xff] }
 0x774   :  { %4840 = vmatmul.mubr.bf16.gmra.mrb[124].mxu1 %v13971_v53  ;;  %v11977_v13 = vadd.f32 %v4373_v39, %v13972_v42  ;;  %v11983_v58 = vadd.f32 %v4375_v40, %v13972_v42  ;;  %v11986_v12 = vadd.f32 %v4377_v48, %v13974_v19  ;;  %v4380_v53 = vadd.f32 %v4379_v52, %v13974_v19  ;;  %v13979_v3 = vld [vmem:[#allocation137_spill] sm:$0xff] }
 0x775   :  { %4847 = vmatprep.mubr.bf16.mxu1 %v13973_v37  ;;  %v5288_v31 = vadd.f32 %v13976_v15, %v13975_v9  ;;  %v4867_v51 = vpack.c.bf16 %v4370_v4, %v4366_v46  ;;  %v4383_v39 = vpop.f32.mrb[20].mxu1  ;;  %v5289_v16 = vadd.f32 %v5257_v54, %v13977_v2  ;;  %v13978_v37 = vld [vmem:[#allocation87_spill] sm:$0xff]  ;;  %v5325_v52 = vmul.f32 %v11499_v17, %v13979_v3  ;;  %v13980_v61 = vld [vmem:[#allocation317_spill] sm:$0xff] }
 0x776   :  { %v4871_v1 = vpack.c.bf16 %v11986_v12, %v11977_v13  ;;  %v4872_v40 = vpack.c.bf16 %v4380_v53, %v11983_v58  ;;  %v4385_v38 = vpop.f32.mrb[21].mxu1  ;;  %v5324_v48 = vmul.f32 %v11499_v17, %v13978_v37  ;;  %v5374_v9 = vpack.c.bf16 %v5353_v47, %v5352_v26  ;;  %v13981_v54 = vld [vmem:[#allocation333_spill] sm:$0xff]  ;;  %v13983_v47 = vld [vmem:[#allocation170_spill] sm:$0xff] }
 0x777   :  { %v4387_v0 = vpop.f32.mrb[22].mxu1  ;;  %6706 = vtanh.bf16 %v5373_v8  ;;  %v12000_v46 = vadd.f32 %v4383_v39, %v13980_v61  ;;  %v4386_v15 = vadd.f32 %v4385_v38, %v13980_v61  ;;  %v5357_v2 = vadd.f32 %v5325_v52, %v5289_v16  ;;  %v13985_v8 = vld [vmem:[#allocation379_spill] sm:$0xff]  ;;  %v14001_v13 = vld [vmem:[#allocation373_spill] sm:$0xff] }
 0x778   :  { %v12003_v34 = vadd.f32 %v4387_v0, %v13981_v54  ;;  %v4389_v4 = vpop.f32.mrb[23].mxu1  ;;  %v5356_v53 = vadd.f32 %v5324_v48, %v5288_v31  ;;  %v13982_v37 = vpack.c.bf16 %v11827_v33, %v11824_v57  ;;  %v13984_v26 = vpack.c.bf16 %v11833_v59, %v11830_v22  ;;  %v13988_v22 = vld [vmem:[#allocation326_spill] sm:$0xff]  ;;  %v13989_v48 = vld [vmem:[#allocation337_spill] sm:$0xff] }
 0x779   :  { %v4390_v58 = vadd.f32 %v4389_v4, %v13981_v54  ;;  %v13986_v3 = vpack.c.bf16 %v11839_v41, %v11836_v44  ;;  %v13987_v33 = vpack.c.bf16 %v11875_v24, %v11872_v7  ;;  %v6703_v38 = vpop.eup %6702 }
 0x77a   :  { %6708 = vtanh.bf16 %v13982_v37  ;;  %v4876_v17 = vpack.c.bf16 %v12003_v34, %v12000_v46  ;;  %v5376_v57 = vpack.c.bf16 %v5357_v2, %v5356_v53  ;;  %v13992_v2 = vpack.c.bf16 %v11881_v23, %v11878_v36 }
 0x77b   :  { %6710 = vtanh.bf16 %v13984_v26  ;;  %v4877_v0 = vpack.c.bf16 %v4390_v58, %v4386_v15  ;;  %v6705_v44 = vpop.eup %6704  ;;  %v13996_v23 = vpack.c.bf16 %v11851_v10, %v11848_v29  ;;  %v13998_v10 = vpack.c.bf16 %v11857_v32, %v11854_v63  ;;  %v14000_v63 = vld [vmem:[#allocation331_spill] sm:$0xff] }
 0x77c   :  { %4848 = vmatmul.mubr.bf16.gmra.mrb[128].mxu1 %v13983_v47  ;;  %6712 = vtanh.bf16 %v5374_v9  ;;  %5894 = vmatprep.subr.bf16.mxu0 %v6705_v44 }
 0x77d   :  { %5059 = vmatprep.mubr.bf16.mxu1 %v13985_v8  ;;  %6714 = vtanh.bf16 %v13986_v3  ;;  %v4393_v31 = vpop.f32.mrb[24].mxu1  ;;  %5895 = vmatpush3.bf16.msra.mxu0 %v6703_v38 }
 0x77e   :  { %6716 = vtanh.bf16 %v13987_v33  ;;  %v4395_v39 = vpop.f32.mrb[25].mxu1  ;;  %v12024_v59 = vadd.f32 %v4393_v31, %v13988_v22 }
 0x77f   :  { %6718 = vtanh.bf16 %v4857_v50  ;;  %v4397_v16 = vpop.f32.mrb[26].mxu1  ;;  %v4396_v41 = vadd.f32 %v4395_v39, %v13988_v22 }
 0x780   :  { %6720 = vtanh.bf16 %v4856_v6  ;;  %v12027_v52 = vadd.f32 %v4397_v16, %v13989_v48  ;;  %v4399_v9 = vpop.f32.mrb[27].mxu1  ;;  %v13990_v6 = vpack.c.bf16 %v11958_v35, %v11948_v55  ;;  %v13993_v55 = vpack.c.bf16 %v11971_v43, %v11968_v21  ;;  %v13994_v35 = vld [vmem:[#allocation323_spill] sm:$0xff] }
 0x781   :  { %6722 = vtanh.bf16 %v4862_v62  ;;  %v4400_v4 = vadd.f32 %v4399_v9, %v13989_v48  ;;  %v13991_v62 = vpack.c.bf16 %v11845_v56, %v11842_v18  ;;  %v13995_v56 = vld [vmem:[#allocation342_spill] sm:$0xff]  ;;  %v13997_v43 = vpack.c.bf16 %v11887_v20, %v11884_v14 }
 0x782   :  { %6724 = vtanh.bf16 %v5376_v57  ;;  %v4881_v7 = vpack.c.bf16 %v12027_v52, %v12024_v59  ;;  %v6707_v24 = vpop.eup %6706  ;;  %v13999_v9 = vpack.c.bf16 %v11893_v5, %v11890_v28 }
 0x783   :  { %6726 = vtanh.bf16 %v4867_v51  ;;  %v4882_v50 = vpack.c.bf16 %v4400_v4, %v4396_v41  ;;  %5896 = vmatprep.subr.bf16.mxu0 %v6707_v24 }
 0x784   :  { %6728 = vtanh.bf16 %v13990_v6  ;;  %v14002_v6 = vpack.c.bf16 %v11863_v60, %v11860_v45 }
 0x785   :  { %v6709_v15 = vpop.eup %6708  ;;  %6730 = vtanh.bf16 %v13991_v62  ;;  %v4403_v58 = vpop.f32.mrb[28].mxu1 }
 0x786   :  { %v6711_v53 = vpop.eup %6710  ;;  %6732 = vtanh.bf16 %v13992_v2  ;;  %v4405_v37 = vpop.f32.mrb[29].mxu1  ;;  %5897 = vmatpush3.bf16.msra.mxu0 %v6709_v15  ;;  %v12046_v18 = vadd.f32 %v4403_v58, %v13994_v35 }
 0x787   :  { %v6713_v47 = vpop.eup %6712  ;;  %6734 = vtanh.bf16 %v4872_v40  ;;  %v4407_v51 = vpop.f32.mrb[30].mxu1  ;;  %v4406_v40 = vadd.f32 %v4405_v37, %v13994_v35 }
 0x788   :  { %v6715_v26 = vpop.eup %6714  ;;  %5898 = vmatprep.subr.bf16.mxu0 %v6713_v47  ;;  %6736 = vtanh.bf16 %v13993_v55  ;;  %v12049_v3 = vadd.f32 %v4407_v51, %v13995_v56  ;;  %v4409_v31 = vpop.f32.mrb[31].mxu1  ;;  %v14003_v47 = vld [vmem:[#allocation327_spill] sm:$0xff] }
 0x789   :  { %v6717_v36 = vpop.eup %6716  ;;  %6738 = vtanh.bf16 %v13996_v23  ;;  %v4410_v57 = vadd.f32 %v4409_v31, %v13995_v56 }
 0x78a   :  { %v6719_v33 = vpop.eup %6718  ;;  %6740 = vtanh.bf16 %v13997_v43  ;;  %v4886_v21 = vpack.c.bf16 %v12049_v3, %v12046_v18  ;;  %5899 = vmatpush3.bf16.msra.mxu0 %v6711_v53 }
 0x78b   :  { %v6721_v39 = vpop.eup %6720  ;;  %5027 = vmatprep.subr.bf16.mxu1 %v6719_v33  ;;  %6742 = vtanh.bf16 %v4877_v0  ;;  %v4887_v16 = vpack.c.bf16 %v4410_v57, %v4406_v40  ;;  %5900 = vmatprep.subr.bf16.mxu0 %v6717_v36 }
 0x78c   :  { %v6723_v38 = vpop.eup %6722  ;;  %5028 = vmatpush1.bf16.msra.mxu1 %v6721_v39  ;;  %6744 = vtanh.bf16 %v4871_v1 }
 0x78d   :  { %v6725_v29 = vpop.eup %6724  ;;  %6746 = vtanh.bf16 %v13998_v10  ;;  %5029 = vmatprep.subr.bf16.mxu1 %v6723_v38  ;;  %v4413_v14 = vpop.f32.mrb[32].mxu1 }
 0x78e   :  { %v6727_v20 = vpop.eup %6726  ;;  %6748 = vtanh.bf16 %v13999_v9  ;;  %v4415_v0 = vpop.f32.mrb[33].mxu1  ;;  %5901 = vmatpush3.bf16.msra.mxu0 %v6715_v26  ;;  %v4414_v32 = vadd.f32 %v4413_v14, %v14000_v63  ;;  %v14004_v26 = vld [vmem:[#allocation376_spill] sm:$0xff] }
 0x78f   :  { %v6729_v44 = vpop.eup %6728  ;;  %6750 = vtanh.bf16 %v4882_v50  ;;  %v4417_v41 = vpop.f32.mrb[34].mxu1  ;;  %5902 = vmatprep.subr.bf16.mxu0 %v6725_v29  ;;  %v4416_v28 = vadd.f32 %v4415_v0, %v14000_v63  ;;  %v14006_v29 = vld [vmem:[#allocation377_spill] sm:$0xff] }
 0x790   :  { %v6731_v4 = vpop.eup %6730  ;;  %5030 = vmatpush1.bf16.msra.mxu1 %v6729_v44  ;;  %6752 = vtanh.bf16 %v4876_v17  ;;  %v4418_v12 = vadd.f32 %v4417_v41, %v14001_v13  ;;  %v4419_v1 = vpop.f32.mrb[35].mxu1  ;;  %v6978_v44 = vld [vmem:[%s12447_s2] ss:$8 sps:$4 sm:$0xff]  }
 0x791   :  { %v6733_v24 = vpop.eup %6732  ;;  %5031 = vmatprep.subr.bf16.mxu1 %v6727_v20  ;;  %v4420_v5 = vadd.f32 %v4419_v1, %v14001_v13  ;;  %6754 = vtanh.bf16 %v14002_v6  ;;  %v14007_v6 = vld [vmem:[#allocation332_spill] sm:$0xff] }
 0x792   :  { %v6735_v50 = vpop.eup %6734  ;;  %v4891_v15 = vpack.c.bf16 %v4418_v12, %v4414_v32  ;;  %5903 = vmatpush3.bf16.msra.mxu0 %v6731_v4  ;;  %6756 = vtanh.bf16 %v4887_v16  ;;  %v14005_v16 = vld [vmem:[#allocation334_spill] sm:$0xff]  ;;  %v6979_v32 = vld [vmem:[%s12447_s2 + $0x14] ss:$8 sps:$4 sm:$0xff]  }
 0x793   :  { %v6737_v62 = vpop.eup %6736  ;;  %v4892_v46 = vpack.c.bf16 %v4420_v5, %v4416_v28  ;;  %5904 = vmatprep.subr.bf16.mxu0 %v6733_v24  ;;  %6758 = vtanh.bf16 %v4881_v7 }
 0x794   :  { %v6739_v34 = vpop.eup %6738  ;;  %5032 = vmatpush1.bf16.msra.mxu1 %v6737_v62  ;;  %v14008_v62 = vld [vmem:[#allocation380_spill] sm:$0xff] }
 0x795   :  { %v6741_v17 = vpop.eup %6740  ;;  %5033 = vmatprep.subr.bf16.mxu1 %v6735_v50  ;;  %v4423_v58 = vpop.f32.mrb[36].mxu1  ;;  %6760 = vtanh.bf16 %v4892_v46 }
 0x796   :  { %v6743_v53 = vpop.eup %6742  ;;  %v4425_v2 = vpop.f32.mrb[37].mxu1  ;;  %5905 = vmatpush3.bf16.msra.mxu0 %v6739_v34  ;;  %6762 = vtanh.bf16 %v4886_v21  ;;  %v4424_v51 = vadd.f32 %v4423_v58, %v14003_v47 }
 0x797   :  { %v6745_v37 = vpop.eup %6744  ;;  %v4427_v45 = vpop.f32.mrb[38].mxu1  ;;  %5906 = vmatprep.subr.bf16.mxu0 %v6741_v17  ;;  %v4426_v52 = vadd.f32 %v4425_v2, %v14003_v47  ;;  %6764 = vtanh.bf16 %v4891_v15 }
 0x798   :  { %v6747_v60 = vpop.eup %6746  ;;  %5034 = vmatpush1.bf16.msra.mxu1 %v6745_v37  ;;  %v4428_v55 = vadd.f32 %v4427_v45, %v14004_v26  ;;  %v4429_v18 = vpop.f32.mrb[39].mxu1  ;;  %v6981_v45 = vld [vmem:[%s12447_s2 + $0x24] ss:$8 sps:$4 sm:$0xff]  }
 0x799   :  { %v6749_v59 = vpop.eup %6748  ;;  %5035 = vmatprep.subr.bf16.mxu1 %v6743_v53  ;;  %v4430_v7 = vadd.f32 %v4429_v18, %v14004_v26  ;;  %v6980_v53 = vld [vmem:[%s12447_s2 + $0x10] ss:$8 sps:$4 sm:$0xff]  }
 0x79a   :  { %v6751_v3 = vpop.eup %6750  ;;  %v4896_v31 = vpack.c.bf16 %v4428_v55, %v4424_v51  ;;  %5907 = vmatpush3.bf16.msra.mxu0 %v6747_v60 }
 0x79b   :  { %v6753_v36 = vpop.eup %6752  ;;  %v4897_v23 = vpack.c.bf16 %v4430_v7, %v4426_v52  ;;  %5908 = vmatprep.subr.bf16.mxu0 %v6749_v59  ;;  %v14009_v52 = vld [vmem:[#allocation338_spill] sm:$0xff] }
 0x79c   :  { %5036 = vmatpush1.bf16.msra.mxu1 %v6753_v36  ;;  %v6755_v40 = vpop.eup %6754 }
 0x79d   :  { %5037 = vmatprep.subr.bf16.mxu1 %v6751_v3  ;;  %6766 = vtanh.bf16 %v4897_v23  ;;  %v4433_v57 = vpop.f32.mrb[40].mxu1  ;;  %v6757_v33 = vpop.eup %6756  ;;  %v14010_v3 = vld [vmem:[#allocation382_spill] sm:$0xff] }
 0x79e   :  { %v4435_v43 = vpop.f32.mrb[41].mxu1  ;;  %v6759_v21 = vpop.eup %6758  ;;  %5909 = vmatpush3.bf16.msra.mxu0 %v6755_v40  ;;  %6768 = vtanh.bf16 %v4896_v31  ;;  %v4434_v38 = vadd.f32 %v4433_v57, %v14005_v16 }
 0x79f   :  { %v4437_v39 = vpop.f32.mrb[42].mxu1  ;;  %v4436_v20 = vadd.f32 %v4435_v43, %v14005_v16 }
 0x7a0   :  { %5038 = vmatpush1.bf16.msra.mxu1 %v6759_v21  ;;  %v4438_v10 = vadd.f32 %v4437_v39, %v14006_v29  ;;  %v4439_v14 = vpop.f32.mrb[43].mxu1  ;;  %v6761_v0 = vpop.eup %6760  ;;  %v6983_v21 = vld [vmem:[%s12447_s2 + $0x34] ss:$8 sps:$4 sm:$0xff]  }
 0x7a1   :  { %5039 = vmatprep.subr.bf16.mxu1 %v6757_v33  ;;  %v4440_v9 = vadd.f32 %v4439_v14, %v14006_v29  ;;  %5461 = vmatmul.mubr.bf16.vlgmr.msra.gmra.mrb[132].mxu0 %v6978_v44  ;;  %v6763_v4 = vpop.eup %6762  ;;  %v6982_v33 = vld [vmem:[%s12447_s2 + $0x20] ss:$8 sps:$4 sm:$0xff]   ;;  %v14012_v44 = vld [vmem:[#allocation165_spill] sm:$0xff] }
 0x7a2   :  { %v4901_v41 = vpack.c.bf16 %v4438_v10, %v4434_v38  ;;  %5468 = vmatprep.mubr.bf16.mxu0 %v6979_v32  ;;  %v6765_v28 = vpop.eup %6764 }
 0x7a3   :  { %v4902_v12 = vpack.c.bf16 %v4440_v9, %v4436_v20  ;;  %v14011_v9 = vld [vmem:[#allocation336_spill] sm:$0xff] }
 0x7a4   :  { %5040 = vmatpush1.bf16.msra.mxu1 %v6763_v4 }
 0x7a5   :  { %6770 = vtanh.bf16 %v4902_v12  ;;  %5041 = vmatprep.subr.bf16.mxu1 %v6761_v0  ;;  %v4443_v1 = vpop.f32.mrb[44].mxu1 }
 0x7a6   :  { %6772 = vtanh.bf16 %v4901_v41  ;;  %v4445_v24 = vpop.f32.mrb[45].mxu1  ;;  %v4444_v15 = vadd.f32 %v4443_v1, %v14007_v6 }
 0x7a7   :  { %v4447_v5 = vpop.f32.mrb[46].mxu1  ;;  %v4446_v17 = vadd.f32 %v4445_v24, %v14007_v6  ;;  %v6984_v24 = vld [vmem:[%s12447_s2 + $0x30] ss:$8 sps:$4 sm:$0xff]  }
 0x7a8   :  { %v6767_v50 = vpop.eup %6766  ;;  %5042 = vmatpush1.bf16.msra.mxu1 %v6765_v28  ;;  %v4448_v46 = vadd.f32 %v4447_v5, %v14008_v62  ;;  %v4449_v34 = vpop.f32.mrb[47].mxu1  ;;  %v6985_v5 = vld [vmem:[%s12447_s2 + $0x44] ss:$8 sps:$4 sm:$0xff]  }
 0x7a9   :  { %v4450_v58 = vadd.f32 %v4449_v34, %v14008_v62  ;;  %5043 = vmatprep.subr.bf16.mxu1 %v6767_v50  ;;  %5469 = vmatmul.mubr.bf16.gmra.mrb[136].mxu0 %v6980_v53  ;;  %v6769_v37 = vpop.eup %6768 }
 0x7aa   :  { %v4906_v2 = vpack.c.bf16 %v4448_v46, %v4444_v15  ;;  %5476 = vmatprep.mubr.bf16.mxu0 %v6981_v45 }
 0x7ab   :  { %v4907_v60 = vpack.c.bf16 %v4450_v58, %v4446_v17  ;;  %v14013_v58 = vld [vmem:[#allocation339_spill] sm:$0xff] }
 0x7ac   :  { %5044 = vmatpush1.bf16.msra.mxu1 %v6769_v37 }
 0x7ad   :  { %6774 = vtanh.bf16 %v4907_v60  ;;  %v4453_v51 = vpop.f32.mrb[48].mxu1 }
 0x7ae   :  { %6776 = vtanh.bf16 %v4906_v2  ;;  %v4455_v55 = vpop.f32.mrb[49].mxu1  ;;  %v4454_v7 = vadd.f32 %v4453_v51, %v14009_v52  ;;  %v14014_v2 = vld [vmem:[#allocation250_spill] sm:$0xff] }
 0x7af   :  { %v4457_v18 = vpop.f32.mrb[50].mxu1  ;;  %v4456_v40 = vadd.f32 %v4455_v55, %v14009_v52 }
 0x7b0   :  { %v6771_v59 = vpop.eup %6770  ;;  %v4458_v31 = vadd.f32 %v4457_v18, %v14010_v3  ;;  %v4459_v36 = vpop.f32.mrb[51].mxu1  ;;  %v6986_v18 = vld [vmem:[%s12447_s2 + $0x40] ss:$8 sps:$4 sm:$0xff]  }
 0x7b1   :  { %v6773_v23 = vpop.eup %6772  ;;  %v4460_v57 = vadd.f32 %v4459_v36, %v14010_v3  ;;  %5045 = vmatprep.subr.bf16.mxu1 %v6771_v59  ;;  %5477 = vmatmul.mubr.bf16.gmra.mrb[140].mxu0 %v6982_v33  ;;  %v14015_v33 = vld [vmem:[#allocation344_spill] sm:$0xff] }
 0x7b2   :  { %v4911_v43 = vpack.c.bf16 %v4458_v31, %v4454_v7  ;;  %5046 = vmatpush1.bf16.msra.mxu1 %v6773_v23  ;;  %5484 = vmatprep.mubr.bf16.mxu0 %v6983_v21  ;;  %v6987_v7 = vld [vmem:[%s12447_s2 + $0x54] ss:$8 sps:$4 sm:$0xff]   ;;  %v14016_v21 = vld [vmem:[#allocation259_spill] sm:$0xff] }
 0x7b3   :  { %v4912_v39 = vpack.c.bf16 %v4460_v57, %v4456_v40 }
 0x7b5   :  { %6778 = vtanh.bf16 %v4912_v39  ;;  %v4463_v38 = vpop.f32.mrb[52].mxu1 }
 0x7b6   :  { %6780 = vtanh.bf16 %v4911_v43  ;;  %v4465_v10 = vpop.f32.mrb[53].mxu1  ;;  %v4464_v0 = vadd.f32 %v4463_v38, %v14011_v9 }
 0x7b7   :  { %v4467_v14 = vpop.f32.mrb[54].mxu1  ;;  %v4466_v12 = vadd.f32 %v4465_v10, %v14011_v9 }
 0x7b8   :  { %v6775_v20 = vpop.eup %6774  ;;  %v4468_v41 = vadd.f32 %v4467_v14, %v14012_v44  ;;  %v4469_v4 = vpop.f32.mrb[55].mxu1 }
 0x7b9   :  { %v6777_v32 = vpop.eup %6776  ;;  %v4470_v1 = vadd.f32 %v4469_v4, %v14012_v44  ;;  %5047 = vmatprep.subr.bf16.mxu1 %v6775_v20  ;;  %5485 = vmatmul.mubr.bf16.gmra.mrb[144].mxu0 %v6984_v24  ;;  %v6989_v4 = vld [vmem:[%s12447_s2 + $0x64] ss:$8 sps:$4 sm:$0xff]  }
 0x7ba   :  { %v4916_v28 = vpack.c.bf16 %v4468_v41, %v4464_v0  ;;  %5048 = vmatpush1.bf16.msra.mxu1 %v6777_v32  ;;  %5492 = vmatprep.mubr.bf16.mxu0 %v6985_v5  ;;  %v6988_v0 = vld [vmem:[%s12447_s2 + $0x50] ss:$8 sps:$4 sm:$0xff]   ;;  %v14017_v5 = vld [vmem:[#allocation374_spill] sm:$0xff] }
 0x7bb   :  { %v4917_v50 = vpack.c.bf16 %v4470_v1, %v4466_v12 }
 0x7bd   :  { %6782 = vtanh.bf16 %v4917_v50  ;;  %v4473_v15 = vpop.f32.mrb[56].mxu1 }
 0x7be   :  { %6784 = vtanh.bf16 %v4916_v28  ;;  %v4475_v46 = vpop.f32.mrb[57].mxu1  ;;  %v4474_v53 = vadd.f32 %v4473_v15, %v14013_v58  ;;  %v14018_v15 = vld [vmem:[#allocation160_spill] sm:$0xff] }
 0x7bf   :  { %v4477_v34 = vpop.f32.mrb[58].mxu1  ;;  %v4476_v51 = vadd.f32 %v4475_v46, %v14013_v58 }
 0x7c0   :  { %v6779_v17 = vpop.eup %6778  ;;  %v4478_v37 = vadd.f32 %v4477_v34, %v14014_v2  ;;  %v4479_v45 = vpop.f32.mrb[59].mxu1 }
 0x7c1   :  { %v6781_v60 = vpop.eup %6780  ;;  %v4480_v55 = vadd.f32 %v4479_v45, %v14014_v2  ;;  %5049 = vmatprep.subr.bf16.mxu1 %v6779_v17  ;;  %5493 = vmatmul.mubr.bf16.gmra.mrb[148].mxu0 %v6986_v18  ;;  %v6990_v45 = vld [vmem:[%s12447_s2 + $0x60] ss:$8 sps:$4 sm:$0xff]  }
 0x7c2   :  { %v4921_v59 = vpack.c.bf16 %v4478_v37, %v4474_v53  ;;  %5050 = vmatpush1.bf16.msra.mxu1 %v6781_v60  ;;  %5500 = vmatprep.mubr.bf16.mxu0 %v6987_v7 }
 0x7c3   :  { %v4922_v31 = vpack.c.bf16 %v4480_v55, %v4476_v51  ;;  %v6991_v51 = vld [vmem:[%s12447_s2 + $0x74] ss:$8 sps:$4 sm:$0xff]  }
 0x7c5   :  { %6786 = vtanh.bf16 %v4922_v31  ;;  %v4483_v36 = vpop.f32.mrb[60].mxu1 }
 0x7c6   :  { %6788 = vtanh.bf16 %v4921_v59  ;;  %v4485_v23 = vpop.f32.mrb[61].mxu1  ;;  %v4484_v43 = vadd.f32 %v4483_v36, %v14015_v33 }
 0x7c7   :  { %v4487_v40 = vpop.f32.mrb[62].mxu1  ;;  %v4486_v14 = vadd.f32 %v4485_v23, %v14015_v33 }
 0x7c8   :  { %v6783_v57 = vpop.eup %6782  ;;  %v4488_v39 = vadd.f32 %v4487_v40, %v14016_v21  ;;  %v4489_v38 = vpop.f32.mrb[63].mxu1 }
 0x7c9   :  { %v6785_v10 = vpop.eup %6784  ;;  %v4490_v20 = vadd.f32 %v4489_v38, %v14016_v21  ;;  %5051 = vmatprep.subr.bf16.mxu1 %v6783_v57  ;;  %5501 = vmatmul.mubr.bf16.gmra.mrb[152].mxu0 %v6988_v0 }
 0x7ca   :  { %v4926_v41 = vpack.c.bf16 %v4488_v39, %v4484_v43  ;;  %5052 = vmatpush1.bf16.msra.mxu1 %v6785_v10  ;;  %5508 = vmatprep.mubr.bf16.mxu0 %v6989_v4  ;;  %v6992_v43 = vld [vmem:[%s12447_s2 + $0x70] ss:$8 sps:$4 sm:$0xff]   ;;  %v6993_v39 = vld [vmem:[%s12447_s2 + $0x84] ss:$8 sps:$4 sm:$0xff]  }
 0x7cb   :  { %v4927_v32 = vpack.c.bf16 %v4490_v20, %v4486_v14 }
 0x7cd   :  { %6790 = vtanh.bf16 %v4927_v32  ;;  %v4493_v12 = vpop.f32.mrb[64].mxu1 }
 0x7ce   :  { %6792 = vtanh.bf16 %v4926_v41  ;;  %v4495_v1 = vpop.f32.mrb[65].mxu1  ;;  %v4494_v50 = vadd.f32 %v4493_v12, %v14017_v5 }
 0x7cf   :  { %v4497_v24 = vpop.f32.mrb[66].mxu1  ;;  %v4496_v53 = vadd.f32 %v4495_v1, %v14017_v5 }
 0x7d0   :  { %v6787_v28 = vpop.eup %6786  ;;  %v4498_v46 = vadd.f32 %v4497_v24, %v14018_v15  ;;  %v4499_v34 = vpop.f32.mrb[67].mxu1 }
 0x7d1   :  { %v6789_v17 = vpop.eup %6788  ;;  %v4500_v37 = vadd.f32 %v4499_v34, %v14018_v15  ;;  %5053 = vmatprep.subr.bf16.mxu1 %v6787_v28  ;;  %5509 = vmatmul.mubr.bf16.gmra.mrb[156].mxu0 %v6990_v45 }
 0x7d2   :  { %v4931_v60 = vpack.c.bf16 %v4498_v46, %v4494_v50  ;;  %5054 = vmatpush1.bf16.msra.mxu1 %v6789_v17  ;;  %5516 = vmatprep.mubr.bf16.mxu0 %v6991_v51  ;;  %v14019_v50 = vld [vmem:[#allocation329_spill] sm:$0xff] }
 0x7d3   :  { %v4932_v55 = vpack.c.bf16 %v4500_v37, %v4496_v53  ;;  %v14020_v53 = vld [vmem:[#allocation268_spill] sm:$0xff] }
 0x7d5   :  { %6794 = vtanh.bf16 %v4932_v55  ;;  %v5776_v18 = vpop.f32.mrb[68].mxu1 }
 0x7d6   :  { %6796 = vtanh.bf16 %v4931_v60  ;;  %v5777_v59 = vpop.f32.mrb[69].mxu1 }
 0x7d7   :  { %v5778_v7 = vadd.f32 %v5777_v59, %v5776_v18  ;;  %v5779_v31 = vpop.f32.mrb[70].mxu1  ;;  %v6997_v18 = vld [vmem:[%s12447_s2 + $0xa4] ss:$8 sps:$4 sm:$0xff]  }
 0x7d8   :  { %v6791_v36 = vpop.eup %6790  ;;  %v5780_v23 = vpop.f32.mrb[71].mxu1 }
 0x7d9   :  { %v6793_v40 = vpop.eup %6792  ;;  %v5781_v57 = vadd.f32 %v5780_v23, %v5779_v31  ;;  %5055 = vmatprep.subr.bf16.mxu1 %v6791_v36  ;;  %5517 = vmatmul.mubr.bf16.gmra.mrb[160].mxu0 %v6992_v43  ;;  %v12164_v38 = vadd.f32 %v5778_v7, %v13958_v11  ;;  %v6994_v11 = vld [vmem:[%s12447_s2 + $0x80] ss:$8 sps:$4 sm:$0xff]  }
 0x7da   :  { %5056 = vmatpush1.bf16.msra.mxu1 %v6793_v40  ;;  %5524 = vmatprep.mubr.bf16.mxu0 %v6993_v39  ;;  %v6998_v39 = vld [vmem:[%s12447_s2 + $0xa0] ss:$8 sps:$4 sm:$0xff]  }
 0x7db   :  { %v12167_v10 = vadd.f32 %v5781_v57, %v13960_v49  ;;  %v6995_v49 = vld [vmem:[%s12447_s2 + $0x94] ss:$8 sps:$4 sm:$0xff]  }
 0x7dd   :  { %v4860_v14 = vpack.c.bf16 %v12167_v10, %v12164_v38  ;;  %v5782_v20 = vpop.f32.mrb[72].mxu1 }
 0x7de   :  { %v5783_v0 = vpop.f32.mrb[73].mxu1 }
 0x7df   :  { %v5784_v41 = vadd.f32 %v5783_v0, %v5782_v20  ;;  %v5785_v4 = vpop.f32.mrb[74].mxu1 }
 0x7e0   :  { %v6795_v32 = vpop.eup %6794  ;;  %v5786_v12 = vpop.f32.mrb[75].mxu1 }
 0x7e1   :  { %v6797_v1 = vpop.eup %6796  ;;  %v5787_v24 = vadd.f32 %v5786_v12, %v5785_v4  ;;  %5057 = vmatprep.subr.bf16.mxu1 %v6795_v32  ;;  %5525 = vmatmul.mubr.bf16.gmra.mrb[164].mxu0 %v6994_v11  ;;  %v12178_v28 = vadd.f32 %v5784_v41, %v13965_v30  ;;  %v6996_v30 = vld [vmem:[%s12447_s2 + $0x90] ss:$8 sps:$4 sm:$0xff]  }
 0x7e2   :  { %5058 = vmatpush1.bf16.msra.mxu1 %v6797_v1  ;;  %5532 = vmatprep.mubr.bf16.mxu0 %v6995_v49  ;;  %v7000_v11 = vld [vmem:[%s12447_s2 + $0xb0] ss:$8 sps:$4 sm:$0xff]  }
 0x7e3   :  { %v12181_v46 = vadd.f32 %v5787_v24, %v14019_v50 }
 0x7e5   :  { %v4865_v34 = vpack.c.bf16 %v12181_v46, %v12178_v28  ;;  %v5788_v17 = vpop.f32.mrb[76].mxu1  ;;  %5060 = vmatmul.mubr.bf16.vlgmr.msra.gmra.mrb[132].mxu1 %v14020_v53 }
 0x7e6   :  { %v5789_v37 = vpop.f32.mrb[77].mxu1  ;;  %5141 = vmatprep.mubr.bf16.mxu1 %v13985_v8 }
 0x7e7   :  { %v5790_v45 = vadd.f32 %v5789_v37, %v5788_v17  ;;  %v5791_v60 = vpop.f32.mrb[78].mxu1 }
 0x7e8   :  { %v5792_v51 = vpop.f32.mrb[79].mxu1 }
 0x7e9   :  { %v5793_v55 = vadd.f32 %v5792_v51, %v5791_v60  ;;  %5533 = vmatmul.mubr.bf16.gmra.mrb[168].mxu0 %v6996_v30  ;;  %v12194_v59 = vadd.f32 %v5790_v45, %v13969_v25  ;;  %v6999_v25 = vld [vmem:[%s12447_s2 + $0xb4] ss:$8 sps:$4 sm:$0xff]   ;;  %v7002_v30 = vld [vmem:[%s12447_s2 + $0xc0] ss:$8 sps:$4 sm:$0xff]  }
 0x7ea   :  { %5540 = vmatprep.mubr.bf16.mxu0 %v6997_v18 }
 0x7eb   :  { %v12197_v7 = vadd.f32 %v5793_v55, %v13970_v27 }
 0x7ed   :  { %v4870_v8 = vpack.c.bf16 %v12197_v7, %v12194_v59  ;;  %v5794_v31 = vpop.f32.mrb[80].mxu1 }
 0x7ee   :  { %v5795_v36 = vpop.f32.mrb[81].mxu1 }
 0x7ef   :  { %v5796_v23 = vadd.f32 %v5795_v36, %v5794_v31  ;;  %v5797_v40 = vpop.f32.mrb[82].mxu1 }
 0x7f0   :  { %v5798_v57 = vpop.f32.mrb[83].mxu1 }
 0x7f1   :  { %v5799_v43 = vadd.f32 %v5798_v57, %v5797_v40  ;;  %5541 = vmatmul.mubr.bf16.gmra.mrb[172].mxu0 %v6998_v39  ;;  %v12208_v27 = vadd.f32 %v5796_v23, %v13972_v42  ;;  %v7001_v42 = vld [vmem:[%s12447_s2 + $0xc4] ss:$8 sps:$4 sm:$0xff]  }
 0x7f2   :  { %5548 = vmatprep.mubr.bf16.mxu0 %v6999_v25  ;;  %v7004_v25 = vld [vmem:[%s12447_s2 + $0xd0] ss:$8 sps:$4 sm:$0xff]  }
 0x7f3   :  { %v12211_v20 = vadd.f32 %v5799_v43, %v13974_v19 }
 0x7f5   :  { %v4875_v0 = vpack.c.bf16 %v12211_v20, %v12208_v27  ;;  %v5800_v41 = vpop.f32.mrb[84].mxu1 }
 0x7f6   :  { %v5801_v4 = vpop.f32.mrb[85].mxu1 }
 0x7f7   :  { %v5802_v32 = vadd.f32 %v5801_v4, %v5800_v41  ;;  %v5803_v12 = vpop.f32.mrb[86].mxu1 }
 0x7f8   :  { %v5804_v1 = vpop.f32.mrb[87].mxu1 }
 0x7f9   :  { %v5805_v24 = vadd.f32 %v5804_v1, %v5803_v12  ;;  %5549 = vmatmul.mubr.bf16.gmra.mrb[176].mxu0 %v7000_v11  ;;  %v12222_v19 = vadd.f32 %v5802_v32, %v13980_v61  ;;  %v7003_v61 = vld [vmem:[%s12447_s2 + $0xd4] ss:$8 sps:$4 sm:$0xff]  }
 0x7fa   :  { %5556 = vmatprep.mubr.bf16.mxu0 %v7001_v42 }
 0x7fb   :  { %v12225_v49 = vadd.f32 %v5805_v24, %v13981_v54 }
 0x7fd   :  { %v4880_v50 = vpack.c.bf16 %v12225_v49, %v12222_v19  ;;  %v5806_v17 = vpop.f32.mrb[88].mxu1 }
 0x7fe   :  { %v5807_v37 = vpop.f32.mrb[89].mxu1 }
 0x7ff   :  { %v5808_v45 = vadd.f32 %v5807_v37, %v5806_v17  ;;  %v5809_v60 = vpop.f32.mrb[90].mxu1  ;;  %v7006_v17 = vld [vmem:[%s12447_s2 + $0xe0] ss:$8 sps:$4 sm:$0xff]  }
 0x800   :  { %v5810_v51 = vpop.f32.mrb[91].mxu1 }
 0x801   :  { %v5811_v55 = vadd.f32 %v5810_v51, %v5809_v60  ;;  %5557 = vmatmul.mubr.bf16.gmra.mrb[180].mxu0 %v7002_v30  ;;  %v12236_v54 = vadd.f32 %v5808_v45, %v13988_v22  ;;  %v7005_v22 = vld [vmem:[%s12447_s2 + $0xe4] ss:$8 sps:$4 sm:$0xff]  }
 0x802   :  { %5564 = vmatprep.mubr.bf16.mxu0 %v7003_v61 }
 0x803   :  { %v12239_v18 = vadd.f32 %v5811_v55, %v13989_v48 }
 0x805   :  { %v4885_v31 = vpack.c.bf16 %v12239_v18, %v12236_v54  ;;  %v5812_v36 = vpop.f32.mrb[92].mxu1 }
 0x806   :  { %v5813_v23 = vpop.f32.mrb[93].mxu1 }
 0x807   :  { %v5814_v40 = vadd.f32 %v5813_v23, %v5812_v36  ;;  %v5815_v57 = vpop.f32.mrb[94].mxu1  ;;  %v7008_v23 = vld [vmem:[%s12447_s2 + $0xf0] ss:$8 sps:$4 sm:$0xff]  }
 0x808   :  { %v5816_v43 = vpop.f32.mrb[95].mxu1 }
 0x809   :  { %v5817_v39 = vadd.f32 %v5816_v43, %v5815_v57  ;;  %5565 = vmatmul.mubr.bf16.gmra.mrb[184].mxu0 %v7004_v25  ;;  %v12250_v48 = vadd.f32 %v5814_v40, %v13994_v35  ;;  %v7007_v35 = vld [vmem:[%s12447_s2 + $0xf4] ss:$8 sps:$4 sm:$0xff]  }
 0x80a   :  { %5572 = vmatprep.mubr.bf16.mxu0 %v7005_v22 }
 0x80b   :  { %v12253_v41 = vadd.f32 %v5817_v39, %v13995_v56 }
 0x80d   :  { %v4890_v4 = vpack.c.bf16 %v12253_v41, %v12250_v48  ;;  %v5818_v32 = vpop.f32.mrb[96].mxu1 }
 0x80e   :  { %v5819_v12 = vpop.f32.mrb[97].mxu1 }
 0x80f   :  { %v5820_v1 = vadd.f32 %v5819_v12, %v5818_v32  ;;  %v5821_v24 = vpop.f32.mrb[98].mxu1 }
 0x810   :  { %v5822_v11 = vpop.f32.mrb[99].mxu1 }
 0x811   :  { %v5823_v42 = vadd.f32 %v5822_v11, %v5821_v24  ;;  %5573 = vmatmul.mubr.bf16.gmra.mrb[188].mxu0 %v7006_v17  ;;  %v12264_v56 = vadd.f32 %v5820_v1, %v14000_v63 }
 0x812   :  { %5580 = vmatprep.mubr.bf16.mxu0 %v7007_v35 }
 0x813   :  { %v12267_v37 = vadd.f32 %v5823_v42, %v14001_v13 }
 0x815   :  { %v4895_v45 = vpack.c.bf16 %v12267_v37, %v12264_v56  ;;  %v5824_v60 = vpop.f32.mrb[100].mxu1  ;;  %v14022_v56 = vld [vmem:[#allocation368_spill] sm:$0xff] }
 0x816   :  { %v5825_v51 = vpop.f32.mrb[101].mxu1 }
 0x817   :  { %v5826_v55 = vadd.f32 %v5825_v51, %v5824_v60  ;;  %v5827_v30 = vpop.f32.mrb[102].mxu1 }
 0x818   :  { %v5828_v61 = vpop.f32.mrb[103].mxu1 }
 0x819   :  { %v5829_v36 = vadd.f32 %v5828_v61, %v5827_v30  ;;  %5581 = vmatmul.mubr.bf16.gmra.mrb[192].mxu0 %v7008_v23  ;;  %v4794_v63 = vadd.f32 %v5826_v55, %v14003_v47 }
 0x81b   :  { %v4797_v40 = vadd.f32 %v5829_v36, %v14004_v26 }
 0x81d   :  { %v4900_v13 = vpack.c.bf16 %v4797_v40, %v4794_v63  ;;  %v5830_v57 = vpop.f32.mrb[104].mxu1 }
 0x81e   :  { %v5831_v43 = vpop.f32.mrb[105].mxu1 }
 0x81f   :  { %6798 = vtanh.bf16 %v4900_v13  ;;  %v5832_v39 = vadd.f32 %v5831_v43, %v5830_v57  ;;  %v5833_v25 = vpop.f32.mrb[106].mxu1 }
 0x820   :  { %6800 = vtanh.bf16 %v4860_v14  ;;  %v5834_v22 = vpop.f32.mrb[107].mxu1 }
 0x821   :  { %v5835_v32 = vadd.f32 %v5834_v22, %v5833_v25  ;;  %v4802_v12 = vadd.f32 %v5832_v39, %v14005_v16 }
 0x823   :  { %v4805_v1 = vadd.f32 %v5835_v32, %v14006_v29 }
 0x825   :  { %v4905_v24 = vpack.c.bf16 %v4805_v1, %v4802_v12  ;;  %v5836_v47 = vpop.f32.mrb[108].mxu1 }
 0x826   :  { %v5837_v11 = vpop.f32.mrb[109].mxu1 }
 0x827   :  { %6802 = vtanh.bf16 %v4905_v24  ;;  %v5838_v26 = vadd.f32 %v5837_v11, %v5836_v47  ;;  %v5839_v42 = vpop.f32.mrb[110].mxu1 }
 0x828   :  { %6804 = vtanh.bf16 %v4865_v34  ;;  %v5840_v17 = vpop.f32.mrb[111].mxu1 }
 0x829   :  { %v5841_v35 = vadd.f32 %v5840_v17, %v5839_v42  ;;  %v4810_v14 = vadd.f32 %v5838_v26, %v14007_v6 }
 0x82a   :  { %v6799_v38 = vpop.eup %6798 }
 0x82b   :  { %v6801_v10 = vpop.eup %6800  ;;  %v4813_v16 = vadd.f32 %v5841_v35, %v14008_v62  ;;  %5872 = vmatprep.subr.bf16.mxu1 %v6799_v38 }
 0x82c   :  { %5873 = vmatpush3.bf16.msra.mxu1 %v6801_v10 }
 0x82d   :  { %v4910_v29 = vpack.c.bf16 %v4813_v16, %v4810_v14  ;;  %v5842_v60 = vpop.f32.mrb[112].mxu1 }
 0x82e   :  { %v5843_v51 = vpop.f32.mrb[113].mxu1 }
 0x82f   :  { %6806 = vtanh.bf16 %v4910_v29  ;;  %v5844_v55 = vadd.f32 %v5843_v51, %v5842_v60  ;;  %v5845_v30 = vpop.f32.mrb[114].mxu1 }
 0x830   :  { %6808 = vtanh.bf16 %v4870_v8  ;;  %v5846_v28 = vpop.f32.mrb[115].mxu1 }
 0x831   :  { %v5847_v46 = vadd.f32 %v5846_v28, %v5845_v30  ;;  %v4818_v6 = vadd.f32 %v5844_v55, %v14009_v52 }
 0x832   :  { %v6803_v34 = vpop.eup %6802 }
 0x833   :  { %v6805_v61 = vpop.eup %6804  ;;  %v4821_v62 = vadd.f32 %v5847_v46, %v14010_v3  ;;  %5874 = vmatprep.subr.bf16.mxu1 %v6803_v34 }
 0x834   :  { %5875 = vmatpush3.bf16.msra.mxu1 %v6805_v61 }
 0x835   :  { %v4915_v36 = vpack.c.bf16 %v4821_v62, %v4818_v6  ;;  %v5848_v23 = vpop.f32.mrb[116].mxu1 }
 0x836   :  { %v5849_v63 = vpop.f32.mrb[117].mxu1 }
 0x837   :  { %6810 = vtanh.bf16 %v4915_v36  ;;  %v5850_v40 = vadd.f32 %v5849_v63, %v5848_v23  ;;  %v5851_v13 = vpop.f32.mrb[118].mxu1 }
 0x838   :  { %6812 = vtanh.bf16 %v4875_v0  ;;  %v5852_v59 = vpop.f32.mrb[119].mxu1 }
 0x839   :  { %v5853_v7 = vadd.f32 %v5852_v59, %v5851_v13  ;;  %v4826_v52 = vadd.f32 %v5850_v40, %v14011_v9  ;;  %v14024_v40 = vld [vmem:[#allocation356_spill] sm:$0xff] }
 0x83a   :  { %v6807_v8 = vpop.eup %6806  ;;  %v14025_v59 = vld [vmem:[#allocation372_spill] sm:$0xff] }
 0x83b   :  { %v6809_v57 = vpop.eup %6808  ;;  %v4829_v3 = vadd.f32 %v5853_v7, %v14012_v44  ;;  %5876 = vmatprep.subr.bf16.mxu1 %v6807_v8 }
 0x83c   :  { %5877 = vmatpush3.bf16.msra.mxu1 %v6809_v57 }
 0x83d   :  { %v4920_v43 = vpack.c.bf16 %v4829_v3, %v4826_v52 }
 0x83f   :  { %v5854_v39 = vpop.f32.mrb[120].mxu1  ;;  %6814 = vtanh.bf16 %v4920_v43 }
 0x840   :  { %v5855_v25 = vpop.f32.mrb[121].mxu1  ;;  %6816 = vtanh.bf16 %v4880_v50 }
 0x841   :  { %v5856_v22 = vadd.f32 %v5855_v25, %v5854_v39  ;;  %v5857_v32 = vpop.f32.mrb[122].mxu1 }
 0x842   :  { %v5858_v27 = vpop.f32.mrb[123].mxu1  ;;  %v6811_v0 = vpop.eup %6810 }
 0x843   :  { %v5859_v20 = vadd.f32 %v5858_v27, %v5857_v32  ;;  %v6813_v12 = vpop.eup %6812  ;;  %v4834_v9 = vadd.f32 %v5856_v22, %v14013_v58  ;;  %5878 = vmatprep.subr.bf16.mxu1 %v6811_v0  ;;  %v14026_v22 = vld [vmem:[#allocation289_spill] sm:$0xff]  ;;  %v14027_v27 = vld [vmem:[#allocation359_spill] sm:$0xff] }
 0x844   :  { %5879 = vmatpush3.bf16.msra.mxu1 %v6813_v12 }
 0x845   :  { %v4837_v44 = vadd.f32 %v5859_v20, %v14014_v2 }
 0x847   :  { %v4925_v1 = vpack.c.bf16 %v4837_v44, %v4834_v9  ;;  %v5860_v24 = vpop.f32.mrb[124].mxu1 }
 0x848   :  { %v5861_v47 = vpop.f32.mrb[125].mxu1 }
 0x849   :  { %6818 = vtanh.bf16 %v4925_v1  ;;  %v5862_v11 = vadd.f32 %v5861_v47, %v5860_v24  ;;  %v5863_v26 = vpop.f32.mrb[126].mxu1 }
 0x84a   :  { %6820 = vtanh.bf16 %v4885_v31  ;;  %v5864_v19 = vpop.f32.mrb[127].mxu1  ;;  %v6815_v50 = vpop.eup %6814 }
 0x84b   :  { %v5865_v49 = vadd.f32 %v5864_v19, %v5863_v26  ;;  %v6817_v42 = vpop.eup %6816  ;;  %v4842_v58 = vadd.f32 %v5862_v11, %v14015_v33  ;;  %5880 = vmatprep.subr.bf16.mxu1 %v6815_v50  ;;  %v14028_v11 = vld [vmem:[#allocation287_spill] sm:$0xff]  ;;  %v14029_v19 = vld [vmem:[#allocation361_spill] sm:$0xff] }
 0x84c   :  { %5881 = vmatpush3.bf16.msra.mxu1 %v6817_v42 }
 0x84d   :  { %v4845_v2 = vadd.f32 %v5865_v49, %v14016_v21 }
 0x84f   :  { %v4930_v17 = vpack.c.bf16 %v4845_v2, %v4842_v58  ;;  %v5866_v35 = vpop.f32.mrb[128].mxu1 }
 0x850   :  { %v5867_v38 = vpop.f32.mrb[129].mxu1 }
 0x851   :  { %6822 = vtanh.bf16 %v4930_v17  ;;  %v5868_v10 = vadd.f32 %v5867_v38, %v5866_v35  ;;  %v5869_v14 = vpop.f32.mrb[130].mxu1 }
 0x852   :  { %6824 = vtanh.bf16 %v4890_v4  ;;  %v5870_v54 = vpop.f32.mrb[131].mxu1 }
 0x853   :  { %v5871_v18 = vadd.f32 %v5870_v54, %v5869_v14  ;;  %v4850_v33 = vadd.f32 %v5868_v10, %v14017_v5  ;;  %v14021_v5 = vld [vmem:[#allocation349_spill] sm:$0xff]  ;;  %v14031_v54 = vld [vmem:[#allocation363_spill] sm:$0xff] }
 0x854   :  { %v6819_v31 = vpop.eup %6818  ;;  %v14030_v10 = vld [vmem:[#allocation293_spill] sm:$0xff] }
 0x855   :  { %v6821_v16 = vpop.eup %6820  ;;  %v4853_v21 = vadd.f32 %v5871_v18, %v14018_v15  ;;  %5882 = vmatprep.subr.bf16.mxu1 %v6819_v31 }
 0x856   :  { %5883 = vmatpush3.bf16.msra.mxu1 %v6821_v16 }
 0x857   :  { %v4935_v29 = vpack.c.bf16 %v4853_v21, %v4850_v33 }
 0x859   :  { %6826 = vtanh.bf16 %v4935_v29 }
 0x85a   :  { %6828 = vtanh.bf16 %v4895_v45  ;;  %v14023_v45 = vld [vmem:[#allocation370_spill] sm:$0xff] }
 0x85c   :  { %v6823_v60 = vpop.eup %6822 }
 0x85d   :  { %v6825_v51 = vpop.eup %6824  ;;  %5884 = vmatprep.subr.bf16.mxu1 %v6823_v60 }
 0x85e   :  { %5885 = vmatpush3.bf16.msra.mxu1 %v6825_v51 }
 0x864   :  { %v6827_v48 = vpop.eup %6826 }
 0x865   :  { %v6829_v41 = vpop.eup %6828  ;;  %5886 = vmatprep.subr.bf16.mxu1 %v6827_v48  ;;  %v14032_v48 = vld [vmem:[#allocation294_spill] sm:$0xff] }
 0x866   :  { %5887 = vmatpush3.bf16.msra.mxu1 %v6829_v41 }
 0x869   :  { %5142 = vmatmul.mubr.bf16.vlgmr.msra.gmra.mrb[136].mxu1 %v14020_v53 }
 0x86a   :  { %5653 = vmatprep.mubr.bf16.mxu1 %v14021_v5  ;;  %v14033_v5 = vld [vmem:[#allocation369_spill] sm:$0xff] }
 0x874   :  { %v5910_v15 = vpop.f32.mrb[132].mxu0 }
 0x875   :  { %v5911_v4 = vpop.f32.mrb[133].mxu0 }
 0x876   :  { %v5912_v55 = vadd.f32 %v5911_v4, %v5910_v15  ;;  %v5913_v30 = vpop.f32.mrb[134].mxu0 }
 0x877   :  { %v5914_v28 = vpop.f32.mrb[135].mxu0 }
 0x878   :  { %v5915_v46 = vadd.f32 %v5914_v28, %v5913_v30  ;;  %v12317_v37 = vadd.f32 %v5912_v55, %v14022_v56 }
 0x87a   :  { %v12320_v34 = vadd.f32 %v5915_v46, %v14023_v45 }
 0x87c   :  { %v5589_v61 = vpack.c.bf16 %v12320_v34, %v12317_v37  ;;  %v5916_v6 = vpop.f32.mrb[136].mxu0 }
 0x87d   :  { %v5917_v62 = vpop.f32.mrb[137].mxu0 }
 0x87e   :  { %v5918_v53 = vadd.f32 %v5917_v62, %v5916_v6  ;;  %v5919_v36 = vpop.f32.mrb[138].mxu0  ;;  %v14034_v6 = vld [vmem:[#allocation292_spill] sm:$0xff] }
 0x87f   :  { %v5920_v23 = vpop.f32.mrb[139].mxu0 }
 0x880   :  { %v5921_v63 = vadd.f32 %v5920_v23, %v5919_v36  ;;  %v12325_v13 = vadd.f32 %v5918_v53, %v14024_v40  ;;  %v14035_v53 = vld [vmem:[#allocation371_spill] sm:$0xff] }
 0x882   :  { %v12328_v7 = vadd.f32 %v5921_v63, %v14025_v59 }
 0x884   :  { %v5590_v8 = vpack.c.bf16 %v12328_v7, %v12325_v13  ;;  %v5922_v57 = vpop.f32.mrb[140].mxu0 }
 0x885   :  { %v5923_v52 = vpop.f32.mrb[141].mxu0 }
 0x886   :  { %v5924_v3 = vadd.f32 %v5923_v52, %v5922_v57  ;;  %v5925_v43 = vpop.f32.mrb[142].mxu0 }
 0x887   :  { %v5926_v39 = vpop.f32.mrb[143].mxu0 }
 0x888   :  { %v5927_v25 = vadd.f32 %v5926_v39, %v5925_v43  ;;  %v12333_v32 = vadd.f32 %v5924_v3, %v14026_v22  ;;  %v14036_v43 = vld [vmem:[#allocation301_spill] sm:$0xff] }
 0x88a   :  { %v12336_v20 = vadd.f32 %v5927_v25, %v14027_v27  ;;  %v14037_v25 = vld [vmem:[#allocation290_spill] sm:$0xff] }
 0x88c   :  { %v5591_v0 = vpack.c.bf16 %v12336_v20, %v12333_v32  ;;  %v5928_v12 = vpop.f32.mrb[144].mxu0 }
 0x88d   :  { %v5929_v9 = vpop.f32.mrb[145].mxu0 }
 0x88e   :  { %v5930_v44 = vadd.f32 %v5929_v9, %v5928_v12  ;;  %v5931_v1 = vpop.f32.mrb[146].mxu0 }
 0x88f   :  { %v5932_v24 = vpop.f32.mrb[147].mxu0 }
 0x890   :  { %v5933_v47 = vadd.f32 %v5932_v24, %v5931_v1  ;;  %v12341_v26 = vadd.f32 %v5930_v44, %v14028_v11 }
 0x892   :  { %v12344_v49 = vadd.f32 %v5933_v47, %v14029_v19  ;;  %v14038_v19 = vld [vmem:[#allocation15_spill] sm:$0xff] }
 0x894   :  { %v5592_v50 = vpack.c.bf16 %v12344_v49, %v12341_v26  ;;  %v5934_v42 = vpop.f32.mrb[148].mxu0 }
 0x895   :  { %v5935_v58 = vpop.f32.mrb[149].mxu0 }
 0x896   :  { %v5936_v2 = vadd.f32 %v5935_v58, %v5934_v42  ;;  %v5937_v17 = vpop.f32.mrb[150].mxu0 }
 0x897   :  { %v5938_v35 = vpop.f32.mrb[151].mxu0 }
 0x898   :  { %v5939_v38 = vadd.f32 %v5938_v35, %v5937_v17  ;;  %v12349_v14 = vadd.f32 %v5936_v2, %v14030_v10  ;;  %v14039_v35 = vld [vmem:[#allocation297_spill] sm:$0xff]  ;;  %v14040_v10 = vld [vmem:[#allocation288_spill] sm:$0xff] }
 0x89a   :  { %v12352_v18 = vadd.f32 %v5939_v38, %v14031_v54 }
 0x89c   :  { %v5593_v31 = vpack.c.bf16 %v12352_v18, %v12349_v14  ;;  %v5940_v16 = vpop.f32.mrb[152].mxu0 }
 0x89d   :  { %v5941_v33 = vpop.f32.mrb[153].mxu0 }
 0x89e   :  { %v5942_v21 = vadd.f32 %v5941_v33, %v5940_v16  ;;  %v5943_v29 = vpop.f32.mrb[154].mxu0 }
 0x89f   :  { %v5944_v60 = vpop.f32.mrb[155].mxu0 }
 0x8a0   :  { %v5945_v51 = vadd.f32 %v5944_v60, %v5943_v29  ;;  %v12357_v41 = vadd.f32 %v5942_v21, %v14032_v48 }
 0x8a2   :  { %v12360_v15 = vadd.f32 %v5945_v51, %v14033_v5 }
 0x8a4   :  { %v5594_v4 = vpack.c.bf16 %v12360_v15, %v12357_v41  ;;  %v5946_v55 = vpop.f32.mrb[156].mxu0 }
 0x8a5   :  { %v5947_v30 = vpop.f32.mrb[157].mxu0 }
 0x8a6   :  { %v5948_v28 = vadd.f32 %v5947_v30, %v5946_v55  ;;  %v5949_v46 = vpop.f32.mrb[158].mxu0  ;;  %v14041_v30 = vld [vmem:[#allocation381_spill] sm:$0xff] }
 0x8a7   :  { %v5950_v56 = vpop.f32.mrb[159].mxu0 }
 0x8a8   :  { %v5951_v45 = vadd.f32 %v5950_v56, %v5949_v46  ;;  %v12365_v62 = vadd.f32 %v5948_v28, %v14034_v6  ;;  %v14042_v56 = vld [vmem:[#allocation305_spill] sm:$0xff]  ;;  %v14043_v6 = vld [vmem:[#allocation291_spill] sm:$0xff] }
 0x8aa   :  { %v12368_v36 = vadd.f32 %v5951_v45, %v14035_v53 }
 0x8ac   :  { %v5595_v23 = vpack.c.bf16 %v12368_v36, %v12365_v62  ;;  %v5952_v63 = vpop.f32.mrb[160].mxu0 }
 0x8ad   :  { %v5953_v40 = vpop.f32.mrb[161].mxu0 }
 0x8ae   :  { %v5954_v59 = vadd.f32 %v5953_v40, %v5952_v63  ;;  %v5955_v57 = vpop.f32.mrb[162].mxu0 }
 0x8af   :  { %v5956_v52 = vpop.f32.mrb[163].mxu0 }
 0x8b0   :  { %v5957_v3 = vadd.f32 %v5956_v52, %v5955_v57  ;;  %v12373_v39 = vadd.f32 %v5954_v59, %v14036_v43  ;;  %v14044_v43 = vld [vmem:[#allocation303_spill] sm:$0xff] }
 0x8b2   :  { %v12376_v22 = vadd.f32 %v5957_v3, %v14037_v25 }
 0x8b4   :  { %v5596_v27 = vpack.c.bf16 %v12376_v22, %v12373_v39  ;;  %v5958_v12 = vpop.f32.mrb[164].mxu0 }
 0x8b5   :  { %v5959_v9 = vpop.f32.mrb[165].mxu0 }
 0x8b6   :  { %v5960_v44 = vadd.f32 %v5959_v9, %v5958_v12  ;;  %v5961_v1 = vpop.f32.mrb[166].mxu0  ;;  %v14045_v12 = vld [vmem:[#allocation300_spill] sm:$0xff] }
 0x8b7   :  { %v5962_v24 = vpop.f32.mrb[167].mxu0 }
 0x8b8   :  { %v5061_v47 = vpop.f32.mrb[132].mxu1  ;;  %v5963_v11 = vadd.f32 %v5962_v24, %v5961_v1  ;;  %v5527_v38 = vadd.f32 %v5960_v44, %v14039_v35 }
 0x8b9   :  { %v5062_v42 = vadd.f32 %v5061_v47, %v14038_v19  ;;  %v5063_v58 = vpop.f32.mrb[133].mxu1 }
 0x8ba   :  { %v5064_v2 = vadd.f32 %v5063_v58, %v14038_v19  ;;  %v5065_v17 = vpop.f32.mrb[134].mxu1  ;;  %v5530_v54 = vadd.f32 %v5963_v11, %v14040_v10  ;;  %v14046_v58 = vld [vmem:[#allocation304_spill] sm:$0xff] }
 0x8bb   :  { %v5066_v16 = vpop.f32.mrb[135].mxu1  ;;  %v14047_v17 = vld [vmem:[#allocation298_spill] sm:$0xff] }
 0x8bc   :  { %v5149_v33 = vsub.f32 %v5062_v42, %v5064_v2  ;;  %v5597_v21 = vpack.c.bf16 %v5530_v54, %v5527_v38  ;;  %v5964_v29 = vpop.f32.mrb[168].mxu0 }
 0x8bd   :  { %v5965_v60 = vpop.f32.mrb[169].mxu0 }
 0x8be   :  { %v5151_v51 = vrot.slane %v5149_v33, 7  ;;  %6830 = vtanh.bf16 %v5597_v21  ;;  %v5966_v48 = vadd.f32 %v5965_v60, %v5964_v29  ;;  %v5967_v5 = vpop.f32.mrb[170].mxu0  ;;  %v14048_v29 = vld [vmem:[#allocation311_spill] sm:$0xff] }
 0x8bf   :  { %6832 = vtanh.bf16 %v5589_v61  ;;  %v5968_v55 = vpop.f32.mrb[171].mxu0 }
 0x8c0   :  { %v12388_v28 = vadd.f32 %v5151_v51, %v14041_v30  ;;  %v5969_v46 = vadd.f32 %v5968_v55, %v5967_v5  ;;  %v5535_v45 = vadd.f32 %v5966_v48, %v14042_v56  ;;  %v14049_v51 = vld [vmem:[#allocation306_spill] sm:$0xff] }
 0x8c2   :  { %5666 = vst [vmem:[%s12450_s5 - $0x1] sm:$0x6] %v12388_v28  ;;  %v5538_v53 = vadd.f32 %v5969_v46, %v14043_v6  ;;  %v14050_v6 = vld [vmem:[#allocation309_spill] sm:$0xff] }
 0x8c4   :  { %v5598_v63 = vpack.c.bf16 %v5538_v53, %v5535_v45  ;;  %v5970_v40 = vpop.f32.mrb[172].mxu0 }
 0x8c5   :  { %v5971_v59 = vpop.f32.mrb[173].mxu0 }
 0x8c6   :  { %6834 = vtanh.bf16 %v5598_v63  ;;  %v5972_v37 = vadd.f32 %v5971_v59, %v5970_v40  ;;  %v5973_v34 = vpop.f32.mrb[174].mxu0  ;;  %v14051_v63 = vld [vmem:[#allocation310_spill] sm:$0xff] }
 0x8c7   :  { %6836 = vtanh.bf16 %v5590_v8  ;;  %v5974_v61 = vpop.f32.mrb[175].mxu0 }
 0x8c8   :  { %v5975_v57 = vadd.f32 %v5974_v61, %v5973_v34  ;;  %v5543_v25 = vadd.f32 %v5972_v37, %v14044_v43 }
 0x8c9   :  { %v6831_v52 = vpop.eup %6830 }
 0x8ca   :  { %v6833_v3 = vpop.eup %6832  ;;  %v5546_v9 = vadd.f32 %v5975_v57, %v14045_v12  ;;  %6006 = vmatprep.subr.bf16.mxu1 %v6831_v52 }
 0x8cb   :  { %6007 = vmatpush3.bf16.msra.mxu1 %v6833_v3  ;;  %v14052_v3 = vld [vmem:[#allocation314_spill] sm:$0xff] }
 0x8cc   :  { %v5599_v44 = vpack.c.bf16 %v5546_v9, %v5543_v25  ;;  %v5976_v1 = vpop.f32.mrb[176].mxu0  ;;  %v14053_v25 = vld [vmem:[#allocation307_spill] sm:$0xff] }
 0x8cd   :  { %v5977_v24 = vpop.f32.mrb[177].mxu0 }
 0x8ce   :  { %6838 = vtanh.bf16 %v5599_v44  ;;  %v5978_v47 = vadd.f32 %v5977_v24, %v5976_v1  ;;  %v5979_v11 = vpop.f32.mrb[178].mxu0 }
 0x8cf   :  { %6840 = vtanh.bf16 %v5591_v0  ;;  %v5980_v13 = vpop.f32.mrb[179].mxu0 }
 0x8d0   :  { %v5981_v7 = vadd.f32 %v5980_v13, %v5979_v11  ;;  %v5551_v2 = vadd.f32 %v5978_v47, %v14046_v58  ;;  %v14054_v13 = vld [vmem:[#allocation312_spill] sm:$0xff] }
 0x8d1   :  { %v6835_v8 = vpop.eup %6834 }
 0x8d2   :  { %v6837_v42 = vpop.eup %6836  ;;  %v5554_v35 = vadd.f32 %v5981_v7, %v14047_v17  ;;  %6008 = vmatprep.subr.bf16.mxu1 %v6835_v8  ;;  %v14055_v8 = vld [vmem:[#allocation315_spill] sm:$0xff] }
 0x8d3   :  { %6009 = vmatpush3.bf16.msra.mxu1 %v6837_v42 }
 0x8d4   :  { %v5600_v38 = vpack.c.bf16 %v5554_v35, %v5551_v2  ;;  %v5982_v10 = vpop.f32.mrb[180].mxu0 }
 0x8d5   :  { %v5983_v54 = vpop.f32.mrb[181].mxu0 }
 0x8d6   :  { %6842 = vtanh.bf16 %v5600_v38  ;;  %v5984_v16 = vadd.f32 %v5983_v54, %v5982_v10  ;;  %v5985_v33 = vpop.f32.mrb[182].mxu0 }
 0x8d7   :  { %6844 = vtanh.bf16 %v5592_v50  ;;  %v5986_v32 = vpop.f32.mrb[183].mxu0 }
 0x8d8   :  { %v5987_v20 = vadd.f32 %v5986_v32, %v5985_v33  ;;  %v5559_v60 = vadd.f32 %v5984_v16, %v14048_v29  ;;  %v14057_v32 = vld [vmem:[#allocation168_spill] sm:$0xff] }
 0x8d9   :  { %v6839_v0 = vpop.eup %6838 }
 0x8da   :  { %v6841_v21 = vpop.eup %6840  ;;  %v5562_v48 = vadd.f32 %v5987_v20, %v14049_v51  ;;  %6010 = vmatprep.subr.bf16.mxu1 %v6839_v0 }
 0x8db   :  { %6011 = vmatpush3.bf16.msra.mxu1 %v6841_v21 }
 0x8dc   :  { %v5601_v5 = vpack.c.bf16 %v5562_v48, %v5559_v60  ;;  %v5988_v55 = vpop.f32.mrb[184].mxu0  ;;  %v14058_v48 = vld [vmem:[#allocation375_spill] sm:$0xff] }
 0x8dd   :  { %v5989_v30 = vpop.f32.mrb[185].mxu0 }
 0x8de   :  { %6846 = vtanh.bf16 %v5601_v5  ;;  %v5990_v46 = vadd.f32 %v5989_v30, %v5988_v55  ;;  %v5991_v56 = vpop.f32.mrb[186].mxu0 }
 0x8df   :  { %6848 = vtanh.bf16 %v5593_v31  ;;  %v5992_v26 = vpop.f32.mrb[187].mxu0 }
 0x8e0   :  { %v5993_v49 = vadd.f32 %v5992_v26, %v5991_v56  ;;  %v5567_v53 = vadd.f32 %v5990_v46, %v14050_v6  ;;  %v14060_v46 = vld [vmem:[#allocation121_spill] sm:$0xff] }
 0x8e1   :  { %v6843_v50 = vpop.eup %6842 }
 0x8e2   :  { %v6845_v45 = vpop.eup %6844  ;;  %v5570_v40 = vadd.f32 %v5993_v49, %v14051_v63  ;;  %6012 = vmatprep.subr.bf16.mxu1 %v6843_v50 }
 0x8e3   :  { %6013 = vmatpush3.bf16.msra.mxu1 %v6845_v45 }
 0x8e4   :  { %v5602_v59 = vpack.c.bf16 %v5570_v40, %v5567_v53  ;;  %v5994_v37 = vpop.f32.mrb[188].mxu0 }
 0x8e5   :  { %v5995_v34 = vpop.f32.mrb[189].mxu0 }
 0x8e6   :  { %6850 = vtanh.bf16 %v5602_v59  ;;  %v5996_v61 = vadd.f32 %v5995_v34, %v5994_v37  ;;  %v5997_v57 = vpop.f32.mrb[190].mxu0 }
 0x8e7   :  { %6852 = vtanh.bf16 %v5594_v4  ;;  %v5998_v14 = vpop.f32.mrb[191].mxu0 }
 0x8e8   :  { %v5999_v18 = vadd.f32 %v5998_v14, %v5997_v57  ;;  %v5575_v43 = vadd.f32 %v5996_v61, %v14052_v3 }
 0x8e9   :  { %v6847_v31 = vpop.eup %6846 }
 0x8ea   :  { %v6849_v52 = vpop.eup %6848  ;;  %v5578_v12 = vadd.f32 %v5999_v18, %v14053_v25  ;;  %6014 = vmatprep.subr.bf16.mxu1 %v6847_v31 }
 0x8eb   :  { %6015 = vmatpush3.bf16.msra.mxu1 %v6849_v52 }
 0x8ec   :  { %v5603_v9 = vpack.c.bf16 %v5578_v12, %v5575_v43  ;;  %v6000_v44 = vpop.f32.mrb[192].mxu0 }
 0x8ed   :  { %v6001_v1 = vpop.f32.mrb[193].mxu0 }
 0x8ee   :  { %6854 = vtanh.bf16 %v5603_v9  ;;  %v6002_v24 = vadd.f32 %v6001_v1, %v6000_v44  ;;  %v6003_v47 = vpop.f32.mrb[194].mxu0 }
 0x8ef   :  { %6856 = vtanh.bf16 %v5595_v23  ;;  %v6004_v41 = vpop.f32.mrb[195].mxu0  ;;  %v14056_v23 = vld [vmem:[#allocation313_spill] sm:$0xff] }
 0x8f0   :  { %v6005_v15 = vadd.f32 %v6004_v41, %v6003_v47  ;;  %v5583_v7 = vadd.f32 %v6002_v24, %v14054_v13 }
 0x8f1   :  { %v6851_v4 = vpop.eup %6850 }
 0x8f2   :  { %v6853_v11 = vpop.eup %6852  ;;  %v5586_v42 = vadd.f32 %v6005_v15, %v14055_v8  ;;  %6016 = vmatprep.subr.bf16.mxu1 %v6851_v4 }
 0x8f3   :  { %6017 = vmatpush3.bf16.msra.mxu1 %v6853_v11 }
 0x8f4   :  { %v5604_v58 = vpack.c.bf16 %v5586_v42, %v5583_v7 }
 0x8f6   :  { %6858 = vtanh.bf16 %v5604_v58 }
 0x8f7   :  { %6860 = vtanh.bf16 %v5596_v27  ;;  %v7009_v27 = vld [vmem:[%s12445_s0] sm:$0xff] }
 0x8f9   :  { %v6855_v2 = vpop.eup %6854 }
 0x8fa   :  { %v6857_v17 = vpop.eup %6856  ;;  %6018 = vmatprep.subr.bf16.mxu1 %v6855_v2 }
 0x8fb   :  { %6019 = vmatpush3.bf16.msra.mxu1 %v6857_v17 }
 0x901   :  { %v6859_v62 = vpop.eup %6858 }
 0x902   :  { %v6861_v36 = vpop.eup %6860  ;;  %6020 = vmatprep.subr.bf16.mxu1 %v6859_v62 }
 0x903   :  { %6021 = vmatpush3.bf16.msra.mxu1 %v6861_v36 }
 0x906   :  { %5654 = vmatmul.mubr.bf16.vlgmr.msra.gmra.mrb[140].mxu1 %v14056_v23 }
 0x93c   :  { %v5888_v35 = vpop.f32.mrb[136].mxu1 }
 0x93d   :  { %v5889_v38 = vpop.f32.mrb[137].mxu1 }
 0x93e   :  { %v5890_v10 = vadd.f32 %v5889_v38, %v5888_v35  ;;  %v5891_v54 = vpop.f32.mrb[138].mxu1 }
 0x93f   :  { %v5892_v16 = vpop.f32.mrb[139].mxu1 }
 0x940   :  { %v5144_v33 = vadd.f32 %v5890_v10, %v14038_v19  ;;  %v14059_v19 = vld [vmem:[#allocation43_spill] sm:$0xff] }
 0x942   :  { %v5159_v39 = vsub.f32 %v5144_v33, %v14057_v32 }
 0x944   :  { %v5161_v22 = vrot.slane %v5159_v39, 7 }
 0x946   :  { %v5163_v20 = vadd.f32 %v7009_v27, %v5161_v22 }
 0x948   :  { %5669 = vst [vmem:[%s12450_s5 + $0x3] sm:$0x6] %v5163_v20 }
 0x9d9   :  { %v6022_v0 = vpop.f32.mrb[140].mxu1 }
 0x9da   :  { %v6023_v21 = vpop.f32.mrb[141].mxu1 }
 0x9db   :  { %v6024_v29 = vadd.f32 %v6023_v21, %v6022_v0  ;;  %v6025_v60 = vpop.f32.mrb[142].mxu1 }
 0x9dc   :  { %v6026_v51 = vpop.f32.mrb[143].mxu1 }
 0x9dd   :  { %v5656_v5 = vadd.f32 %v6024_v29, %v14058_v48 }
 0x9df   :  { %v5661_v55 = vmul.f32 %v5656_v5, %v14059_v19 }
 0x9e1   :  { %v5663_v30 = vrot.slane %v5661_v55, 7 }
 0x9e3   :  { %v5665_v56 = vadd.f32 %v5663_v30, %v14060_v46 }
 0x9e5   :  { %v5667_v26 = vsub.f32 %v12388_v28, %v5665_v56 }
 0x9e7   :  { %5668 = vst [vmem:[%s12450_s5 + $0x1] sm:$0x6] %v5667_v26 }
 0x9e8   :  { %5675 = vsyncpa [#allocation4], 1 }

</bundles_post_ra>
